<compile_context>
chip_gen: v6e
topology: v6e:2x2x1
jax: 0.10.0
libtpu: 0.0.40
codegen_flags: <defaults>
</compile_context>

<pallas_src>
import numpy as np
import jax
import jax.numpy as jnp
from jax.experimental import pallas as pl
from jax.experimental.pallas import tpu as pltpu


# ------------------------------ fused kernel ------------------------------

def _lenet5_fused_kernel(x_ref, m1_ref, b1_ref, m2_ref, b2_ref,
                         w5_ref, b5_ref, w6_ref, b6_ref, w7_ref, b7_ref,
                         o_ref, p1_ref, p2_ref):
    f32 = jnp.float32

    def pool4(u):
        # u: (TB, 512) holding the four 2x2 pool phases in four 128-lane groups.
        return jnp.maximum(jnp.maximum(u[:, 0:128], u[:, 128:256]),
                           jnp.maximum(u[:, 256:384], u[:, 384:512]))

    # ---- conv1 (5x5, 1->6) + bias + ReLU + 2x2/2 maxpool ----
    # One dot per pooled output row: LHS = 6 consecutive image rows (168 lanes),
    # RHS (read at the dot site) = (168, 512) patch matrix, pool phases (ph,pw) along N.
    for i1 in range(12):
        lhs = x_ref[:, 56 * i1: 56 * i1 + 168]                      # image rows 2*i1..2*i1+5
        u = jnp.dot(lhs, m1_ref[...], preferred_element_type=f32)   # (TB, 512)
        p1_ref[:, 128 * i1: 128 * (i1 + 1)] = jnp.maximum(pool4(u) + b1_ref[...], 0.0)

    # ---- conv2 (5x5, 6->16) + bias + ReLU + 2x2/2 maxpool ----
    # pooled1 rows sit in 128-lane slots of p1_ref, so the LHS is an aligned slice.
    for i2 in range(4):
        lhs = p1_ref[:, 256 * i2: 256 * i2 + 768]                   # pooled1 rows 2*i2..2*i2+5
        u = jnp.dot(lhs, m2_ref[...], preferred_element_type=f32)   # (TB, 512)
        p2_ref[:, 128 * i2: 128 * (i2 + 1)] = jnp.maximum(pool4(u) + b2_ref[...], 0.0)

    # ---- FC 256->120->84->10 + softmax (flatten permutation folded into w5) ----
    h = jnp.maximum(jnp.dot(p2_ref[...], w5_ref[...], preferred_element_type=f32)
                    + b5_ref[...], 0.0)
    h = jnp.maximum(jnp.dot(h, w6_ref[...], preferred_element_type=f32)
                    + b6_ref[...], 0.0)
    logits = jnp.dot(h, w7_ref[...], preferred_element_type=f32) + b7_ref[...]
    mx = jnp.max(logits, axis=-1, keepdims=True)
    e = jnp.exp(logits - mx)                  # padded lanes carry bias -1e30 -> exp == 0
    s = jnp.sum(e, axis=-1, keepdims=True)
    # Exact reciprocal (approx=True would loosen the sum-to-1 guarantee).
    o_ref[...] = e * pl.reciprocal(s, approx=False)                 # lane-dense (TB, 128)


# ------------------------------ wrapper ------------------------------

def _const_spec(shape):
    nd = len(shape)
    return pl.BlockSpec(shape, lambda i, _nd=nd: (0,) * _nd)


def _choose_tb(batch):
    """Samples per grid step: fill MXU rows, keep >=2 grid steps (v7x megacore) if possible."""
    if batch <= 8:
        return 8
    half = -(-batch // 2)                       # ceil(B/2) -> at least 2 grid steps
    return min(256, ((half + 7) // 8) * 8)


@jax.jit
def lenet5_forward(kparams, img_nchw):
    """img_nchw: (B, 1, 28, 28) float32 -> (B, 10) softmax probabilities."""
    B = img_nchw.shape[0]
    x = img_nchw.reshape(B, 784).astype(jnp.float32)    # pure view reshape, no transpose
    TB = _choose_tb(B)
    Bp = ((B + TB - 1) // TB) * TB
    if Bp != B:
        x = jnp.pad(x, ((0, Bp - B), (0, 0)))

    kp = kparams
    operands = (x, kp["m1"], kp["b1"], kp["m2"], kp["b2"],
                kp["w5"], kp["b5"], kp["w6"], kp["b6"], kp["w7"], kp["b7"])
    in_specs = [pl.BlockSpec((TB, 784), lambda i: (i, 0))]
    in_specs += [_const_spec(op.shape) for op in operands[1:]]

    out = pl.pallas_call(
        _lenet5_fused_kernel,
        out_shape=jax.ShapeDtypeStruct((Bp, 128), jnp.float32),
        grid=(Bp // TB,),
        in_specs=in_specs,
        out_specs=pl.BlockSpec((TB, 128), lambda i: (i, 0)),
        scratch_shapes=[pltpu.VMEM((TB, 12 * 128), jnp.float32),    # pooled1 row slots
                        pltpu.VMEM((TB, 4 * 128), jnp.float32)],    # pooled2 row slots
        compiler_params=pltpu.CompilerParams(
            dimension_semantics=("parallel",),
            vmem_limit_bytes=32 * 1024 * 1024),
    )(*operands)
    return out[:B, :10]


# ------------------------------ parameter prep ------------------------------

def init_params(key):
    """PyTorch-equivalent init (Linear weights stored transposed: (in, out))."""
    ks = jax.random.split(key, 10)

    def u(k, shape, fan_in):
        bound = 1.0 / jnp.sqrt(jnp.float32(fan_in))
        return jax.random.uniform(k, shape, jnp.float32, -bound, bound)

    return {
        "c1_w": u(ks[0], (6, 1, 5, 5), 25),   "c1_b": u(ks[1], (6,), 25),
        "c3_w": u(ks[2], (16, 6, 5, 5), 150), "c3_b": u(ks[3], (16,), 150),
        "f5_w": u(ks[4], (256, 120), 256),    "f5_b": u(ks[5], (120,), 256),
        "f6_w": u(ks[6], (120, 84), 120),     "f6_b": u(ks[7], (84,), 120),
        "f7_w": u(ks[8], (84, 10), 84),       "f7_b": u(ks[9], (10,), 84),
    }


def prepare_params(p):
    """One-time repack of the PyTorch-layout weights into kernel-ready patch matrices."""
    w1 = np.asarray(p["c1_w"])[:, 0]            # (6, 5, 5)      [c, di, dj]
    w2 = np.asarray(p["c3_w"])                  # (16, 6, 5, 5)  [oc, ic, di, dj]
    c1b = np.asarray(p["c1_b"])
    c3b = np.asarray(p["c3_b"])

    # conv1 patch matrix: K = rr*28 + w  (6 image rows), N = ph*256 + pw*128 + j1*8 + c.
    m1 = np.zeros((168, 512), np.float32)
    for ph in range(2):
        for pw in range(2):
            for j1 in range(12):
                for c in range(6):
                    n = ph * 256 + pw * 128 + j1 * 8 + c
                    for di in range(5):
                        for dj in range(5):
                            m1[(ph + di) * 28 + 2 * j1 + pw + dj, n] = w1[c, di, dj]
    b1 = np.zeros((1, 128), np.float32)
    for j1 in range(12):
        b1[0, j1 * 8: j1 * 8 + 6] = c1b

    # conv2 patch matrix: K = rr*128 + j1*8 + ic (6 pooled1 rows), N = ph*256 + pw*128 + j2*16 + oc.
    m2 = np.zeros((768, 512), np.float32)
    for ph in range(2):
        for pw in range(2):
            for j2 in range(4):
                for oc in range(16):
                    n = ph * 256 + pw * 128 + j2 * 16 + oc
                    for ic in range(6):
                        for di in range(5):
                            for dj in range(5):
                                m2[(ph + di) * 128 + (2 * j2 + pw + dj) * 8 + ic, n] = \
                                    w2[oc, ic, di, dj]
    b2 = np.zeros((1, 128), np.float32)
    for j2 in range(4):
        b2[0, j2 * 16: j2 * 16 + 16] = c3b

    # FC1: fold the NCHW flatten permutation (t = oc*16 + i2*4 + j2) into the weights;
    # K index m = i2*128 + j2*16 + oc matches the pooled2 scratch layout.
    f5 = np.asarray(p["f5_w"])                  # (256, 120)
    w5 = np.zeros((512, 128), np.float32)
    for i2 in range(4):
        for j2 in range(4):
            for oc in range(16):
                w5[i2 * 128 + j2 * 16 + oc, :120] = f5[oc * 16 + i2 * 4 + j2]
    b5 = np.zeros((1, 128), np.float32); b5[0, :120] = np.asarray(p["f5_b"])
    w6 = np.zeros((128, 128), np.float32); w6[:120, :84] = np.asarray(p["f6_w"])
    b6 = np.zeros((1, 128), np.float32); b6[0, :84] = np.asarray(p["f6_b"])
    w7 = np.zeros((128, 128), np.float32); w7[:84, :10] = np.asarray(p["f7_w"])
    # Padded logit lanes get a huge negative bias so they vanish in the softmax.
    b7 = np.full((1, 128), -1e30, np.float32); b7[0, :10] = np.asarray(p["f7_b"])

    return {k: jnp.asarray(v) for k, v in
            dict(m1=m1, b1=b1, m2=m2, b2=b2, w5=w5, b5=b5,
                 w6=w6, b6=b6, w7=w7, b7=b7).items()}


# ------------------------------ pure-JAX reference ------------------------------

def lenet5_reference(p, img):
    hi = jax.lax.Precision.HIGHEST
    B = img.shape[0]
    x = jax.lax.conv_general_dilated(img, p["c1_w"], (1, 1), "VALID",
                                     dimension_numbers=("NCHW", "OIHW", "NCHW"),
                                     precision=hi) + p["c1_b"][None, :, None, None]
    x = jnp.maximum(x, 0.0)
    x = x.reshape(B, 6, 12, 2, 12, 2).max(axis=(3, 5))
    x = jax.lax.conv_general_dilated(x, p["c3_w"], (1, 1), "VALID",
                                     dimension_numbers=("NCHW", "OIHW", "NCHW"),
                                     precision=hi) + p["c3_b"][None, :, None, None]
    x = jnp.maximum(x, 0.0)
    x = x.reshape(B, 16, 4, 2, 4, 2).max(axis=(3, 5))
    x = x.reshape(B, 256)
    x = jnp.maximum(jnp.dot(x, p["f5_w"], precision=hi) + p["f5_b"], 0.0)
    x = jnp.maximum(jnp.dot(x, p["f6_w"], precision=hi) + p["f6_b"], 0.0)
    x = jnp.dot(x, p["f7_w"], precision=hi) + p["f7_b"]
    return jax.nn.softmax(x, axis=-1)


# ------------------------------ demo / self-check ------------------------------

if __name__ == "__main__":
    key = jax.random.PRNGKey(0)
    pkey, xkey = jax.random.split(key)
    params = init_params(pkey)
    kparams = prepare_params(params)           # one-time weight repack (init-time work)
    # LeNet5 hard-wires 1x28x28 input (flatten size 256); batch = 2.
    img = jax.random.normal(xkey, (2, 1, 28, 28), dtype=jnp.float32)

    out = jax.block_until_ready(lenet5_forward(kparams, img))
    ref = jax.block_until_ready(lenet5_reference(params, img))

    assert out.shape == (2, 10), out.shape
    assert bool(jnp.all(jnp.isfinite(out)))
    assert bool(jnp.all(jnp.abs(jnp.sum(out, axis=1) - 1.0) < 1e-4))
    assert bool(jnp.allclose(out, ref, atol=2e-3)), float(jnp.max(jnp.abs(out - ref)))
    print("KERNEL_OK")
</pallas_src>

<mosaic_0001>
module attributes {stable_mosaic.version = 11 : i64} {
  func.func @_lenet5_fused_kernel(%arg0: i32, %arg1: memref<8x784xf32, #tpu.memory_space<vmem>>, %arg2: memref<168x512xf32, #tpu.memory_space<vmem>>, %arg3: memref<1x128xf32, #tpu.memory_space<vmem>>, %arg4: memref<768x512xf32, #tpu.memory_space<vmem>>, %arg5: memref<1x128xf32, #tpu.memory_space<vmem>>, %arg6: memref<512x128xf32, #tpu.memory_space<vmem>>, %arg7: memref<1x128xf32, #tpu.memory_space<vmem>>, %arg8: memref<128x128xf32, #tpu.memory_space<vmem>>, %arg9: memref<1x128xf32, #tpu.memory_space<vmem>>, %arg10: memref<128x128xf32, #tpu.memory_space<vmem>>, %arg11: memref<1x128xf32, #tpu.memory_space<vmem>>, %arg12: memref<8x128xf32, #tpu.memory_space<vmem>>, %arg13: memref<8x1536xf32, #tpu.memory_space<vmem>>, %arg14: memref<8x512xf32, #tpu.memory_space<vmem>>) attributes {dimension_semantics = [#tpu.dimension_semantics<parallel>], iteration_bounds = array<i64: 1>, scalar_prefetch = 0 : i64, scratch_operands = 2 : i64, tpu.core_type = #tpu.core_type<tc>, window_params = [{transform_indices = @transform_0, window_bounds = array<i64: 8, 784>}, {pipeline_mode = #tpu.pipeline_mode<synchronous>, transform_indices = @transform_1, window_bounds = array<i64: 168, 512>}, {pipeline_mode = #tpu.pipeline_mode<synchronous>, transform_indices = @transform_2, window_bounds = array<i64: 1, 128>}, {pipeline_mode = #tpu.pipeline_mode<synchronous>, transform_indices = @transform_3, window_bounds = array<i64: 768, 512>}, {pipeline_mode = #tpu.pipeline_mode<synchronous>, transform_indices = @transform_4, window_bounds = array<i64: 1, 128>}, {pipeline_mode = #tpu.pipeline_mode<synchronous>, transform_indices = @transform_5, window_bounds = array<i64: 512, 128>}, {pipeline_mode = #tpu.pipeline_mode<synchronous>, transform_indices = @transform_6, window_bounds = array<i64: 1, 128>}, {pipeline_mode = #tpu.pipeline_mode<synchronous>, transform_indices = @transform_7, window_bounds = array<i64: 128, 128>}, {pipeline_mode = #tpu.pipeline_mode<synchronous>, transform_indices = @transform_8, window_bounds = array<i64: 1, 128>}, {pipeline_mode = #tpu.pipeline_mode<synchronous>, transform_indices = @transform_9, window_bounds = array<i64: 128, 128>}, {pipeline_mode = #tpu.pipeline_mode<synchronous>, transform_indices = @transform_10, window_bounds = array<i64: 1, 128>}, {transform_indices = @transform_11, window_bounds = array<i64: 8, 128>}]} {
    %c0 = arith.constant 0 : index
    %c0_0 = arith.constant 0 : index
    %0 = vector.load %arg1[%c0, %c0_0] : memref<8x784xf32, #tpu.memory_space<vmem>>, vector<8x168xf32>
    %c0_1 = arith.constant 0 : index
    %c0_2 = arith.constant 0 : index
    %1 = vector.load %arg2[%c0_1, %c0_2] : memref<168x512xf32, #tpu.memory_space<vmem>>, vector<168x512xf32>
    %cst = arith.constant dense<0.000000e+00> : vector<8x512xf32>
    %2 = tpu.matmul %0, %1, %cst {dimension_numbers = #tpu.dot_dimension_numbers<[1], [0], [0], [1], [0, 0, 1, 1], [], []>} : vector<8x168xf32>, vector<168x512xf32>, vector<8x512xf32> -> vector<8x512xf32>
    %3 = vector.extract_strided_slice %2 {offsets = [0, 0], sizes = [8, 128], strides = [1, 1]} : vector<8x512xf32> to vector<8x128xf32>
    %4 = vector.extract_strided_slice %2 {offsets = [0, 128], sizes = [8, 128], strides = [1, 1]} : vector<8x512xf32> to vector<8x128xf32>
    %5 = arith.maximumf %3, %4 : vector<8x128xf32>
    %6 = vector.extract_strided_slice %2 {offsets = [0, 256], sizes = [8, 128], strides = [1, 1]} : vector<8x512xf32> to vector<8x128xf32>
    %7 = vector.extract_strided_slice %2 {offsets = [0, 384], sizes = [8, 128], strides = [1, 1]} : vector<8x512xf32> to vector<8x128xf32>
    %8 = arith.maximumf %6, %7 : vector<8x128xf32>
    %9 = arith.maximumf %5, %8 : vector<8x128xf32>
    %c0_3 = arith.constant 0 : index
    %c0_4 = arith.constant 0 : index
    %10 = vector.load %arg3[%c0_3, %c0_4] : memref<1x128xf32, #tpu.memory_space<vmem>>, vector<1x128xf32>
    %11 = vector.broadcast %10 : vector<1x128xf32> to vector<8x128xf32>
    %12 = arith.addf %9, %11 : vector<8x128xf32>
    %cst_5 = arith.constant 0.000000e+00 : f32
    %13 = vector.broadcast %cst_5 : f32 to vector<8x128xf32>
    %14 = arith.maximumf %12, %13 : vector<8x128xf32>
    %c0_6 = arith.constant 0 : index
    %c0_7 = arith.constant 0 : index
    %15 = vector.load %arg13[%c0_6, %c0_7] : memref<8x1536xf32, #tpu.memory_space<vmem>>, vector<8x128xf32>
    tpu.vector_store %arg13[%c0_6, %c0_7], %14 {strides = array<i32>} : memref<8x1536xf32, #tpu.memory_space<vmem>>, vector<8x128xf32>,
    %c0_8 = arith.constant 0 : index
    %c56 = arith.constant 56 : index
    %16 = vector.load %arg1[%c0_8, %c56] : memref<8x784xf32, #tpu.memory_space<vmem>>, vector<8x168xf32>
    %c0_9 = arith.constant 0 : index
    %c0_10 = arith.constant 0 : index
    %17 = vector.load %arg2[%c0_9, %c0_10] : memref<168x512xf32, #tpu.memory_space<vmem>>, vector<168x512xf32>
    %cst_11 = arith.constant dense<0.000000e+00> : vector<8x512xf32>
    %18 = tpu.matmul %16, %17, %cst_11 {dimension_numbers = #tpu.dot_dimension_numbers<[1], [0], [0], [1], [0, 0, 1, 1], [], []>} : vector<8x168xf32>, vector<168x512xf32>, vector<8x512xf32> -> vector<8x512xf32>
    %19 = vector.extract_strided_slice %18 {offsets = [0, 0], sizes = [8, 128], strides = [1, 1]} : vector<8x512xf32> to vector<8x128xf32>
    %20 = vector.extract_strided_slice %18 {offsets = [0, 128], sizes = [8, 128], strides = [1, 1]} : vector<8x512xf32> to vector<8x128xf32>
    %21 = arith.maximumf %19, %20 : vector<8x128xf32>
    %22 = vector.extract_strided_slice %18 {offsets = [0, 256], sizes = [8, 128], strides = [1, 1]} : vector<8x512xf32> to vector<8x128xf32>
    %23 = vector.extract_strided_slice %18 {offsets = [0, 384], sizes = [8, 128], strides = [1, 1]} : vector<8x512xf32> to vector<8x128xf32>
    %24 = arith.maximumf %22, %23 : vector<8x128xf32>
    %25 = arith.maximumf %21, %24 : vector<8x128xf32>
    %c0_12 = arith.constant 0 : index
    %c0_13 = arith.constant 0 : index
    %26 = vector.load %arg3[%c0_12, %c0_13] : memref<1x128xf32, #tpu.memory_space<vmem>>, vector<1x128xf32>
    %27 = vector.broadcast %26 : vector<1x128xf32> to vector<8x128xf32>
    %28 = arith.addf %25, %27 : vector<8x128xf32>
    %cst_14 = arith.constant 0.000000e+00 : f32
    %29 = vector.broadcast %cst_14 : f32 to vector<8x128xf32>
    %30 = arith.maximumf %28, %29 : vector<8x128xf32>
    %c0_15 = arith.constant 0 : index
    %c128 = arith.constant 128 : index
    %31 = vector.load %arg13[%c0_15, %c128] : memref<8x1536xf32, #tpu.memory_space<vmem>>, vector<8x128xf32>
    tpu.vector_store %arg13[%c0_15, %c128], %30 {strides = array<i32>} : memref<8x1536xf32, #tpu.memory_space<vmem>>, vector<8x128xf32>,
    %c0_16 = arith.constant 0 : index
    %c112 = arith.constant 112 : index
    %32 = vector.load %arg1[%c0_16, %c112] : memref<8x784xf32, #tpu.memory_space<vmem>>, vector<8x168xf32>
    %c0_17 = arith.constant 0 : index
    %c0_18 = arith.constant 0 : index
    %33 = vector.load %arg2[%c0_17, %c0_18] : memref<168x512xf32, #tpu.memory_space<vmem>>, vector<168x512xf32>
    %cst_19 = arith.constant dense<0.000000e+00> : vector<8x512xf32>
    %34 = tpu.matmul %32, %33, %cst_19 {dimension_numbers = #tpu.dot_dimension_numbers<[1], [0], [0], [1], [0, 0, 1, 1], [], []>} : vector<8x168xf32>, vector<168x512xf32>, vector<8x512xf32> -> vector<8x512xf32>
    %35 = vector.extract_strided_slice %34 {offsets = [0, 0], sizes = [8, 128], strides = [1, 1]} : vector<8x512xf32> to vector<8x128xf32>
    %36 = vector.extract_strided_slice %34 {offsets = [0, 128], sizes = [8, 128], strides = [1, 1]} : vector<8x512xf32> to vector<8x128xf32>
    %37 = arith.maximumf %35, %36 : vector<8x128xf32>
    %38 = vector.extract_strided_slice %34 {offsets = [0, 256], sizes = [8, 128], strides = [1, 1]} : vector<8x512xf32> to vector<8x128xf32>
    %39 = vector.extract_strided_slice %34 {offsets = [0, 384], sizes = [8, 128], strides = [1, 1]} : vector<8x512xf32> to vector<8x128xf32>
    %40 = arith.maximumf %38, %39 : vector<8x128xf32>
    %41 = arith.maximumf %37, %40 : vector<8x128xf32>
    %c0_20 = arith.constant 0 : index
    %c0_21 = arith.constant 0 : index
    %42 = vector.load %arg3[%c0_20, %c0_21] : memref<1x128xf32, #tpu.memory_space<vmem>>, vector<1x128xf32>
    %43 = vector.broadcast %42 : vector<1x128xf32> to vector<8x128xf32>
    %44 = arith.addf %41, %43 : vector<8x128xf32>
    %cst_22 = arith.constant 0.000000e+00 : f32
    %45 = vector.broadcast %cst_22 : f32 to vector<8x128xf32>
    %46 = arith.maximumf %44, %45 : vector<8x128xf32>
    %c0_23 = arith.constant 0 : index
    %c256 = arith.constant 256 : index
    %47 = vector.load %arg13[%c0_23, %c256] : memref<8x1536xf32, #tpu.memory_space<vmem>>, vector<8x128xf32>
    tpu.vector_store %arg13[%c0_23, %c256], %46 {strides = array<i32>} : memref<8x1536xf32, #tpu.memory_space<vmem>>, vector<8x128xf32>,
    %c0_24 = arith.constant 0 : index
    %c168 = arith.constant 168 : index
    %48 = vector.load %arg1[%c0_24, %c168] : memref<8x784xf32, #tpu.memory_space<vmem>>, vector<8x168xf32>
    %c0_25 = arith.constant 0 : index
    %c0_26 = arith.constant 0 : index
    %49 = vector.load %arg2[%c0_25, %c0_26] : memref<168x512xf32, #tpu.memory_space<vmem>>, vector<168x512xf32>
    %cst_27 = arith.constant dense<0.000000e+00> : vector<8x512xf32>
    %50 = tpu.matmul %48, %49, %cst_27 {dimension_numbers = #tpu.dot_dimension_numbers<[1], [0], [0], [1], [0, 0, 1, 1], [], []>} : vector<8x168xf32>, vector<168x512xf32>, vector<8x512xf32> -> vector<8x512xf32>
    %51 = vector.extract_strided_slice %50 {offsets = [0, 0], sizes = [8, 128], strides = [1, 1]} : vector<8x512xf32> to vector<8x128xf32>
    %52 = vector.extract_strided_slice %50 {offsets = [0, 128], sizes = [8, 128], strides = [1, 1]} : vector<8x512xf32> to vector<8x128xf32>
    %53 = arith.maximumf %51, %52 : vector<8x128xf32>
    %54 = vector.extract_strided_slice %50 {offsets = [0, 256], sizes = [8, 128], strides = [1, 1]} : vector<8x512xf32> to vector<8x128xf32>
    %55 = vector.extract_strided_slice %50 {offsets = [0, 384], sizes = [8, 128], strides = [1, 1]} : vector<8x512xf32> to vector<8x128xf32>
    %56 = arith.maximumf %54, %55 : vector<8x128xf32>
    %57 = arith.maximumf %53, %56 : vector<8x128xf32>
    %c0_28 = arith.constant 0 : index
    %c0_29 = arith.constant 0 : index
    %58 = vector.load %arg3[%c0_28, %c0_29] : memref<1x128xf32, #tpu.memory_space<vmem>>, vector<1x128xf32>
    %59 = vector.broadcast %58 : vector<1x128xf32> to vector<8x128xf32>
    %60 = arith.addf %57, %59 : vector<8x128xf32>
    %cst_30 = arith.constant 0.000000e+00 : f32
    %61 = vector.broadcast %cst_30 : f32 to vector<8x128xf32>
    %62 = arith.maximumf %60, %61 : vector<8x128xf32>
    %c0_31 = arith.constant 0 : index
    %c384 = arith.constant 384 : index
    %63 = vector.load %arg13[%c0_31, %c384] : memref<8x1536xf32, #tpu.memory_space<vmem>>, vector<8x128xf32>
    tpu.vector_store %arg13[%c0_31, %c384], %62 {strides = array<i32>} : memref<8x1536xf32, #tpu.memory_space<vmem>>, vector<8x128xf32>,
    %c0_32 = arith.constant 0 : index
    %c224 = arith.constant 224 : index
    %64 = vector.load %arg1[%c0_32, %c224] : memref<8x784xf32, #tpu.memory_space<vmem>>, vector<8x168xf32>
    %c0_33 = arith.constant 0 : index
    %c0_34 = arith.constant 0 : index
    %65 = vector.load %arg2[%c0_33, %c0_34] : memref<168x512xf32, #tpu.memory_space<vmem>>, vector<168x512xf32>
    %cst_35 = arith.constant dense<0.000000e+00> : vector<8x512xf32>
    %66 = tpu.matmul %64, %65, %cst_35 {dimension_numbers = #tpu.dot_dimension_numbers<[1], [0], [0], [1], [0, 0, 1, 1], [], []>} : vector<8x168xf32>, vector<168x512xf32>, vector<8x512xf32> -> vector<8x512xf32>
    %67 = vector.extract_strided_slice %66 {offsets = [0, 0], sizes = [8, 128], strides = [1, 1]} : vector<8x512xf32> to vector<8x128xf32>
    %68 = vector.extract_strided_slice %66 {offsets = [0, 128], sizes = [8, 128], strides = [1, 1]} : vector<8x512xf32> to vector<8x128xf32>
    %69 = arith.maximumf %67, %68 : vector<8x128xf32>
    %70 = vector.extract_strided_slice %66 {offsets = [0, 256], sizes = [8, 128], strides = [1, 1]} : vector<8x512xf32> to vector<8x128xf32>
    %71 = vector.extract_strided_slice %66 {offsets = [0, 384], sizes = [8, 128], strides = [1, 1]} : vector<8x512xf32> to vector<8x128xf32>
    %72 = arith.maximumf %70, %71 : vector<8x128xf32>
    %73 = arith.maximumf %69, %72 : vector<8x128xf32>
    %c0_36 = arith.constant 0 : index
    %c0_37 = arith.constant 0 : index
    %74 = vector.load %arg3[%c0_36, %c0_37] : memref<1x128xf32, #tpu.memory_space<vmem>>, vector<1x128xf32>
    %75 = vector.broadcast %74 : vector<1x128xf32> to vector<8x128xf32>
    %76 = arith.addf %73, %75 : vector<8x128xf32>
    %cst_38 = arith.constant 0.000000e+00 : f32
    %77 = vector.broadcast %cst_38 : f32 to vector<8x128xf32>
    %78 = arith.maximumf %76, %77 : vector<8x128xf32>
    %c0_39 = arith.constant 0 : index
    %c512 = arith.constant 512 : index
    %79 = vector.load %arg13[%c0_39, %c512] : memref<8x1536xf32, #tpu.memory_space<vmem>>, vector<8x128xf32>
    tpu.vector_store %arg13[%c0_39, %c512], %78 {strides = array<i32>} : memref<8x1536xf32, #tpu.memory_space<vmem>>, vector<8x128xf32>,
    %c0_40 = arith.constant 0 : index
    %c280 = arith.constant 280 : index
    %80 = vector.load %arg1[%c0_40, %c280] : memref<8x784xf32, #tpu.memory_space<vmem>>, vector<8x168xf32>
    %c0_41 = arith.constant 0 : index
    %c0_42 = arith.constant 0 : index
    %81 = vector.load %arg2[%c0_41, %c0_42] : memref<168x512xf32, #tpu.memory_space<vmem>>, vector<168x512xf32>
    %cst_43 = arith.constant dense<0.000000e+00> : vector<8x512xf32>
    %82 = tpu.matmul %80, %81, %cst_43 {dimension_numbers = #tpu.dot_dimension_numbers<[1], [0], [0], [1], [0, 0, 1, 1], [], []>} : vector<8x168xf32>, vector<168x512xf32>, vector<8x512xf32> -> vector<8x512xf32>
    %83 = vector.extract_strided_slice %82 {offsets = [0, 0], sizes = [8, 128], strides = [1, 1]} : vector<8x512xf32> to vector<8x128xf32>
    %84 = vector.extract_strided_slice %82 {offsets = [0, 128], sizes = [8, 128], strides = [1, 1]} : vector<8x512xf32> to vector<8x128xf32>
    %85 = arith.maximumf %83, %84 : vector<8x128xf32>
    %86 = vector.extract_strided_slice %82 {offsets = [0, 256], sizes = [8, 128], strides = [1, 1]} : vector<8x512xf32> to vector<8x128xf32>
    %87 = vector.extract_strided_slice %82 {offsets = [0, 384], sizes = [8, 128], strides = [1, 1]} : vector<8x512xf32> to vector<8x128xf32>
    %88 = arith.maximumf %86, %87 : vector<8x128xf32>
    %89 = arith.maximumf %85, %88 : vector<8x128xf32>
    %c0_44 = arith.constant 0 : index
    %c0_45 = arith.constant 0 : index
    %90 = vector.load %arg3[%c0_44, %c0_45] : memref<1x128xf32, #tpu.memory_space<vmem>>, vector<1x128xf32>
    %91 = vector.broadcast %90 : vector<1x128xf32> to vector<8x128xf32>
    %92 = arith.addf %89, %91 : vector<8x128xf32>
    %cst_46 = arith.constant 0.000000e+00 : f32
    %93 = vector.broadcast %cst_46 : f32 to vector<8x128xf32>
    %94 = arith.maximumf %92, %93 : vector<8x128xf32>
    %c0_47 = arith.constant 0 : index
    %c640 = arith.constant 640 : index
    %95 = vector.load %arg13[%c0_47, %c640] : memref<8x1536xf32, #tpu.memory_space<vmem>>, vector<8x128xf32>
    tpu.vector_store %arg13[%c0_47, %c640], %94 {strides = array<i32>} : memref<8x1536xf32, #tpu.memory_space<vmem>>, vector<8x128xf32>,
    %c0_48 = arith.constant 0 : index
    %c336 = arith.constant 336 : index
    %96 = vector.load %arg1[%c0_48, %c336] : memref<8x784xf32, #tpu.memory_space<vmem>>, vector<8x168xf32>
    %c0_49 = arith.constant 0 : index
    %c0_50 = arith.constant 0 : index
    %97 = vector.load %arg2[%c0_49, %c0_50] : memref<168x512xf32, #tpu.memory_space<vmem>>, vector<168x512xf32>
    %cst_51 = arith.constant dense<0.000000e+00> : vector<8x512xf32>
    %98 = tpu.matmul %96, %97, %cst_51 {dimension_numbers = #tpu.dot_dimension_numbers<[1], [0], [0], [1], [0, 0, 1, 1], [], []>} : vector<8x168xf32>, vector<168x512xf32>, vector<8x512xf32> -> vector<8x512xf32>
    %99 = vector.extract_strided_slice %98 {offsets = [0, 0], sizes = [8, 128], strides = [1, 1]} : vector<8x512xf32> to vector<8x128xf32>
    %100 = vector.extract_strided_slice %98 {offsets = [0, 128], sizes = [8, 128], strides = [1, 1]} : vector<8x512xf32> to vector<8x128xf32>
    %101 = arith.maximumf %99, %100 : vector<8x128xf32>
    %102 = vector.extract_strided_slice %98 {offsets = [0, 256], sizes = [8, 128], strides = [1, 1]} : vector<8x512xf32> to vector<8x128xf32>
    %103 = vector.extract_strided_slice %98 {offsets = [0, 384], sizes = [8, 128], strides = [1, 1]} : vector<8x512xf32> to vector<8x128xf32>
    %104 = arith.maximumf %102, %103 : vector<8x128xf32>
    %105 = arith.maximumf %101, %104 : vector<8x128xf32>
    %c0_52 = arith.constant 0 : index
    %c0_53 = arith.constant 0 : index
    %106 = vector.load %arg3[%c0_52, %c0_53] : memref<1x128xf32, #tpu.memory_space<vmem>>, vector<1x128xf32>
    %107 = vector.broadcast %106 : vector<1x128xf32> to vector<8x128xf32>
    %108 = arith.addf %105, %107 : vector<8x128xf32>
    %cst_54 = arith.constant 0.000000e+00 : f32
    %109 = vector.broadcast %cst_54 : f32 to vector<8x128xf32>
    %110 = arith.maximumf %108, %109 : vector<8x128xf32>
    %c0_55 = arith.constant 0 : index
    %c768 = arith.constant 768 : index
    %111 = vector.load %arg13[%c0_55, %c768] : memref<8x1536xf32, #tpu.memory_space<vmem>>, vector<8x128xf32>
    tpu.vector_store %arg13[%c0_55, %c768], %110 {strides = array<i32>} : memref<8x1536xf32, #tpu.memory_space<vmem>>, vector<8x128xf32>,
    %c0_56 = arith.constant 0 : index
    %c392 = arith.constant 392 : index
    %112 = vector.load %arg1[%c0_56, %c392] : memref<8x784xf32, #tpu.memory_space<vmem>>, vector<8x168xf32>
    %c0_57 = arith.constant 0 : index
    %c0_58 = arith.constant 0 : index
    %113 = vector.load %arg2[%c0_57, %c0_58] : memref<168x512xf32, #tpu.memory_space<vmem>>, vector<168x512xf32>
    %cst_59 = arith.constant dense<0.000000e+00> : vector<8x512xf32>
    %114 = tpu.matmul %112, %113, %cst_59 {dimension_numbers = #tpu.dot_dimension_numbers<[1], [0], [0], [1], [0, 0, 1, 1], [], []>} : vector<8x168xf32>, vector<168x512xf32>, vector<8x512xf32> -> vector<8x512xf32>
    %115 = vector.extract_strided_slice %114 {offsets = [0, 0], sizes = [8, 128], strides = [1, 1]} : vector<8x512xf32> to vector<8x128xf32>
    %116 = vector.extract_strided_slice %114 {offsets = [0, 128], sizes = [8, 128], strides = [1, 1]} : vector<8x512xf32> to vector<8x128xf32>
    %117 = arith.maximumf %115, %116 : vector<8x128xf32>
    %118 = vector.extract_strided_slice %114 {offsets = [0, 256], sizes = [8, 128], strides = [1, 1]} : vector<8x512xf32> to vector<8x128xf32>
    %119 = vector.extract_strided_slice %114 {offsets = [0, 384], sizes = [8, 128], strides = [1, 1]} : vector<8x512xf32> to vector<8x128xf32>
    %120 = arith.maximumf %118, %119 : vector<8x128xf32>
    %121 = arith.maximumf %117, %120 : vector<8x128xf32>
    %c0_60 = arith.constant 0 : index
    %c0_61 = arith.constant 0 : index
    %122 = vector.load %arg3[%c0_60, %c0_61] : memref<1x128xf32, #tpu.memory_space<vmem>>, vector<1x128xf32>
    %123 = vector.broadcast %122 : vector<1x128xf32> to vector<8x128xf32>
    %124 = arith.addf %121, %123 : vector<8x128xf32>
    %cst_62 = arith.constant 0.000000e+00 : f32
    %125 = vector.broadcast %cst_62 : f32 to vector<8x128xf32>
    %126 = arith.maximumf %124, %125 : vector<8x128xf32>
    %c0_63 = arith.constant 0 : index
    %c896 = arith.constant 896 : index
    %127 = vector.load %arg13[%c0_63, %c896] : memref<8x1536xf32, #tpu.memory_space<vmem>>, vector<8x128xf32>
    tpu.vector_store %arg13[%c0_63, %c896], %126 {strides = array<i32>} : memref<8x1536xf32, #tpu.memory_space<vmem>>, vector<8x128xf32>,
    %c0_64 = arith.constant 0 : index
    %c448 = arith.constant 448 : index
    %128 = vector.load %arg1[%c0_64, %c448] : memref<8x784xf32, #tpu.memory_space<vmem>>, vector<8x168xf32>
    %c0_65 = arith.constant 0 : index
    %c0_66 = arith.constant 0 : index
    %129 = vector.load %arg2[%c0_65, %c0_66] : memref<168x512xf32, #tpu.memory_space<vmem>>, vector<168x512xf32>
    %cst_67 = arith.constant dense<0.000000e+00> : vector<8x512xf32>
    %130 = tpu.matmul %128, %129, %cst_67 {dimension_numbers = #tpu.dot_dimension_numbers<[1], [0], [0], [1], [0, 0, 1, 1], [], []>} : vector<8x168xf32>, vector<168x512xf32>, vector<8x512xf32> -> vector<8x512xf32>
    %131 = vector.extract_strided_slice %130 {offsets = [0, 0], sizes = [8, 128], strides = [1, 1]} : vector<8x512xf32> to vector<8x128xf32>
    %132 = vector.extract_strided_slice %130 {offsets = [0, 128], sizes = [8, 128], strides = [1, 1]} : vector<8x512xf32> to vector<8x128xf32>
    %133 = arith.maximumf %131, %132 : vector<8x128xf32>
    %134 = vector.extract_strided_slice %130 {offsets = [0, 256], sizes = [8, 128], strides = [1, 1]} : vector<8x512xf32> to vector<8x128xf32>
    %135 = vector.extract_strided_slice %130 {offsets = [0, 384], sizes = [8, 128], strides = [1, 1]} : vector<8x512xf32> to vector<8x128xf32>
    %136 = arith.maximumf %134, %135 : vector<8x128xf32>
    %137 = arith.maximumf %133, %136 : vector<8x128xf32>
    %c0_68 = arith.constant 0 : index
    %c0_69 = arith.constant 0 : index
    %138 = vector.load %arg3[%c0_68, %c0_69] : memref<1x128xf32, #tpu.memory_space<vmem>>, vector<1x128xf32>
    %139 = vector.broadcast %138 : vector<1x128xf32> to vector<8x128xf32>
    %140 = arith.addf %137, %139 : vector<8x128xf32>
    %cst_70 = arith.constant 0.000000e+00 : f32
    %141 = vector.broadcast %cst_70 : f32 to vector<8x128xf32>
    %142 = arith.maximumf %140, %141 : vector<8x128xf32>
    %c0_71 = arith.constant 0 : index
    %c1024 = arith.constant 1024 : index
    %143 = vector.load %arg13[%c0_71, %c1024] : memref<8x1536xf32, #tpu.memory_space<vmem>>, vector<8x128xf32>
    tpu.vector_store %arg13[%c0_71, %c1024], %142 {strides = array<i32>} : memref<8x1536xf32, #tpu.memory_space<vmem>>, vector<8x128xf32>,
    %c0_72 = arith.constant 0 : index
    %c504 = arith.constant 504 : index
    %144 = vector.load %arg1[%c0_72, %c504] : memref<8x784xf32, #tpu.memory_space<vmem>>, vector<8x168xf32>
    %c0_73 = arith.constant 0 : index
    %c0_74 = arith.constant 0 : index
    %145 = vector.load %arg2[%c0_73, %c0_74] : memref<168x512xf32, #tpu.memory_space<vmem>>, vector<168x512xf32>
    %cst_75 = arith.constant dense<0.000000e+00> : vector<8x512xf32>
    %146 = tpu.matmul %144, %145, %cst_75 {dimension_numbers = #tpu.dot_dimension_numbers<[1], [0], [0], [1], [0, 0, 1, 1], [], []>} : vector<8x168xf32>, vector<168x512xf32>, vector<8x512xf32> -> vector<8x512xf32>
    %147 = vector.extract_strided_slice %146 {offsets = [0, 0], sizes = [8, 128], strides = [1, 1]} : vector<8x512xf32> to vector<8x128xf32>
    %148 = vector.extract_strided_slice %146 {offsets = [0, 128], sizes = [8, 128], strides = [1, 1]} : vector<8x512xf32> to vector<8x128xf32>
    %149 = arith.maximumf %147, %148 : vector<8x128xf32>
    %150 = vector.extract_strided_slice %146 {offsets = [0, 256], sizes = [8, 128], strides = [1, 1]} : vector<8x512xf32> to vector<8x128xf32>
    %151 = vector.extract_strided_slice %146 {offsets = [0, 384], sizes = [8, 128], strides = [1, 1]} : vector<8x512xf32> to vector<8x128xf32>
    %152 = arith.maximumf %150, %151 : vector<8x128xf32>
    %153 = arith.maximumf %149, %152 : vector<8x128xf32>
    %c0_76 = arith.constant 0 : index
    %c0_77 = arith.constant 0 : index
    %154 = vector.load %arg3[%c0_76, %c0_77] : memref<1x128xf32, #tpu.memory_space<vmem>>, vector<1x128xf32>
    %155 = vector.broadcast %154 : vector<1x128xf32> to vector<8x128xf32>
    %156 = arith.addf %153, %155 : vector<8x128xf32>
    %cst_78 = arith.constant 0.000000e+00 : f32
    %157 = vector.broadcast %cst_78 : f32 to vector<8x128xf32>
    %158 = arith.maximumf %156, %157 : vector<8x128xf32>
    %c0_79 = arith.constant 0 : index
    %c1152 = arith.constant 1152 : index
    %159 = vector.load %arg13[%c0_79, %c1152] : memref<8x1536xf32, #tpu.memory_space<vmem>>, vector<8x128xf32>
    tpu.vector_store %arg13[%c0_79, %c1152], %158 {strides = array<i32>} : memref<8x1536xf32, #tpu.memory_space<vmem>>, vector<8x128xf32>,
    %c0_80 = arith.constant 0 : index
    %c560 = arith.constant 560 : index
    %160 = vector.load %arg1[%c0_80, %c560] : memref<8x784xf32, #tpu.memory_space<vmem>>, vector<8x168xf32>
    %c0_81 = arith.constant 0 : index
    %c0_82 = arith.constant 0 : index
    %161 = vector.load %arg2[%c0_81, %c0_82] : memref<168x512xf32, #tpu.memory_space<vmem>>, vector<168x512xf32>
    %cst_83 = arith.constant dense<0.000000e+00> : vector<8x512xf32>
    %162 = tpu.matmul %160, %161, %cst_83 {dimension_numbers = #tpu.dot_dimension_numbers<[1], [0], [0], [1], [0, 0, 1, 1], [], []>} : vector<8x168xf32>, vector<168x512xf32>, vector<8x512xf32> -> vector<8x512xf32>
    %163 = vector.extract_strided_slice %162 {offsets = [0, 0], sizes = [8, 128], strides = [1, 1]} : vector<8x512xf32> to vector<8x128xf32>
    %164 = vector.extract_strided_slice %162 {offsets = [0, 128], sizes = [8, 128], strides = [1, 1]} : vector<8x512xf32> to vector<8x128xf32>
    %165 = arith.maximumf %163, %164 : vector<8x128xf32>
    %166 = vector.extract_strided_slice %162 {offsets = [0, 256], sizes = [8, 128], strides = [1, 1]} : vector<8x512xf32> to vector<8x128xf32>
    %167 = vector.extract_strided_slice %162 {offsets = [0, 384], sizes = [8, 128], strides = [1, 1]} : vector<8x512xf32> to vector<8x128xf32>
    %168 = arith.maximumf %166, %167 : vector<8x128xf32>
    %169 = arith.maximumf %165, %168 : vector<8x128xf32>
    %c0_84 = arith.constant 0 : index
    %c0_85 = arith.constant 0 : index
    %170 = vector.load %arg3[%c0_84, %c0_85] : memref<1x128xf32, #tpu.memory_space<vmem>>, vector<1x128xf32>
    %171 = vector.broadcast %170 : vector<1x128xf32> to vector<8x128xf32>
    %172 = arith.addf %169, %171 : vector<8x128xf32>
    %cst_86 = arith.constant 0.000000e+00 : f32
    %173 = vector.broadcast %cst_86 : f32 to vector<8x128xf32>
    %174 = arith.maximumf %172, %173 : vector<8x128xf32>
    %c0_87 = arith.constant 0 : index
    %c1280 = arith.constant 1280 : index
    %175 = vector.load %arg13[%c0_87, %c1280] : memref<8x1536xf32, #tpu.memory_space<vmem>>, vector<8x128xf32>
    tpu.vector_store %arg13[%c0_87, %c1280], %174 {strides = array<i32>} : memref<8x1536xf32, #tpu.memory_space<vmem>>, vector<8x128xf32>,
    %c0_88 = arith.constant 0 : index
    %c616 = arith.constant 616 : index
    %176 = vector.load %arg1[%c0_88, %c616] : memref<8x784xf32, #tpu.memory_space<vmem>>, vector<8x168xf32>
    %c0_89 = arith.constant 0 : index
    %c0_90 = arith.constant 0 : index
    %177 = vector.load %arg2[%c0_89, %c0_90] : memref<168x512xf32, #tpu.memory_space<vmem>>, vector<168x512xf32>
    %cst_91 = arith.constant dense<0.000000e+00> : vector<8x512xf32>
    %178 = tpu.matmul %176, %177, %cst_91 {dimension_numbers = #tpu.dot_dimension_numbers<[1], [0], [0], [1], [0, 0, 1, 1], [], []>} : vector<8x168xf32>, vector<168x512xf32>, vector<8x512xf32> -> vector<8x512xf32>
    %179 = vector.extract_strided_slice %178 {offsets = [0, 0], sizes = [8, 128], strides = [1, 1]} : vector<8x512xf32> to vector<8x128xf32>
    %180 = vector.extract_strided_slice %178 {offsets = [0, 128], sizes = [8, 128], strides = [1, 1]} : vector<8x512xf32> to vector<8x128xf32>
    %181 = arith.maximumf %179, %180 : vector<8x128xf32>
    %182 = vector.extract_strided_slice %178 {offsets = [0, 256], sizes = [8, 128], strides = [1, 1]} : vector<8x512xf32> to vector<8x128xf32>
    %183 = vector.extract_strided_slice %178 {offsets = [0, 384], sizes = [8, 128], strides = [1, 1]} : vector<8x512xf32> to vector<8x128xf32>
    %184 = arith.maximumf %182, %183 : vector<8x128xf32>
    %185 = arith.maximumf %181, %184 : vector<8x128xf32>
    %c0_92 = arith.constant 0 : index
    %c0_93 = arith.constant 0 : index
    %186 = vector.load %arg3[%c0_92, %c0_93] : memref<1x128xf32, #tpu.memory_space<vmem>>, vector<1x128xf32>
    %187 = vector.broadcast %186 : vector<1x128xf32> to vector<8x128xf32>
    %188 = arith.addf %185, %187 : vector<8x128xf32>
    %cst_94 = arith.constant 0.000000e+00 : f32
    %189 = vector.broadcast %cst_94 : f32 to vector<8x128xf32>
    %190 = arith.maximumf %188, %189 : vector<8x128xf32>
    %c0_95 = arith.constant 0 : index
    %c1408 = arith.constant 1408 : index
    %191 = vector.load %arg13[%c0_95, %c1408] : memref<8x1536xf32, #tpu.memory_space<vmem>>, vector<8x128xf32>
    tpu.vector_store %arg13[%c0_95, %c1408], %190 {strides = array<i32>} : memref<8x1536xf32, #tpu.memory_space<vmem>>, vector<8x128xf32>,
    %c0_96 = arith.constant 0 : index
    %c0_97 = arith.constant 0 : index
    %192 = vector.load %arg13[%c0_96, %c0_97] : memref<8x1536xf32, #tpu.memory_space<vmem>>, vector<8x768xf32>
    %c0_98 = arith.constant 0 : index
    %c0_99 = arith.constant 0 : index
    %193 = vector.load %arg4[%c0_98, %c0_99] : memref<768x512xf32, #tpu.memory_space<vmem>>, vector<768x512xf32>
    %cst_100 = arith.constant dense<0.000000e+00> : vector<8x512xf32>
    %194 = tpu.matmul %192, %193, %cst_100 {dimension_numbers = #tpu.dot_dimension_numbers<[1], [0], [0], [1], [0, 0, 1, 1], [], []>} : vector<8x768xf32>, vector<768x512xf32>, vector<8x512xf32> -> vector<8x512xf32>
    %195 = vector.extract_strided_slice %194 {offsets = [0, 0], sizes = [8, 128], strides = [1, 1]} : vector<8x512xf32> to vector<8x128xf32>
    %196 = vector.extract_strided_slice %194 {offsets = [0, 128], sizes = [8, 128], strides = [1, 1]} : vector<8x512xf32> to vector<8x128xf32>
    %197 = arith.maximumf %195, %196 : vector<8x128xf32>
    %198 = vector.extract_strided_slice %194 {offsets = [0, 256], sizes = [8, 128], strides = [1, 1]} : vector<8x512xf32> to vector<8x128xf32>
    %199 = vector.extract_strided_slice %194 {offsets = [0, 384], sizes = [8, 128], strides = [1, 1]} : vector<8x512xf32> to vector<8x128xf32>
    %200 = arith.maximumf %198, %199 : vector<8x128xf32>
    %201 = arith.maximumf %197, %200 : vector<8x128xf32>
    %c0_101 = arith.constant 0 : index
    %c0_102 = arith.constant 0 : index
    %202 = vector.load %arg5[%c0_101, %c0_102] : memref<1x128xf32, #tpu.memory_space<vmem>>, vector<1x128xf32>
    %203 = vector.broadcast %202 : vector<1x128xf32> to vector<8x128xf32>
    %204 = arith.addf %201, %203 : vector<8x128xf32>
    %cst_103 = arith.constant 0.000000e+00 : f32
    %205 = vector.broadcast %cst_103 : f32 to vector<8x128xf32>
    %206 = arith.maximumf %204, %205 : vector<8x128xf32>
    %c0_104 = arith.constant 0 : index
    %c0_105 = arith.constant 0 : index
    %207 = vector.load %arg14[%c0_104, %c0_105] : memref<8x512xf32, #tpu.memory_space<vmem>>, vector<8x128xf32>
    tpu.vector_store %arg14[%c0_104, %c0_105], %206 {strides = array<i32>} : memref<8x512xf32, #tpu.memory_space<vmem>>, vector<8x128xf32>,
    %c0_106 = arith.constant 0 : index
    %c256_107 = arith.constant 256 : index
    %208 = vector.load %arg13[%c0_106, %c256_107] : memref<8x1536xf32, #tpu.memory_space<vmem>>, vector<8x768xf32>
    %c0_108 = arith.constant 0 : index
    %c0_109 = arith.constant 0 : index
    %209 = vector.load %arg4[%c0_108, %c0_109] : memref<768x512xf32, #tpu.memory_space<vmem>>, vector<768x512xf32>
    %cst_110 = arith.constant dense<0.000000e+00> : vector<8x512xf32>
    %210 = tpu.matmul %208, %209, %cst_110 {dimension_numbers = #tpu.dot_dimension_numbers<[1], [0], [0], [1], [0, 0, 1, 1], [], []>} : vector<8x768xf32>, vector<768x512xf32>, vector<8x512xf32> -> vector<8x512xf32>
    %211 = vector.extract_strided_slice %210 {offsets = [0, 0], sizes = [8, 128], strides = [1, 1]} : vector<8x512xf32> to vector<8x128xf32>
    %212 = vector.extract_strided_slice %210 {offsets = [0, 128], sizes = [8, 128], strides = [1, 1]} : vector<8x512xf32> to vector<8x128xf32>
    %213 = arith.maximumf %211, %212 : vector<8x128xf32>
    %214 = vector.extract_strided_slice %210 {offsets = [0, 256], sizes = [8, 128], strides = [1, 1]} : vector<8x512xf32> to vector<8x128xf32>
    %215 = vector.extract_strided_slice %210 {offsets = [0, 384], sizes = [8, 128], strides = [1, 1]} : vector<8x512xf32> to vector<8x128xf32>
    %216 = arith.maximumf %214, %215 : vector<8x128xf32>
    %217 = arith.maximumf %213, %216 : vector<8x128xf32>
    %c0_111 = arith.constant 0 : index
    %c0_112 = arith.constant 0 : index
    %218 = vector.load %arg5[%c0_111, %c0_112] : memref<1x128xf32, #tpu.memory_space<vmem>>, vector<1x128xf32>
    %219 = vector.broadcast %218 : vector<1x128xf32> to vector<8x128xf32>
    %220 = arith.addf %217, %219 : vector<8x128xf32>
    %cst_113 = arith.constant 0.000000e+00 : f32
    %221 = vector.broadcast %cst_113 : f32 to vector<8x128xf32>
    %222 = arith.maximumf %220, %221 : vector<8x128xf32>
    %c0_114 = arith.constant 0 : index
    %c128_115 = arith.constant 128 : index
    %223 = vector.load %arg14[%c0_114, %c128_115] : memref<8x512xf32, #tpu.memory_space<vmem>>, vector<8x128xf32>
    tpu.vector_store %arg14[%c0_114, %c128_115], %222 {strides = array<i32>} : memref<8x512xf32, #tpu.memory_space<vmem>>, vector<8x128xf32>,
    %c0_116 = arith.constant 0 : index
    %c512_117 = arith.constant 512 : index
    %224 = vector.load %arg13[%c0_116, %c512_117] : memref<8x1536xf32, #tpu.memory_space<vmem>>, vector<8x768xf32>
    %c0_118 = arith.constant 0 : index
    %c0_119 = arith.constant 0 : index
    %225 = vector.load %arg4[%c0_118, %c0_119] : memref<768x512xf32, #tpu.memory_space<vmem>>, vector<768x512xf32>
    %cst_120 = arith.constant dense<0.000000e+00> : vector<8x512xf32>
    %226 = tpu.matmul %224, %225, %cst_120 {dimension_numbers = #tpu.dot_dimension_numbers<[1], [0], [0], [1], [0, 0, 1, 1], [], []>} : vector<8x768xf32>, vector<768x512xf32>, vector<8x512xf32> -> vector<8x512xf32>
    %227 = vector.extract_strided_slice %226 {offsets = [0, 0], sizes = [8, 128], strides = [1, 1]} : vector<8x512xf32> to vector<8x128xf32>
    %228 = vector.extract_strided_slice %226 {offsets = [0, 128], sizes = [8, 128], strides = [1, 1]} : vector<8x512xf32> to vector<8x128xf32>
    %229 = arith.maximumf %227, %228 : vector<8x128xf32>
    %230 = vector.extract_strided_slice %226 {offsets = [0, 256], sizes = [8, 128], strides = [1, 1]} : vector<8x512xf32> to vector<8x128xf32>
    %231 = vector.extract_strided_slice %226 {offsets = [0, 384], sizes = [8, 128], strides = [1, 1]} : vector<8x512xf32> to vector<8x128xf32>
    %232 = arith.maximumf %230, %231 : vector<8x128xf32>
    %233 = arith.maximumf %229, %232 : vector<8x128xf32>
    %c0_121 = arith.constant 0 : index
    %c0_122 = arith.constant 0 : index
    %234 = vector.load %arg5[%c0_121, %c0_122] : memref<1x128xf32, #tpu.memory_space<vmem>>, vector<1x128xf32>
    %235 = vector.broadcast %234 : vector<1x128xf32> to vector<8x128xf32>
    %236 = arith.addf %233, %235 : vector<8x128xf32>
    %cst_123 = arith.constant 0.000000e+00 : f32
    %237 = vector.broadcast %cst_123 : f32 to vector<8x128xf32>
    %238 = arith.maximumf %236, %237 : vector<8x128xf32>
    %c0_124 = arith.constant 0 : index
    %c256_125 = arith.constant 256 : index
    %239 = vector.load %arg14[%c0_124, %c256_125] : memref<8x512xf32, #tpu.memory_space<vmem>>, vector<8x128xf32>
    tpu.vector_store %arg14[%c0_124, %c256_125], %238 {strides = array<i32>} : memref<8x512xf32, #tpu.memory_space<vmem>>, vector<8x128xf32>,
    %c0_126 = arith.constant 0 : index
    %c768_127 = arith.constant 768 : index
    %240 = vector.load %arg13[%c0_126, %c768_127] : memref<8x1536xf32, #tpu.memory_space<vmem>>, vector<8x768xf32>
    %c0_128 = arith.constant 0 : index
    %c0_129 = arith.constant 0 : index
    %241 = vector.load %arg4[%c0_128, %c0_129] : memref<768x512xf32, #tpu.memory_space<vmem>>, vector<768x512xf32>
    %cst_130 = arith.constant dense<0.000000e+00> : vector<8x512xf32>
    %242 = tpu.matmul %240, %241, %cst_130 {dimension_numbers = #tpu.dot_dimension_numbers<[1], [0], [0], [1], [0, 0, 1, 1], [], []>} : vector<8x768xf32>, vector<768x512xf32>, vector<8x512xf32> -> vector<8x512xf32>
    %243 = vector.extract_strided_slice %242 {offsets = [0, 0], sizes = [8, 128], strides = [1, 1]} : vector<8x512xf32> to vector<8x128xf32>
    %244 = vector.extract_strided_slice %242 {offsets = [0, 128], sizes = [8, 128], strides = [1, 1]} : vector<8x512xf32> to vector<8x128xf32>
    %245 = arith.maximumf %243, %244 : vector<8x128xf32>
    %246 = vector.extract_strided_slice %242 {offsets = [0, 256], sizes = [8, 128], strides = [1, 1]} : vector<8x512xf32> to vector<8x128xf32>
    %247 = vector.extract_strided_slice %242 {offsets = [0, 384], sizes = [8, 128], strides = [1, 1]} : vector<8x512xf32> to vector<8x128xf32>
    %248 = arith.maximumf %246, %247 : vector<8x128xf32>
    %249 = arith.maximumf %245, %248 : vector<8x128xf32>
    %c0_131 = arith.constant 0 : index
    %c0_132 = arith.constant 0 : index
    %250 = vector.load %arg5[%c0_131, %c0_132] : memref<1x128xf32, #tpu.memory_space<vmem>>, vector<1x128xf32>
    %251 = vector.broadcast %250 : vector<1x128xf32> to vector<8x128xf32>
    %252 = arith.addf %249, %251 : vector<8x128xf32>
    %cst_133 = arith.constant 0.000000e+00 : f32
    %253 = vector.broadcast %cst_133 : f32 to vector<8x128xf32>
    %254 = arith.maximumf %252, %253 : vector<8x128xf32>
    %c0_134 = arith.constant 0 : index
    %c384_135 = arith.constant 384 : index
    %255 = vector.load %arg14[%c0_134, %c384_135] : memref<8x512xf32, #tpu.memory_space<vmem>>, vector<8x128xf32>
    tpu.vector_store %arg14[%c0_134, %c384_135], %254 {strides = array<i32>} : memref<8x512xf32, #tpu.memory_space<vmem>>, vector<8x128xf32>,
    %c0_136 = arith.constant 0 : index
    %c0_137 = arith.constant 0 : index
    %256 = vector.load %arg14[%c0_136, %c0_137] : memref<8x512xf32, #tpu.memory_space<vmem>>, vector<8x512xf32>
    %c0_138 = arith.constant 0 : index
    %c0_139 = arith.constant 0 : index
    %257 = vector.load %arg6[%c0_138, %c0_139] : memref<512x128xf32, #tpu.memory_space<vmem>>, vector<512x128xf32>
    %cst_140 = arith.constant dense<0.000000e+00> : vector<8x128xf32>
    %258 = tpu.matmul %256, %257, %cst_140 {dimension_numbers = #tpu.dot_dimension_numbers<[1], [0], [0], [1], [0, 0, 1, 1], [], []>} : vector<8x512xf32>, vector<512x128xf32>, vector<8x128xf32> -> vector<8x128xf32>
    %c0_141 = arith.constant 0 : index
    %c0_142 = arith.constant 0 : index
    %259 = vector.load %arg7[%c0_141, %c0_142] : memref<1x128xf32, #tpu.memory_space<vmem>>, vector<1x128xf32>
    %260 = vector.broadcast %259 : vector<1x128xf32> to vector<8x128xf32>
    %261 = arith.addf %258, %260 : vector<8x128xf32>
    %cst_143 = arith.constant 0.000000e+00 : f32
    %262 = vector.broadcast %cst_143 : f32 to vector<8x128xf32>
    %263 = arith.maximumf %261, %262 : vector<8x128xf32>
    %c0_144 = arith.constant 0 : index
    %c0_145 = arith.constant 0 : index
    %264 = vector.load %arg8[%c0_144, %c0_145] : memref<128x128xf32, #tpu.memory_space<vmem>>, vector<128x128xf32>
    %cst_146 = arith.constant dense<0.000000e+00> : vector<8x128xf32>
    %265 = tpu.matmul %263, %264, %cst_146 {dimension_numbers = #tpu.dot_dimension_numbers<[1], [0], [0], [1], [0, 0, 1, 1], [], []>} : vector<8x128xf32>, vector<128x128xf32>, vector<8x128xf32> -> vector<8x128xf32>
    %c0_147 = arith.constant 0 : index
    %c0_148 = arith.constant 0 : index
    %266 = vector.load %arg9[%c0_147, %c0_148] : memref<1x128xf32, #tpu.memory_space<vmem>>, vector<1x128xf32>
    %267 = vector.broadcast %266 : vector<1x128xf32> to vector<8x128xf32>
    %268 = arith.addf %265, %267 : vector<8x128xf32>
    %cst_149 = arith.constant 0.000000e+00 : f32
    %269 = vector.broadcast %cst_149 : f32 to vector<8x128xf32>
    %270 = arith.maximumf %268, %269 : vector<8x128xf32>
    %c0_150 = arith.constant 0 : index
    %c0_151 = arith.constant 0 : index
    %271 = vector.load %arg10[%c0_150, %c0_151] : memref<128x128xf32, #tpu.memory_space<vmem>>, vector<128x128xf32>
    %cst_152 = arith.constant dense<0.000000e+00> : vector<8x128xf32>
    %272 = tpu.matmul %270, %271, %cst_152 {dimension_numbers = #tpu.dot_dimension_numbers<[1], [0], [0], [1], [0, 0, 1, 1], [], []>} : vector<8x128xf32>, vector<128x128xf32>, vector<8x128xf32> -> vector<8x128xf32>
    %c0_153 = arith.constant 0 : index
    %c0_154 = arith.constant 0 : index
    %273 = vector.load %arg11[%c0_153, %c0_154] : memref<1x128xf32, #tpu.memory_space<vmem>>, vector<1x128xf32>
    %274 = vector.broadcast %273 : vector<1x128xf32> to vector<8x128xf32>
    %275 = arith.addf %272, %274 : vector<8x128xf32>
    %cst_155 = arith.constant dense<0xFF800000> : vector<8xf32>
    %276 = vector.multi_reduction <maximumf>, %275, %cst_155 [1] : vector<8x128xf32> to vector<8xf32>
    %277 = vector.shape_cast %276 : vector<8xf32> to vector<8x1xf32>
    %278 = vector.broadcast %277 : vector<8x1xf32> to vector<8x128xf32>
    %279 = arith.subf %275, %278 : vector<8x128xf32>
    %280 = math.exp %279 : vector<8x128xf32>
    %cst_156 = arith.constant dense<0.000000e+00> : vector<8xf32>
    %281 = vector.multi_reduction <add>, %280, %cst_156 [1] : vector<8x128xf32> to vector<8xf32>
    %282 = vector.shape_cast %281 : vector<8xf32> to vector<8x1xf32>
    %283 = tpu.reciprocal %282 : vector<8x1xf32> -> vector<8x1xf32>
    %284 = vector.broadcast %283 : vector<8x1xf32> to vector<8x128xf32>
    %285 = arith.mulf %280, %284 : vector<8x128xf32>
    %c0_157 = arith.constant 0 : index
    %c0_158 = arith.constant 0 : index
    %286 = vector.load %arg12[%c0_157, %c0_158] : memref<8x128xf32, #tpu.memory_space<vmem>>, vector<8x128xf32>
    tpu.vector_store %arg12[%c0_157, %c0_158], %285 {strides = array<i32>} : memref<8x128xf32, #tpu.memory_space<vmem>>, vector<8x128xf32>,
    return
  }
  func.func @transform_0(%arg0: i32) -> (i32, i32) {
    %c0_i32 = arith.constant 0 : i32
    %c0_i32_0 = arith.constant 0 : i32
    return %arg0, %c0_i32 : i32, i32
  }
  func.func @transform_1(%arg0: i32) -> (i32, i32) {
    %c0_i32 = arith.constant 0 : i32
    %c0_i32_0 = arith.constant 0 : i32
    %c0_i32_1 = arith.constant 0 : i32
    return %c0_i32, %c0_i32_0 : i32, i32
  }
  func.func @transform_2(%arg0: i32) -> (i32, i32) {
    %c0_i32 = arith.constant 0 : i32
    %c0_i32_0 = arith.constant 0 : i32
    %c0_i32_1 = arith.constant 0 : i32
    return %c0_i32, %c0_i32_0 : i32, i32
  }
  func.func @transform_3(%arg0: i32) -> (i32, i32) {
    %c0_i32 = arith.constant 0 : i32
    %c0_i32_0 = arith.constant 0 : i32
    %c0_i32_1 = arith.constant 0 : i32
    return %c0_i32, %c0_i32_0 : i32, i32
  }
  func.func @transform_4(%arg0: i32) -> (i32, i32) {
    %c0_i32 = arith.constant 0 : i32
    %c0_i32_0 = arith.constant 0 : i32
    %c0_i32_1 = arith.constant 0 : i32
    return %c0_i32, %c0_i32_0 : i32, i32
  }
  func.func @transform_5(%arg0: i32) -> (i32, i32) {
    %c0_i32 = arith.constant 0 : i32
    %c0_i32_0 = arith.constant 0 : i32
    %c0_i32_1 = arith.constant 0 : i32
    return %c0_i32, %c0_i32_0 : i32, i32
  }
  func.func @transform_6(%arg0: i32) -> (i32, i32) {
    %c0_i32 = arith.constant 0 : i32
    %c0_i32_0 = arith.constant 0 : i32
    %c0_i32_1 = arith.constant 0 : i32
    return %c0_i32, %c0_i32_0 : i32, i32
  }
  func.func @transform_7(%arg0: i32) -> (i32, i32) {
    %c0_i32 = arith.constant 0 : i32
    %c0_i32_0 = arith.constant 0 : i32
    %c0_i32_1 = arith.constant 0 : i32
    return %c0_i32, %c0_i32_0 : i32, i32
  }
  func.func @transform_8(%arg0: i32) -> (i32, i32) {
    %c0_i32 = arith.constant 0 : i32
    %c0_i32_0 = arith.constant 0 : i32
    %c0_i32_1 = arith.constant 0 : i32
    return %c0_i32, %c0_i32_0 : i32, i32
  }
  func.func @transform_9(%arg0: i32) -> (i32, i32) {
    %c0_i32 = arith.constant 0 : i32
    %c0_i32_0 = arith.constant 0 : i32
    %c0_i32_1 = arith.constant 0 : i32
    return %c0_i32, %c0_i32_0 : i32, i32
  }
  func.func @transform_10(%arg0: i32) -> (i32, i32) {
    %c0_i32 = arith.constant 0 : i32
    %c0_i32_0 = arith.constant 0 : i32
    %c0_i32_1 = arith.constant 0 : i32
    return %c0_i32, %c0_i32_0 : i32, i32
  }
  func.func @transform_11(%arg0: i32) -> (i32, i32) {
    %c0_i32 = arith.constant 0 : i32
    %c0_i32_0 = arith.constant 0 : i32
    return %arg0, %c0_i32 : i32, i32
  }
}

</mosaic_0001>

<bundles_post_ra>
// kernel: lenet5_forward.1
= control target key start
LH: loop header
LB: loop body
LE: loop exit
PB: predicated region body
PF: predicated region fallthrough
CT: control target
= control target key end

     0   :  { %16 = vsyncpa [#allocation5], 0  ;;  %s9568_s0 = inlined_call_operand.vmem [shape: f32[8,784], index: 0, kind: input, shape index: {}]   ;;  %s9569_s1 = inlined_call_operand.hbm [shape: f32[168,512], index: 1, kind: input, shape index: {}]   ;;  %s9570_s2 = inlined_call_operand.hbm [shape: f32[1,128], index: 2, kind: input, shape index: {}]   ;;  %s9571_s3 = inlined_call_operand.hbm [shape: f32[768,512], index: 3, kind: input, shape index: {}]   ;;  %s9572_s4 = inlined_call_operand.hbm [shape: f32[1,128], index: 4, kind: input, shape index: {}]   ;;  %s9573_s5 = inlined_call_operand.hbm [shape: f32[512,128], index: 5, kind: input, shape index: {}]   ;;  %s9574_s6 = inlined_call_operand.hbm [shape: f32[1,128], index: 6, kind: input, shape index: {}]   ;;  %s9575_s7 = inlined_call_operand.hbm [shape: f32[128,128], index: 7, kind: input, shape index: {}]   ;;  %s9576_s8 = inlined_call_operand.hbm [shape: f32[1,128], index: 8, kind: input, shape index: {}]   ;;  %s9577_s9 = inlined_call_operand.hbm [shape: f32[128,128], index: 9, kind: input, shape index: {}]   ;;  %s9578_s10 = inlined_call_operand.hbm [shape: f32[1,128], index: 10, kind: input, shape index: {}]   ;;  %s9579_s11 = inlined_call_operand.vmem [shape: f32[8,128], index: 11, kind: output, shape index: {}]  }
   0x1   :  { %17 = vsyncpa [#allocation7], 0 }
   0x2   :  { %18 = vsyncpa [#allocation10], 0 }
   0x3   :  { %19 = vsyncpa [#allocation13], 0 }
   0x4   :  { %20 = vsyncpa [#allocation16], 0 }
   0x5   :  { %21 = vsyncpa [#allocation19], 0  ;;  %s7402_s17 = smov [#allocation6]   ;;  %s7403_s19 = smov [#allocation9]  }
   0x6   :  { %s42_s18 = sshll.u32 %s7402_s17, 4  ;;  %s64_s20 = sshll.u32 %s7403_s19, 4  ;;  %s43_s18 = int_to_ptr.vmem [resolvable:$true] %s42_s18  ;;  %s65_s20 = int_to_ptr.vmem [resolvable:$true] %s64_s20 }
   0x7   :  { %s7198_s21 = scalar_lea.vmem %s43_s18, 16  ;;  %s7202_s22 = scalar_lea.vmem %s43_s18, 32 }
   0x8   :  { %p7199_p0 = scmp.ne.s32.totalorder %s43_s18, %s7198_s21  ;;  %p7203_p1 = scmp.lt.s32.totalorder %s43_s18, %s43_s18 }
   0x9   :  { %p7204_p2 = scmp.lt.s32.totalorder %s7202_s22, %s7198_s21 }
   0xb   :  { %p7205_p3 = por %p7204_p2, %p7203_p1 }
   0xd   :  { %p7206_p4 = pnand %p7205_p3, %p7199_p0 }
   0xf   :  { %7209 = shalt.err (!%p7206_p4)
}
  0x10   :  { %45 = dma.hbm_to_vmem [thread:$0]  %s9570_s2, 16, %s43_s18, [#allocation7]  }
  0x11   :  { %s7218_s25 = scalar_lea.vmem %s65_s20, 16  ;;  %s7222_s26 = scalar_lea.vmem %s65_s20, 32 }
  0x12   :  { %p7219_p5 = scmp.ne.s32.totalorder %s65_s20, %s7218_s25  ;;  %p7223_p6 = scmp.lt.s32.totalorder %s65_s20, %s65_s20 }
  0x13   :  { %p7224_p7 = scmp.lt.s32.totalorder %s7222_s26, %s7218_s25 }
  0x15   :  { %p7225_p8 = por %p7224_p7, %p7223_p6 }
  0x17   :  { %p7226_p9 = pnand %p7225_p8, %p7219_p5 }
  0x19   :  { %7229 = shalt.err (!%p7226_p9)
}
  0x1a   :  { %67 = dma.hbm_to_vmem [thread:$0]  %s9572_s4, 16, %s65_s20, [#allocation10]  }
  0x1b   :  { %s7404_s29 = smov [#allocation12]   ;;  %s7405_s12 = smov [#allocation15]  }
  0x1c   :  { %s86_s30 = sshll.u32 %s7404_s29, 4  ;;  %s108_s13 = sshll.u32 %s7405_s12, 4  ;;  %s87_s30 = int_to_ptr.vmem [resolvable:$true] %s86_s30  ;;  %s109_s13 = int_to_ptr.vmem [resolvable:$true] %s108_s13 }
  0x1d   :  { %s7238_s14 = scalar_lea.vmem %s87_s30, 16  ;;  %s7242_s2 = scalar_lea.vmem %s87_s30, 32 }
  0x1e   :  { %p7239_p10 = scmp.ne.s32.totalorder %s87_s30, %s7238_s14  ;;  %p7243_p11 = scmp.lt.s32.totalorder %s87_s30, %s87_s30 }
  0x1f   :  { %p7244_p12 = scmp.lt.s32.totalorder %s7242_s2, %s7238_s14 }
  0x21   :  { %p7245_p13 = por %p7244_p12, %p7243_p11 }
  0x23   :  { %p7246_p0 = pnand %p7245_p13, %p7239_p10 }
  0x25   :  { %7249 = shalt.err (!%p7246_p0)
}
  0x26   :  { %89 = dma.hbm_to_vmem [thread:$0]  %s9574_s6, 16, %s87_s30, [#allocation13]  }
  0x27   :  { %s7258_s17 = scalar_lea.vmem %s109_s13, 16  ;;  %s7262_s4 = scalar_lea.vmem %s109_s13, 32 }
  0x28   :  { %p7259_p1 = scmp.ne.s32.totalorder %s109_s13, %s7258_s17  ;;  %p7263_p2 = scmp.lt.s32.totalorder %s109_s13, %s109_s13 }
  0x29   :  { %p7264_p3 = scmp.lt.s32.totalorder %s7262_s4, %s7258_s17 }
  0x2b   :  { %p7265_p4 = por %p7264_p3, %p7263_p2 }
  0x2d   :  { %p7266_p5 = pnand %p7265_p4, %p7259_p1 }
  0x2f   :  { %7269 = shalt.err (!%p7266_p5)
}
  0x30   :  { %111 = dma.hbm_to_vmem [thread:$0]  %s9576_s8, 16, %s109_s13, [#allocation16]  }
  0x31   :  { %s7406_s20 = smov [#allocation4]  }
  0x32   :  { %s29_s21 = sshll.u32 %s7406_s20, 4  ;;  %s30_s21 = int_to_ptr.vmem [resolvable:$true] %s29_s21 }
  0x33   :  { %s7278_s22 = scalar_lea.vmem %s30_s21, 10752  ;;  %p7283_p7 = scmp.lt.s32.totalorder %s30_s21, %s30_s21 }
  0x34   :  { %p7279_p6 = scmp.ne.s32.totalorder %s30_s21, %s7278_s22  ;;  %p7284_p8 = scmp.lt.s32.totalorder %s7278_s22, %s7278_s22 }
  0x36   :  { %p7285_p9 = por %p7284_p8, %p7283_p7 }
  0x38   :  { %p7286_p10 = pnand %p7285_p9, %p7279_p6 }
  0x3a   :  { %7289 = shalt.err (!%p7286_p10)
}
  0x3b   :  { %s7407_s6 = smov 512   ;;  %s7408_s23 = smov 32  }
  0x3c   :  { %35 = dma.hbm_to_vmem [thread:$0]  %s9569_s1, 10752, %s30_s21, [#allocation5], %s7407_s6, %s7407_s6, %s7408_s23  }
  0x3d   :  { %s7409_s26 = smov [#allocation8]   ;;  %s7410_s8 = smov [#allocation11]  }
  0x3e   :  { %s51_s27 = sshll.u32 %s7409_s26, 4  ;;  %s73_s28 = sshll.u32 %s7410_s8, 4  ;;  %s52_s27 = int_to_ptr.vmem [resolvable:$true] %s51_s27  ;;  %s74_s28 = int_to_ptr.vmem [resolvable:$true] %s73_s28 }
  0x3f   :  { %s7298_s29 = scalar_lea.vmem %s52_s27, 49152  ;;  %p7303_p12 = scmp.lt.s32.totalorder %s52_s27, %s52_s27 }
  0x40   :  { %p7299_p11 = scmp.ne.s32.totalorder %s52_s27, %s7298_s29  ;;  %p7304_p13 = scmp.lt.s32.totalorder %s7298_s29, %s7298_s29 }
  0x42   :  { %p7305_p0 = por %p7304_p13, %p7303_p12 }
  0x44   :  { %p7306_p1 = pnand %p7305_p0, %p7299_p11 }
  0x46   :  { %7309 = shalt.err (!%p7306_p1)
}
  0x47   :  { %57 = dma.hbm_to_vmem [thread:$0]  %s9571_s3, 49152, %s52_s27, [#allocation7], %s7407_s6, %s7407_s6, %s7408_s23  }
  0x48   :  { %s7318_s13 = scalar_lea.vmem %s74_s28, 8192  ;;  %p7323_p3 = scmp.lt.s32.totalorder %s74_s28, %s74_s28 }
  0x49   :  { %p7319_p2 = scmp.ne.s32.totalorder %s74_s28, %s7318_s13  ;;  %p7324_p4 = scmp.lt.s32.totalorder %s7318_s13, %s7318_s13 }
  0x4b   :  { %p7325_p5 = por %p7324_p4, %p7323_p3 }
  0x4d   :  { %p7326_p6 = pnand %p7325_p5, %p7319_p2 }
  0x4f   :  { %7329 = shalt.err (!%p7326_p6)
}
  0x50   :  { %s7411_s1 = smov 128   ;;  %s7412_s14 = smov 8  }
  0x51   :  { %79 = dma.hbm_to_vmem [thread:$0]  %s9573_s5, 8192, %s74_s28, [#allocation10], %s7411_s1, %s7411_s1, %s7412_s14  }
  0x52   :  { %s7413_s16 = smov [#allocation14]   ;;  %s7414_s4 = smov [#allocation17]  }
  0x53   :  { %s95_s17 = sshll.u32 %s7413_s16, 4  ;;  %s117_s3 = sshll.u32 %s7414_s4, 4  ;;  %s96_s17 = int_to_ptr.vmem [resolvable:$true] %s95_s17  ;;  %s118_s3 = int_to_ptr.vmem [resolvable:$true] %s117_s3 }
  0x54   :  { %s7338_s18 = scalar_lea.vmem %s96_s17, 2048  ;;  %p7343_p8 = scmp.lt.s32.totalorder %s96_s17, %s96_s17 }
  0x55   :  { %p7339_p7 = scmp.ne.s32.totalorder %s96_s17, %s7338_s18  ;;  %p7344_p9 = scmp.lt.s32.totalorder %s7338_s18, %s7338_s18 }
  0x57   :  { %p7345_p10 = por %p7344_p9, %p7343_p8 }
  0x59   :  { %p7346_p11 = pnand %p7345_p10, %p7339_p7 }
  0x5b   :  { %7349 = shalt.err (!%p7346_p11)
}
  0x5c   :  { %101 = dma.hbm_to_vmem [thread:$0]  %s9575_s7, 2048, %s96_s17, [#allocation13], %s7411_s1, %s7411_s1, %s7412_s14  }
  0x5d   :  { %s7358_s21 = scalar_lea.vmem %s118_s3, 2048  ;;  %p7363_p13 = scmp.lt.s32.totalorder %s118_s3, %s118_s3 }
  0x5e   :  { %p7359_p12 = scmp.ne.s32.totalorder %s118_s3, %s7358_s21  ;;  %p7364_p0 = scmp.lt.s32.totalorder %s7358_s21, %s7358_s21 }
  0x60   :  { %p7365_p1 = por %p7364_p0, %p7363_p13 }
  0x62   :  { %p7366_p2 = pnand %p7365_p1, %p7359_p12 }
  0x64   :  { %7369 = shalt.err (!%p7366_p2)
}
  0x65   :  { %123 = dma.hbm_to_vmem [thread:$0]  %s9577_s9, 2048, %s118_s3, [#allocation16], %s7411_s1, %s7411_s1, %s7412_s14  }
  0x66   :  { %s7415_s6 = smov [#allocation18]  }
  0x67   :  { %s130_s24 = sshll.u32 %s7415_s6, 4  ;;  %s131_s24 = int_to_ptr.vmem [resolvable:$true] %s130_s24 }
  0x68   :  { %s7378_s25 = scalar_lea.vmem %s131_s24, 16  ;;  %s7382_s26 = scalar_lea.vmem %s131_s24, 32 }
  0x69   :  { %p7379_p3 = scmp.ne.s32.totalorder %s131_s24, %s7378_s25  ;;  %p7383_p4 = scmp.lt.s32.totalorder %s131_s24, %s131_s24 }
  0x6a   :  { %p7384_p5 = scmp.lt.s32.totalorder %s7382_s26, %s7378_s25 }
  0x6c   :  { %p7385_p6 = por %p7384_p5, %p7383_p4 }
  0x6e   :  { %p7386_p7 = pnand %p7385_p6, %p7379_p3 }
  0x70   :  { %7389 = shalt.err (!%p7386_p7)
}
  0x71   :  { %133 = dma.hbm_to_vmem [thread:$0]  %s9578_s10, 16, %s131_s24, [#allocation19]  }
  0x72   :  { %7390 = dma.done.wait [#allocation5], 10752  }
  0x73   :  { %7391 = vsyncadd [#allocation5], 4294956544 }
  0x74   :  { %7392 = dma.done.wait [#allocation7], 49168  }
  0x75   :  { %7393 = vsyncadd [#allocation7], 4294918128 }
  0x76   :  { %7394 = dma.done.wait [#allocation10], 8208  }
  0x77   :  { %7395 = vsyncadd [#allocation10], 4294959088 }
  0x78   :  { %7396 = dma.done.wait [#allocation13], 2064  }
  0x79   :  { %7397 = vsyncadd [#allocation13], 4294965232 }
  0x7a   :  { %7398 = dma.done.wait [#allocation16], 2064  }
  0x7b   :  { %7399 = vsyncadd [#allocation16], 4294965232 }
  0x7c   :  { %7400 = dma.done.wait [#allocation19], 16  }
  0x7d   :  { %7401 = vsyncadd [#allocation19], 4294967280  ;;  %v7525_v0 = vld [vmem:[%s9568_s0] sm:$0xff]  ;;  %v7530_v1 = vld [vmem:[%s9568_s0 + $0x8] sm:$0xff]  ;;  %s7416_s10 = smov 72   ;;  %s7417_s30 = smov 16  }
  0x7e   :  { %v7532_v2 = vld [vmem:[#allocation4 + $0x1e8] sm:$0xff]  ;;  %497 = vrot.lane.b32.xlu0 %v7525_v0, %s7416_s10  ;;  %v7536_v3 = vld [vmem:[#allocation4 + $0x1f8] sm:$0xff]  ;;  %v7538_v4 = vld [vmem:[#allocation4 + $0x1e0] sm:$0xff]  ;;  %753 = vrot.lane.b32.xlu1 %v7530_v1, %s7417_s30  ;;  %vm250_vm0 = vcmask 326656   ;;  %s7418_s1 = smov 88   ;;  %s7419_s4 = smov 104  }
  0x7f   :  { %254 = vmatprep.subr.mxu0 %v7532_v2  ;;  %v7540_v5 = vld [vmem:[#allocation4 + $0x1f0] sm:$0xff]  ;;  %325 = vmatprep.subr.mxu1 %v7536_v3  ;;  %v7544_v6 = vld [vmem:[#allocation4 + $0x1c8] sm:$0xff]  ;;  %v7546_v7 = vld [vmem:[#allocation4 + $0x1d8] sm:$0xff]  ;;  %s7420_s3 = smov 48   ;;  %vm501_vm1 = vcmask 588800   ;;  %vm757_vm2 = vcmask 130048  }
  0x80   :  { %255 = vmatpush1.msra.mxu0 %v7538_v4  ;;  %v7548_v8 = vld [vmem:[#allocation4 + $0x1c0] sm:$0xff]  ;;  %326 = vmatpush1.msra.mxu1 %v7540_v5  ;;  %v7552_v9 = vld [vmem:[#allocation4 + $0x1d0] sm:$0xff]  ;;  %v7554_v10 = vld [vmem:[#allocation4 + $0x1a8] sm:$0xff]  ;;  %vm1010_vm3 = vcmask 719872   ;;  %vm1266_vm4 = vcmask 261120   ;;  %s7421_s21 = smov 120  }
  0x81   :  { %256 = vmatprep.subr.mxu0 %v7544_v6  ;;  %327 = vmatprep.subr.mxu1 %v7546_v7  ;;  %v7558_v11 = vld [vmem:[#allocation4 + $0x1b8] sm:$0xff]  ;;  %v7560_v12 = vld [vmem:[#allocation4 + $0x1a0] sm:$0xff]  ;;  %v7564_v13 = vld [vmem:[#allocation4 + $0x1b0] sm:$0xff]  ;;  %vm1519_vm5 = vcmask 850944   ;;  %s7422_s5 = smov 64   ;;  %vm1771_vm6 = vcmask 392192  }
  0x82   :  { %499 = vrot.lane.b32.xlu0 %v7530_v1, %s7416_s10  ;;  %257 = vmatpush1.msra.mxu0 %v7548_v8  ;;  %v7566_v14 = vld [vmem:[#allocation4 + $0x188] sm:$0xff]  ;;  %v7570_v15 = vld [vmem:[#allocation4 + $0x198] sm:$0xff]  ;;  %v7575_v16 = vld [vmem:[%s9568_s0 + $0x10] sm:$0xff]  ;;  %vm2023_vm7 = vcmask 982016   ;;  %s7423_s25 = smov 80   ;;  %vm2275_vm8 = vcmask 523264  }
  0x83   :  { %328 = vmatpush1.msra.mxu1 %v7552_v9  ;;  %258 = vmatprep.subr.mxu0 %v7554_v10  ;;  %v7579_v17 = vld [vmem:[#allocation4 + $0x180] sm:$0xff]  ;;  %v7583_v18 = vld [vmem:[#allocation4 + $0x190] sm:$0xff]  ;;  %v7585_v19 = vld [vmem:[#allocation4 + $0x168] sm:$0xff]  ;;  %s7424_s26 = smov 24   ;;  %vm2531_vm9 = vcmask 64512   ;;  %vm2784_vm10 = vcmask 654336  }
  0x84   :  { %329 = vmatprep.subr.mxu1 %v7558_v11  ;;  %259 = vmatpush1.msra.mxu0 %v7560_v12  ;;  %v7589_v20 = vld [vmem:[#allocation4 + $0x178] sm:$0xff]  ;;  %v7591_v21 = vld [vmem:[#allocation4 + $0x160] sm:$0xff]  ;;  %v7595_v22 = vld [vmem:[#allocation4 + $0x170] sm:$0xff]  ;;  %vm3040_vm11 = vcmask 195584   ;;  %vm7426_vm12 = vmmov 0  }
  0x85   :  { %330 = vmatpush1.msra.mxu1 %v7564_v13  ;;  %260 = vmatprep.subr.mxu0 %v7566_v14  ;;  %v7597_v23 = vld [vmem:[#allocation4 + $0x148] sm:$0xff]  ;;  %v7601_v24 = vld [vmem:[#allocation4 + $0x158] sm:$0xff]  ;;  %v7603_v25 = vld [vmem:[#allocation4 + $0x140] sm:$0xff] }
  0x86   :  { %331 = vmatprep.subr.mxu1 %v7570_v15  ;;  %755 = vrot.lane.b32.xlu1 %v7575_v16, %s7417_s30  ;;  %v7607_v26 = vld [vmem:[#allocation4 + $0x150] sm:$0xff]  ;;  %v7609_v27 = vld [vmem:[#allocation4 + $0x128] sm:$0xff]  ;;  %v7613_v28 = vld [vmem:[#allocation4 + $0x138] sm:$0xff] }
  0x87   :  { %751 = vrot.lane.b32.xlu0 %v7525_v0, %s7417_s30  ;;  %261 = vmatpush1.msra.mxu0 %v7579_v17  ;;  %v7615_v29 = vld [vmem:[#allocation4 + $0x120] sm:$0xff]  ;;  %v7619_v30 = vld [vmem:[#allocation4 + $0x130] sm:$0xff]  ;;  %v7621_v31 = vld [vmem:[#allocation4 + $0x108] sm:$0xff] }
  0x88   :  { %332 = vmatpush1.msra.mxu1 %v7583_v18  ;;  %262 = vmatprep.subr.mxu0 %v7585_v19  ;;  %v7625_v32 = vld [vmem:[#allocation4 + $0x118] sm:$0xff]  ;;  %v7627_v33 = vld [vmem:[#allocation4 + $0x100] sm:$0xff]  ;;  %v7631_v34 = vld [vmem:[#allocation4 + $0x110] sm:$0xff] }
  0x89   :  { %333 = vmatprep.subr.mxu1 %v7589_v20  ;;  %263 = vmatpush1.msra.mxu0 %v7591_v21  ;;  %v7633_v35 = vld [vmem:[#allocation4 + $0xe8] sm:$0xff]  ;;  %v7637_v36 = vld [vmem:[#allocation4 + $0xf8] sm:$0xff]  ;;  %v7639_v37 = vld [vmem:[#allocation4 + $0xe0] sm:$0xff] }
  0x8a   :  { %334 = vmatpush1.msra.mxu1 %v7595_v22  ;;  %264 = vmatprep.subr.mxu0 %v7597_v23  ;;  %v7643_v38 = vld [vmem:[#allocation4 + $0xf0] sm:$0xff]  ;;  %v7645_v39 = vld [vmem:[#allocation4 + $0xc8] sm:$0xff]  ;;  %v7649_v40 = vld [vmem:[#allocation4 + $0xd8] sm:$0xff] }
  0x8b   :  { %335 = vmatprep.subr.mxu1 %v7601_v24  ;;  %265 = vmatpush1.msra.mxu0 %v7603_v25  ;;  %v7651_v41 = vld [vmem:[#allocation4 + $0xc0] sm:$0xff]  ;;  %v7655_v42 = vld [vmem:[#allocation4 + $0xd0] sm:$0xff]  ;;  %v7657_v43 = vld [vmem:[#allocation4 + $0xa8] sm:$0xff] }
  0x8c   :  { %336 = vmatpush1.msra.mxu1 %v7607_v26  ;;  %266 = vmatprep.subr.mxu0 %v7609_v27  ;;  %9810 = vst [vmem:[#allocation26_spill] sm:$0xff] %v7657_v43  ;;  %v7661_v44 = vld [vmem:[#allocation4 + $0xb8] sm:$0xff]  ;;  %v7663_v45 = vld [vmem:[#allocation4 + $0xa0] sm:$0xff]  ;;  %v7667_v46 = vld [vmem:[#allocation4 + $0xb0] sm:$0xff] }
  0x8d   :  { %337 = vmatprep.subr.mxu1 %v7613_v28  ;;  %267 = vmatpush1.msra.mxu0 %v7615_v29  ;;  %9811 = vst [vmem:[#allocation27_spill] sm:$0xff] %v7661_v44  ;;  %9812 = vst [vmem:[#allocation28_spill] sm:$0xff] %v7663_v45  ;;  %v7669_v47 = vld [vmem:[#allocation4 + $0x88] sm:$0xff]  ;;  %v7673_v48 = vld [vmem:[#allocation4 + $0x98] sm:$0xff] }
  0x8e   :  { %338 = vmatpush1.msra.mxu1 %v7619_v30  ;;  %268 = vmatprep.subr.mxu0 %v7621_v31  ;;  %9813 = vst [vmem:[#allocation29_spill] sm:$0xff] %v7667_v46  ;;  %9814 = vst [vmem:[#allocation30_spill] sm:$0xff] %v7669_v47  ;;  %v7675_v49 = vld [vmem:[#allocation4 + $0x80] sm:$0xff]  ;;  %v7679_v50 = vld [vmem:[#allocation4 + $0x90] sm:$0xff] }
  0x8f   :  { %339 = vmatprep.subr.mxu1 %v7625_v32  ;;  %269 = vmatpush1.msra.mxu0 %v7627_v33  ;;  %9815 = vst [vmem:[#allocation31_spill] sm:$0xff] %v7673_v48  ;;  %9816 = vst [vmem:[#allocation32_spill] sm:$0xff] %v7675_v49  ;;  %v7681_v51 = vld [vmem:[#allocation4 + $0x68] sm:$0xff]  ;;  %v7685_v52 = vld [vmem:[#allocation4 + $0x78] sm:$0xff] }
  0x90   :  { %340 = vmatpush1.msra.mxu1 %v7631_v34  ;;  %270 = vmatprep.subr.mxu0 %v7633_v35  ;;  %9817 = vst [vmem:[#allocation33_spill] sm:$0xff] %v7679_v50  ;;  %9818 = vst [vmem:[#allocation34_spill] sm:$0xff] %v7681_v51  ;;  %v7687_v53 = vld [vmem:[#allocation4 + $0x60] sm:$0xff]  ;;  %v7691_v54 = vld [vmem:[#allocation4 + $0x70] sm:$0xff] }
  0x91   :  { %341 = vmatprep.subr.mxu1 %v7637_v36  ;;  %271 = vmatpush1.msra.mxu0 %v7639_v37  ;;  %9819 = vst [vmem:[#allocation35_spill] sm:$0xff] %v7685_v52  ;;  %9820 = vst [vmem:[#allocation36_spill] sm:$0xff] %v7687_v53  ;;  %v7693_v55 = vld [vmem:[#allocation4 + $0x48] sm:$0xff]  ;;  %v7697_v56 = vld [vmem:[#allocation4 + $0x58] sm:$0xff] }
  0x92   :  { %342 = vmatpush1.msra.mxu1 %v7643_v38  ;;  %272 = vmatprep.subr.mxu0 %v7645_v39  ;;  %9821 = vst [vmem:[#allocation37_spill] sm:$0xff] %v7691_v54  ;;  %9822 = vst [vmem:[#allocation38_spill] sm:$0xff] %v7693_v55  ;;  %v7699_v57 = vld [vmem:[#allocation4 + $0x40] sm:$0xff]  ;;  %v7703_v58 = vld [vmem:[#allocation4 + $0x50] sm:$0xff] }
  0x93   :  { %343 = vmatprep.subr.mxu1 %v7649_v40  ;;  %273 = vmatpush1.msra.mxu0 %v7651_v41  ;;  %9823 = vst [vmem:[#allocation39_spill] sm:$0xff] %v7697_v56  ;;  %9824 = vst [vmem:[#allocation40_spill] sm:$0xff] %v7699_v57  ;;  %v7705_v59 = vld [vmem:[#allocation4 + $0x28] sm:$0xff]  ;;  %v7709_v60 = vld [vmem:[#allocation4 + $0x38] sm:$0xff] }
  0x94   :  { %344 = vmatpush1.msra.mxu1 %v7655_v42  ;;  %274 = vmatprep.subr.mxu0 %v7657_v43  ;;  %9825 = vst [vmem:[#allocation41_spill] sm:$0xff] %v7703_v58  ;;  %9826 = vst [vmem:[#allocation42_spill] sm:$0xff] %v7705_v59  ;;  %v7711_v61 = vld [vmem:[#allocation4 + $0x20] sm:$0xff]  ;;  %v7715_v62 = vld [vmem:[#allocation4 + $0x30] sm:$0xff] }
  0x95   :  { %345 = vmatprep.subr.mxu1 %v7661_v44  ;;  %275 = vmatpush1.msra.mxu0 %v7663_v45  ;;  %9827 = vst [vmem:[#allocation43_spill] sm:$0xff] %v7709_v60  ;;  %9828 = vst [vmem:[#allocation44_spill] sm:$0xff] %v7711_v61  ;;  %v7717_v63 = vld [vmem:[#allocation4 + $0x8] sm:$0xff] }
  0x96   :  { %346 = vmatpush1.msra.mxu1 %v7667_v46  ;;  %276 = vmatprep.subr.mxu0 %v7669_v47  ;;  %9829 = vst [vmem:[#allocation45_spill] sm:$0xff] %v7715_v62  ;;  %9830 = vst [vmem:[#allocation46_spill] sm:$0xff] %v7717_v63 }
  0x97   :  { %347 = vmatprep.subr.mxu1 %v7673_v48  ;;  %277 = vmatpush1.msra.mxu0 %v7675_v49 }
  0x98   :  { %348 = vmatpush1.msra.mxu1 %v7679_v50  ;;  %278 = vmatprep.subr.mxu0 %v7681_v51 }
  0x99   :  { %349 = vmatprep.subr.mxu1 %v7685_v52  ;;  %279 = vmatpush1.msra.mxu0 %v7687_v53  ;;  %v7721_v53 = vld [vmem:[#allocation4 + $0x18] sm:$0xff] }
  0x9a   :  { %350 = vmatpush1.msra.mxu1 %v7691_v54  ;;  %280 = vmatprep.subr.mxu0 %v7693_v55  ;;  %9831 = vst [vmem:[#allocation47_spill] sm:$0xff] %v7721_v53  ;;  %v7723_v54 = vld [vmem:[#allocation4] sm:$0xff]  ;;  %v7727_v55 = vld [vmem:[#allocation4 + $0x10] sm:$0xff] }
  0x9b   :  { %351 = vmatprep.subr.mxu1 %v7697_v56  ;;  %281 = vmatpush1.msra.mxu0 %v7699_v57  ;;  %9832 = vst [vmem:[#allocation48_spill] sm:$0xff] %v7723_v54  ;;  %9833 = vst [vmem:[#allocation49_spill] sm:$0xff] %v7727_v55  ;;  %v7729_v56 = vld [vmem:[#allocation4 + $0x288] sm:$0xff]  ;;  %v7733_v57 = vld [vmem:[#allocation4 + $0x298] sm:$0xff] }
  0x9c   :  { %352 = vmatpush1.msra.mxu1 %v7703_v58  ;;  %282 = vmatprep.subr.mxu0 %v7705_v59  ;;  %9834 = vst [vmem:[#allocation50_spill] sm:$0xff] %v7729_v56  ;;  %9835 = vst [vmem:[#allocation51_spill] sm:$0xff] %v7733_v57  ;;  %v7735_v58 = vld [vmem:[#allocation4 + $0x280] sm:$0xff]  ;;  %v7739_v59 = vld [vmem:[#allocation4 + $0x290] sm:$0xff] }
  0x9d   :  { %353 = vmatprep.subr.mxu1 %v7709_v60  ;;  %283 = vmatpush1.msra.mxu0 %v7711_v61  ;;  %9836 = vst [vmem:[#allocation52_spill] sm:$0xff] %v7735_v58  ;;  %9837 = vst [vmem:[#allocation53_spill] sm:$0xff] %v7739_v59  ;;  %v7741_v60 = vld [vmem:[#allocation4 + $0x268] sm:$0xff]  ;;  %v7745_v61 = vld [vmem:[#allocation4 + $0x278] sm:$0xff] }
  0x9e   :  { %354 = vmatpush1.msra.mxu1 %v7715_v62  ;;  %284 = vmatprep.subr.mxu0 %v7717_v63  ;;  %9838 = vst [vmem:[#allocation54_spill] sm:$0xff] %v7741_v60  ;;  %9839 = vst [vmem:[#allocation55_spill] sm:$0xff] %v7745_v61  ;;  %v7747_v62 = vld [vmem:[#allocation4 + $0x260] sm:$0xff]  ;;  %v7751_v63 = vld [vmem:[#allocation4 + $0x270] sm:$0xff] }
  0x9f   :  { %355 = vmatprep.subr.mxu1 %v7721_v53  ;;  %285 = vmatpush1.msra.mxu0 %v7723_v54  ;;  %9840 = vst [vmem:[#allocation56_spill] sm:$0xff] %v7747_v62  ;;  %9841 = vst [vmem:[#allocation57_spill] sm:$0xff] %v7751_v63  ;;  %v7753_v53 = vld [vmem:[#allocation4 + $0x248] sm:$0xff]  ;;  %v7757_v54 = vld [vmem:[#allocation4 + $0x258] sm:$0xff] }
  0xa0   :  { %356 = vmatpush1.msra.mxu1 %v7727_v55  ;;  %308 = vmatprep.subr.mxu0 %v7729_v56  ;;  %9842 = vst [vmem:[#allocation58_spill] sm:$0xff] %v7757_v54  ;;  %v7759_v55 = vld [vmem:[#allocation4 + $0x240] sm:$0xff]  ;;  %v7763_v56 = vld [vmem:[#allocation4 + $0x250] sm:$0xff] }
  0xa1   :  { %379 = vmatprep.subr.mxu1 %v7733_v57  ;;  %309 = vmatpush2.msra.mxu0 %v7735_v58  ;;  %9843 = vst [vmem:[#allocation59_spill] sm:$0xff] %v7759_v55  ;;  %v7765_v57 = vld [vmem:[#allocation4 + $0x228] sm:$0xff]  ;;  %v7769_v58 = vld [vmem:[#allocation4 + $0x238] sm:$0xff] }
  0xa2   :  { %380 = vmatpush2.msra.mxu1 %v7739_v59  ;;  %310 = vmatprep.subr.mxu0 %v7741_v60  ;;  %v7771_v59 = vld [vmem:[#allocation4 + $0x220] sm:$0xff]  ;;  %v7775_v60 = vld [vmem:[#allocation4 + $0x230] sm:$0xff] }
  0xa3   :  { %381 = vmatprep.subr.mxu1 %v7745_v61  ;;  %311 = vmatpush2.msra.mxu0 %v7747_v62  ;;  %v7777_v61 = vld [vmem:[#allocation4 + $0x208] sm:$0xff]  ;;  %v7781_v62 = vld [vmem:[#allocation4 + $0x218] sm:$0xff] }
  0xa4   :  { %382 = vmatpush2.msra.mxu1 %v7751_v63  ;;  %312 = vmatprep.subr.mxu0 %v7753_v53  ;;  %9844 = vst [vmem:[#allocation60_spill] sm:$0xff] %v7781_v62  ;;  %v7783_v63 = vld [vmem:[#allocation4 + $0x200] sm:$0xff] }
  0xa5   :  { %383 = vmatprep.subr.mxu1 %v7757_v54  ;;  %313 = vmatpush2.msra.mxu0 %v7759_v55  ;;  %v7787_v54 = vld [vmem:[#allocation4 + $0x210] sm:$0xff] }
  0xa6   :  { %384 = vmatpush2.msra.mxu1 %v7763_v56  ;;  %314 = vmatprep.subr.mxu0 %v7765_v57 }
  0xa7   :  { %385 = vmatprep.subr.mxu1 %v7769_v58  ;;  %315 = vmatpush2.msra.mxu0 %v7771_v59 }
  0xa8   :  { %386 = vmatpush2.msra.mxu1 %v7775_v60  ;;  %316 = vmatprep.subr.mxu0 %v7777_v61 }
  0xa9   :  { %387 = vmatprep.subr.mxu1 %v7781_v62  ;;  %317 = vmatpush2.msra.mxu0 %v7783_v63 }
  0xaa   :  { %6940 = vmatprep.mubr.msk.f32.mxu0 %vm250_vm0, %v7530_v1  ;;  %388 = vmatpush2.msra.mxu1 %v7787_v54 }
  0xab   :  { %6941 = vmatprep.mubr.msk.f32.mxu1 %vm250_vm0, %v7530_v1  ;;  %319 = vmatmul.mubr.f32.vlgmr.msra.gmra.mxu0 %v7525_v0 }
  0xac   :  { %390 = vmatmul.mubr.f32.vlgmr.msra.gmra.mxu1 %v7525_v0  ;;  %506 = vmatprep.subr.mxu0 %v7532_v2  ;;  %v9845_v0 = vld [vmem:[#allocation36_spill] sm:$0xff] }
  0xad   :  { %577 = vmatprep.subr.mxu1 %v7536_v3  ;;  %507 = vmatpush1.msra.mxu0 %v7538_v4 }
  0xae   :  { %578 = vmatpush1.msra.mxu1 %v7540_v5  ;;  %508 = vmatprep.subr.mxu0 %v7544_v6 }
  0xaf   :  { %579 = vmatprep.subr.mxu1 %v7546_v7  ;;  %509 = vmatpush1.msra.mxu0 %v7548_v8 }
  0xb0   :  { %580 = vmatpush1.msra.mxu1 %v7552_v9  ;;  %510 = vmatprep.subr.mxu0 %v7554_v10 }
  0xb1   :  { %581 = vmatprep.subr.mxu1 %v7558_v11  ;;  %511 = vmatpush1.msra.mxu0 %v7560_v12 }
  0xb2   :  { %582 = vmatpush1.msra.mxu1 %v7564_v13  ;;  %512 = vmatprep.subr.mxu0 %v7566_v14 }
  0xb3   :  { %583 = vmatprep.subr.mxu1 %v7570_v15  ;;  %513 = vmatpush1.msra.mxu0 %v7579_v17 }
  0xb4   :  { %584 = vmatpush1.msra.mxu1 %v7583_v18  ;;  %514 = vmatprep.subr.mxu0 %v7585_v19 }
  0xb5   :  { %585 = vmatprep.subr.mxu1 %v7589_v20  ;;  %515 = vmatpush1.msra.mxu0 %v7591_v21 }
  0xb6   :  { %586 = vmatpush1.msra.mxu1 %v7595_v22  ;;  %1006 = vrot.lane.b32.xlu1 %v7530_v1, %s7418_s1 }
  0xb7   :  { %1008 = vrot.lane.b32.xlu0 %v7575_v16, %s7418_s1  ;;  %516 = vmatprep.subr.mxu0 %v7597_v23 }
  0xb8   :  { %587 = vmatprep.subr.mxu1 %v7601_v24  ;;  %517 = vmatpush1.msra.mxu0 %v7603_v25 }
  0xb9   :  { %588 = vmatpush1.msra.mxu1 %v7607_v26  ;;  %518 = vmatprep.subr.mxu0 %v7609_v27 }
  0xba   :  { %589 = vmatprep.subr.mxu1 %v7613_v28  ;;  %519 = vmatpush1.msra.mxu0 %v7615_v29 }
  0xbb   :  { %590 = vmatpush1.msra.mxu1 %v7619_v30  ;;  %520 = vmatprep.subr.mxu0 %v7621_v31 }
  0xbc   :  { %591 = vmatprep.subr.mxu1 %v7625_v32  ;;  %521 = vmatpush1.msra.mxu0 %v7627_v33 }
  0xbd   :  { %592 = vmatpush1.msra.mxu1 %v7631_v34  ;;  %522 = vmatprep.subr.mxu0 %v7633_v35 }
  0xbe   :  { %593 = vmatprep.subr.mxu1 %v7637_v36  ;;  %523 = vmatpush1.msra.mxu0 %v7639_v37 }
  0xbf   :  { %594 = vmatpush1.msra.mxu1 %v7643_v38  ;;  %524 = vmatprep.subr.mxu0 %v7645_v39 }
  0xc0   :  { %595 = vmatprep.subr.mxu1 %v7649_v40  ;;  %525 = vmatpush1.msra.mxu0 %v7651_v41 }
  0xc1   :  { %596 = vmatpush1.msra.mxu1 %v7655_v42  ;;  %526 = vmatprep.subr.mxu0 %v7657_v43  ;;  %v9846_v43 = vld [vmem:[#allocation37_spill] sm:$0xff] }
  0xc2   :  { %597 = vmatprep.subr.mxu1 %v7661_v44  ;;  %527 = vmatpush1.msra.mxu0 %v7663_v45  ;;  %v9847_v44 = vld [vmem:[#allocation38_spill] sm:$0xff]  ;;  %v9848_v45 = vld [vmem:[#allocation39_spill] sm:$0xff] }
  0xc3   :  { %598 = vmatpush1.msra.mxu1 %v7667_v46  ;;  %528 = vmatprep.subr.mxu0 %v7669_v47  ;;  %v9849_v46 = vld [vmem:[#allocation40_spill] sm:$0xff]  ;;  %v9850_v47 = vld [vmem:[#allocation41_spill] sm:$0xff] }
  0xc4   :  { %599 = vmatprep.subr.mxu1 %v7673_v48  ;;  %529 = vmatpush1.msra.mxu0 %v7675_v49  ;;  %v9851_v48 = vld [vmem:[#allocation42_spill] sm:$0xff]  ;;  %v9852_v49 = vld [vmem:[#allocation43_spill] sm:$0xff] }
  0xc5   :  { %600 = vmatpush1.msra.mxu1 %v7679_v50  ;;  %530 = vmatprep.subr.mxu0 %v7681_v51  ;;  %v9853_v50 = vld [vmem:[#allocation44_spill] sm:$0xff]  ;;  %v9854_v51 = vld [vmem:[#allocation45_spill] sm:$0xff] }
  0xc6   :  { %601 = vmatprep.subr.mxu1 %v7685_v52  ;;  %531 = vmatpush1.msra.mxu0 %v9845_v0  ;;  %v9855_v52 = vld [vmem:[#allocation46_spill] sm:$0xff]  ;;  %v9856_v0 = vld [vmem:[#allocation47_spill] sm:$0xff] }
  0xc7   :  { %602 = vmatpush1.msra.mxu1 %v9846_v43  ;;  %532 = vmatprep.subr.mxu0 %v9847_v44  ;;  %v9857_v43 = vld [vmem:[#allocation48_spill] sm:$0xff]  ;;  %v9858_v44 = vld [vmem:[#allocation49_spill] sm:$0xff] }
  0xc8   :  { %603 = vmatprep.subr.mxu1 %v9848_v45  ;;  %533 = vmatpush1.msra.mxu0 %v9849_v46  ;;  %v9859_v45 = vld [vmem:[#allocation50_spill] sm:$0xff]  ;;  %v9860_v46 = vld [vmem:[#allocation51_spill] sm:$0xff] }
  0xc9   :  { %604 = vmatpush1.msra.mxu1 %v9850_v47  ;;  %534 = vmatprep.subr.mxu0 %v9851_v48  ;;  %v9861_v47 = vld [vmem:[#allocation52_spill] sm:$0xff]  ;;  %v9862_v48 = vld [vmem:[#allocation53_spill] sm:$0xff] }
  0xca   :  { %605 = vmatprep.subr.mxu1 %v9852_v49  ;;  %535 = vmatpush1.msra.mxu0 %v9853_v50  ;;  %v9863_v49 = vld [vmem:[#allocation54_spill] sm:$0xff]  ;;  %v9864_v50 = vld [vmem:[#allocation55_spill] sm:$0xff] }
  0xcb   :  { %606 = vmatpush1.msra.mxu1 %v9854_v51  ;;  %536 = vmatprep.subr.mxu0 %v9855_v52  ;;  %v9865_v51 = vld [vmem:[#allocation56_spill] sm:$0xff]  ;;  %v9866_v52 = vld [vmem:[#allocation57_spill] sm:$0xff] }
  0xcc   :  { %607 = vmatprep.subr.mxu1 %v9856_v0  ;;  %537 = vmatpush1.msra.mxu0 %v9857_v43  ;;  %v9867_v43 = vld [vmem:[#allocation58_spill] sm:$0xff] }
  0xcd   :  { %608 = vmatpush1.msra.mxu1 %v9858_v44  ;;  %560 = vmatprep.subr.mxu0 %v9859_v45 }
  0xce   :  { %631 = vmatprep.subr.mxu1 %v9860_v46  ;;  %561 = vmatpush2.msra.mxu0 %v9861_v47 }
  0xcf   :  { %632 = vmatpush2.msra.mxu1 %v9862_v48  ;;  %562 = vmatprep.subr.mxu0 %v9863_v49 }
  0xd0   :  { %633 = vmatprep.subr.mxu1 %v9864_v50  ;;  %563 = vmatpush2.msra.mxu0 %v9865_v51 }
  0xd1   :  { %634 = vmatpush2.msra.mxu1 %v9866_v52  ;;  %564 = vmatprep.subr.mxu0 %v7753_v53 }
  0xd2   :  { %635 = vmatprep.subr.mxu1 %v9867_v43  ;;  %565 = vmatpush2.msra.mxu0 %v7759_v55  ;;  %v1172_v55 = vld [vmem:[%s9568_s0 + $0x18] sm:$0xff] }
  0xd3   :  { %636 = vmatpush2.msra.mxu1 %v7763_v56  ;;  %566 = vmatprep.subr.mxu0 %v7765_v57 }
  0xd4   :  { %637 = vmatprep.subr.mxu1 %v7769_v58  ;;  %567 = vmatpush2.msra.mxu0 %v7771_v59 }
  0xd5   :  { %638 = vmatpush2.msra.mxu1 %v7775_v60  ;;  %568 = vmatprep.subr.mxu0 %v7777_v61 }
  0xd6   :  { %639 = vmatprep.subr.mxu1 %v7781_v62  ;;  %569 = vmatpush2.msra.mxu0 %v7783_v63  ;;  %v1427_v62 = vld [vmem:[%s9568_s0 + $0x10] sm:$0xff] }
  0xd7   :  { %640 = vmatpush2.msra.mxu1 %v7787_v54  ;;  %763 = vmatprep.subr.mxu0 %v7532_v2 }
  0xd8   :  { %834 = vmatprep.subr.mxu1 %v7536_v3  ;;  %1262 = vrot.lane.b32.xlu1 %v7575_v16, %s7408_s23 }
  0xd9   :  { %1264 = vrot.lane.b32.xlu0 %v1172_v55, %s7408_s23 }
  0xdc   :  { %1260 = vrot.lane.b32.xlu1 %v7530_v1, %s7408_s23  ;;  %v9868_v1 = vld [vmem:[#allocation26_spill] sm:$0xff] }
  0xdd   :  { %1515 = vrot.lane.b32.xlu0 %v1427_v62, %s7419_s4 }
  0xe0   :  { %1517 = vrot.lane.b32.xlu1 %v1172_v55, %s7419_s4 }
  0xe1   :  { %1767 = vrot.lane.b32.xlu0 %v1427_v62, %s7420_s3  ;;  %v8069_v62 = vld [vmem:[#allocation4 + $0x118] sm:$0xff] }
  0xe4   :  { %1769 = vrot.lane.b32.xlu1 %v1172_v55, %s7420_s3  ;;  %v8049_v55 = vld [vmem:[#allocation4 + $0x140] sm:$0xff] }
  0xf0   :  { %v498_v2 = vpop.permute.xlu0 %497 }
  0xf4   :  { %v500_v3 = vpop.permute.xlu0 %499 }
  0xf5   :  { %6943 = vmatprep.mubr.msk.f32.mxu0 %vm250_vm0, %v500_v3  ;;  %6944 = vmatprep.mubr.msk.f32.mxu1 %vm250_vm0, %v500_v3  ;;  %v502_v16 = vsel %vm501_vm1, %v498_v2, %v500_v3  ;;  %v8079_v2 = vld [vmem:[#allocation4 + $0xe8] sm:$0xff]  ;;  %v8081_v3 = vld [vmem:[#allocation4 + $0xf8] sm:$0xff] }
  0xf6   :  { %571 = vmatmul.mubr.f32.vlgmr.msra.gmra.mxu0 %v502_v16  ;;  %642 = vmatmul.mubr.f32.vlgmr.msra.gmra.mxu1 %v502_v16  ;;  %v8085_v16 = vld [vmem:[#allocation4 + $0xe0] sm:$0xff] }
  0xf7   :  { %764 = vmatpush1.msra.mxu0 %v7538_v4  ;;  %835 = vmatpush1.msra.mxu1 %v7540_v5  ;;  %v9869_v4 = vld [vmem:[#allocation27_spill] sm:$0xff]  ;;  %v9870_v5 = vld [vmem:[#allocation28_spill] sm:$0xff] }
  0xf8   :  { %765 = vmatprep.subr.mxu0 %v7544_v6  ;;  %836 = vmatprep.subr.mxu1 %v7546_v7  ;;  %v9871_v6 = vld [vmem:[#allocation29_spill] sm:$0xff]  ;;  %v9872_v7 = vld [vmem:[#allocation30_spill] sm:$0xff] }
  0xf9   :  { %766 = vmatpush1.msra.mxu0 %v7548_v8  ;;  %837 = vmatpush1.msra.mxu1 %v7552_v9  ;;  %v9873_v8 = vld [vmem:[#allocation31_spill] sm:$0xff]  ;;  %v9874_v9 = vld [vmem:[#allocation32_spill] sm:$0xff] }
  0xfa   :  { %767 = vmatprep.subr.mxu0 %v7554_v10  ;;  %838 = vmatprep.subr.mxu1 %v7558_v11  ;;  %v9875_v10 = vld [vmem:[#allocation33_spill] sm:$0xff]  ;;  %v9876_v11 = vld [vmem:[#allocation34_spill] sm:$0xff] }
  0xfb   :  { %768 = vmatpush1.msra.mxu0 %v7560_v12  ;;  %839 = vmatpush1.msra.mxu1 %v7564_v13  ;;  %v9877_v12 = vld [vmem:[#allocation35_spill] sm:$0xff]  ;;  %v9878_v13 = vld [vmem:[#allocation36_spill] sm:$0xff] }
  0xfc   :  { %769 = vmatprep.subr.mxu0 %v7566_v14  ;;  %840 = vmatprep.subr.mxu1 %v7570_v15  ;;  %v9879_v14 = vld [vmem:[#allocation37_spill] sm:$0xff]  ;;  %v9880_v15 = vld [vmem:[#allocation38_spill] sm:$0xff] }
  0xfd   :  { %770 = vmatpush1.msra.mxu0 %v7579_v17  ;;  %841 = vmatpush1.msra.mxu1 %v7583_v18  ;;  %v9881_v17 = vld [vmem:[#allocation39_spill] sm:$0xff]  ;;  %v754_v18 = vpop.permute.xlu1 %753 }
  0xfe   :  { %771 = vmatprep.subr.mxu0 %v7585_v19  ;;  %842 = vmatprep.subr.mxu1 %v7589_v20  ;;  %v9882_v19 = vld [vmem:[#allocation40_spill] sm:$0xff]  ;;  %v9883_v20 = vld [vmem:[#allocation41_spill] sm:$0xff] }
  0xff   :  { %772 = vmatpush1.msra.mxu0 %v7591_v21  ;;  %843 = vmatpush1.msra.mxu1 %v7595_v22  ;;  %v9884_v21 = vld [vmem:[#allocation42_spill] sm:$0xff]  ;;  %v9885_v22 = vld [vmem:[#allocation43_spill] sm:$0xff] }
 0x100   :  { %773 = vmatprep.subr.mxu0 %v7597_v23  ;;  %844 = vmatprep.subr.mxu1 %v7601_v24  ;;  %v9886_v23 = vld [vmem:[#allocation44_spill] sm:$0xff]  ;;  %v9887_v24 = vld [vmem:[#allocation45_spill] sm:$0xff] }
 0x101   :  { %774 = vmatpush1.msra.mxu0 %v7603_v25  ;;  %845 = vmatpush1.msra.mxu1 %v7607_v26  ;;  %v9888_v25 = vld [vmem:[#allocation46_spill] sm:$0xff]  ;;  %v9889_v26 = vld [vmem:[#allocation48_spill] sm:$0xff] }
 0x102   :  { %775 = vmatprep.subr.mxu0 %v7609_v27  ;;  %846 = vmatprep.subr.mxu1 %v7613_v28  ;;  %v756_v27 = vpop.permute.xlu1 %755 }
 0x103   :  { %776 = vmatpush1.msra.mxu0 %v7615_v29  ;;  %847 = vmatpush1.msra.mxu1 %v7619_v30  ;;  %v759_v28 = vsel %vm757_vm2, %v754_v18, %v756_v27  ;;  %v9890_v29 = vld [vmem:[#allocation59_spill] sm:$0xff]  ;;  %v752_v30 = vpop.permute.xlu0 %751  ;;  %v8157_v27 = vld [vmem:[#allocation4 + $0x20] sm:$0xff] }
 0x104   :  { %777 = vmatprep.subr.mxu0 %v7621_v31  ;;  %848 = vmatprep.subr.mxu1 %v7625_v32  ;;  %v9891_v31 = vld [vmem:[#allocation60_spill] sm:$0xff]  ;;  %v7984_v32 = vld [vmem:[#allocation4 + $0x1e8] sm:$0xff]  ;;  %9911 = vst [vmem:[#allocation34_spill] sm:$0xff] %v8157_v27 }
 0x105   :  { %778 = vmatpush1.msra.mxu0 %v7627_v33  ;;  %849 = vmatpush1.msra.mxu1 %v7631_v34  ;;  %v7986_v33 = vld [vmem:[#allocation4 + $0x1f8] sm:$0xff]  ;;  %v758_v34 = vsel %vm757_vm2, %v752_v30, %v754_v18 }
 0x106   :  { %779 = vmatprep.subr.mxu0 %v7633_v35  ;;  %850 = vmatprep.subr.mxu1 %v7637_v36  ;;  %v7991_v35 = vld [vmem:[#allocation4 + $0x1e0] sm:$0xff]  ;;  %v7993_v36 = vld [vmem:[#allocation4 + $0x1f0] sm:$0xff]  ;;  %v8129_v18 = vld [vmem:[#allocation4 + $0x78] sm:$0xff] }
 0x107   :  { %780 = vmatpush1.msra.mxu0 %v7639_v37  ;;  %851 = vmatpush1.msra.mxu1 %v7643_v38  ;;  %v7995_v37 = vld [vmem:[#allocation4 + $0x1c8] sm:$0xff]  ;;  %v7997_v38 = vld [vmem:[#allocation4 + $0x1d8] sm:$0xff]  ;;  %9902 = vst [vmem:[#allocation58_spill] sm:$0xff] %v8129_v18 }
 0x108   :  { %781 = vmatprep.subr.mxu0 %v7645_v39  ;;  %852 = vmatprep.subr.mxu1 %v7649_v40  ;;  %v8001_v39 = vld [vmem:[#allocation4 + $0x1c0] sm:$0xff]  ;;  %v8003_v40 = vld [vmem:[#allocation4 + $0x1d0] sm:$0xff]  ;;  %v8165_v30 = vld [vmem:[#allocation4 + $0x18] sm:$0xff] }
 0x109   :  { %782 = vmatpush1.msra.mxu0 %v7651_v41  ;;  %853 = vmatpush1.msra.mxu1 %v7655_v42  ;;  %v8007_v41 = vld [vmem:[#allocation4 + $0x1a8] sm:$0xff]  ;;  %v8009_v42 = vld [vmem:[#allocation4 + $0x1b8] sm:$0xff]  ;;  %9914 = vst [vmem:[#allocation37_spill] sm:$0xff] %v8165_v30 }
 0x10a   :  { %783 = vmatprep.subr.mxu0 %v9868_v1  ;;  %854 = vmatprep.subr.mxu1 %v9869_v4  ;;  %v8087_v1 = vld [vmem:[#allocation4 + $0xf0] sm:$0xff]  ;;  %v8091_v4 = vld [vmem:[#allocation4 + $0xc8] sm:$0xff] }
 0x10b   :  { %784 = vmatpush1.msra.mxu0 %v9870_v5  ;;  %855 = vmatpush1.msra.mxu1 %v9871_v6  ;;  %v8093_v5 = vld [vmem:[#allocation4 + $0xd8] sm:$0xff]  ;;  %v8097_v6 = vld [vmem:[#allocation4 + $0xc0] sm:$0xff] }
 0x10c   :  { %785 = vmatprep.subr.mxu0 %v9872_v7  ;;  %856 = vmatprep.subr.mxu1 %v9873_v8  ;;  %v8099_v7 = vld [vmem:[#allocation4 + $0xd0] sm:$0xff]  ;;  %v8103_v8 = vld [vmem:[#allocation4 + $0xa8] sm:$0xff] }
 0x10d   :  { %786 = vmatpush1.msra.mxu0 %v9874_v9  ;;  %857 = vmatpush1.msra.mxu1 %v9875_v10  ;;  %9892 = vst [vmem:[#allocation47_spill] sm:$0xff] %v8099_v7  ;;  %9893 = vst [vmem:[#allocation49_spill] sm:$0xff] %v8103_v8  ;;  %v8105_v9 = vld [vmem:[#allocation4 + $0xb8] sm:$0xff]  ;;  %v8109_v10 = vld [vmem:[#allocation4 + $0xa0] sm:$0xff] }
 0x10e   :  { %787 = vmatprep.subr.mxu0 %v9876_v11  ;;  %858 = vmatprep.subr.mxu1 %v9877_v12  ;;  %9894 = vst [vmem:[#allocation50_spill] sm:$0xff] %v8105_v9  ;;  %9895 = vst [vmem:[#allocation51_spill] sm:$0xff] %v8109_v10  ;;  %v8111_v11 = vld [vmem:[#allocation4 + $0xb0] sm:$0xff]  ;;  %v8115_v12 = vld [vmem:[#allocation4 + $0x88] sm:$0xff] }
 0x10f   :  { %788 = vmatpush1.msra.mxu0 %v9878_v13  ;;  %859 = vmatpush1.msra.mxu1 %v9879_v14  ;;  %9896 = vst [vmem:[#allocation52_spill] sm:$0xff] %v8111_v11  ;;  %9897 = vst [vmem:[#allocation53_spill] sm:$0xff] %v8115_v12  ;;  %v8117_v13 = vld [vmem:[#allocation4 + $0x98] sm:$0xff]  ;;  %v8121_v14 = vld [vmem:[#allocation4 + $0x80] sm:$0xff] }
 0x110   :  { %789 = vmatprep.subr.mxu0 %v9880_v15  ;;  %860 = vmatprep.subr.mxu1 %v9881_v17  ;;  %9898 = vst [vmem:[#allocation54_spill] sm:$0xff] %v8117_v13  ;;  %9899 = vst [vmem:[#allocation55_spill] sm:$0xff] %v8121_v14  ;;  %v8123_v15 = vld [vmem:[#allocation4 + $0x90] sm:$0xff]  ;;  %v8127_v17 = vld [vmem:[#allocation4 + $0x68] sm:$0xff] }
 0x111   :  { %790 = vmatpush1.msra.mxu0 %v9882_v19  ;;  %861 = vmatpush1.msra.mxu1 %v9883_v20  ;;  %9900 = vst [vmem:[#allocation56_spill] sm:$0xff] %v8123_v15  ;;  %9901 = vst [vmem:[#allocation57_spill] sm:$0xff] %v8127_v17  ;;  %v8133_v19 = vld [vmem:[#allocation4 + $0x60] sm:$0xff]  ;;  %v8135_v20 = vld [vmem:[#allocation4 + $0x70] sm:$0xff] }
 0x112   :  { %791 = vmatprep.subr.mxu0 %v9884_v21  ;;  %862 = vmatprep.subr.mxu1 %v9885_v22  ;;  %9903 = vst [vmem:[#allocation26_spill] sm:$0xff] %v8133_v19  ;;  %9904 = vst [vmem:[#allocation27_spill] sm:$0xff] %v8135_v20  ;;  %v8139_v21 = vld [vmem:[#allocation4 + $0x48] sm:$0xff]  ;;  %v8141_v22 = vld [vmem:[#allocation4 + $0x58] sm:$0xff] }
 0x113   :  { %792 = vmatpush1.msra.mxu0 %v9886_v23  ;;  %863 = vmatpush1.msra.mxu1 %v9887_v24  ;;  %9905 = vst [vmem:[#allocation28_spill] sm:$0xff] %v8139_v21  ;;  %9906 = vst [vmem:[#allocation29_spill] sm:$0xff] %v8141_v22  ;;  %v8145_v23 = vld [vmem:[#allocation4 + $0x40] sm:$0xff]  ;;  %v8147_v24 = vld [vmem:[#allocation4 + $0x50] sm:$0xff] }
 0x114   :  { %793 = vmatprep.subr.mxu0 %v9888_v25  ;;  %864 = vmatprep.subr.mxu1 %v9856_v0  ;;  %v8075_v0 = vld [vmem:[#allocation4 + $0x110] sm:$0xff]  ;;  %9907 = vst [vmem:[#allocation30_spill] sm:$0xff] %v8145_v23  ;;  %9908 = vst [vmem:[#allocation31_spill] sm:$0xff] %v8147_v24  ;;  %v8151_v25 = vld [vmem:[#allocation4 + $0x28] sm:$0xff] }
 0x115   :  { %794 = vmatpush1.msra.mxu0 %v9889_v26  ;;  %865 = vmatpush1.msra.mxu1 %v9858_v44  ;;  %v8015_v44 = vld [vmem:[#allocation4 + $0x1b0] sm:$0xff]  ;;  %9909 = vst [vmem:[#allocation32_spill] sm:$0xff] %v8151_v25  ;;  %v8153_v26 = vld [vmem:[#allocation4 + $0x38] sm:$0xff] }
 0x116   :  { %817 = vmatprep.subr.mxu0 %v9859_v45  ;;  %888 = vmatprep.subr.mxu1 %v9860_v46  ;;  %v8019_v45 = vld [vmem:[#allocation4 + $0x188] sm:$0xff]  ;;  %v8021_v46 = vld [vmem:[#allocation4 + $0x198] sm:$0xff]  ;;  %9910 = vst [vmem:[#allocation33_spill] sm:$0xff] %v8153_v26 }
 0x117   :  { %818 = vmatpush2.msra.mxu0 %v9861_v47  ;;  %889 = vmatpush2.msra.mxu1 %v9862_v48  ;;  %v8025_v47 = vld [vmem:[#allocation4 + $0x180] sm:$0xff]  ;;  %v8027_v48 = vld [vmem:[#allocation4 + $0x190] sm:$0xff] }
 0x118   :  { %819 = vmatprep.subr.mxu0 %v9863_v49  ;;  %890 = vmatprep.subr.mxu1 %v9864_v50  ;;  %v8031_v49 = vld [vmem:[#allocation4 + $0x168] sm:$0xff]  ;;  %v8033_v50 = vld [vmem:[#allocation4 + $0x178] sm:$0xff] }
 0x119   :  { %820 = vmatpush2.msra.mxu0 %v9865_v51  ;;  %891 = vmatpush2.msra.mxu1 %v9866_v52  ;;  %v8037_v51 = vld [vmem:[#allocation4 + $0x160] sm:$0xff]  ;;  %v8039_v52 = vld [vmem:[#allocation4 + $0x170] sm:$0xff] }
 0x11a   :  { %821 = vmatprep.subr.mxu0 %v7753_v53  ;;  %892 = vmatprep.subr.mxu1 %v9867_v43  ;;  %v8013_v43 = vld [vmem:[#allocation4 + $0x1a0] sm:$0xff]  ;;  %v8043_v53 = vld [vmem:[#allocation4 + $0x148] sm:$0xff] }
 0x11b   :  { %822 = vmatpush2.msra.mxu0 %v9890_v29  ;;  %893 = vmatpush2.msra.mxu1 %v7763_v56  ;;  %v8051_v56 = vld [vmem:[#allocation4 + $0x150] sm:$0xff]  ;;  %v8163_v29 = vld [vmem:[#allocation4 + $0x8] sm:$0xff] }
 0x11c   :  { %823 = vmatprep.subr.mxu0 %v7765_v57  ;;  %6946 = vmatprep.mubr.msk.f32.mxu0 %vm250_vm0, %v759_v28  ;;  %v8055_v57 = vld [vmem:[#allocation4 + $0x128] sm:$0xff]  ;;  %9913 = vst [vmem:[#allocation36_spill] sm:$0xff] %v8163_v29 }
 0x11d   :  { %894 = vmatprep.subr.mxu1 %v7769_v58  ;;  %6947 = vmatprep.mubr.msk.f32.mxu1 %vm250_vm0, %v759_v28  ;;  %v8057_v58 = vld [vmem:[#allocation4 + $0x138] sm:$0xff]  ;;  %v8159_v28 = vld [vmem:[#allocation4 + $0x30] sm:$0xff] }
 0x11e   :  { %824 = vmatpush2.msra.mxu0 %v7771_v59  ;;  %895 = vmatpush2.msra.mxu1 %v7775_v60  ;;  %v8061_v59 = vld [vmem:[#allocation4 + $0x120] sm:$0xff]  ;;  %v8063_v60 = vld [vmem:[#allocation4 + $0x130] sm:$0xff]  ;;  %9912 = vst [vmem:[#allocation35_spill] sm:$0xff] %v8159_v28 }
 0x11f   :  { %825 = vmatprep.subr.mxu0 %v7777_v61  ;;  %896 = vmatprep.subr.mxu1 %v9891_v31  ;;  %v8067_v61 = vld [vmem:[#allocation4 + $0x108] sm:$0xff]  ;;  %v8169_v31 = vld [vmem:[#allocation4] sm:$0xff] }
 0x120   :  { %826 = vmatpush2.msra.mxu0 %v7783_v63  ;;  %897 = vmatpush2.msra.mxu1 %v7787_v54  ;;  %v8045_v54 = vld [vmem:[#allocation4 + $0x158] sm:$0xff]  ;;  %v8073_v63 = vld [vmem:[#allocation4 + $0x100] sm:$0xff]  ;;  %9915 = vst [vmem:[#allocation38_spill] sm:$0xff] %v8169_v31 }
 0x121   :  { %828 = vmatmul.mubr.f32.vlgmr.msra.gmra.mxu0 %v758_v34  ;;  %899 = vmatmul.mubr.f32.vlgmr.msra.gmra.mxu1 %v758_v34  ;;  %v8171_v34 = vld [vmem:[#allocation4 + $0x10] sm:$0xff] }
 0x122   :  { %1015 = vmatprep.subr.mxu0 %v7984_v32  ;;  %1086 = vmatprep.subr.mxu1 %v7986_v33  ;;  %9916 = vst [vmem:[#allocation39_spill] sm:$0xff] %v8171_v34 }
 0x123   :  { %1016 = vmatpush1.msra.mxu0 %v7991_v35  ;;  %1087 = vmatpush1.msra.mxu1 %v7993_v36 }
 0x124   :  { %1017 = vmatprep.subr.mxu0 %v7995_v37  ;;  %1088 = vmatprep.subr.mxu1 %v7997_v38 }
 0x125   :  { %1018 = vmatpush1.msra.mxu0 %v8001_v39  ;;  %1089 = vmatpush1.msra.mxu1 %v8003_v40 }
 0x126   :  { %1019 = vmatprep.subr.mxu0 %v8007_v41  ;;  %1090 = vmatprep.subr.mxu1 %v8009_v42 }
 0x127   :  { %1020 = vmatpush1.msra.mxu0 %v8013_v43  ;;  %1091 = vmatpush1.msra.mxu1 %v8015_v44 }
 0x128   :  { %1021 = vmatprep.subr.mxu0 %v8019_v45  ;;  %1092 = vmatprep.subr.mxu1 %v8021_v46 }
 0x129   :  { %1022 = vmatpush1.msra.mxu0 %v8025_v47  ;;  %1093 = vmatpush1.msra.mxu1 %v8027_v48 }
 0x12a   :  { %1023 = vmatprep.subr.mxu0 %v8031_v49  ;;  %1094 = vmatprep.subr.mxu1 %v8033_v50 }
 0x12b   :  { %1024 = vmatpush1.msra.mxu0 %v8037_v51  ;;  %1095 = vmatpush1.msra.mxu1 %v8039_v52 }
 0x12c   :  { %1025 = vmatprep.subr.mxu0 %v8043_v53  ;;  %1096 = vmatprep.subr.mxu1 %v8045_v54 }
 0x12d   :  { %1026 = vmatpush1.msra.mxu0 %v8049_v55  ;;  %1097 = vmatpush1.msra.mxu1 %v8051_v56 }
 0x12e   :  { %1027 = vmatprep.subr.mxu0 %v8055_v57  ;;  %1098 = vmatprep.subr.mxu1 %v8057_v58 }
 0x12f   :  { %1028 = vmatpush1.msra.mxu0 %v8061_v59  ;;  %1099 = vmatpush1.msra.mxu1 %v8063_v60 }
 0x130   :  { %1029 = vmatprep.subr.mxu0 %v8067_v61  ;;  %1100 = vmatprep.subr.mxu1 %v8069_v62 }
 0x131   :  { %1030 = vmatpush1.msra.mxu0 %v8073_v63  ;;  %1101 = vmatpush1.msra.mxu1 %v8075_v0 }
 0x132   :  { %1031 = vmatprep.subr.mxu0 %v8079_v2  ;;  %1102 = vmatprep.subr.mxu1 %v8081_v3 }
 0x133   :  { %1032 = vmatpush1.msra.mxu0 %v8085_v16  ;;  %1103 = vmatpush1.msra.mxu1 %v8087_v1 }
 0x134   :  { %1033 = vmatprep.subr.mxu0 %v8091_v4  ;;  %1104 = vmatprep.subr.mxu1 %v8093_v5 }
 0x135   :  { %1034 = vmatpush1.msra.mxu0 %v8097_v6  ;;  %1105 = vmatpush1.msra.mxu1 %v8099_v7 }
 0x136   :  { %1035 = vmatprep.subr.mxu0 %v8103_v8  ;;  %1106 = vmatprep.subr.mxu1 %v8105_v9 }
 0x137   :  { %1036 = vmatpush1.msra.mxu0 %v8109_v10  ;;  %1107 = vmatpush1.msra.mxu1 %v8111_v11 }
 0x138   :  { %1037 = vmatprep.subr.mxu0 %v8115_v12  ;;  %1108 = vmatprep.subr.mxu1 %v8117_v13 }
 0x139   :  { %1038 = vmatpush1.msra.mxu0 %v8121_v14  ;;  %1109 = vmatpush1.msra.mxu1 %v8123_v15 }
 0x13a   :  { %1039 = vmatprep.subr.mxu0 %v8127_v17  ;;  %1110 = vmatprep.subr.mxu1 %v8129_v18 }
 0x13b   :  { %1040 = vmatpush1.msra.mxu0 %v8133_v19  ;;  %1111 = vmatpush1.msra.mxu1 %v8135_v20 }
 0x13c   :  { %1041 = vmatprep.subr.mxu0 %v8139_v21  ;;  %1112 = vmatprep.subr.mxu1 %v8141_v22  ;;  %v8175_v22 = vld [vmem:[#allocation4 + $0x288] sm:$0xff] }
 0x13d   :  { %1042 = vmatpush1.msra.mxu0 %v8145_v23  ;;  %1113 = vmatpush1.msra.mxu1 %v8147_v24  ;;  %9917 = vst [vmem:[#allocation40_spill] sm:$0xff] %v8175_v22  ;;  %v8177_v23 = vld [vmem:[#allocation4 + $0x298] sm:$0xff]  ;;  %v8181_v24 = vld [vmem:[#allocation4 + $0x280] sm:$0xff]  ;;  %v8223_v21 = vld [vmem:[#allocation4 + $0x208] sm:$0xff] }
 0x13e   :  { %1043 = vmatprep.subr.mxu0 %v8151_v25  ;;  %1114 = vmatprep.subr.mxu1 %v8153_v26  ;;  %9918 = vst [vmem:[#allocation41_spill] sm:$0xff] %v8177_v23  ;;  %9919 = vst [vmem:[#allocation42_spill] sm:$0xff] %v8181_v24  ;;  %v8183_v25 = vld [vmem:[#allocation4 + $0x290] sm:$0xff]  ;;  %v8187_v26 = vld [vmem:[#allocation4 + $0x268] sm:$0xff] }
 0x13f   :  { %1044 = vmatpush1.msra.mxu0 %v8157_v27  ;;  %1115 = vmatpush1.msra.mxu1 %v8159_v28  ;;  %9920 = vst [vmem:[#allocation43_spill] sm:$0xff] %v8183_v25  ;;  %9921 = vst [vmem:[#allocation44_spill] sm:$0xff] %v8187_v26  ;;  %v8189_v27 = vld [vmem:[#allocation4 + $0x278] sm:$0xff]  ;;  %v8193_v28 = vld [vmem:[#allocation4 + $0x260] sm:$0xff] }
 0x140   :  { %1045 = vmatprep.subr.mxu0 %v8163_v29  ;;  %1116 = vmatprep.subr.mxu1 %v8165_v30  ;;  %9922 = vst [vmem:[#allocation45_spill] sm:$0xff] %v8189_v27  ;;  %9923 = vst [vmem:[#allocation46_spill] sm:$0xff] %v8193_v28  ;;  %v8195_v29 = vld [vmem:[#allocation4 + $0x270] sm:$0xff]  ;;  %v8199_v30 = vld [vmem:[#allocation4 + $0x248] sm:$0xff] }
 0x141   :  { %1046 = vmatpush1.msra.mxu0 %v8169_v31  ;;  %1117 = vmatpush1.msra.mxu1 %v8171_v34  ;;  %9924 = vst [vmem:[#allocation48_spill] sm:$0xff] %v8195_v29  ;;  %v8201_v31 = vld [vmem:[#allocation4 + $0x258] sm:$0xff]  ;;  %v8205_v34 = vld [vmem:[#allocation4 + $0x240] sm:$0xff] }
 0x142   :  { %1069 = vmatprep.subr.mxu0 %v8175_v22  ;;  %1140 = vmatprep.subr.mxu1 %v8177_v23  ;;  %9925 = vst [vmem:[#allocation59_spill] sm:$0xff] %v8201_v31  ;;  %9926 = vst [vmem:[#allocation60_spill] sm:$0xff] %v8205_v34  ;;  %v8207_v22 = vld [vmem:[#allocation4 + $0x250] sm:$0xff]  ;;  %v8211_v23 = vld [vmem:[#allocation4 + $0x228] sm:$0xff] }
 0x143   :  { %1070 = vmatpush2.msra.mxu0 %v8181_v24  ;;  %1141 = vmatpush2.msra.mxu1 %v8183_v25  ;;  %9927 = vst [vmem:[#allocation61_spill] sm:$0xff] %v8207_v22  ;;  %v8213_v24 = vld [vmem:[#allocation4 + $0x238] sm:$0xff]  ;;  %v8217_v25 = vld [vmem:[#allocation4 + $0x220] sm:$0xff] }
 0x144   :  { %1071 = vmatprep.subr.mxu0 %v8187_v26  ;;  %1142 = vmatprep.subr.mxu1 %v8189_v27  ;;  %v8219_v26 = vld [vmem:[#allocation4 + $0x230] sm:$0xff]  ;;  %v1007_v27 = vpop.permute.xlu1 %1006 }
 0x145   :  { %1072 = vmatpush2.msra.mxu0 %v8193_v28  ;;  %1143 = vmatpush2.msra.mxu1 %v8195_v29  ;;  %v1009_v28 = vpop.permute.xlu0 %1008  ;;  %v8225_v29 = vld [vmem:[#allocation4 + $0x218] sm:$0xff] }
 0x146   :  { %1073 = vmatprep.subr.mxu0 %v8199_v30  ;;  %1144 = vmatprep.subr.mxu1 %v8201_v31  ;;  %v8229_v31 = vld [vmem:[#allocation4 + $0x200] sm:$0xff] }
 0x147   :  { %1074 = vmatpush2.msra.mxu0 %v8205_v34  ;;  %1145 = vmatpush2.msra.mxu1 %v8207_v22  ;;  %v8233_v34 = vld [vmem:[#allocation4 + $0x210] sm:$0xff]  ;;  %v1011_v22 = vsel %vm1010_vm3, %v1007_v27, %v1009_v28  ;;  %v9929_v27 = vld [vmem:[#allocation29_spill] sm:$0xff] }
 0x148   :  { %1075 = vmatprep.subr.mxu0 %v8211_v23  ;;  %1146 = vmatprep.subr.mxu1 %v8213_v24 }
 0x149   :  { %1076 = vmatpush2.msra.mxu0 %v8217_v25  ;;  %1147 = vmatpush2.msra.mxu1 %v8219_v26 }
 0x14a   :  { %1077 = vmatprep.subr.mxu0 %v8223_v21  ;;  %1148 = vmatprep.subr.mxu1 %v8225_v29 }
 0x14b   :  { %1078 = vmatpush2.msra.mxu0 %v8229_v31  ;;  %6949 = vmatprep.mubr.msk.f32.mxu0 %vm250_vm0, %v1009_v28 }
 0x14c   :  { %1149 = vmatpush2.msra.mxu1 %v8233_v34  ;;  %6950 = vmatprep.mubr.msk.f32.mxu1 %vm250_vm0, %v1009_v28  ;;  %v9930_v28 = vld [vmem:[#allocation30_spill] sm:$0xff] }
 0x14d   :  { %1080 = vmatmul.mubr.f32.vlgmr.msra.gmra.mxu0 %v1011_v22  ;;  %1151 = vmatmul.mubr.f32.vlgmr.msra.gmra.mxu1 %v1011_v22  ;;  %v9928_v22 = vld [vmem:[#allocation28_spill] sm:$0xff] }
 0x14e   :  { %1272 = vmatprep.subr.mxu0 %v7984_v32  ;;  %1343 = vmatprep.subr.mxu1 %v7986_v33 }
 0x14f   :  { %1273 = vmatpush1.msra.mxu0 %v7991_v35  ;;  %1344 = vmatpush1.msra.mxu1 %v7993_v36 }
 0x150   :  { %1274 = vmatprep.subr.mxu0 %v7995_v37  ;;  %1345 = vmatprep.subr.mxu1 %v7997_v38 }
 0x151   :  { %1275 = vmatpush1.msra.mxu0 %v8001_v39  ;;  %1346 = vmatpush1.msra.mxu1 %v8003_v40 }
 0x152   :  { %1276 = vmatprep.subr.mxu0 %v8007_v41  ;;  %1347 = vmatprep.subr.mxu1 %v8009_v42 }
 0x153   :  { %1277 = vmatpush1.msra.mxu0 %v8013_v43  ;;  %1348 = vmatpush1.msra.mxu1 %v8015_v44 }
 0x154   :  { %1278 = vmatprep.subr.mxu0 %v8019_v45  ;;  %1349 = vmatprep.subr.mxu1 %v8021_v46 }
 0x155   :  { %1279 = vmatpush1.msra.mxu0 %v8025_v47  ;;  %1350 = vmatpush1.msra.mxu1 %v8027_v48 }
 0x156   :  { %1280 = vmatprep.subr.mxu0 %v8031_v49  ;;  %1351 = vmatprep.subr.mxu1 %v8033_v50 }
 0x157   :  { %1281 = vmatpush1.msra.mxu0 %v8037_v51  ;;  %1352 = vmatpush1.msra.mxu1 %v8039_v52 }
 0x158   :  { %1282 = vmatprep.subr.mxu0 %v8043_v53  ;;  %1353 = vmatprep.subr.mxu1 %v8045_v54 }
 0x159   :  { %1283 = vmatpush1.msra.mxu0 %v8049_v55  ;;  %1354 = vmatpush1.msra.mxu1 %v8051_v56 }
 0x15a   :  { %1284 = vmatprep.subr.mxu0 %v8055_v57  ;;  %1355 = vmatprep.subr.mxu1 %v8057_v58 }
 0x15b   :  { %1285 = vmatpush1.msra.mxu0 %v8061_v59  ;;  %1356 = vmatpush1.msra.mxu1 %v8063_v60 }
 0x15c   :  { %1286 = vmatprep.subr.mxu0 %v8067_v61  ;;  %1357 = vmatprep.subr.mxu1 %v8069_v62 }
 0x15d   :  { %1287 = vmatpush1.msra.mxu0 %v8073_v63  ;;  %1358 = vmatpush1.msra.mxu1 %v8075_v0 }
 0x15e   :  { %1288 = vmatprep.subr.mxu0 %v8079_v2  ;;  %1359 = vmatprep.subr.mxu1 %v8081_v3 }
 0x15f   :  { %1289 = vmatpush1.msra.mxu0 %v8085_v16  ;;  %1360 = vmatpush1.msra.mxu1 %v8087_v1 }
 0x160   :  { %1290 = vmatprep.subr.mxu0 %v8091_v4  ;;  %1361 = vmatprep.subr.mxu1 %v8093_v5 }
 0x161   :  { %1291 = vmatpush1.msra.mxu0 %v8097_v6  ;;  %1362 = vmatpush1.msra.mxu1 %v8099_v7  ;;  %v9947_v7 = vld [vmem:[#allocation48_spill] sm:$0xff] }
 0x162   :  { %1292 = vmatprep.subr.mxu0 %v8103_v8  ;;  %1363 = vmatprep.subr.mxu1 %v8105_v9  ;;  %v9942_v9 = vld [vmem:[#allocation42_spill] sm:$0xff]  ;;  %v9944_v8 = vld [vmem:[#allocation44_spill] sm:$0xff] }
 0x163   :  { %1293 = vmatpush1.msra.mxu0 %v8109_v10  ;;  %1364 = vmatpush1.msra.mxu1 %v8111_v11  ;;  %v9938_v11 = vld [vmem:[#allocation38_spill] sm:$0xff] }
 0x164   :  { %1294 = vmatprep.subr.mxu0 %v8115_v12  ;;  %1365 = vmatprep.subr.mxu1 %v8117_v13  ;;  %v9931_v12 = vld [vmem:[#allocation31_spill] sm:$0xff]  ;;  %v9932_v13 = vld [vmem:[#allocation32_spill] sm:$0xff] }
 0x165   :  { %1295 = vmatpush1.msra.mxu0 %v8121_v14  ;;  %1366 = vmatpush1.msra.mxu1 %v8123_v15  ;;  %v9933_v14 = vld [vmem:[#allocation33_spill] sm:$0xff]  ;;  %v9934_v15 = vld [vmem:[#allocation34_spill] sm:$0xff] }
 0x166   :  { %1296 = vmatprep.subr.mxu0 %v8127_v17  ;;  %1367 = vmatprep.subr.mxu1 %v8129_v18  ;;  %v9935_v17 = vld [vmem:[#allocation35_spill] sm:$0xff] }
 0x167   :  { %1297 = vmatpush1.msra.mxu0 %v8133_v19  ;;  %1368 = vmatpush1.msra.mxu1 %v8135_v20  ;;  %v9936_v19 = vld [vmem:[#allocation36_spill] sm:$0xff]  ;;  %v9937_v20 = vld [vmem:[#allocation37_spill] sm:$0xff] }
 0x168   :  { %1298 = vmatprep.subr.mxu0 %v9928_v22  ;;  %1369 = vmatprep.subr.mxu1 %v9929_v27  ;;  %v9939_v27 = vld [vmem:[#allocation39_spill] sm:$0xff] }
 0x169   :  { %1299 = vmatpush1.msra.mxu0 %v9930_v28  ;;  %1370 = vmatpush1.msra.mxu1 %v9931_v12  ;;  %v9940_v12 = vld [vmem:[#allocation40_spill] sm:$0xff] }
 0x16a   :  { %1300 = vmatprep.subr.mxu0 %v9932_v13  ;;  %1371 = vmatprep.subr.mxu1 %v9933_v14  ;;  %v9941_v13 = vld [vmem:[#allocation41_spill] sm:$0xff] }
 0x16b   :  { %1301 = vmatpush1.msra.mxu0 %v9934_v15  ;;  %1372 = vmatpush1.msra.mxu1 %v9935_v17  ;;  %v320_v18 = vpop.f32.mrf.mxu0  ;;  %v1263_v15 = vpop.permute.xlu1 %1262  ;;  %v9943_v17 = vld [vmem:[#allocation43_spill] sm:$0xff] }
 0x16c   :  { %1302 = vmatprep.subr.mxu0 %v9936_v19  ;;  %1373 = vmatprep.subr.mxu1 %v9937_v20  ;;  %v391_v22 = vpop.f32.mrf.mxu1  ;;  %v1265_v19 = vpop.permute.xlu0 %1264 }
 0x16d   :  { %1303 = vmatpush1.msra.mxu0 %v9938_v11  ;;  %1374 = vmatpush1.msra.mxu1 %v9939_v27  ;;  %v322_v28 = vpop.f32.mrf.mxu0  ;;  %v9945_v11 = vld [vmem:[#allocation45_spill] sm:$0xff]  ;;  %v9946_v27 = vld [vmem:[#allocation46_spill] sm:$0xff] }
 0x16e   :  { %1326 = vmatprep.subr.mxu0 %v9940_v12  ;;  %1397 = vmatprep.subr.mxu1 %v9941_v13  ;;  %v396_v14 = vmax.f32 %v320_v18, %v322_v28  ;;  %v393_v10 = vpop.f32.mrf.mxu1  ;;  %v9949_v18 = vld [vmem:[#allocation59_spill] sm:$0xff]  ;;  %v1268_v28 = vsel %vm1266_vm4, %v1263_v15, %v1265_v19 }
 0x16f   :  { %1327 = vmatpush2.msra.mxu0 %v9942_v9  ;;  %1398 = vmatpush2.msra.mxu1 %v9943_v17  ;;  %v397_v20 = vmax.f32 %v391_v22, %v393_v10  ;;  %v9950_v17 = vld [vmem:[#allocation60_spill] sm:$0xff]  ;;  %v9951_v9 = vld [vmem:[#allocation61_spill] sm:$0xff]  ;;  %v1261_v10 = vpop.permute.xlu1 %1260 }
 0x170   :  { %1328 = vmatprep.subr.mxu0 %v9944_v8  ;;  %1399 = vmatprep.subr.mxu1 %v9945_v11  ;;  %v8463_v19 = vld [vmem:[#allocation4 + $0x198] sm:$0xff]  ;;  %v8499_v22 = vld [vmem:[#allocation4 + $0x128] sm:$0xff] }
 0x171   :  { %1329 = vmatpush2.msra.mxu0 %v9946_v27  ;;  %1400 = vmatpush2.msra.mxu1 %v9947_v7  ;;  %v8313_v12 = vmax.f32 %v396_v14, %v397_v20  ;;  %v1267_v14 = vsel %vm1266_vm4, %v1261_v10, %v1263_v15  ;;  %v8457_v15 = vld [vmem:[#allocation4 + $0x1b0] sm:$0xff]  ;;  %v8467_v20 = vld [vmem:[#allocation4 + $0x180] sm:$0xff]  ;;  %v8511_v10 = vld [vmem:[#allocation4 + $0x108] sm:$0xff] }
 0x172   :  { %1330 = vmatprep.subr.mxu0 %v8199_v30  ;;  %1401 = vmatprep.subr.mxu1 %v9949_v18 }
 0x173   :  { %9948 = vst [vmem:[#allocation41_spill] sm:$0xff] %v8313_v12  ;;  %1331 = vmatpush2.msra.mxu0 %v9950_v17  ;;  %1402 = vmatpush2.msra.mxu1 %v9951_v9  ;;  %v8609_v12 = vld [vmem:[#allocation4 + $0x18] sm:$0xff] }
 0x174   :  { %1332 = vmatprep.subr.mxu0 %v8211_v23  ;;  %1403 = vmatprep.subr.mxu1 %v8213_v24 }
 0x175   :  { %1333 = vmatpush2.msra.mxu0 %v8217_v25  ;;  %6952 = vmatprep.mubr.msk.f32.mxu0 %vm250_vm0, %v1268_v28 }
 0x176   :  { %1404 = vmatpush2.msra.mxu1 %v8219_v26  ;;  %6953 = vmatprep.mubr.msk.f32.mxu1 %vm250_vm0, %v1268_v28  ;;  %v8507_v28 = vld [vmem:[#allocation4 + $0x130] sm:$0xff] }
 0x177   :  { %1334 = vmatprep.subr.mxu0 %v8223_v21  ;;  %1405 = vmatprep.subr.mxu1 %v8225_v29 }
 0x178   :  { %1335 = vmatpush2.msra.mxu0 %v8229_v31  ;;  %1406 = vmatpush2.msra.mxu1 %v8233_v34 }
 0x179   :  { %1337 = vmatmul.mubr.f32.vlgmr.msra.gmra.mxu0 %v1267_v14  ;;  %1408 = vmatmul.mubr.f32.vlgmr.msra.gmra.mxu1 %v1267_v14  ;;  %v8513_v14 = vld [vmem:[#allocation4 + $0x118] sm:$0xff] }
 0x17a   :  { %1524 = vmatprep.subr.mxu0 %v7984_v32  ;;  %1595 = vmatprep.subr.mxu1 %v7986_v33  ;;  %v8350_v32 = vld [vmem:[%s9568_s0 + $0x20] sm:$0xff]  ;;  %v8355_v33 = vld [vmem:[%s9568_s0 + $0x18] sm:$0xff] }
 0x17b   :  { %1525 = vmatpush1.msra.mxu0 %v7991_v35  ;;  %1596 = vmatpush1.msra.mxu1 %v7993_v36  ;;  %v9952_v35 = vld [vmem:[#allocation47_spill] sm:$0xff]  ;;  %v9953_v36 = vld [vmem:[#allocation49_spill] sm:$0xff] }
 0x17c   :  { %1526 = vmatprep.subr.mxu0 %v7995_v37  ;;  %1597 = vmatprep.subr.mxu1 %v7997_v38  ;;  %v9954_v37 = vld [vmem:[#allocation50_spill] sm:$0xff]  ;;  %v9955_v38 = vld [vmem:[#allocation51_spill] sm:$0xff] }
 0x17d   :  { %1527 = vmatpush1.msra.mxu0 %v8001_v39  ;;  %1598 = vmatpush1.msra.mxu1 %v8003_v40  ;;  %v9956_v39 = vld [vmem:[#allocation52_spill] sm:$0xff]  ;;  %v9957_v40 = vld [vmem:[#allocation53_spill] sm:$0xff] }
 0x17e   :  { %1528 = vmatprep.subr.mxu0 %v8007_v41  ;;  %1599 = vmatprep.subr.mxu1 %v8009_v42  ;;  %v9958_v41 = vld [vmem:[#allocation54_spill] sm:$0xff]  ;;  %v9959_v42 = vld [vmem:[#allocation55_spill] sm:$0xff] }
 0x17f   :  { %1529 = vmatpush1.msra.mxu0 %v8013_v43  ;;  %1600 = vmatpush1.msra.mxu1 %v8015_v44  ;;  %v9960_v43 = vld [vmem:[#allocation56_spill] sm:$0xff]  ;;  %v9961_v44 = vld [vmem:[#allocation57_spill] sm:$0xff] }
 0x180   :  { %1530 = vmatprep.subr.mxu0 %v8019_v45  ;;  %1601 = vmatprep.subr.mxu1 %v8021_v46  ;;  %v9962_v45 = vld [vmem:[#allocation58_spill] sm:$0xff] }
 0x181   :  { %1531 = vmatpush1.msra.mxu0 %v8025_v47  ;;  %1602 = vmatpush1.msra.mxu1 %v8027_v48  ;;  %v9963_v46 = vld [vmem:[#allocation26_spill] sm:$0xff]  ;;  %v9964_v47 = vld [vmem:[#allocation27_spill] sm:$0xff]  ;;  %v9965_v48 = vld [vmem:[#allocation28_spill] sm:$0xff] }
 0x182   :  { %1532 = vmatprep.subr.mxu0 %v8031_v49  ;;  %1603 = vmatprep.subr.mxu1 %v8033_v50  ;;  %v9966_v49 = vld [vmem:[#allocation29_spill] sm:$0xff]  ;;  %v9967_v50 = vld [vmem:[#allocation30_spill] sm:$0xff]  ;;  %9998 = vst [vmem:[#allocation26_spill] sm:$0xff] %v8609_v12 }
 0x183   :  { %1533 = vmatpush1.msra.mxu0 %v8037_v51  ;;  %1604 = vmatpush1.msra.mxu1 %v8039_v52  ;;  %v9968_v51 = vld [vmem:[#allocation31_spill] sm:$0xff]  ;;  %v9969_v52 = vld [vmem:[#allocation32_spill] sm:$0xff] }
 0x184   :  { %2021 = vrot.lane.b32.xlu1 %v8350_v32, %s7421_s21  ;;  %2019 = vrot.lane.b32.xlu0 %v8355_v33, %s7421_s21 }
 0x185   :  { %1534 = vmatprep.subr.mxu0 %v8043_v53  ;;  %1605 = vmatprep.subr.mxu1 %v8045_v54  ;;  %v9970_v53 = vld [vmem:[#allocation33_spill] sm:$0xff]  ;;  %v9971_v54 = vld [vmem:[#allocation34_spill] sm:$0xff] }
 0x186   :  { %1535 = vmatpush1.msra.mxu0 %v8049_v55  ;;  %1606 = vmatpush1.msra.mxu1 %v8051_v56  ;;  %v9972_v55 = vld [vmem:[#allocation35_spill] sm:$0xff]  ;;  %v9973_v56 = vld [vmem:[#allocation36_spill] sm:$0xff] }
 0x187   :  { %1536 = vmatprep.subr.mxu0 %v8055_v57  ;;  %1607 = vmatprep.subr.mxu1 %v8057_v58  ;;  %v9974_v57 = vld [vmem:[#allocation37_spill] sm:$0xff]  ;;  %v9975_v58 = vld [vmem:[#allocation38_spill] sm:$0xff] }
 0x188   :  { %1537 = vmatpush1.msra.mxu0 %v8061_v59  ;;  %1608 = vmatpush1.msra.mxu1 %v8063_v60  ;;  %v9976_v59 = vld [vmem:[#allocation39_spill] sm:$0xff]  ;;  %v9977_v60 = vld [vmem:[#allocation40_spill] sm:$0xff] }
 0x189   :  { %1538 = vmatprep.subr.mxu0 %v8067_v61  ;;  %1609 = vmatprep.subr.mxu1 %v8069_v62  ;;  %v9978_v61 = vld [vmem:[#allocation42_spill] sm:$0xff]  ;;  %v9979_v62 = vld [vmem:[#allocation43_spill] sm:$0xff] }
 0x18a   :  { %1539 = vmatpush1.msra.mxu0 %v8073_v63  ;;  %1610 = vmatpush1.msra.mxu1 %v8075_v0  ;;  %v1518_v63 = vpop.permute.xlu1 %1517  ;;  %v1516_v0 = vpop.permute.xlu0 %1515 }
 0x18b   :  { %1540 = vmatprep.subr.mxu0 %v8079_v2  ;;  %1611 = vmatprep.subr.mxu1 %v8081_v3  ;;  %v1520_v2 = vsel %vm1519_vm5, %v1516_v0, %v1518_v63  ;;  %v8427_v3 = vld [vmem:[#allocation4 + $0x1e8] sm:$0xff]  ;;  %v8603_v0 = vld [vmem:[#allocation4 + $0x30] sm:$0xff] }
 0x18c   :  { %1541 = vmatpush1.msra.mxu0 %v8085_v16  ;;  %1612 = vmatpush1.msra.mxu1 %v8087_v1  ;;  %v8429_v16 = vld [vmem:[#allocation4 + $0x1f8] sm:$0xff]  ;;  %v8433_v1 = vld [vmem:[#allocation4 + $0x1e0] sm:$0xff]  ;;  %9996 = vst [vmem:[#allocation57_spill] sm:$0xff] %v8603_v0 }
 0x18d   :  { %1542 = vmatprep.subr.mxu0 %v8091_v4  ;;  %1613 = vmatprep.subr.mxu1 %v8093_v5  ;;  %v8435_v4 = vld [vmem:[#allocation4 + $0x1f0] sm:$0xff]  ;;  %v8437_v5 = vld [vmem:[#allocation4 + $0x1c8] sm:$0xff] }
 0x18e   :  { %1543 = vmatpush1.msra.mxu0 %v8097_v6  ;;  %1614 = vmatpush1.msra.mxu1 %v9952_v35  ;;  %v8439_v6 = vld [vmem:[#allocation4 + $0x1d8] sm:$0xff]  ;;  %v8517_v35 = vld [vmem:[#allocation4 + $0x100] sm:$0xff] }
 0x18f   :  { %1544 = vmatprep.subr.mxu0 %v9953_v36  ;;  %1615 = vmatprep.subr.mxu1 %v9954_v37  ;;  %v8519_v36 = vld [vmem:[#allocation4 + $0x110] sm:$0xff]  ;;  %v8523_v37 = vld [vmem:[#allocation4 + $0xe8] sm:$0xff] }
 0x190   :  { %1545 = vmatpush1.msra.mxu0 %v9955_v38  ;;  %1616 = vmatpush1.msra.mxu1 %v9956_v39  ;;  %v8525_v38 = vld [vmem:[#allocation4 + $0xf8] sm:$0xff]  ;;  %v8529_v39 = vld [vmem:[#allocation4 + $0xe0] sm:$0xff] }
 0x191   :  { %1546 = vmatprep.subr.mxu0 %v9957_v40  ;;  %1617 = vmatprep.subr.mxu1 %v9958_v41  ;;  %v8531_v40 = vld [vmem:[#allocation4 + $0xf0] sm:$0xff]  ;;  %v8535_v41 = vld [vmem:[#allocation4 + $0xc8] sm:$0xff] }
 0x192   :  { %1547 = vmatpush1.msra.mxu0 %v9959_v42  ;;  %1618 = vmatpush1.msra.mxu1 %v9960_v43  ;;  %v8537_v42 = vld [vmem:[#allocation4 + $0xd8] sm:$0xff]  ;;  %v8541_v43 = vld [vmem:[#allocation4 + $0xc0] sm:$0xff] }
 0x193   :  { %1548 = vmatprep.subr.mxu0 %v9961_v44  ;;  %1619 = vmatprep.subr.mxu1 %v9962_v45  ;;  %v8543_v44 = vld [vmem:[#allocation4 + $0xd0] sm:$0xff]  ;;  %v8547_v45 = vld [vmem:[#allocation4 + $0xa8] sm:$0xff] }
 0x194   :  { %1549 = vmatpush1.msra.mxu0 %v9963_v46  ;;  %1620 = vmatpush1.msra.mxu1 %v9964_v47  ;;  %v8549_v46 = vld [vmem:[#allocation4 + $0xb8] sm:$0xff]  ;;  %v8553_v47 = vld [vmem:[#allocation4 + $0xa0] sm:$0xff] }
 0x195   :  { %1550 = vmatprep.subr.mxu0 %v9965_v48  ;;  %1621 = vmatprep.subr.mxu1 %v9966_v49  ;;  %v8555_v48 = vld [vmem:[#allocation4 + $0xb0] sm:$0xff]  ;;  %v8559_v49 = vld [vmem:[#allocation4 + $0x88] sm:$0xff] }
 0x196   :  { %1551 = vmatpush1.msra.mxu0 %v9967_v50  ;;  %1622 = vmatpush1.msra.mxu1 %v9968_v51  ;;  %v8561_v50 = vld [vmem:[#allocation4 + $0x98] sm:$0xff]  ;;  %v8565_v51 = vld [vmem:[#allocation4 + $0x80] sm:$0xff] }
 0x197   :  { %1552 = vmatprep.subr.mxu0 %v9969_v52  ;;  %1623 = vmatprep.subr.mxu1 %v9970_v53  ;;  %9983 = vst [vmem:[#allocation48_spill] sm:$0xff] %v8565_v51  ;;  %v8567_v52 = vld [vmem:[#allocation4 + $0x90] sm:$0xff]  ;;  %v8571_v53 = vld [vmem:[#allocation4 + $0x68] sm:$0xff] }
 0x198   :  { %1553 = vmatpush1.msra.mxu0 %v9971_v54  ;;  %1624 = vmatpush1.msra.mxu1 %v9972_v55  ;;  %9984 = vst [vmem:[#allocation59_spill] sm:$0xff] %v8567_v52  ;;  %9985 = vst [vmem:[#allocation60_spill] sm:$0xff] %v8571_v53  ;;  %v8573_v54 = vld [vmem:[#allocation4 + $0x78] sm:$0xff]  ;;  %v8577_v55 = vld [vmem:[#allocation4 + $0x60] sm:$0xff] }
 0x199   :  { %1554 = vmatprep.subr.mxu0 %v9973_v56  ;;  %1625 = vmatprep.subr.mxu1 %v9974_v57  ;;  %9986 = vst [vmem:[#allocation61_spill] sm:$0xff] %v8573_v54  ;;  %9987 = vst [vmem:[#allocation47_spill] sm:$0xff] %v8577_v55  ;;  %v8579_v56 = vld [vmem:[#allocation4 + $0x70] sm:$0xff]  ;;  %v8583_v57 = vld [vmem:[#allocation4 + $0x48] sm:$0xff] }
 0x19a   :  { %1555 = vmatpush1.msra.mxu0 %v9975_v58  ;;  %1626 = vmatpush1.msra.mxu1 %v9976_v59  ;;  %9988 = vst [vmem:[#allocation49_spill] sm:$0xff] %v8579_v56  ;;  %9989 = vst [vmem:[#allocation50_spill] sm:$0xff] %v8583_v57  ;;  %v8585_v58 = vld [vmem:[#allocation4 + $0x58] sm:$0xff]  ;;  %v8589_v59 = vld [vmem:[#allocation4 + $0x40] sm:$0xff] }
 0x19b   :  { %1578 = vmatprep.subr.mxu0 %v9977_v60  ;;  %1649 = vmatprep.subr.mxu1 %v9941_v13  ;;  %v8455_v13 = vld [vmem:[#allocation4 + $0x1a0] sm:$0xff]  ;;  %9990 = vst [vmem:[#allocation51_spill] sm:$0xff] %v8585_v58  ;;  %9991 = vst [vmem:[#allocation52_spill] sm:$0xff] %v8589_v59  ;;  %v8591_v60 = vld [vmem:[#allocation4 + $0x50] sm:$0xff] }
 0x19c   :  { %1579 = vmatpush2.msra.mxu0 %v9978_v61  ;;  %1650 = vmatpush2.msra.mxu1 %v9979_v62  ;;  %9992 = vst [vmem:[#allocation53_spill] sm:$0xff] %v8591_v60  ;;  %v8595_v61 = vld [vmem:[#allocation4 + $0x28] sm:$0xff]  ;;  %v8597_v62 = vld [vmem:[#allocation4 + $0x38] sm:$0xff] }
 0x19d   :  { %1580 = vmatprep.subr.mxu0 %v9944_v8  ;;  %1651 = vmatprep.subr.mxu1 %v9945_v11  ;;  %v8445_v8 = vld [vmem:[#allocation4 + $0x1d0] sm:$0xff]  ;;  %v8451_v11 = vld [vmem:[#allocation4 + $0x1b8] sm:$0xff]  ;;  %9993 = vst [vmem:[#allocation54_spill] sm:$0xff] %v8595_v61  ;;  %9994 = vst [vmem:[#allocation55_spill] sm:$0xff] %v8597_v62 }
 0x19e   :  { %1581 = vmatpush2.msra.mxu0 %v9946_v27  ;;  %1652 = vmatpush2.msra.mxu1 %v9947_v7  ;;  %v8443_v7 = vld [vmem:[#allocation4 + $0x1c0] sm:$0xff]  ;;  %v8501_v27 = vld [vmem:[#allocation4 + $0x138] sm:$0xff] }
 0x19f   :  { %1582 = vmatprep.subr.mxu0 %v8199_v30  ;;  %1653 = vmatprep.subr.mxu1 %v9949_v18  ;;  %v8489_v30 = vld [vmem:[#allocation4 + $0x158] sm:$0xff]  ;;  %v8505_v18 = vld [vmem:[#allocation4 + $0x120] sm:$0xff] }
 0x1a0   :  { %1583 = vmatpush2.msra.mxu0 %v9950_v17  ;;  %1654 = vmatpush2.msra.mxu1 %v9951_v9  ;;  %v8449_v9 = vld [vmem:[#allocation4 + $0x1a8] sm:$0xff]  ;;  %9982 = vst [vmem:[#allocation46_spill] sm:$0xff] %v8505_v18 }
 0x1a1   :  { %1584 = vmatprep.subr.mxu0 %v8211_v23  ;;  %1655 = vmatprep.subr.mxu1 %v8213_v24  ;;  %v8461_v17 = vld [vmem:[#allocation4 + $0x188] sm:$0xff]  ;;  %v8475_v24 = vld [vmem:[#allocation4 + $0x178] sm:$0xff] }
 0x1a2   :  { %1585 = vmatpush2.msra.mxu0 %v8217_v25  ;;  %1656 = vmatpush2.msra.mxu1 %v8219_v26  ;;  %v8473_v23 = vld [vmem:[#allocation4 + $0x168] sm:$0xff]  ;;  %v8479_v25 = vld [vmem:[#allocation4 + $0x160] sm:$0xff]  ;;  %v8481_v26 = vld [vmem:[#allocation4 + $0x170] sm:$0xff] }
 0x1a3   :  { %1586 = vmatprep.subr.mxu0 %v8223_v21  ;;  %1657 = vmatprep.subr.mxu1 %v8225_v29  ;;  %v8469_v21 = vld [vmem:[#allocation4 + $0x190] sm:$0xff]  ;;  %v8487_v29 = vld [vmem:[#allocation4 + $0x148] sm:$0xff] }
 0x1a4   :  { %1587 = vmatpush2.msra.mxu0 %v8229_v31  ;;  %6955 = vmatprep.mubr.msk.f32.mxu0 %vm250_vm0, %v1518_v63  ;;  %v8493_v31 = vld [vmem:[#allocation4 + $0x140] sm:$0xff] }
 0x1a5   :  { %1658 = vmatpush2.msra.mxu1 %v8233_v34  ;;  %6956 = vmatprep.mubr.msk.f32.mxu1 %vm250_vm0, %v1518_v63  ;;  %9980 = vst [vmem:[#allocation44_spill] sm:$0xff] %v8493_v31  ;;  %v8495_v34 = vld [vmem:[#allocation4 + $0x150] sm:$0xff]  ;;  %v8601_v63 = vld [vmem:[#allocation4 + $0x20] sm:$0xff] }
 0x1a6   :  { %1589 = vmatmul.mubr.f32.vlgmr.msra.gmra.mxu0 %v1520_v2  ;;  %1660 = vmatmul.mubr.f32.vlgmr.msra.gmra.mxu1 %v1520_v2  ;;  %9981 = vst [vmem:[#allocation45_spill] sm:$0xff] %v8495_v34  ;;  %9995 = vst [vmem:[#allocation56_spill] sm:$0xff] %v8601_v63  ;;  %v8607_v2 = vld [vmem:[#allocation4 + $0x8] sm:$0xff] }
 0x1a7   :  { %1776 = vmatprep.subr.mxu0 %v8427_v3  ;;  %1847 = vmatprep.subr.mxu1 %v8429_v16  ;;  %9997 = vst [vmem:[#allocation58_spill] sm:$0xff] %v8607_v2 }
 0x1a8   :  { %1777 = vmatpush1.msra.mxu0 %v8433_v1  ;;  %1848 = vmatpush1.msra.mxu1 %v8435_v4 }
 0x1a9   :  { %1778 = vmatprep.subr.mxu0 %v8437_v5  ;;  %1849 = vmatprep.subr.mxu1 %v8439_v6 }
 0x1aa   :  { %1779 = vmatpush1.msra.mxu0 %v8443_v7  ;;  %1850 = vmatpush1.msra.mxu1 %v8445_v8 }
 0x1ab   :  { %1780 = vmatprep.subr.mxu0 %v8449_v9  ;;  %1851 = vmatprep.subr.mxu1 %v8451_v11 }
 0x1ac   :  { %1781 = vmatpush1.msra.mxu0 %v8455_v13  ;;  %1852 = vmatpush1.msra.mxu1 %v8457_v15 }
 0x1ad   :  { %1782 = vmatprep.subr.mxu0 %v8461_v17  ;;  %1853 = vmatprep.subr.mxu1 %v8463_v19 }
 0x1ae   :  { %1783 = vmatpush1.msra.mxu0 %v8467_v20  ;;  %1854 = vmatpush1.msra.mxu1 %v8469_v21 }
 0x1af   :  { %1784 = vmatprep.subr.mxu0 %v8473_v23  ;;  %1855 = vmatprep.subr.mxu1 %v8475_v24 }
 0x1b0   :  { %1785 = vmatpush1.msra.mxu0 %v8479_v25  ;;  %1856 = vmatpush1.msra.mxu1 %v8481_v26 }
 0x1b1   :  { %2273 = vrot.lane.b32.xlu1 %v8350_v32, %s7422_s5  ;;  %2271 = vrot.lane.b32.xlu0 %v8355_v33, %s7422_s5 }
 0x1b2   :  { %1786 = vmatprep.subr.mxu0 %v8487_v29  ;;  %1857 = vmatprep.subr.mxu1 %v8489_v30 }
 0x1b3   :  { %1787 = vmatpush1.msra.mxu0 %v8493_v31  ;;  %1858 = vmatpush1.msra.mxu1 %v8495_v34 }
 0x1b4   :  { %1788 = vmatprep.subr.mxu0 %v8499_v22  ;;  %1859 = vmatprep.subr.mxu1 %v8501_v27 }
 0x1b5   :  { %1789 = vmatpush1.msra.mxu0 %v8505_v18  ;;  %1860 = vmatpush1.msra.mxu1 %v8507_v28 }
 0x1b6   :  { %1790 = vmatprep.subr.mxu0 %v8511_v10  ;;  %1861 = vmatprep.subr.mxu1 %v8513_v14 }
 0x1b7   :  { %1791 = vmatpush1.msra.mxu0 %v8517_v35  ;;  %1862 = vmatpush1.msra.mxu1 %v8519_v36 }
 0x1b8   :  { %1792 = vmatprep.subr.mxu0 %v8523_v37  ;;  %1863 = vmatprep.subr.mxu1 %v8525_v38 }
 0x1b9   :  { %1793 = vmatpush1.msra.mxu0 %v8529_v39  ;;  %1864 = vmatpush1.msra.mxu1 %v8531_v40 }
 0x1ba   :  { %1794 = vmatprep.subr.mxu0 %v8535_v41  ;;  %1865 = vmatprep.subr.mxu1 %v8537_v42 }
 0x1bb   :  { %1795 = vmatpush1.msra.mxu0 %v8541_v43  ;;  %1866 = vmatpush1.msra.mxu1 %v8543_v44 }
 0x1bc   :  { %1796 = vmatprep.subr.mxu0 %v8547_v45  ;;  %1867 = vmatprep.subr.mxu1 %v8549_v46 }
 0x1bd   :  { %1797 = vmatpush1.msra.mxu0 %v8553_v47  ;;  %1868 = vmatpush1.msra.mxu1 %v8555_v48 }
 0x1be   :  { %1798 = vmatprep.subr.mxu0 %v8559_v49  ;;  %1869 = vmatprep.subr.mxu1 %v8561_v50 }
 0x1bf   :  { %1799 = vmatpush1.msra.mxu0 %v8565_v51  ;;  %1870 = vmatpush1.msra.mxu1 %v8567_v52 }
 0x1c0   :  { %1800 = vmatprep.subr.mxu0 %v8571_v53  ;;  %1871 = vmatprep.subr.mxu1 %v8573_v54 }
 0x1c1   :  { %1801 = vmatpush1.msra.mxu0 %v8577_v55  ;;  %1872 = vmatpush1.msra.mxu1 %v8579_v56  ;;  %v8613_v56 = vld [vmem:[#allocation4] sm:$0xff]  ;;  %v8669_v55 = vld [vmem:[#allocation4 + $0x218] sm:$0xff] }
 0x1c2   :  { %1802 = vmatprep.subr.mxu0 %v8583_v57  ;;  %1873 = vmatprep.subr.mxu1 %v8585_v58  ;;  %9999 = vst [vmem:[#allocation27_spill] sm:$0xff] %v8613_v56  ;;  %v8615_v57 = vld [vmem:[#allocation4 + $0x10] sm:$0xff]  ;;  %v8619_v58 = vld [vmem:[#allocation4 + $0x288] sm:$0xff] }
 0x1c3   :  { %1803 = vmatpush1.msra.mxu0 %v8589_v59  ;;  %1874 = vmatpush1.msra.mxu1 %v8591_v60  ;;  %10000 = vst [vmem:[#allocation28_spill] sm:$0xff] %v8615_v57  ;;  %10001 = vst [vmem:[#allocation29_spill] sm:$0xff] %v8619_v58  ;;  %v8621_v59 = vld [vmem:[#allocation4 + $0x298] sm:$0xff]  ;;  %v8625_v60 = vld [vmem:[#allocation4 + $0x280] sm:$0xff] }
 0x1c4   :  { %1804 = vmatprep.subr.mxu0 %v8595_v61  ;;  %1875 = vmatprep.subr.mxu1 %v8597_v62  ;;  %10002 = vst [vmem:[#allocation30_spill] sm:$0xff] %v8621_v59  ;;  %10003 = vst [vmem:[#allocation31_spill] sm:$0xff] %v8625_v60  ;;  %v8627_v61 = vld [vmem:[#allocation4 + $0x290] sm:$0xff]  ;;  %v8631_v62 = vld [vmem:[#allocation4 + $0x268] sm:$0xff] }
 0x1c5   :  { %1805 = vmatpush1.msra.mxu0 %v8601_v63  ;;  %1876 = vmatpush1.msra.mxu1 %v8603_v0  ;;  %10004 = vst [vmem:[#allocation32_spill] sm:$0xff] %v8627_v61  ;;  %10005 = vst [vmem:[#allocation33_spill] sm:$0xff] %v8631_v62  ;;  %v8633_v63 = vld [vmem:[#allocation4 + $0x278] sm:$0xff]  ;;  %v8637_v0 = vld [vmem:[#allocation4 + $0x260] sm:$0xff] }
 0x1c6   :  { %1806 = vmatprep.subr.mxu0 %v8607_v2  ;;  %1877 = vmatprep.subr.mxu1 %v8609_v12  ;;  %10006 = vst [vmem:[#allocation34_spill] sm:$0xff] %v8633_v63  ;;  %10007 = vst [vmem:[#allocation35_spill] sm:$0xff] %v8637_v0  ;;  %v8639_v2 = vld [vmem:[#allocation4 + $0x270] sm:$0xff]  ;;  %v8643_v12 = vld [vmem:[#allocation4 + $0x248] sm:$0xff] }
 0x1c7   :  { %1807 = vmatpush1.msra.mxu0 %v8613_v56  ;;  %1878 = vmatpush1.msra.mxu1 %v8615_v57  ;;  %10008 = vst [vmem:[#allocation36_spill] sm:$0xff] %v8639_v2  ;;  %v8645_v56 = vld [vmem:[#allocation4 + $0x258] sm:$0xff]  ;;  %v8649_v57 = vld [vmem:[#allocation4 + $0x240] sm:$0xff] }
 0x1c8   :  { %1830 = vmatprep.subr.mxu0 %v8619_v58  ;;  %1901 = vmatprep.subr.mxu1 %v8621_v59  ;;  %10009 = vst [vmem:[#allocation37_spill] sm:$0xff] %v8645_v56  ;;  %10010 = vst [vmem:[#allocation38_spill] sm:$0xff] %v8649_v57  ;;  %v8651_v58 = vld [vmem:[#allocation4 + $0x250] sm:$0xff]  ;;  %v8655_v59 = vld [vmem:[#allocation4 + $0x228] sm:$0xff] }
 0x1c9   :  { %1831 = vmatpush2.msra.mxu0 %v8625_v60  ;;  %1902 = vmatpush2.msra.mxu1 %v8627_v61  ;;  %10011 = vst [vmem:[#allocation39_spill] sm:$0xff] %v8651_v58  ;;  %v8657_v60 = vld [vmem:[#allocation4 + $0x238] sm:$0xff]  ;;  %v8661_v61 = vld [vmem:[#allocation4 + $0x220] sm:$0xff] }
 0x1ca   :  { %1832 = vmatprep.subr.mxu0 %v8631_v62  ;;  %1903 = vmatprep.subr.mxu1 %v8633_v63  ;;  %v8663_v62 = vld [vmem:[#allocation4 + $0x230] sm:$0xff]  ;;  %v1770_v63 = vpop.permute.xlu1 %1769 }
 0x1cb   :  { %1833 = vmatpush2.msra.mxu0 %v8637_v0  ;;  %1904 = vmatpush2.msra.mxu1 %v8639_v2  ;;  %v1768_v0 = vpop.permute.xlu0 %1767  ;;  %v8667_v2 = vld [vmem:[#allocation4 + $0x208] sm:$0xff] }
 0x1cc   :  { %1834 = vmatprep.subr.mxu0 %v8643_v12  ;;  %1905 = vmatprep.subr.mxu1 %v8645_v56  ;;  %v8673_v56 = vld [vmem:[#allocation4 + $0x200] sm:$0xff] }
 0x1cd   :  { %1835 = vmatpush2.msra.mxu0 %v8649_v57  ;;  %1906 = vmatpush2.msra.mxu1 %v8651_v58  ;;  %v8677_v57 = vld [vmem:[#allocation4 + $0x210] sm:$0xff]  ;;  %v1772_v58 = vsel %vm1771_vm6, %v1768_v0, %v1770_v63 }
 0x1ce   :  { %1836 = vmatprep.subr.mxu0 %v8655_v59  ;;  %1907 = vmatprep.subr.mxu1 %v8657_v60 }
 0x1cf   :  { %1837 = vmatpush2.msra.mxu0 %v8661_v61  ;;  %1908 = vmatpush2.msra.mxu1 %v8663_v62 }
 0x1d0   :  { %1838 = vmatprep.subr.mxu0 %v8667_v2  ;;  %1909 = vmatprep.subr.mxu1 %v8669_v55 }
 0x1d1   :  { %1839 = vmatpush2.msra.mxu0 %v8673_v56  ;;  %6958 = vmatprep.mubr.msk.f32.mxu0 %vm250_vm0, %v1770_v63 }
 0x1d2   :  { %1910 = vmatpush2.msra.mxu1 %v8677_v57  ;;  %6959 = vmatprep.mubr.msk.f32.mxu1 %vm250_vm0, %v1770_v63  ;;  %v8707_v63 = vpop.f32.mrf.mxu1 }
 0x1d3   :  { %1841 = vmatmul.mubr.f32.vlgmr.msra.gmra.mxu0 %v1772_v58  ;;  %1912 = vmatmul.mubr.f32.vlgmr.msra.gmra.mxu1 %v1772_v58  ;;  %v8699_v58 = vld [vmem:[%s9568_s0 + $0x28] sm:$0xff]  ;;  %10013 = vst [vmem:[#allocation42_spill] sm:$0xff] %v8707_v63 }
 0x1d4   :  { %2028 = vmatprep.subr.mxu0 %v8427_v3  ;;  %2099 = vmatprep.subr.mxu1 %v8429_v16  ;;  %v8721_v63 = vpop.f32.mrf.mxu1 }
 0x1d5   :  { %2029 = vmatpush1.msra.mxu0 %v8433_v1  ;;  %2100 = vmatpush1.msra.mxu1 %v8435_v4  ;;  %10015 = vst [vmem:[#allocation62_spill] sm:$0xff] %v8721_v63 }
 0x1d6   :  { %2030 = vmatprep.subr.mxu0 %v8437_v5  ;;  %2101 = vmatprep.subr.mxu1 %v8439_v6 }
 0x1d7   :  { %2527 = vrot.lane.b32.xlu0 %v8350_v32, %s7412_s14  ;;  %2031 = vmatpush1.msra.mxu0 %v8443_v7  ;;  %v8705_v32 = vpop.f32.mrf.mxu0 }
 0x1d8   :  { %2102 = vmatpush1.msra.mxu1 %v8445_v8  ;;  %2032 = vmatprep.subr.mxu0 %v8449_v9  ;;  %10012 = vst [vmem:[#allocation40_spill] sm:$0xff] %v8705_v32 }
 0x1d9   :  { %2103 = vmatprep.subr.mxu1 %v8451_v11  ;;  %2033 = vmatpush1.msra.mxu0 %v8455_v13  ;;  %v8719_v0 = vpop.f32.mrf.mxu0 }
 0x1da   :  { %2104 = vmatpush1.msra.mxu1 %v8457_v15  ;;  %2034 = vmatprep.subr.mxu0 %v8461_v17  ;;  %10014 = vst [vmem:[#allocation43_spill] sm:$0xff] %v8719_v0 }
 0x1db   :  { %2105 = vmatprep.subr.mxu1 %v8463_v19  ;;  %2529 = vrot.lane.b32.xlu1 %v8699_v58, %s7412_s14 }
 0x1dc   :  { %2525 = vrot.lane.b32.xlu0 %v8355_v33, %s7412_s14  ;;  %2035 = vmatpush1.msra.mxu0 %v8467_v20 }
 0x1dd   :  { %2106 = vmatpush1.msra.mxu1 %v8469_v21  ;;  %2036 = vmatprep.subr.mxu0 %v8473_v23 }
 0x1de   :  { %2107 = vmatprep.subr.mxu1 %v8475_v24  ;;  %2037 = vmatpush1.msra.mxu0 %v8479_v25 }
 0x1df   :  { %2108 = vmatpush1.msra.mxu1 %v8481_v26  ;;  %2038 = vmatprep.subr.mxu0 %v8487_v29 }
 0x1e0   :  { %2109 = vmatprep.subr.mxu1 %v8489_v30  ;;  %2039 = vmatpush1.msra.mxu0 %v8493_v31 }
 0x1e1   :  { %2110 = vmatpush1.msra.mxu1 %v8495_v34  ;;  %2040 = vmatprep.subr.mxu0 %v8499_v22  ;;  %v829_v33 = vpop.f32.mrf.mxu0  ;;  %v900_v32 = vpop.f32.mrf.mxu1 }
 0x1e2   :  { %2111 = vmatprep.subr.mxu1 %v8501_v27  ;;  %2041 = vmatpush1.msra.mxu0 %v8505_v18 }
 0x1e3   :  { %2112 = vmatpush1.msra.mxu1 %v8507_v28  ;;  %2042 = vmatprep.subr.mxu0 %v8511_v10  ;;  %v831_v63 = vpop.f32.mrf.mxu0  ;;  %v902_v0 = vpop.f32.mrf.mxu1 }
 0x1e4   :  { %2113 = vmatprep.subr.mxu1 %v8513_v14  ;;  %2043 = vmatpush1.msra.mxu0 %v8517_v35  ;;  %v905_v31 = vmax.f32 %v829_v33, %v831_v63  ;;  %v906_v34 = vmax.f32 %v900_v32, %v902_v0  ;;  %v10019_v32 = vld [vmem:[#allocation50_spill] sm:$0xff]  ;;  %v10020_v63 = vld [vmem:[#allocation51_spill] sm:$0xff]  ;;  %v10021_v0 = vld [vmem:[#allocation52_spill] sm:$0xff] }
 0x1e5   :  { %2114 = vmatpush1.msra.mxu1 %v8519_v36  ;;  %2044 = vmatprep.subr.mxu0 %v8523_v37  ;;  %v10022_v33 = vld [vmem:[#allocation53_spill] sm:$0xff] }
 0x1e6   :  { %2115 = vmatprep.subr.mxu1 %v8525_v38  ;;  %2045 = vmatpush1.msra.mxu0 %v8529_v39  ;;  %v8739_v18 = vmax.f32 %v905_v31, %v906_v34  ;;  %v10017_v31 = vld [vmem:[#allocation47_spill] sm:$0xff]  ;;  %v10018_v34 = vld [vmem:[#allocation49_spill] sm:$0xff] }
 0x1e7   :  { %2116 = vmatpush1.msra.mxu1 %v8531_v40  ;;  %2046 = vmatprep.subr.mxu0 %v8535_v41 }
 0x1e8   :  { %10016 = vst [vmem:[#allocation63_spill] sm:$0xff] %v8739_v18  ;;  %2117 = vmatprep.subr.mxu1 %v8537_v42  ;;  %2047 = vmatpush1.msra.mxu0 %v8541_v43  ;;  %v10023_v18 = vld [vmem:[#allocation54_spill] sm:$0xff] }
 0x1e9   :  { %2118 = vmatpush1.msra.mxu1 %v8543_v44  ;;  %2048 = vmatprep.subr.mxu0 %v8547_v45 }
 0x1ea   :  { %2119 = vmatprep.subr.mxu1 %v8549_v46  ;;  %2049 = vmatpush1.msra.mxu0 %v8553_v47 }
 0x1eb   :  { %2120 = vmatpush1.msra.mxu1 %v8555_v48  ;;  %2050 = vmatprep.subr.mxu0 %v8559_v49 }
 0x1ec   :  { %2121 = vmatprep.subr.mxu1 %v8561_v50  ;;  %2051 = vmatpush1.msra.mxu0 %v8565_v51  ;;  %v10024_v51 = vld [vmem:[#allocation55_spill] sm:$0xff] }
 0x1ed   :  { %2122 = vmatpush1.msra.mxu1 %v8567_v52  ;;  %2052 = vmatprep.subr.mxu0 %v8571_v53  ;;  %v10025_v52 = vld [vmem:[#allocation56_spill] sm:$0xff]  ;;  %v10026_v53 = vld [vmem:[#allocation57_spill] sm:$0xff] }
 0x1ee   :  { %2123 = vmatprep.subr.mxu1 %v8573_v54  ;;  %2053 = vmatpush1.msra.mxu0 %v10017_v31  ;;  %v10027_v54 = vld [vmem:[#allocation58_spill] sm:$0xff] }
 0x1ef   :  { %2124 = vmatpush1.msra.mxu1 %v10018_v34  ;;  %2054 = vmatprep.subr.mxu0 %v10019_v32  ;;  %v10028_v31 = vld [vmem:[#allocation26_spill] sm:$0xff]  ;;  %v10029_v34 = vld [vmem:[#allocation27_spill] sm:$0xff]  ;;  %v10030_v32 = vld [vmem:[#allocation28_spill] sm:$0xff] }
 0x1f0   :  { %2125 = vmatprep.subr.mxu1 %v10020_v63  ;;  %2055 = vmatpush1.msra.mxu0 %v10021_v0  ;;  %v10031_v63 = vld [vmem:[#allocation29_spill] sm:$0xff]  ;;  %v10032_v0 = vld [vmem:[#allocation30_spill] sm:$0xff] }
 0x1f1   :  { %2126 = vmatpush1.msra.mxu1 %v10022_v33  ;;  %2056 = vmatprep.subr.mxu0 %v10023_v18  ;;  %v10033_v33 = vld [vmem:[#allocation31_spill] sm:$0xff]  ;;  %v10034_v18 = vld [vmem:[#allocation32_spill] sm:$0xff] }
 0x1f2   :  { %2127 = vmatprep.subr.mxu1 %v10024_v51  ;;  %2057 = vmatpush1.msra.mxu0 %v10025_v52  ;;  %v10035_v51 = vld [vmem:[#allocation33_spill] sm:$0xff]  ;;  %v10036_v52 = vld [vmem:[#allocation34_spill] sm:$0xff] }
 0x1f3   :  { %2128 = vmatpush1.msra.mxu1 %v10026_v53  ;;  %2058 = vmatprep.subr.mxu0 %v10027_v54  ;;  %v10037_v53 = vld [vmem:[#allocation35_spill] sm:$0xff]  ;;  %v10038_v54 = vld [vmem:[#allocation36_spill] sm:$0xff] }
 0x1f4   :  { %2129 = vmatprep.subr.mxu1 %v10028_v31  ;;  %2059 = vmatpush1.msra.mxu0 %v10029_v34  ;;  %v10039_v34 = vld [vmem:[#allocation37_spill] sm:$0xff] }
 0x1f5   :  { %2130 = vmatpush1.msra.mxu1 %v10030_v32  ;;  %2082 = vmatprep.subr.mxu0 %v10031_v63  ;;  %v10040_v32 = vld [vmem:[#allocation38_spill] sm:$0xff] }
 0x1f6   :  { %2153 = vmatprep.subr.mxu1 %v10032_v0  ;;  %2083 = vmatpush2.msra.mxu0 %v10033_v33  ;;  %v2022_v63 = vpop.permute.xlu1 %2021  ;;  %v2020_v0 = vpop.permute.xlu0 %2019  ;;  %v10041_v33 = vld [vmem:[#allocation39_spill] sm:$0xff] }
 0x1f7   :  { %2154 = vmatpush2.msra.mxu1 %v10034_v18  ;;  %2084 = vmatprep.subr.mxu0 %v10035_v51 }
 0x1f8   :  { %2155 = vmatprep.subr.mxu1 %v10036_v52  ;;  %2085 = vmatpush2.msra.mxu0 %v10037_v53 }
 0x1f9   :  { %2156 = vmatpush2.msra.mxu1 %v10038_v54  ;;  %2086 = vmatprep.subr.mxu0 %v8643_v12  ;;  %v2024_v54 = vsel %vm2023_vm7, %v2020_v0, %v2022_v63  ;;  %v8974_v0 = vld [vmem:[#allocation4 + $0x130] sm:$0xff] }
 0x1fa   :  { %2157 = vmatprep.subr.mxu1 %v10039_v34  ;;  %2087 = vmatpush2.msra.mxu0 %v10040_v32 }
 0x1fb   :  { %2158 = vmatpush2.msra.mxu1 %v10041_v33  ;;  %2088 = vmatprep.subr.mxu0 %v8655_v59 }
 0x1fc   :  { %2159 = vmatprep.subr.mxu1 %v8657_v60  ;;  %2089 = vmatpush2.msra.mxu0 %v8661_v61 }
 0x1fd   :  { %2160 = vmatpush2.msra.mxu1 %v8663_v62  ;;  %2090 = vmatprep.subr.mxu0 %v8667_v2 }
 0x1fe   :  { %2161 = vmatprep.subr.mxu1 %v8669_v55  ;;  %2091 = vmatpush2.msra.mxu0 %v8673_v56 }
 0x1ff   :  { %6961 = vmatprep.mubr.msk.f32.mxu0 %vm250_vm0, %v2022_v63  ;;  %2162 = vmatpush2.msra.mxu1 %v8677_v57 }
 0x200   :  { %6962 = vmatprep.mubr.msk.f32.mxu1 %vm250_vm0, %v2022_v63  ;;  %2093 = vmatmul.mubr.f32.vlgmr.msra.gmra.mxu0 %v2024_v54  ;;  %v8972_v63 = vld [vmem:[#allocation4 + $0x120] sm:$0xff] }
 0x201   :  { %2164 = vmatmul.mubr.f32.vlgmr.msra.gmra.mxu1 %v2024_v54  ;;  %2280 = vmatprep.subr.mxu0 %v8427_v3  ;;  %v8810_v3 = vld [vmem:[%s9568_s0 + $0x20] sm:$0xff]  ;;  %v8941_v54 = vld [vmem:[#allocation4 + $0x178] sm:$0xff] }
 0x202   :  { %2351 = vmatprep.subr.mxu1 %v8429_v16  ;;  %2281 = vmatpush1.msra.mxu0 %v8433_v1  ;;  %v10042_v16 = vld [vmem:[#allocation44_spill] sm:$0xff]  ;;  %v10043_v1 = vld [vmem:[#allocation45_spill] sm:$0xff] }
 0x203   :  { %2352 = vmatpush1.msra.mxu1 %v8435_v4  ;;  %2282 = vmatprep.subr.mxu0 %v8437_v5  ;;  %v10044_v4 = vld [vmem:[#allocation46_spill] sm:$0xff]  ;;  %v10045_v5 = vld [vmem:[#allocation48_spill] sm:$0xff] }
 0x204   :  { %2353 = vmatprep.subr.mxu1 %v8439_v6  ;;  %2283 = vmatpush1.msra.mxu0 %v8443_v7  ;;  %v10046_v6 = vld [vmem:[#allocation59_spill] sm:$0xff]  ;;  %v10047_v7 = vld [vmem:[#allocation60_spill] sm:$0xff] }
 0x205   :  { %2354 = vmatpush1.msra.mxu1 %v8445_v8  ;;  %2284 = vmatprep.subr.mxu0 %v8449_v9  ;;  %v10048_v8 = vld [vmem:[#allocation61_spill] sm:$0xff]  ;;  %v10049_v9 = vld [vmem:[#allocation47_spill] sm:$0xff] }
 0x206   :  { %2355 = vmatprep.subr.mxu1 %v8451_v11  ;;  %2285 = vmatpush1.msra.mxu0 %v8455_v13  ;;  %v10050_v11 = vld [vmem:[#allocation49_spill] sm:$0xff]  ;;  %v10051_v13 = vld [vmem:[#allocation50_spill] sm:$0xff] }
 0x207   :  { %2356 = vmatpush1.msra.mxu1 %v8457_v15  ;;  %2286 = vmatprep.subr.mxu0 %v8461_v17  ;;  %v10052_v15 = vld [vmem:[#allocation51_spill] sm:$0xff]  ;;  %v10053_v17 = vld [vmem:[#allocation52_spill] sm:$0xff] }
 0x208   :  { %2357 = vmatprep.subr.mxu1 %v8463_v19  ;;  %2287 = vmatpush1.msra.mxu0 %v8467_v20  ;;  %v10054_v19 = vld [vmem:[#allocation53_spill] sm:$0xff]  ;;  %v10055_v20 = vld [vmem:[#allocation54_spill] sm:$0xff] }
 0x209   :  { %2358 = vmatpush1.msra.mxu1 %v8469_v21  ;;  %2288 = vmatprep.subr.mxu0 %v8473_v23  ;;  %v10056_v21 = vld [vmem:[#allocation55_spill] sm:$0xff]  ;;  %v10057_v23 = vld [vmem:[#allocation56_spill] sm:$0xff] }
 0x20a   :  { %2359 = vmatprep.subr.mxu1 %v8475_v24  ;;  %2289 = vmatpush1.msra.mxu0 %v8479_v25  ;;  %v10058_v24 = vld [vmem:[#allocation57_spill] sm:$0xff]  ;;  %v10059_v25 = vld [vmem:[#allocation58_spill] sm:$0xff] }
 0x20b   :  { %2360 = vmatpush1.msra.mxu1 %v8481_v26  ;;  %2780 = vrot.lane.b32.xlu1 %v8810_v3, %s7423_s25  ;;  %v10060_v26 = vld [vmem:[#allocation27_spill] sm:$0xff] }
 0x20c   :  { %2782 = vrot.lane.b32.xlu0 %v8699_v58, %s7423_s25  ;;  %2290 = vmatprep.subr.mxu0 %v8487_v29  ;;  %v10061_v29 = vld [vmem:[#allocation28_spill] sm:$0xff] }
 0x20d   :  { %2361 = vmatprep.subr.mxu1 %v8489_v30  ;;  %2291 = vmatpush1.msra.mxu0 %v10042_v16  ;;  %v10062_v30 = vld [vmem:[#allocation29_spill] sm:$0xff] }
 0x20e   :  { %2362 = vmatpush1.msra.mxu1 %v10043_v1  ;;  %2292 = vmatprep.subr.mxu0 %v8499_v22  ;;  %v10063_v22 = vld [vmem:[#allocation30_spill] sm:$0xff] }
 0x20f   :  { %2363 = vmatprep.subr.mxu1 %v8501_v27  ;;  %2293 = vmatpush1.msra.mxu0 %v10044_v4  ;;  %v10064_v27 = vld [vmem:[#allocation31_spill] sm:$0xff]  ;;  %v8984_v4 = vld [vmem:[#allocation4 + $0x100] sm:$0xff] }
 0x210   :  { %2364 = vmatpush1.msra.mxu1 %v8507_v28  ;;  %2294 = vmatprep.subr.mxu0 %v8511_v10  ;;  %v10065_v28 = vld [vmem:[#allocation36_spill] sm:$0xff] }
 0x211   :  { %2365 = vmatprep.subr.mxu1 %v8513_v14  ;;  %2295 = vmatpush1.msra.mxu0 %v8517_v35  ;;  %v8886_v35 = vld [vmem:[#allocation4 + $0x1f8] sm:$0xff] }
 0x212   :  { %2366 = vmatpush1.msra.mxu1 %v8519_v36  ;;  %2296 = vmatprep.subr.mxu0 %v8523_v37  ;;  %v8888_v36 = vld [vmem:[#allocation4 + $0x1e0] sm:$0xff]  ;;  %v8891_v37 = vld [vmem:[#allocation4 + $0x1f0] sm:$0xff] }
 0x213   :  { %2367 = vmatprep.subr.mxu1 %v8525_v38  ;;  %2297 = vmatpush1.msra.mxu0 %v8529_v39  ;;  %v8893_v38 = vld [vmem:[#allocation4 + $0x1c8] sm:$0xff]  ;;  %v8896_v39 = vld [vmem:[#allocation4 + $0x1d8] sm:$0xff] }
 0x214   :  { %2368 = vmatpush1.msra.mxu1 %v8531_v40  ;;  %2298 = vmatprep.subr.mxu0 %v8535_v41  ;;  %v8900_v40 = vld [vmem:[#allocation4 + $0x1c0] sm:$0xff]  ;;  %v8902_v41 = vld [vmem:[#allocation4 + $0x1d0] sm:$0xff] }
 0x215   :  { %2369 = vmatprep.subr.mxu1 %v8537_v42  ;;  %2299 = vmatpush1.msra.mxu0 %v8541_v43  ;;  %v8906_v42 = vld [vmem:[#allocation4 + $0x1a8] sm:$0xff]  ;;  %v8908_v43 = vld [vmem:[#allocation4 + $0x1b8] sm:$0xff] }
 0x216   :  { %2370 = vmatpush1.msra.mxu1 %v8543_v44  ;;  %2300 = vmatprep.subr.mxu0 %v8547_v45  ;;  %v8912_v44 = vld [vmem:[#allocation4 + $0x1a0] sm:$0xff]  ;;  %v8914_v45 = vld [vmem:[#allocation4 + $0x1b0] sm:$0xff] }
 0x217   :  { %2371 = vmatprep.subr.mxu1 %v8549_v46  ;;  %2301 = vmatpush1.msra.mxu0 %v8553_v47  ;;  %v8918_v46 = vld [vmem:[#allocation4 + $0x188] sm:$0xff]  ;;  %v8920_v47 = vld [vmem:[#allocation4 + $0x198] sm:$0xff] }
 0x218   :  { %2372 = vmatpush1.msra.mxu1 %v8555_v48  ;;  %2302 = vmatprep.subr.mxu0 %v8559_v49  ;;  %v8922_v48 = vpop.f32.mrf.mxu0  ;;  %v8924_v49 = vpop.f32.mrf.mxu1 }
 0x219   :  { %2373 = vmatprep.subr.mxu1 %v8561_v50  ;;  %2303 = vmatpush1.msra.mxu0 %v10045_v5  ;;  %10066 = vst [vmem:[#allocation26_spill] sm:$0xff] %v8922_v48  ;;  %10067 = vst [vmem:[#allocation32_spill] sm:$0xff] %v8924_v49  ;;  %v2946_v50 = vld [vmem:[%s9568_s0 + $0x30] sm:$0xff]  ;;  %v9076_v49 = vld [vmem:[#allocation4 + $0x8] sm:$0xff] }
 0x21a   :  { %2374 = vmatpush1.msra.mxu1 %v10046_v6  ;;  %2304 = vmatprep.subr.mxu0 %v10047_v7  ;;  %v8986_v5 = vld [vmem:[#allocation4 + $0x110] sm:$0xff]  ;;  %10087 = vst [vmem:[#allocation54_spill] sm:$0xff] %v9076_v49  ;;  %v9082_v48 = vld [vmem:[#allocation4] sm:$0xff] }
 0x21b   :  { %2375 = vmatprep.subr.mxu1 %v10048_v8  ;;  %2305 = vmatpush1.msra.mxu0 %v10049_v9  ;;  %v8990_v8 = vld [vmem:[#allocation4 + $0xe8] sm:$0xff]  ;;  %v8992_v9 = vld [vmem:[#allocation4 + $0xf8] sm:$0xff]  ;;  %10089 = vst [vmem:[#allocation56_spill] sm:$0xff] %v9082_v48 }
 0x21c   :  { %2376 = vmatpush1.msra.mxu1 %v10050_v11  ;;  %2306 = vmatprep.subr.mxu0 %v10051_v13  ;;  %v8996_v11 = vld [vmem:[#allocation4 + $0xe0] sm:$0xff]  ;;  %v8998_v13 = vld [vmem:[#allocation4 + $0xf0] sm:$0xff] }
 0x21d   :  { %2377 = vmatprep.subr.mxu1 %v10052_v15  ;;  %2307 = vmatpush1.msra.mxu0 %v10053_v17  ;;  %v9004_v17 = vld [vmem:[#allocation4 + $0xc8] sm:$0xff] }
 0x21e   :  { %2378 = vmatpush1.msra.mxu1 %v10054_v19  ;;  %2308 = vmatprep.subr.mxu0 %v10055_v20  ;;  %v9006_v19 = vld [vmem:[#allocation4 + $0xd8] sm:$0xff]  ;;  %v9010_v20 = vld [vmem:[#allocation4 + $0xc0] sm:$0xff] }
 0x21f   :  { %2379 = vmatprep.subr.mxu1 %v10056_v21  ;;  %2309 = vmatpush1.msra.mxu0 %v10057_v23  ;;  %v9012_v21 = vld [vmem:[#allocation4 + $0xd0] sm:$0xff]  ;;  %v9016_v23 = vld [vmem:[#allocation4 + $0xa8] sm:$0xff] }
 0x220   :  { %2380 = vmatpush1.msra.mxu1 %v10058_v24  ;;  %2310 = vmatprep.subr.mxu0 %v10059_v25  ;;  %v9018_v24 = vld [vmem:[#allocation4 + $0xb8] sm:$0xff]  ;;  %v9022_v25 = vld [vmem:[#allocation4 + $0xa0] sm:$0xff] }
 0x221   :  { %2381 = vmatprep.subr.mxu1 %v10028_v31  ;;  %2311 = vmatpush1.msra.mxu0 %v10060_v26  ;;  %v8968_v31 = vld [vmem:[#allocation4 + $0x138] sm:$0xff]  ;;  %v9024_v26 = vld [vmem:[#allocation4 + $0xb0] sm:$0xff] }
 0x222   :  { %2382 = vmatpush1.msra.mxu1 %v10061_v29  ;;  %2334 = vmatprep.subr.mxu0 %v10062_v30  ;;  %v9028_v29 = vld [vmem:[#allocation4 + $0x88] sm:$0xff]  ;;  %v9030_v30 = vld [vmem:[#allocation4 + $0x98] sm:$0xff] }
 0x223   :  { %2405 = vmatprep.subr.mxu1 %v10063_v22  ;;  %2335 = vmatpush2.msra.mxu0 %v10064_v27  ;;  %v2274_v10 = vpop.permute.xlu1 %2273  ;;  %v2272_v14 = vpop.permute.xlu0 %2271  ;;  %10071 = vst [vmem:[#allocation37_spill] sm:$0xff] %v9028_v29  ;;  %10072 = vst [vmem:[#allocation38_spill] sm:$0xff] %v9030_v30  ;;  %v9034_v22 = vld [vmem:[#allocation4 + $0x80] sm:$0xff]  ;;  %v9036_v27 = vld [vmem:[#allocation4 + $0x90] sm:$0xff] }
 0x224   :  { %2406 = vmatpush2.msra.mxu1 %v10034_v18  ;;  %2336 = vmatprep.subr.mxu0 %v10035_v51  ;;  %v2276_v18 = vsel %vm2275_vm8, %v2272_v14, %v2274_v10  ;;  %v8933_v51 = vld [vmem:[#allocation4 + $0x180] sm:$0xff]  ;;  %10073 = vst [vmem:[#allocation39_spill] sm:$0xff] %v9034_v22  ;;  %10074 = vst [vmem:[#allocation44_spill] sm:$0xff] %v9036_v27 }
 0x225   :  { %2407 = vmatprep.subr.mxu1 %v10036_v52  ;;  %2337 = vmatpush2.msra.mxu0 %v10037_v53  ;;  %v8935_v52 = vld [vmem:[#allocation4 + $0x190] sm:$0xff]  ;;  %v8939_v53 = vld [vmem:[#allocation4 + $0x168] sm:$0xff]  ;;  %v9046_v14 = vld [vmem:[#allocation4 + $0x60] sm:$0xff] }
 0x226   :  { %2408 = vmatpush2.msra.mxu1 %v10065_v28  ;;  %2338 = vmatprep.subr.mxu0 %v8643_v12  ;;  %v8882_v12 = vld [vmem:[#allocation4 + $0x1e8] sm:$0xff]  ;;  %10077 = vst [vmem:[#allocation48_spill] sm:$0xff] %v9046_v14 }
 0x227   :  { %2409 = vmatprep.subr.mxu1 %v10039_v34  ;;  %2339 = vmatpush2.msra.mxu0 %v10040_v32  ;;  %v9040_v28 = vld [vmem:[#allocation4 + $0x68] sm:$0xff] }
 0x228   :  { %2410 = vmatpush2.msra.mxu1 %v10041_v33  ;;  %2340 = vmatprep.subr.mxu0 %v8655_v59  ;;  %v8950_v59 = vpop.f32.mrf.mxu1  ;;  %v8978_v33 = vld [vmem:[#allocation4 + $0x108] sm:$0xff]  ;;  %10075 = vst [vmem:[#allocation45_spill] sm:$0xff] %v9040_v28 }
 0x229   :  { %2411 = vmatprep.subr.mxu1 %v8657_v60  ;;  %2341 = vmatpush2.msra.mxu0 %v8661_v61  ;;  %10069 = vst [vmem:[#allocation34_spill] sm:$0xff] %v8950_v59  ;;  %v8954_v60 = vld [vmem:[#allocation4 + $0x148] sm:$0xff]  ;;  %v8956_v61 = vld [vmem:[#allocation4 + $0x158] sm:$0xff] }
 0x22a   :  { %2412 = vmatpush2.msra.mxu1 %v8663_v62  ;;  %2342 = vmatprep.subr.mxu0 %v8667_v2  ;;  %v8960_v62 = vld [vmem:[#allocation4 + $0x140] sm:$0xff]  ;;  %v8962_v2 = vld [vmem:[#allocation4 + $0x150] sm:$0xff]  ;;  %v9078_v59 = vld [vmem:[#allocation4 + $0x18] sm:$0xff] }
 0x22b   :  { %2413 = vmatprep.subr.mxu1 %v8669_v55  ;;  %2343 = vmatpush2.msra.mxu0 %v8673_v56  ;;  %v8944_v55 = vld [vmem:[#allocation4 + $0x160] sm:$0xff]  ;;  %v8946_v56 = vld [vmem:[#allocation4 + $0x170] sm:$0xff]  ;;  %10088 = vst [vmem:[#allocation55_spill] sm:$0xff] %v9078_v59 }
 0x22c   :  { %6964 = vmatprep.mubr.msk.f32.mxu0 %vm250_vm0, %v2274_v10  ;;  %2414 = vmatpush2.msra.mxu1 %v8677_v57  ;;  %v8948_v57 = vpop.f32.mrf.mxu0 }
 0x22d   :  { %6965 = vmatprep.mubr.msk.f32.mxu1 %vm250_vm0, %v2274_v10  ;;  %2345 = vmatmul.mubr.f32.vlgmr.msra.gmra.mxu0 %v2276_v18  ;;  %10068 = vst [vmem:[#allocation33_spill] sm:$0xff] %v8948_v57  ;;  %v9042_v10 = vld [vmem:[#allocation4 + $0x78] sm:$0xff]  ;;  %v9084_v57 = vld [vmem:[#allocation4 + $0x10] sm:$0xff] }
 0x22e   :  { %2416 = vmatmul.mubr.f32.vlgmr.msra.gmra.mxu1 %v2276_v18  ;;  %2537 = vmatprep.subr.mxu0 %v8882_v12  ;;  %10076 = vst [vmem:[#allocation46_spill] sm:$0xff] %v9042_v10  ;;  %v9048_v18 = vld [vmem:[#allocation4 + $0x70] sm:$0xff]  ;;  %10090 = vst [vmem:[#allocation57_spill] sm:$0xff] %v9084_v57 }
 0x22f   :  { %2608 = vmatprep.subr.mxu1 %v8886_v35  ;;  %2538 = vmatpush1.msra.mxu0 %v8888_v36  ;;  %10078 = vst [vmem:[#allocation59_spill] sm:$0xff] %v9048_v18 }
 0x230   :  { %2609 = vmatpush1.msra.mxu1 %v8891_v37  ;;  %2539 = vmatprep.subr.mxu0 %v8893_v38 }
 0x231   :  { %2610 = vmatprep.subr.mxu1 %v8896_v39  ;;  %3036 = vrot.lane.b32.xlu1 %v8699_v58, %s7424_s26  ;;  %v8966_v58 = vld [vmem:[#allocation4 + $0x128] sm:$0xff] }
 0x232   :  { %2540 = vmatpush1.msra.mxu0 %v8900_v40  ;;  %2611 = vmatpush1.msra.mxu1 %v8902_v41 }
 0x233   :  { %2541 = vmatprep.subr.mxu0 %v8906_v42  ;;  %2612 = vmatprep.subr.mxu1 %v8908_v43 }
 0x234   :  { %2542 = vmatpush1.msra.mxu0 %v8912_v44  ;;  %2613 = vmatpush1.msra.mxu1 %v8914_v45 }
 0x235   :  { %2543 = vmatprep.subr.mxu0 %v8918_v46  ;;  %2614 = vmatprep.subr.mxu1 %v8920_v47 }
 0x236   :  { %3034 = vrot.lane.b32.xlu1 %v8810_v3, %s7424_s26  ;;  %3038 = vrot.lane.b32.xlu0 %v2946_v50, %s7424_s26  ;;  %v8980_v3 = vld [vmem:[#allocation4 + $0x118] sm:$0xff]  ;;  %v9052_v50 = vld [vmem:[#allocation4 + $0x48] sm:$0xff] }
 0x237   :  { %2544 = vmatpush1.msra.mxu0 %v8933_v51  ;;  %2615 = vmatpush1.msra.mxu1 %v8935_v52  ;;  %10079 = vst [vmem:[#allocation60_spill] sm:$0xff] %v9052_v50 }
 0x238   :  { %2545 = vmatprep.subr.mxu0 %v8939_v53  ;;  %2616 = vmatprep.subr.mxu1 %v8941_v54 }
 0x239   :  { %2546 = vmatpush1.msra.mxu0 %v8944_v55  ;;  %2617 = vmatpush1.msra.mxu1 %v8946_v56  ;;  %v1338_v34 = vpop.f32.mrf.mxu0  ;;  %v1409_v32 = vpop.f32.mrf.mxu1 }
 0x23a   :  { %2547 = vmatprep.subr.mxu0 %v8954_v60  ;;  %2618 = vmatprep.subr.mxu1 %v8956_v61 }
 0x23b   :  { %2548 = vmatpush1.msra.mxu0 %v8960_v62  ;;  %2619 = vmatpush1.msra.mxu1 %v8962_v2  ;;  %v1340_v16 = vpop.f32.mrf.mxu0  ;;  %v1411_v1 = vpop.f32.mrf.mxu1 }
 0x23c   :  { %2549 = vmatprep.subr.mxu0 %v8966_v58  ;;  %2620 = vmatprep.subr.mxu1 %v8968_v31  ;;  %v1414_v6 = vmax.f32 %v1338_v34, %v1340_v16  ;;  %v1415_v7 = vmax.f32 %v1409_v32, %v1411_v1  ;;  %v9054_v34 = vld [vmem:[#allocation4 + $0x58] sm:$0xff]  ;;  %v9058_v32 = vld [vmem:[#allocation4 + $0x40] sm:$0xff]  ;;  %v9060_v16 = vld [vmem:[#allocation4 + $0x50] sm:$0xff] }
 0x23d   :  { %2550 = vmatpush1.msra.mxu0 %v8972_v63  ;;  %2621 = vmatpush1.msra.mxu1 %v8974_v0  ;;  %10080 = vst [vmem:[#allocation61_spill] sm:$0xff] %v9054_v34  ;;  %10081 = vst [vmem:[#allocation47_spill] sm:$0xff] %v9058_v32  ;;  %v9064_v1 = vld [vmem:[#allocation4 + $0x28] sm:$0xff] }
 0x23e   :  { %2551 = vmatprep.subr.mxu0 %v8978_v33  ;;  %2622 = vmatprep.subr.mxu1 %v8980_v3  ;;  %v9000_v15 = vmax.f32 %v1414_v6, %v1415_v7  ;;  %10082 = vst [vmem:[#allocation49_spill] sm:$0xff] %v9060_v16  ;;  %10083 = vst [vmem:[#allocation50_spill] sm:$0xff] %v9064_v1  ;;  %v9066_v6 = vld [vmem:[#allocation4 + $0x38] sm:$0xff]  ;;  %v9070_v7 = vld [vmem:[#allocation4 + $0x20] sm:$0xff] }
 0x23f   :  { %2552 = vmatpush1.msra.mxu0 %v8984_v4  ;;  %2623 = vmatpush1.msra.mxu1 %v8986_v5  ;;  %10084 = vst [vmem:[#allocation51_spill] sm:$0xff] %v9066_v6  ;;  %10085 = vst [vmem:[#allocation52_spill] sm:$0xff] %v9070_v7 }
 0x240   :  { %10070 = vst [vmem:[#allocation35_spill] sm:$0xff] %v9000_v15  ;;  %2553 = vmatprep.subr.mxu0 %v8990_v8  ;;  %2624 = vmatprep.subr.mxu1 %v8992_v9  ;;  %v9072_v15 = vld [vmem:[#allocation4 + $0x30] sm:$0xff] }
 0x241   :  { %2554 = vmatpush1.msra.mxu0 %v8996_v11  ;;  %2625 = vmatpush1.msra.mxu1 %v8998_v13  ;;  %10086 = vst [vmem:[#allocation53_spill] sm:$0xff] %v9072_v15 }
 0x242   :  { %2555 = vmatprep.subr.mxu0 %v9004_v17  ;;  %2626 = vmatprep.subr.mxu1 %v9006_v19 }
 0x243   :  { %2556 = vmatpush1.msra.mxu0 %v9010_v20  ;;  %2627 = vmatpush1.msra.mxu1 %v9012_v21 }
 0x244   :  { %2557 = vmatprep.subr.mxu0 %v9016_v23  ;;  %2628 = vmatprep.subr.mxu1 %v9018_v24 }
 0x245   :  { %2558 = vmatpush1.msra.mxu0 %v9022_v25  ;;  %2629 = vmatpush1.msra.mxu1 %v9024_v26 }
 0x246   :  { %2559 = vmatprep.subr.mxu0 %v9028_v29  ;;  %2630 = vmatprep.subr.mxu1 %v9030_v30 }
 0x247   :  { %2560 = vmatpush1.msra.mxu0 %v9034_v22  ;;  %2631 = vmatpush1.msra.mxu1 %v9036_v27 }
 0x248   :  { %2561 = vmatprep.subr.mxu0 %v9040_v28  ;;  %2632 = vmatprep.subr.mxu1 %v9042_v10 }
 0x249   :  { %2562 = vmatpush1.msra.mxu0 %v9046_v14  ;;  %2633 = vmatpush1.msra.mxu1 %v9048_v18  ;;  %v9131_v18 = vld [vmem:[#allocation4 + $0x220] sm:$0xff] }
 0x24a   :  { %2563 = vmatprep.subr.mxu0 %v9052_v50  ;;  %2634 = vmatprep.subr.mxu1 %v9054_v34  ;;  %v9088_v34 = vld [vmem:[#allocation4 + $0x288] sm:$0xff] }
 0x24b   :  { %2564 = vmatpush1.msra.mxu0 %v9058_v32  ;;  %2635 = vmatpush1.msra.mxu1 %v9060_v16  ;;  %10091 = vst [vmem:[#allocation58_spill] sm:$0xff] %v9088_v34  ;;  %v9090_v32 = vld [vmem:[#allocation4 + $0x298] sm:$0xff]  ;;  %v9094_v16 = vld [vmem:[#allocation4 + $0x280] sm:$0xff] }
 0x24c   :  { %2565 = vmatprep.subr.mxu0 %v9064_v1  ;;  %2636 = vmatprep.subr.mxu1 %v9066_v6  ;;  %10092 = vst [vmem:[#allocation27_spill] sm:$0xff] %v9090_v32  ;;  %10093 = vst [vmem:[#allocation28_spill] sm:$0xff] %v9094_v16  ;;  %v9096_v1 = vld [vmem:[#allocation4 + $0x290] sm:$0xff]  ;;  %v9100_v6 = vld [vmem:[#allocation4 + $0x268] sm:$0xff] }
 0x24d   :  { %2566 = vmatpush1.msra.mxu0 %v9070_v7  ;;  %2637 = vmatpush1.msra.mxu1 %v9072_v15  ;;  %10094 = vst [vmem:[#allocation29_spill] sm:$0xff] %v9096_v1  ;;  %10095 = vst [vmem:[#allocation30_spill] sm:$0xff] %v9100_v6  ;;  %v9102_v7 = vld [vmem:[#allocation4 + $0x278] sm:$0xff]  ;;  %v9106_v15 = vld [vmem:[#allocation4 + $0x260] sm:$0xff]  ;;  %v2530_v50 = vpop.permute.xlu1 %2529 }
 0x24e   :  { %2567 = vmatprep.subr.mxu0 %v9076_v49  ;;  %2638 = vmatprep.subr.mxu1 %v9078_v59  ;;  %10096 = vst [vmem:[#allocation31_spill] sm:$0xff] %v9102_v7  ;;  %10097 = vst [vmem:[#allocation36_spill] sm:$0xff] %v9106_v15  ;;  %v9108_v49 = vld [vmem:[#allocation4 + $0x270] sm:$0xff]  ;;  %v2528_v59 = vpop.permute.xlu0 %2527 }
 0x24f   :  { %2568 = vmatpush1.msra.mxu0 %v9082_v48  ;;  %2639 = vmatpush1.msra.mxu1 %v9084_v57  ;;  %10098 = vst [vmem:[#allocation64_spill] sm:$0xff] %v9108_v49  ;;  %v9112_v48 = vld [vmem:[#allocation4 + $0x248] sm:$0xff]  ;;  %v9114_v57 = vld [vmem:[#allocation4 + $0x258] sm:$0xff] }
 0x250   :  { %2591 = vmatprep.subr.mxu0 %v9088_v34  ;;  %2662 = vmatprep.subr.mxu1 %v9090_v32  ;;  %10099 = vst [vmem:[#allocation65_spill] sm:$0xff] %v9112_v48  ;;  %10100 = vst [vmem:[#allocation66_spill] sm:$0xff] %v9114_v57  ;;  %v9118_v32 = vld [vmem:[#allocation4 + $0x240] sm:$0xff]  ;;  %v9120_v34 = vld [vmem:[#allocation4 + $0x250] sm:$0xff] }
 0x251   :  { %2592 = vmatpush2.msra.mxu0 %v9094_v16  ;;  %2663 = vmatpush2.msra.mxu1 %v9096_v1  ;;  %10101 = vst [vmem:[#allocation67_spill] sm:$0xff] %v9118_v32  ;;  %v9124_v16 = vld [vmem:[#allocation4 + $0x228] sm:$0xff]  ;;  %v9126_v1 = vld [vmem:[#allocation4 + $0x238] sm:$0xff] }
 0x252   :  { %2593 = vmatprep.subr.mxu0 %v9100_v6  ;;  %2664 = vmatprep.subr.mxu1 %v9102_v7  ;;  %10102 = vst [vmem:[#allocation68_spill] sm:$0xff] %v9126_v1  ;;  %v2533_v6 = vsel %vm2531_vm9, %v2528_v59, %v2530_v50  ;;  %v9135_v7 = vld [vmem:[#allocation4 + $0x230] sm:$0xff]  ;;  %v9145_v50 = vld [vmem:[#allocation4 + $0x200] sm:$0xff] }
 0x253   :  { %2594 = vmatpush2.msra.mxu0 %v9106_v15  ;;  %2665 = vmatpush2.msra.mxu1 %v9108_v49  ;;  %v9139_v49 = vld [vmem:[#allocation4 + $0x208] sm:$0xff]  ;;  %v9141_v15 = vld [vmem:[#allocation4 + $0x218] sm:$0xff] }
 0x254   :  { %2595 = vmatprep.subr.mxu0 %v9112_v48  ;;  %2666 = vmatprep.subr.mxu1 %v9114_v57  ;;  %v2526_v48 = vpop.permute.xlu0 %2525 }
 0x255   :  { %2596 = vmatpush2.msra.mxu0 %v9118_v32  ;;  %2667 = vmatpush2.msra.mxu1 %v9120_v34  ;;  %v9147_v32 = vld [vmem:[#allocation4 + $0x210] sm:$0xff] }
 0x256   :  { %2597 = vmatprep.subr.mxu0 %v9124_v16  ;;  %2668 = vmatprep.subr.mxu1 %v9126_v1  ;;  %v2532_v1 = vsel %vm2531_vm9, %v2526_v48, %v2528_v59  ;;  %v10103_v48 = vld [vmem:[#allocation59_spill] sm:$0xff]  ;;  %v10104_v59 = vld [vmem:[#allocation60_spill] sm:$0xff] }
 0x257   :  { %2598 = vmatpush2.msra.mxu0 %v9131_v18  ;;  %6967 = vmatprep.mubr.msk.f32.mxu0 %vm250_vm0, %v2533_v6 }
 0x258   :  { %2669 = vmatpush2.msra.mxu1 %v9135_v7  ;;  %6968 = vmatprep.mubr.msk.f32.mxu1 %vm250_vm0, %v2533_v6  ;;  %v10106_v6 = vld [vmem:[#allocation47_spill] sm:$0xff] }
 0x259   :  { %2599 = vmatprep.subr.mxu0 %v9139_v49  ;;  %2670 = vmatprep.subr.mxu1 %v9141_v15 }
 0x25a   :  { %2600 = vmatpush2.msra.mxu0 %v9145_v50  ;;  %2671 = vmatpush2.msra.mxu1 %v9147_v32 }
 0x25b   :  { %2602 = vmatmul.mubr.f32.vlgmr.msra.gmra.mxu0 %v2532_v1  ;;  %2673 = vmatmul.mubr.f32.vlgmr.msra.gmra.mxu1 %v2532_v1  ;;  %v10105_v1 = vld [vmem:[#allocation61_spill] sm:$0xff] }
 0x25c   :  { %2789 = vmatprep.subr.mxu0 %v8882_v12  ;;  %2860 = vmatprep.subr.mxu1 %v8886_v35 }
 0x25d   :  { %2790 = vmatpush1.msra.mxu0 %v8888_v36  ;;  %2861 = vmatpush1.msra.mxu1 %v8891_v37 }
 0x25e   :  { %2791 = vmatprep.subr.mxu0 %v8893_v38  ;;  %2862 = vmatprep.subr.mxu1 %v8896_v39 }
 0x25f   :  { %2792 = vmatpush1.msra.mxu0 %v8900_v40  ;;  %2863 = vmatpush1.msra.mxu1 %v8902_v41 }
 0x260   :  { %2793 = vmatprep.subr.mxu0 %v8906_v42  ;;  %2864 = vmatprep.subr.mxu1 %v8908_v43 }
 0x261   :  { %2794 = vmatpush1.msra.mxu0 %v8912_v44  ;;  %2865 = vmatpush1.msra.mxu1 %v8914_v45 }
 0x262   :  { %2795 = vmatprep.subr.mxu0 %v8918_v46  ;;  %2866 = vmatprep.subr.mxu1 %v8920_v47 }
 0x263   :  { %2796 = vmatpush1.msra.mxu0 %v8933_v51  ;;  %2867 = vmatpush1.msra.mxu1 %v8935_v52 }
 0x264   :  { %2797 = vmatprep.subr.mxu0 %v8939_v53  ;;  %2868 = vmatprep.subr.mxu1 %v8941_v54 }
 0x265   :  { %2798 = vmatpush1.msra.mxu0 %v8944_v55  ;;  %2869 = vmatpush1.msra.mxu1 %v8946_v56 }
 0x266   :  { %2799 = vmatprep.subr.mxu0 %v8954_v60  ;;  %2870 = vmatprep.subr.mxu1 %v8956_v61 }
 0x267   :  { %2800 = vmatpush1.msra.mxu0 %v8960_v62  ;;  %2871 = vmatpush1.msra.mxu1 %v8962_v2 }
 0x268   :  { %2801 = vmatprep.subr.mxu0 %v8966_v58  ;;  %2872 = vmatprep.subr.mxu1 %v8968_v31 }
 0x269   :  { %2802 = vmatpush1.msra.mxu0 %v8972_v63  ;;  %2873 = vmatpush1.msra.mxu1 %v8974_v0 }
 0x26a   :  { %2803 = vmatprep.subr.mxu0 %v8978_v33  ;;  %2874 = vmatprep.subr.mxu1 %v8980_v3 }
 0x26b   :  { %2804 = vmatpush1.msra.mxu0 %v8984_v4  ;;  %2875 = vmatpush1.msra.mxu1 %v8986_v5 }
 0x26c   :  { %2805 = vmatprep.subr.mxu0 %v8990_v8  ;;  %2876 = vmatprep.subr.mxu1 %v8992_v9 }
 0x26d   :  { %2806 = vmatpush1.msra.mxu0 %v8996_v11  ;;  %2877 = vmatpush1.msra.mxu1 %v8998_v13 }
 0x26e   :  { %2807 = vmatprep.subr.mxu0 %v9004_v17  ;;  %2878 = vmatprep.subr.mxu1 %v9006_v19 }
 0x26f   :  { %2808 = vmatpush1.msra.mxu0 %v9010_v20  ;;  %2879 = vmatpush1.msra.mxu1 %v9012_v21 }
 0x270   :  { %2809 = vmatprep.subr.mxu0 %v9016_v23  ;;  %2880 = vmatprep.subr.mxu1 %v9018_v24 }
 0x271   :  { %2810 = vmatpush1.msra.mxu0 %v9022_v25  ;;  %2881 = vmatpush1.msra.mxu1 %v9024_v26 }
 0x272   :  { %2811 = vmatprep.subr.mxu0 %v9028_v29  ;;  %2882 = vmatprep.subr.mxu1 %v9030_v30  ;;  %v10107_v29 = vld [vmem:[#allocation49_spill] sm:$0xff]  ;;  %v10108_v30 = vld [vmem:[#allocation50_spill] sm:$0xff] }
 0x273   :  { %2812 = vmatpush1.msra.mxu0 %v9034_v22  ;;  %2883 = vmatpush1.msra.mxu1 %v9036_v27  ;;  %v10109_v22 = vld [vmem:[#allocation51_spill] sm:$0xff]  ;;  %v10110_v27 = vld [vmem:[#allocation52_spill] sm:$0xff] }
 0x274   :  { %2813 = vmatprep.subr.mxu0 %v9040_v28  ;;  %2884 = vmatprep.subr.mxu1 %v9042_v10  ;;  %v10111_v28 = vld [vmem:[#allocation53_spill] sm:$0xff]  ;;  %v10112_v10 = vld [vmem:[#allocation54_spill] sm:$0xff] }
 0x275   :  { %2814 = vmatpush1.msra.mxu0 %v9046_v14  ;;  %2885 = vmatpush1.msra.mxu1 %v10103_v48  ;;  %v10113_v14 = vld [vmem:[#allocation55_spill] sm:$0xff]  ;;  %v10114_v48 = vld [vmem:[#allocation56_spill] sm:$0xff] }
 0x276   :  { %2815 = vmatprep.subr.mxu0 %v10104_v59  ;;  %2886 = vmatprep.subr.mxu1 %v10105_v1  ;;  %v10115_v59 = vld [vmem:[#allocation57_spill] sm:$0xff]  ;;  %v10116_v1 = vld [vmem:[#allocation58_spill] sm:$0xff] }
 0x277   :  { %2816 = vmatpush1.msra.mxu0 %v10106_v6  ;;  %2887 = vmatpush1.msra.mxu1 %v10107_v29  ;;  %v10117_v6 = vld [vmem:[#allocation27_spill] sm:$0xff]  ;;  %v10118_v29 = vld [vmem:[#allocation28_spill] sm:$0xff] }
 0x278   :  { %2817 = vmatprep.subr.mxu0 %v10108_v30  ;;  %2888 = vmatprep.subr.mxu1 %v10109_v22  ;;  %v10119_v30 = vld [vmem:[#allocation29_spill] sm:$0xff]  ;;  %v10120_v22 = vld [vmem:[#allocation30_spill] sm:$0xff] }
 0x279   :  { %2818 = vmatpush1.msra.mxu0 %v10110_v27  ;;  %2889 = vmatpush1.msra.mxu1 %v10111_v28  ;;  %v10121_v27 = vld [vmem:[#allocation31_spill] sm:$0xff]  ;;  %v10122_v28 = vld [vmem:[#allocation36_spill] sm:$0xff] }
 0x27a   :  { %2819 = vmatprep.subr.mxu0 %v10112_v10  ;;  %2890 = vmatprep.subr.mxu1 %v10113_v14  ;;  %v10123_v10 = vld [vmem:[#allocation64_spill] sm:$0xff]  ;;  %v10124_v14 = vld [vmem:[#allocation65_spill] sm:$0xff] }
 0x27b   :  { %2820 = vmatpush1.msra.mxu0 %v10114_v48  ;;  %2891 = vmatpush1.msra.mxu1 %v10115_v59  ;;  %v10125_v59 = vld [vmem:[#allocation67_spill] sm:$0xff] }
 0x27c   :  { %2843 = vmatprep.subr.mxu0 %v10116_v1  ;;  %2914 = vmatprep.subr.mxu1 %v10117_v6 }
 0x27d   :  { %2844 = vmatpush2.msra.mxu0 %v10118_v29  ;;  %2915 = vmatpush2.msra.mxu1 %v10119_v30  ;;  %v2781_v6 = vpop.permute.xlu1 %2780 }
 0x27e   :  { %2845 = vmatprep.subr.mxu0 %v10120_v22  ;;  %2916 = vmatprep.subr.mxu1 %v10121_v27  ;;  %v2783_v29 = vpop.permute.xlu0 %2782  ;;  %v10126_v22 = vld [vmem:[#allocation68_spill] sm:$0xff] }
 0x27f   :  { %2846 = vmatpush2.msra.mxu0 %v10122_v28  ;;  %2917 = vmatpush2.msra.mxu1 %v10123_v10 }
 0x280   :  { %2847 = vmatprep.subr.mxu0 %v10124_v14  ;;  %2918 = vmatprep.subr.mxu1 %v9114_v57  ;;  %v2785_v57 = vsel %vm2784_vm10, %v2781_v6, %v2783_v29 }
 0x281   :  { %2848 = vmatpush2.msra.mxu0 %v10125_v59  ;;  %2919 = vmatpush2.msra.mxu1 %v9120_v34 }
 0x282   :  { %2849 = vmatprep.subr.mxu0 %v9124_v16  ;;  %2920 = vmatprep.subr.mxu1 %v10126_v22 }
 0x283   :  { %2850 = vmatpush2.msra.mxu0 %v9131_v18  ;;  %2921 = vmatpush2.msra.mxu1 %v9135_v7 }
 0x284   :  { %2851 = vmatprep.subr.mxu0 %v9139_v49  ;;  %2922 = vmatprep.subr.mxu1 %v9141_v15 }
 0x285   :  { %2852 = vmatpush2.msra.mxu0 %v9145_v50  ;;  %6970 = vmatprep.mubr.msk.f32.mxu0 %vm250_vm0, %v2783_v29 }
 0x286   :  { %2923 = vmatpush2.msra.mxu1 %v9147_v32  ;;  %6971 = vmatprep.mubr.msk.f32.mxu1 %vm250_vm0, %v2783_v29 }
 0x287   :  { %2854 = vmatmul.mubr.f32.vlgmr.msra.gmra.mxu0 %v2785_v57  ;;  %2925 = vmatmul.mubr.f32.vlgmr.msra.gmra.mxu1 %v2785_v57  ;;  %v9252_v57 = vpop.f32.mrf.mxu0 }
 0x288   :  { %3046 = vmatprep.subr.mxu0 %v8882_v12  ;;  %3117 = vmatprep.subr.mxu1 %v8886_v35  ;;  %v9254_v12 = vpop.f32.mrf.mxu1 }
 0x289   :  { %3047 = vmatpush1.msra.mxu0 %v8888_v36  ;;  %3118 = vmatpush1.msra.mxu1 %v8891_v37  ;;  %v9264_v35 = vpop.f32.mrf.mxu0 }
 0x28a   :  { %3048 = vmatprep.subr.mxu0 %v8893_v38  ;;  %3119 = vmatprep.subr.mxu1 %v8896_v39  ;;  %v9266_v36 = vpop.f32.mrf.mxu1 }
 0x28b   :  { %3049 = vmatpush1.msra.mxu0 %v8900_v40  ;;  %3120 = vmatpush1.msra.mxu1 %v8902_v41 }
 0x28c   :  { %3050 = vmatprep.subr.mxu0 %v8906_v42  ;;  %3121 = vmatprep.subr.mxu1 %v8908_v43 }
 0x28d   :  { %3051 = vmatpush1.msra.mxu0 %v8912_v44  ;;  %3122 = vmatpush1.msra.mxu1 %v8914_v45  ;;  %v10127_v44 = vld [vmem:[#allocation37_spill] sm:$0xff]  ;;  %v10128_v45 = vld [vmem:[#allocation38_spill] sm:$0xff] }
 0x28e   :  { %3052 = vmatprep.subr.mxu0 %v8918_v46  ;;  %3123 = vmatprep.subr.mxu1 %v8920_v47  ;;  %v10129_v46 = vld [vmem:[#allocation39_spill] sm:$0xff]  ;;  %v10130_v47 = vld [vmem:[#allocation44_spill] sm:$0xff] }
 0x28f   :  { %3053 = vmatpush1.msra.mxu0 %v8933_v51  ;;  %3124 = vmatpush1.msra.mxu1 %v8935_v52  ;;  %v10131_v51 = vld [vmem:[#allocation45_spill] sm:$0xff]  ;;  %v10132_v52 = vld [vmem:[#allocation46_spill] sm:$0xff] }
 0x290   :  { %3054 = vmatprep.subr.mxu0 %v8939_v53  ;;  %3125 = vmatprep.subr.mxu1 %v8941_v54  ;;  %v10133_v53 = vld [vmem:[#allocation48_spill] sm:$0xff]  ;;  %v10134_v54 = vld [vmem:[#allocation59_spill] sm:$0xff] }
 0x291   :  { %3055 = vmatpush1.msra.mxu0 %v8944_v55  ;;  %3126 = vmatpush1.msra.mxu1 %v8946_v56  ;;  %v10135_v55 = vld [vmem:[#allocation60_spill] sm:$0xff]  ;;  %v10136_v56 = vld [vmem:[#allocation61_spill] sm:$0xff] }
 0x292   :  { %3056 = vmatprep.subr.mxu0 %v8954_v60  ;;  %3127 = vmatprep.subr.mxu1 %v8956_v61  ;;  %v10137_v60 = vld [vmem:[#allocation47_spill] sm:$0xff]  ;;  %v10138_v61 = vld [vmem:[#allocation49_spill] sm:$0xff] }
 0x293   :  { %3057 = vmatpush1.msra.mxu0 %v8960_v62  ;;  %3128 = vmatpush1.msra.mxu1 %v8962_v2  ;;  %v1842_v37 = vpop.f32.mrf.mxu0  ;;  %v1913_v38 = vpop.f32.mrf.mxu1  ;;  %v10139_v62 = vld [vmem:[#allocation50_spill] sm:$0xff]  ;;  %v10140_v2 = vld [vmem:[#allocation51_spill] sm:$0xff] }
 0x294   :  { %3058 = vmatprep.subr.mxu0 %v8966_v58  ;;  %3129 = vmatprep.subr.mxu1 %v8968_v31  ;;  %v10141_v58 = vld [vmem:[#allocation52_spill] sm:$0xff]  ;;  %v10142_v31 = vld [vmem:[#allocation53_spill] sm:$0xff] }
 0x295   :  { %3059 = vmatpush1.msra.mxu0 %v8972_v63  ;;  %3130 = vmatpush1.msra.mxu1 %v8974_v0  ;;  %v1844_v39 = vpop.f32.mrf.mxu0  ;;  %v1915_v40 = vpop.f32.mrf.mxu1  ;;  %v10143_v63 = vld [vmem:[#allocation54_spill] sm:$0xff]  ;;  %v10144_v0 = vld [vmem:[#allocation55_spill] sm:$0xff] }
 0x296   :  { %3060 = vmatprep.subr.mxu0 %v8978_v33  ;;  %3131 = vmatprep.subr.mxu1 %v8980_v3  ;;  %v1918_v41 = vmax.f32 %v1842_v37, %v1844_v39  ;;  %v1919_v42 = vmax.f32 %v1913_v38, %v1915_v40  ;;  %v10145_v33 = vld [vmem:[#allocation43_spill] sm:$0xff]  ;;  %v10146_v3 = vld [vmem:[#allocation40_spill] sm:$0xff]  ;;  %v10157_v38 = vld [vmem:[#allocation66_spill] sm:$0xff] }
 0x297   :  { %3061 = vmatpush1.msra.mxu0 %v8984_v4  ;;  %3132 = vmatpush1.msra.mxu1 %v8986_v5  ;;  %v648_v4 = vmax.f32 %v10146_v3, %v10145_v33  ;;  %v10147_v5 = vld [vmem:[#allocation62_spill] sm:$0xff]  ;;  %v3263_v40 = vld [vmem:[#allocation8 + $0x1c0] sm:$0xff] }
 0x298   :  { %3062 = vmatprep.subr.mxu0 %v8990_v8  ;;  %3133 = vmatprep.subr.mxu1 %v8992_v9  ;;  %v9284_v43 = vmax.f32 %v1918_v41, %v1919_v42  ;;  %v10148_v8 = vld [vmem:[#allocation42_spill] sm:$0xff]  ;;  %v3259_v42 = vld [vmem:[#allocation8 + $0x1a0] sm:$0xff] }
 0x299   :  { %3063 = vmatpush1.msra.mxu0 %v8996_v11  ;;  %3134 = vmatpush1.msra.mxu1 %v8998_v13  ;;  %v649_v9 = vmax.f32 %v10148_v8, %v10147_v5  ;;  %v10149_v11 = vld [vmem:[#allocation57_spill] sm:$0xff]  ;;  %v3388_v41 = vld [vmem:[#allocation8 + $0x5a8] sm:$0xff] }
 0x29a   :  { %3064 = vmatprep.subr.mxu0 %v9004_v17  ;;  %3135 = vmatprep.subr.mxu1 %v9006_v19  ;;  %v10150_v13 = vld [vmem:[#allocation33_spill] sm:$0xff]  ;;  %v10151_v17 = vld [vmem:[#allocation26_spill] sm:$0xff] }
 0x29b   :  { %3065 = vmatpush1.msra.mxu0 %v9010_v20  ;;  %3136 = vmatpush1.msra.mxu1 %v9012_v21  ;;  %v1157_v19 = vmax.f32 %v10151_v17, %v10150_v13  ;;  %v10152_v20 = vld [vmem:[#allocation34_spill] sm:$0xff]  ;;  %v10153_v21 = vld [vmem:[#allocation32_spill] sm:$0xff]  ;;  %v650_v6 = vmax.f32 %v648_v4, %v649_v9  ;;  %v3239_v3 = vld [vmem:[#allocation8 + $0x100] sm:$0xff] }
 0x29c   :  { %3066 = vmatprep.subr.mxu0 %v9016_v23  ;;  %3137 = vmatprep.subr.mxu1 %v9018_v24  ;;  %v1158_v23 = vmax.f32 %v10153_v21, %v10152_v20  ;;  %v10154_v24 = vld [vmem:[#allocation27_spill] sm:$0xff]  ;;  %v3368_v33 = vld [vmem:[#allocation8 + $0x508] sm:$0xff]  ;;  %v3367_v4 = vld [vmem:[#allocation8 + $0x500] sm:$0xff] }
 0x29d   :  { %3067 = vmatpush1.msra.mxu0 %v9022_v25  ;;  %3138 = vmatpush1.msra.mxu1 %v9024_v26  ;;  %v10155_v26 = vld [vmem:[#allocation28_spill] sm:$0xff]  ;;  %v3236_v5 = vld [vmem:[#allocation8 + $0xe8] sm:$0xff]  ;;  %v3235_v9 = vld [vmem:[#allocation8 + $0xe0] sm:$0xff] }
 0x29e   :  { %3068 = vmatprep.subr.mxu0 %v10127_v44  ;;  %3139 = vmatprep.subr.mxu1 %v10128_v45  ;;  %v1159_v37 = vmax.f32 %v1157_v19, %v1158_v23  ;;  %v3387_v44 = vld [vmem:[#allocation8 + $0x5a0] sm:$0xff]  ;;  %v3256_v45 = vld [vmem:[#allocation8 + $0x188] sm:$0xff] }
 0x29f   :  { %3069 = vmatpush1.msra.mxu0 %v10129_v46  ;;  %3140 = vmatpush1.msra.mxu1 %v10130_v47  ;;  %v3384_v46 = vld [vmem:[#allocation8 + $0x588] sm:$0xff]  ;;  %v3255_v47 = vld [vmem:[#allocation8 + $0x180] sm:$0xff] }
 0x2a0   :  { %3070 = vmatprep.subr.mxu0 %v10131_v51  ;;  %3141 = vmatprep.subr.mxu1 %v10132_v52  ;;  %v3383_v51 = vld [vmem:[#allocation8 + $0x580] sm:$0xff]  ;;  %v3252_v52 = vld [vmem:[#allocation8 + $0x168] sm:$0xff] }
 0x2a1   :  { %3071 = vmatpush1.msra.mxu0 %v10133_v53  ;;  %3142 = vmatpush1.msra.mxu1 %v10134_v54  ;;  %v3380_v53 = vld [vmem:[#allocation8 + $0x568] sm:$0xff]  ;;  %v3251_v54 = vld [vmem:[#allocation8 + $0x160] sm:$0xff] }
 0x2a2   :  { %3072 = vmatprep.subr.mxu0 %v10135_v55  ;;  %3143 = vmatprep.subr.mxu1 %v10136_v56  ;;  %v3379_v55 = vld [vmem:[#allocation8 + $0x560] sm:$0xff]  ;;  %v3248_v56 = vld [vmem:[#allocation8 + $0x148] sm:$0xff] }
 0x2a3   :  { %3073 = vmatpush1.msra.mxu0 %v10137_v60  ;;  %3144 = vmatpush1.msra.mxu1 %v10138_v61  ;;  %v3037_v25 = vpop.permute.xlu1 %3036  ;;  %v3376_v60 = vld [vmem:[#allocation8 + $0x548] sm:$0xff]  ;;  %v3247_v61 = vld [vmem:[#allocation8 + $0x140] sm:$0xff] }
 0x2a4   :  { %3074 = vmatprep.subr.mxu0 %v10139_v62  ;;  %3145 = vmatprep.subr.mxu1 %v10140_v2  ;;  %v3375_v62 = vld [vmem:[#allocation8 + $0x540] sm:$0xff]  ;;  %v3244_v2 = vld [vmem:[#allocation8 + $0x128] sm:$0xff] }
 0x2a5   :  { %3075 = vmatpush1.msra.mxu0 %v10141_v58  ;;  %3146 = vmatpush1.msra.mxu1 %v10142_v31  ;;  %v3372_v58 = vld [vmem:[#allocation8 + $0x528] sm:$0xff]  ;;  %v3243_v31 = vld [vmem:[#allocation8 + $0x120] sm:$0xff] }
 0x2a6   :  { %3076 = vmatprep.subr.mxu0 %v10143_v63  ;;  %3147 = vmatprep.subr.mxu1 %v10144_v0  ;;  %v3371_v63 = vld [vmem:[#allocation8 + $0x520] sm:$0xff]  ;;  %v3240_v0 = vld [vmem:[#allocation8 + $0x108] sm:$0xff] }
 0x2a7   :  { %3077 = vmatpush1.msra.mxu0 %v10114_v48  ;;  %3148 = vmatpush1.msra.mxu1 %v10149_v11  ;;  %v10156_v48 = vld [vmem:[#allocation30_spill] sm:$0xff]  ;;  %v3363_v11 = vld [vmem:[#allocation8 + $0x4e0] sm:$0xff] }
 0x2a8   :  { %3100 = vmatprep.subr.mxu0 %v10116_v1  ;;  %3171 = vmatprep.subr.mxu1 %v10154_v24  ;;  %v3039_v29 = vpop.permute.xlu0 %3038  ;;  %v6960_v1 = vld [vmem:[#allocation6] ss:$0 sm:$0xff]  ;;  %v3364_v8 = vld [vmem:[#allocation8 + $0x4e8] sm:$0xff]  ;;  %v3231_v19 = vld [vmem:[#allocation8 + $0xc0] sm:$0xff] }
 0x2a9   :  { %3101 = vmatpush2.msra.mxu0 %v10155_v26  ;;  %3172 = vmatpush2.msra.mxu1 %v10119_v30  ;;  %v3042_v39 = vsel %vm3040_vm11, %v3037_v25, %v3039_v29  ;;  %v9335_v30 = vld [vmem:[#allocation6] ss:$0 sm:$0xff]  ;;  %v3232_v13 = vld [vmem:[#allocation8 + $0xc8] sm:$0xff]  ;;  %v3359_v20 = vld [vmem:[#allocation8 + $0x4c0] sm:$0xff] }
 0x2aa   :  { %3102 = vmatprep.subr.mxu0 %v10156_v48  ;;  %3173 = vmatprep.subr.mxu1 %v10121_v27  ;;  %v3035_v27 = vpop.permute.xlu1 %3034  ;;  %v3360_v17 = vld [vmem:[#allocation8 + $0x4c8] sm:$0xff]  ;;  %v3227_v24 = vld [vmem:[#allocation8 + $0xa0] sm:$0xff] }
 0x2ab   :  { %3103 = vmatpush2.msra.mxu0 %v10122_v28  ;;  %3174 = vmatpush2.msra.mxu1 %v10123_v10  ;;  %v9343_v28 = vadd.f32 %v6960_v1, %v650_v6  ;;  %v1167_v10 = vadd.f32 %v9335_v30, %v1159_v37  ;;  %v3228_v21 = vld [vmem:[#allocation8 + $0xa8] sm:$0xff]  ;;  %v3223_v48 = vld [vmem:[#allocation8 + $0x80] sm:$0xff] }
 0x2ac   :  { %3104 = vmatprep.subr.mxu0 %v10124_v14  ;;  %3175 = vmatprep.subr.mxu1 %v10157_v38  ;;  %v3268_v14 = vld [vmem:[#allocation8 + $0x1e8] sm:$0xff]  ;;  %v3351_v6 = vld [vmem:[#allocation8 + $0x480] sm:$0xff] }
 0x2ad   :  { %3105 = vmatpush2.msra.mxu0 %v10125_v59  ;;  %3176 = vmatpush2.msra.mxu1 %v9120_v34  ;;  %v3396_v34 = vld [vmem:[#allocation8 + $0x5e8] sm:$0xff]  ;;  %v9354_v59 = vmax.f32 %v1167_v10, 0.0  ;;  %v3219_v38 = vld [vmem:[#allocation8 + $0x60] sm:$0xff] }
 0x2ae   :  { %3106 = vmatprep.subr.mxu0 %v9124_v16  ;;  %3177 = vmatprep.subr.mxu1 %v10126_v22  ;;  %v3041_v22 = vsel %vm3040_vm11, %v3035_v27, %v3037_v25  ;;  %v659_v16 = vmax.f32 %v9343_v28, 0.0  ;;  %v3356_v23 = vld [vmem:[#allocation8 + $0x4a8] sm:$0xff]  ;;  %v3355_v25 = vld [vmem:[#allocation8 + $0x4a0] sm:$0xff] }
 0x2af   :  { %3107 = vmatpush2.msra.mxu0 %v9131_v18  ;;  %6973 = vmatprep.mubr.msk.f32.mxu0 %vm250_vm0, %v3042_v39  ;;  %v3267_v18 = vld [vmem:[#allocation8 + $0x1e0] sm:$0xff]  ;;  %v3224_v26 = vld [vmem:[#allocation8 + $0x88] sm:$0xff] }
 0x2b0   :  { %3178 = vmatpush2.msra.mxu1 %v9135_v7  ;;  %6974 = vmatprep.mubr.msk.f32.mxu1 %vm250_vm0, %v3042_v39  ;;  %v3395_v7 = vld [vmem:[#allocation8 + $0x5e0] sm:$0xff]  ;;  %v3352_v29 = vld [vmem:[#allocation8 + $0x488] sm:$0xff] }
 0x2b1   :  { %3108 = vmatprep.subr.mxu0 %v9139_v49  ;;  %3179 = vmatprep.subr.mxu1 %v9141_v15  ;;  %v3264_v49 = vld [vmem:[#allocation8 + $0x1c8] sm:$0xff]  ;;  %v3347_v39 = vld [vmem:[#allocation8 + $0x460] sm:$0xff] }
 0x2b2   :  { %3109 = vmatpush2.msra.mxu0 %v9145_v50  ;;  %3180 = vmatpush2.msra.mxu1 %v9147_v32  ;;  %v3392_v15 = vld [vmem:[#allocation8 + $0x5c8] sm:$0xff]  ;;  %v3391_v50 = vld [vmem:[#allocation8 + $0x5c0] sm:$0xff] }
 0x2b3   :  { %3111 = vmatmul.mubr.f32.vlgmr.msra.gmra.mxu0 %v3041_v22  ;;  %3182 = vmatmul.mubr.f32.vlgmr.msra.gmra.mxu1 %v3041_v22  ;;  %v3260_v32 = vld [vmem:[#allocation8 + $0x1a8] sm:$0xff]  ;;  %v3507_v28 = vld [vmem:[#allocation8 + $0x960] sm:$0xff] }
 0x2b4   :  { %3591 = vmatprep.subr.mxu0 %v3268_v14  ;;  %3662 = vmatprep.subr.mxu1 %v3396_v34  ;;  %v3220_v37 = vld [vmem:[#allocation8 + $0x68] sm:$0xff]  ;;  %v3215_v14 = vld [vmem:[#allocation8 + $0x40] sm:$0xff] }
 0x2b5   :  { %3592 = vmatpush1.msra.mxu0 %v3267_v18  ;;  %3655 = vmatprep.mubr.f32.mxu0 %v659_v16  ;;  %v3348_v1 = vld [vmem:[#allocation8 + $0x468] sm:$0xff]  ;;  %v3343_v34 = vld [vmem:[#allocation8 + $0x440] sm:$0xff] }
 0x2b6   :  { %3663 = vmatpush1.msra.mxu1 %v3395_v7  ;;  %3726 = vmatprep.mubr.f32.mxu1 %v9354_v59  ;;  %v3216_v27 = vld [vmem:[#allocation8 + $0x48] sm:$0xff]  ;;  %v3211_v7 = vld [vmem:[#allocation8 + $0x20] sm:$0xff] }
 0x2b7   :  { %3593 = vmatprep.subr.mxu0 %v3264_v49  ;;  %3664 = vmatprep.subr.mxu1 %v3392_v15  ;;  %v3344_v10 = vld [vmem:[#allocation8 + $0x448] sm:$0xff]  ;;  %v3339_v49 = vld [vmem:[#allocation8 + $0x420] sm:$0xff] }
 0x2b8   :  { %3594 = vmatpush1.msra.mxu0 %v3263_v40  ;;  %3665 = vmatpush1.msra.mxu1 %v3391_v50  ;;  %v3212_v22 = vld [vmem:[#allocation8 + $0x28] sm:$0xff]  ;;  %v3207_v50 = vld [vmem:[#allocation8] sm:$0xff] }
 0x2b9   :  { %3595 = vmatprep.subr.mxu0 %v3260_v32  ;;  %3666 = vmatprep.subr.mxu1 %v3388_v41  ;;  %v3340_v18 = vld [vmem:[#allocation8 + $0x428] sm:$0xff]  ;;  %v3335_v32 = vld [vmem:[#allocation8 + $0x400] sm:$0xff] }
 0x2ba   :  { %3596 = vmatpush1.msra.mxu0 %v3259_v42  ;;  %3667 = vmatpush1.msra.mxu1 %v3387_v44  ;;  %v3208_v15 = vld [vmem:[#allocation8 + $0x8] sm:$0xff]  ;;  %v3331_v44 = vld [vmem:[#allocation8 + $0x3e0] sm:$0xff] }
 0x2bb   :  { %3597 = vmatprep.subr.mxu0 %v3256_v45  ;;  %3668 = vmatprep.subr.mxu1 %v3384_v46  ;;  %v3336_v40 = vld [vmem:[#allocation8 + $0x408] sm:$0xff]  ;;  %v3459_v45 = vld [vmem:[#allocation8 + $0x7e0] sm:$0xff] }
 0x2bc   :  { %3598 = vmatpush1.msra.mxu0 %v3255_v47  ;;  %3669 = vmatpush1.msra.mxu1 %v3383_v51  ;;  %v3332_v41 = vld [vmem:[#allocation8 + $0x3e8] sm:$0xff]  ;;  %v3327_v51 = vld [vmem:[#allocation8 + $0x3c0] sm:$0xff] }
 0x2bd   :  { %3599 = vmatprep.subr.mxu0 %v3252_v52  ;;  %3670 = vmatprep.subr.mxu1 %v3380_v53  ;;  %v3460_v42 = vld [vmem:[#allocation8 + $0x7e8] sm:$0xff]  ;;  %v3455_v52 = vld [vmem:[#allocation8 + $0x7c0] sm:$0xff] }
 0x2be   :  { %3600 = vmatpush1.msra.mxu0 %v3251_v54  ;;  %3671 = vmatpush1.msra.mxu1 %v3379_v55  ;;  %v3328_v46 = vld [vmem:[#allocation8 + $0x3c8] sm:$0xff]  ;;  %v3323_v55 = vld [vmem:[#allocation8 + $0x3a0] sm:$0xff] }
 0x2bf   :  { %3601 = vmatprep.subr.mxu0 %v3248_v56  ;;  %3672 = vmatprep.subr.mxu1 %v3376_v60  ;;  %v3456_v47 = vld [vmem:[#allocation8 + $0x7c8] sm:$0xff]  ;;  %v3451_v56 = vld [vmem:[#allocation8 + $0x7a0] sm:$0xff] }
 0x2c0   :  { %3602 = vmatpush1.msra.mxu0 %v3247_v61  ;;  %3673 = vmatpush1.msra.mxu1 %v3375_v62  ;;  %v3324_v53 = vld [vmem:[#allocation8 + $0x3a8] sm:$0xff]  ;;  %v3319_v62 = vld [vmem:[#allocation8 + $0x380] sm:$0xff] }
 0x2c1   :  { %3603 = vmatprep.subr.mxu0 %v3244_v2  ;;  %3674 = vmatprep.subr.mxu1 %v3372_v58  ;;  %v3452_v54 = vld [vmem:[#allocation8 + $0x7a8] sm:$0xff]  ;;  %v3447_v2 = vld [vmem:[#allocation8 + $0x780] sm:$0xff] }
 0x2c2   :  { %3604 = vmatpush1.msra.mxu0 %v3243_v31  ;;  %3675 = vmatpush1.msra.mxu1 %v3371_v63  ;;  %v3320_v60 = vld [vmem:[#allocation8 + $0x388] sm:$0xff]  ;;  %v3315_v63 = vld [vmem:[#allocation8 + $0x360] sm:$0xff] }
 0x2c3   :  { %3605 = vmatprep.subr.mxu0 %v3240_v0  ;;  %3676 = vmatprep.subr.mxu1 %v3368_v33  ;;  %v3448_v61 = vld [vmem:[#allocation8 + $0x788] sm:$0xff]  ;;  %v3443_v0 = vld [vmem:[#allocation8 + $0x760] sm:$0xff] }
 0x2c4   :  { %3606 = vmatpush1.msra.mxu0 %v3239_v3  ;;  %3677 = vmatpush1.msra.mxu1 %v3367_v4  ;;  %v3316_v58 = vld [vmem:[#allocation8 + $0x368] sm:$0xff]  ;;  %v3311_v4 = vld [vmem:[#allocation8 + $0x340] sm:$0xff] }
 0x2c5   :  { %3607 = vmatprep.subr.mxu0 %v3236_v5  ;;  %3678 = vmatprep.subr.mxu1 %v3364_v8  ;;  %v3444_v31 = vld [vmem:[#allocation8 + $0x768] sm:$0xff]  ;;  %v3439_v5 = vld [vmem:[#allocation8 + $0x740] sm:$0xff] }
 0x2c6   :  { %3608 = vmatpush1.msra.mxu0 %v3235_v9  ;;  %3679 = vmatpush1.msra.mxu1 %v3363_v11  ;;  %v3312_v33 = vld [vmem:[#allocation8 + $0x348] sm:$0xff]  ;;  %v3307_v11 = vld [vmem:[#allocation8 + $0x320] sm:$0xff] }
 0x2c7   :  { %3609 = vmatprep.subr.mxu0 %v3232_v13  ;;  %3680 = vmatprep.subr.mxu1 %v3360_v17  ;;  %v3440_v3 = vld [vmem:[#allocation8 + $0x748] sm:$0xff]  ;;  %v3435_v13 = vld [vmem:[#allocation8 + $0x720] sm:$0xff] }
 0x2c8   :  { %3610 = vmatpush1.msra.mxu0 %v3231_v19  ;;  %3681 = vmatpush1.msra.mxu1 %v3359_v20  ;;  %v3308_v8 = vld [vmem:[#allocation8 + $0x328] sm:$0xff]  ;;  %v3303_v20 = vld [vmem:[#allocation8 + $0x300] sm:$0xff] }
 0x2c9   :  { %3611 = vmatprep.subr.mxu0 %v3228_v21  ;;  %3682 = vmatprep.subr.mxu1 %v3356_v23  ;;  %v3436_v9 = vld [vmem:[#allocation8 + $0x728] sm:$0xff]  ;;  %v3431_v21 = vld [vmem:[#allocation8 + $0x700] sm:$0xff] }
 0x2ca   :  { %3612 = vmatpush1.msra.mxu0 %v3227_v24  ;;  %3683 = vmatpush1.msra.mxu1 %v3355_v25  ;;  %v3304_v17 = vld [vmem:[#allocation8 + $0x308] sm:$0xff]  ;;  %v3299_v25 = vld [vmem:[#allocation8 + $0x2e0] sm:$0xff] }
 0x2cb   :  { %3613 = vmatprep.subr.mxu0 %v3224_v26  ;;  %3684 = vmatprep.subr.mxu1 %v3352_v29  ;;  %v3432_v19 = vld [vmem:[#allocation8 + $0x708] sm:$0xff]  ;;  %v3427_v26 = vld [vmem:[#allocation8 + $0x6e0] sm:$0xff] }
 0x2cc   :  { %3614 = vmatpush1.msra.mxu0 %v3223_v48  ;;  %3685 = vmatpush1.msra.mxu1 %v3351_v6  ;;  %v3300_v23 = vld [vmem:[#allocation8 + $0x2e8] sm:$0xff]  ;;  %v3295_v6 = vld [vmem:[#allocation8 + $0x2c0] sm:$0xff] }
 0x2cd   :  { %3615 = vmatprep.subr.mxu0 %v3220_v37  ;;  %3686 = vmatprep.subr.mxu1 %v3348_v1  ;;  %v3428_v24 = vld [vmem:[#allocation8 + $0x6e8] sm:$0xff]  ;;  %v3423_v37 = vld [vmem:[#allocation8 + $0x6c0] sm:$0xff] }
 0x2ce   :  { %3616 = vmatpush1.msra.mxu0 %v3219_v38  ;;  %3687 = vmatpush1.msra.mxu1 %v3347_v39  ;;  %v3296_v29 = vld [vmem:[#allocation8 + $0x2c8] sm:$0xff]  ;;  %v9359_v39 = vpop.f32.mrf.mxu0 }
 0x2cf   :  { %3617 = vmatprep.subr.mxu0 %v3216_v27  ;;  %3688 = vmatprep.subr.mxu1 %v3344_v10  ;;  %v3424_v48 = vld [vmem:[#allocation8 + $0x6c8] sm:$0xff]  ;;  %v3291_v27 = vld [vmem:[#allocation8 + $0x2a0] sm:$0xff] }
 0x2d0   :  { %3618 = vmatpush1.msra.mxu0 %v3215_v14  ;;  %3689 = vmatpush1.msra.mxu1 %v3343_v34  ;;  %v3292_v1 = vld [vmem:[#allocation8 + $0x2a8] sm:$0xff]  ;;  %v3419_v10 = vld [vmem:[#allocation8 + $0x6a0] sm:$0xff]  ;;  %v9361_v14 = vpop.f32.mrf.mxu1 }
 0x2d1   :  { %3619 = vmatprep.subr.mxu0 %v3212_v22  ;;  %3690 = vmatprep.subr.mxu1 %v3340_v18  ;;  %v3420_v38 = vld [vmem:[#allocation8 + $0x6a8] sm:$0xff]  ;;  %v1666_v18 = vmax.f32 %v9252_v57, %v9264_v35 }
 0x2d2   :  { %3620 = vmatpush1.msra.mxu0 %v3211_v7  ;;  %3691 = vmatpush1.msra.mxu1 %v3339_v49  ;;  %v3288_v34 = vld [vmem:[#allocation8 + $0x288] sm:$0xff]  ;;  %v1667_v7 = vmax.f32 %v9254_v12, %v9266_v36  ;;  %v3287_v49 = vld [vmem:[#allocation8 + $0x280] sm:$0xff] }
 0x2d3   :  { %3621 = vmatprep.subr.mxu0 %v3208_v15  ;;  %3692 = vmatprep.subr.mxu1 %v3336_v40  ;;  %v3416_v22 = vld [vmem:[#allocation8 + $0x688] sm:$0xff]  ;;  %v3415_v15 = vld [vmem:[#allocation8 + $0x680] sm:$0xff] }
 0x2d4   :  { %3622 = vmatpush1.msra.mxu0 %v3207_v50  ;;  %3693 = vmatpush1.msra.mxu1 %v3335_v32  ;;  %v3284_v40 = vld [vmem:[#allocation8 + $0x268] sm:$0xff]  ;;  %v9367_v32 = vpop.f32.mrf.mxu0  ;;  %v1668_v35 = vmax.f32 %v1666_v18, %v1667_v7  ;;  %v3279_v36 = vld [vmem:[#allocation8 + $0x240] sm:$0xff]  ;;  %v3250_v18 = vld [vmem:[#allocation8 + $0x158] sm:$0xff] }
 0x2d5   :  { %3623 = vmatprep.subr.mxu0 %v3332_v41  ;;  %3694 = vmatprep.subr.mxu1 %v3460_v42  ;;  %v3412_v50 = vld [vmem:[#allocation8 + $0x668] sm:$0xff]  ;;  %v3283_v41 = vld [vmem:[#allocation8 + $0x260] sm:$0xff] }
 0x2d6   :  { %3624 = vmatpush2.msra.mxu0 %v3331_v44  ;;  %3695 = vmatpush2.msra.mxu1 %v3459_v45  ;;  %v3411_v42 = vld [vmem:[#allocation8 + $0x660] sm:$0xff]  ;;  %v6942_v44 = vld [vmem:[#allocation6] ss:$0 sm:$0xff]  ;;  %v9369_v45 = vpop.f32.mrf.mxu1  ;;  %v3280_v57 = vld [vmem:[#allocation8 + $0x248] sm:$0xff] }
 0x2d7   :  { %3625 = vmatprep.subr.mxu0 %v3328_v46  ;;  %3696 = vmatprep.subr.mxu1 %v3456_v47  ;;  %v3408_v12 = vld [vmem:[#allocation8 + $0x648] sm:$0xff]  ;;  %v3407_v46 = vld [vmem:[#allocation8 + $0x640] sm:$0xff] }
 0x2d8   :  { %3626 = vmatpush2.msra.mxu0 %v3327_v51  ;;  %3697 = vmatpush2.msra.mxu1 %v3455_v52  ;;  %v3276_v51 = vld [vmem:[#allocation8 + $0x228] sm:$0xff]  ;;  %v3503_v7 = vld [vmem:[#allocation8 + $0x940] sm:$0xff] }
 0x2d9   :  { %3627 = vmatprep.subr.mxu0 %v3324_v53  ;;  %3698 = vmatprep.subr.mxu1 %v3452_v54  ;;  %v3404_v52 = vld [vmem:[#allocation8 + $0x628] sm:$0xff]  ;;  %v10158_v54 = vld [vmem:[#allocation41_spill] sm:$0xff] }
 0x2da   :  { %3628 = vmatpush2.msra.mxu0 %v3323_v55  ;;  %3699 = vmatpush2.msra.mxu1 %v3451_v56  ;;  %v9372_v55 = vadd.f32 %v6942_v44, %v10158_v54  ;;  %v10159_v56 = vld [vmem:[#allocation63_spill] sm:$0xff] }
 0x2db   :  { %3629 = vmatprep.subr.mxu0 %v3320_v60  ;;  %3700 = vmatprep.subr.mxu1 %v3448_v61  ;;  %v915_v60 = vadd.f32 %v6942_v44, %v10159_v56  ;;  %v3275_v61 = vld [vmem:[#allocation8 + $0x220] sm:$0xff]  ;;  %v3242_v44 = vld [vmem:[#allocation8 + $0x118] sm:$0xff]  ;;  %v3233_v54 = vld [vmem:[#allocation8 + $0xd0] sm:$0xff] }
 0x2dc   :  { %3630 = vmatpush2.msra.mxu0 %v3319_v62  ;;  %3701 = vmatpush2.msra.mxu1 %v3447_v2  ;;  %v3403_v62 = vld [vmem:[#allocation8 + $0x620] sm:$0xff]  ;;  %v3484_v56 = vld [vmem:[#allocation8 + $0x8a8] sm:$0xff] }
 0x2dd   :  { %3631 = vmatprep.subr.mxu0 %v3316_v58  ;;  %3702 = vmatprep.subr.mxu1 %v3444_v31  ;;  %v3272_v58 = vld [vmem:[#allocation8 + $0x208] sm:$0xff] }
 0x2de   :  { %3632 = vmatpush2.msra.mxu0 %v3315_v63  ;;  %3703 = vmatpush2.msra.mxu1 %v3443_v0  ;;  %v3400_v31 = vld [vmem:[#allocation8 + $0x608] sm:$0xff] }
 0x2df   :  { %3633 = vmatprep.subr.mxu0 %v3312_v33  ;;  %3704 = vmatprep.subr.mxu1 %v3440_v3  ;;  %v1676_v33 = vadd.f32 %v9335_v30, %v1668_v35  ;;  %v3271_v3 = vld [vmem:[#allocation8 + $0x200] sm:$0xff]  ;;  %v3492_v35 = vld [vmem:[#allocation8 + $0x8e8] sm:$0xff] }
 0x2e0   :  { %3634 = vmatpush2.msra.mxu0 %v3311_v4  ;;  %3705 = vmatpush2.msra.mxu1 %v3439_v5  ;;  %v3399_v4 = vld [vmem:[#allocation8 + $0x600] sm:$0xff] }
 0x2e1   :  { %3635 = vmatprep.subr.mxu0 %v3308_v8  ;;  %3706 = vmatprep.subr.mxu1 %v3436_v9  ;;  %v407_v8 = vmax.f32 %v9372_v55, 0.0  ;;  %v9377_v9 = vmax.f32 %v915_v60, 0.0  ;;  %v3523_v30 = vld [vmem:[#allocation8 + $0x9e0] sm:$0xff]  ;;  %v3230_v60 = vld [vmem:[#allocation8 + $0xb8] sm:$0xff]  ;;  %v3517_v55 = vld [vmem:[#allocation8 + $0x9b0] sm:$0xff] }
 0x2e2   :  { %3636 = vmatpush2.msra.mxu0 %v3307_v11  ;;  %3707 = vmatpush2.msra.mxu1 %v3435_v13  ;;  %v3524_v11 = vld [vmem:[#allocation8 + $0x9e8] sm:$0xff]  ;;  %v3270_v13 = vld [vmem:[#allocation8 + $0x1f8] sm:$0xff] }
 0x2e3   :  { %3637 = vmatprep.subr.mxu0 %v3304_v17  ;;  %3708 = vmatprep.subr.mxu1 %v3432_v19  ;;  %v9381_v19 = vmax.f32 %v1676_v33, 0.0  ;;  %v3222_v33 = vld [vmem:[#allocation8 + $0x78] sm:$0xff] }
 0x2e4   :  { %3638 = vmatpush2.msra.mxu0 %v3303_v20  ;;  %3709 = vmatpush2.msra.mxu1 %v3431_v21  ;;  %v3269_v20 = vld [vmem:[#allocation8 + $0x1f0] sm:$0xff]  ;;  %v3520_v21 = vld [vmem:[#allocation8 + $0x9c8] sm:$0xff] }
 0x2e5   :  { %3639 = vmatprep.subr.mxu0 %v3300_v23  ;;  %3710 = vmatprep.subr.mxu1 %v3428_v24  ;;  %v3266_v23 = vld [vmem:[#allocation8 + $0x1d8] sm:$0xff]  ;;  %v3519_v24 = vld [vmem:[#allocation8 + $0x9c0] sm:$0xff] }
 0x2e6   :  { %3640 = vmatpush2.msra.mxu0 %v3299_v25  ;;  %3711 = vmatpush2.msra.mxu1 %v3427_v26  ;;  %v3265_v25 = vld [vmem:[#allocation8 + $0x1d0] sm:$0xff]  ;;  %v3516_v26 = vld [vmem:[#allocation8 + $0x9a8] sm:$0xff] }
 0x2e7   :  { %3641 = vmatprep.subr.mxu0 %v3296_v29  ;;  %3712 = vmatprep.subr.mxu1 %v3424_v48  ;;  %v3262_v29 = vld [vmem:[#allocation8 + $0x1b8] sm:$0xff]  ;;  %v3515_v48 = vld [vmem:[#allocation8 + $0x9a0] sm:$0xff] }
 0x2e8   :  { %3642 = vmatpush2.msra.mxu0 %v3295_v6  ;;  %3713 = vmatpush2.msra.mxu1 %v3423_v37  ;;  %v3261_v6 = vld [vmem:[#allocation8 + $0x1b0] sm:$0xff]  ;;  %v3512_v37 = vld [vmem:[#allocation8 + $0x988] sm:$0xff] }
 0x2e9   :  { %3643 = vmatprep.subr.mxu0 %v3292_v1  ;;  %3714 = vmatprep.subr.mxu1 %v3420_v38  ;;  %v3258_v1 = vld [vmem:[#allocation8 + $0x198] sm:$0xff]  ;;  %v3511_v38 = vld [vmem:[#allocation8 + $0x980] sm:$0xff] }
 0x2ea   :  { %3644 = vmatpush2.msra.mxu0 %v3291_v27  ;;  %3715 = vmatpush2.msra.mxu1 %v3419_v10  ;;  %v3257_v27 = vld [vmem:[#allocation8 + $0x190] sm:$0xff]  ;;  %v3508_v10 = vld [vmem:[#allocation8 + $0x968] sm:$0xff] }
 0x2eb   :  { %3645 = vmatprep.subr.mxu0 %v3288_v34  ;;  %3716 = vmatprep.subr.mxu1 %v3416_v22  ;;  %v3254_v34 = vld [vmem:[#allocation8 + $0x178] sm:$0xff]  ;;  %v3504_v22 = vld [vmem:[#allocation8 + $0x948] sm:$0xff] }
 0x2ec   :  { %3646 = vmatpush2.msra.mxu0 %v3287_v49  ;;  %3717 = vmatpush2.msra.mxu1 %v3415_v15  ;;  %v3249_v49 = vld [vmem:[#allocation8 + $0x150] sm:$0xff]  ;;  %v3500_v15 = vld [vmem:[#allocation8 + $0x928] sm:$0xff] }
 0x2ed   :  { %3647 = vmatprep.subr.mxu0 %v3284_v40  ;;  %3718 = vmatprep.subr.mxu1 %v3412_v50  ;;  %v2346_v47 = vpop.f32.mrf.mxu0  ;;  %v3246_v40 = vld [vmem:[#allocation8 + $0x138] sm:$0xff]  ;;  %v3499_v50 = vld [vmem:[#allocation8 + $0x920] sm:$0xff] }
 0x2ee   :  { %3648 = vmatpush2.msra.mxu0 %v3283_v41  ;;  %3719 = vmatpush2.msra.mxu1 %v3411_v42  ;;  %v2417_v53 = vpop.f32.mrf.mxu1  ;;  %v3245_v41 = vld [vmem:[#allocation8 + $0x130] sm:$0xff]  ;;  %v3496_v42 = vld [vmem:[#allocation8 + $0x908] sm:$0xff] }
 0x2ef   :  { %3649 = vmatprep.subr.mxu0 %v3280_v57  ;;  %3720 = vmatprep.subr.mxu1 %v3408_v12  ;;  %v2348_v2 = vpop.f32.mrf.mxu0  ;;  %v3495_v57 = vld [vmem:[#allocation8 + $0x900] sm:$0xff]  ;;  %v3241_v12 = vld [vmem:[#allocation8 + $0x110] sm:$0xff] }
 0x2f0   :  { %3650 = vmatpush2.msra.mxu0 %v3279_v36  ;;  %3721 = vmatpush2.msra.mxu1 %v3407_v46  ;;  %v2422_v63 = vmax.f32 %v2346_v47, %v2348_v2  ;;  %v2419_v0 = vpop.f32.mrf.mxu1  ;;  %v3238_v36 = vld [vmem:[#allocation8 + $0xf8] sm:$0xff]  ;;  %v3491_v46 = vld [vmem:[#allocation8 + $0x8e0] sm:$0xff]  ;;  %v3237_v47 = vld [vmem:[#allocation8 + $0xf0] sm:$0xff] }
 0x2f1   :  { %3651 = vmatprep.subr.mxu0 %v3276_v51  ;;  %3722 = vmatprep.subr.mxu1 %v3404_v52  ;;  %v2423_v5 = vmax.f32 %v2417_v53, %v2419_v0  ;;  %v3488_v51 = vld [vmem:[#allocation8 + $0x8c8] sm:$0xff]  ;;  %v3234_v52 = vld [vmem:[#allocation8 + $0xd8] sm:$0xff]  ;;  %v3487_v53 = vld [vmem:[#allocation8 + $0x8c0] sm:$0xff] }
 0x2f2   :  { %3652 = vmatpush2.msra.mxu0 %v3275_v61  ;;  %3723 = vmatpush2.msra.mxu1 %v3403_v62  ;;  %v3483_v61 = vld [vmem:[#allocation8 + $0x8a0] sm:$0xff]  ;;  %v3229_v62 = vld [vmem:[#allocation8 + $0xb0] sm:$0xff]  ;;  %v3480_v2 = vld [vmem:[#allocation8 + $0x888] sm:$0xff] }
 0x2f3   :  { %3653 = vmatprep.subr.mxu0 %v3272_v58  ;;  %3724 = vmatprep.subr.mxu1 %v3400_v31  ;;  %v9379_v17 = vmax.f32 %v2422_v63, %v2423_v5  ;;  %v3226_v58 = vld [vmem:[#allocation8 + $0x98] sm:$0xff]  ;;  %v3479_v31 = vld [vmem:[#allocation8 + $0x880] sm:$0xff]  ;;  %v3225_v63 = vld [vmem:[#allocation8 + $0x90] sm:$0xff] }
 0x2f4   :  { %3654 = vmatpush2.msra.mxu0 %v3271_v3  ;;  %3725 = vmatpush2.msra.mxu1 %v3399_v4  ;;  %v3476_v0 = vld [vmem:[#allocation8 + $0x868] sm:$0xff]  ;;  %v3475_v3 = vld [vmem:[#allocation8 + $0x860] sm:$0xff]  ;;  %v3221_v4 = vld [vmem:[#allocation8 + $0x70] sm:$0xff] }
 0x2f5   :  { %3656 = vmatmul.mubr.f32.vlgmr.msra.gmra.mxu0 %v407_v8  ;;  %3727 = vmatmul.mubr.f32.vlgmr.msra.gmra.mxu1 %v9377_v9  ;;  %v3472_v5 = vld [vmem:[#allocation8 + $0x848] sm:$0xff] }
 0x2f6   :  { %3733 = vmatprep.subr.mxu0 %v3524_v11  ;;  %3804 = vmatprep.subr.mxu1 %v3270_v13  ;;  %v3218_v11 = vld [vmem:[#allocation8 + $0x58] sm:$0xff]  ;;  %v3471_v13 = vld [vmem:[#allocation8 + $0x840] sm:$0xff] }
 0x2f7   :  { %3734 = vmatpush1.msra.mxu0 %v3523_v30  ;;  %3797 = vmatprep.mubr.f32.mxu0 %v9381_v19  ;;  %v3217_v30 = vld [vmem:[#allocation8 + $0x50] sm:$0xff] }
 0x2f8   :  { %3805 = vmatpush1.msra.mxu1 %v3269_v20  ;;  %3868 = vmatprep.mubr.f32.mxu1 %v659_v16  ;;  %v3253_v16 = vld [vmem:[#allocation8 + $0x170] sm:$0xff]  ;;  %v3468_v20 = vld [vmem:[#allocation8 + $0x828] sm:$0xff] }
 0x2f9   :  { %3735 = vmatprep.subr.mxu0 %v3520_v21  ;;  %3806 = vmatprep.subr.mxu1 %v3266_v23  ;;  %v3214_v21 = vld [vmem:[#allocation8 + $0x38] sm:$0xff]  ;;  %v3467_v23 = vld [vmem:[#allocation8 + $0x820] sm:$0xff] }
 0x2fa   :  { %3736 = vmatpush1.msra.mxu0 %v3519_v24  ;;  %3807 = vmatpush1.msra.mxu1 %v3265_v25  ;;  %v3213_v24 = vld [vmem:[#allocation8 + $0x30] sm:$0xff]  ;;  %v3464_v25 = vld [vmem:[#allocation8 + $0x808] sm:$0xff] }
 0x2fb   :  { %3737 = vmatprep.subr.mxu0 %v3516_v26  ;;  %3808 = vmatprep.subr.mxu1 %v3262_v29  ;;  %v3210_v26 = vld [vmem:[#allocation8 + $0x18] sm:$0xff]  ;;  %v3463_v29 = vld [vmem:[#allocation8 + $0x800] sm:$0xff] }
 0x2fc   :  { %3738 = vmatpush1.msra.mxu0 %v3515_v48  ;;  %3809 = vmatpush1.msra.mxu1 %v3261_v6  ;;  %v3209_v48 = vld [vmem:[#allocation8 + $0x10] sm:$0xff]  ;;  %v3588_v6 = vld [vmem:[#allocation8 + $0xbe8] sm:$0xff] }
 0x2fd   :  { %3739 = vmatprep.subr.mxu0 %v3512_v37  ;;  %3810 = vmatprep.subr.mxu1 %v3258_v1  ;;  %v3334_v37 = vld [vmem:[#allocation8 + $0x3f8] sm:$0xff]  ;;  %v3587_v1 = vld [vmem:[#allocation8 + $0xbe0] sm:$0xff] }
 0x2fe   :  { %3740 = vmatpush1.msra.mxu0 %v3511_v38  ;;  %3811 = vmatpush1.msra.mxu1 %v3257_v27  ;;  %v3333_v38 = vld [vmem:[#allocation8 + $0x3f0] sm:$0xff]  ;;  %v3584_v27 = vld [vmem:[#allocation8 + $0xbc8] sm:$0xff] }
 0x2ff   :  { %3741 = vmatprep.subr.mxu0 %v3508_v10  ;;  %3812 = vmatprep.subr.mxu1 %v3254_v34  ;;  %v3330_v10 = vld [vmem:[#allocation8 + $0x3d8] sm:$0xff]  ;;  %v3583_v34 = vld [vmem:[#allocation8 + $0xbc0] sm:$0xff] }
 0x300   :  { %3742 = vmatpush1.msra.mxu0 %v3507_v28  ;;  %3813 = vmatpush1.msra.mxu1 %v3253_v16  ;;  %v3329_v28 = vld [vmem:[#allocation8 + $0x3d0] sm:$0xff]  ;;  %v3580_v16 = vld [vmem:[#allocation8 + $0xba8] sm:$0xff] }
 0x301   :  { %3743 = vmatprep.subr.mxu0 %v3504_v22  ;;  %3814 = vmatprep.subr.mxu1 %v3250_v18  ;;  %v3326_v22 = vld [vmem:[#allocation8 + $0x3b8] sm:$0xff]  ;;  %v3579_v18 = vld [vmem:[#allocation8 + $0xba0] sm:$0xff] }
 0x302   :  { %3744 = vmatpush1.msra.mxu0 %v3503_v7  ;;  %3815 = vmatpush1.msra.mxu1 %v3249_v49  ;;  %v3325_v7 = vld [vmem:[#allocation8 + $0x3b0] sm:$0xff]  ;;  %v3576_v49 = vld [vmem:[#allocation8 + $0xb88] sm:$0xff] }
 0x303   :  { %3745 = vmatprep.subr.mxu0 %v3500_v15  ;;  %3816 = vmatprep.subr.mxu1 %v3246_v40  ;;  %v3322_v15 = vld [vmem:[#allocation8 + $0x398] sm:$0xff]  ;;  %v3575_v40 = vld [vmem:[#allocation8 + $0xb80] sm:$0xff] }
 0x304   :  { %3746 = vmatpush1.msra.mxu0 %v3499_v50  ;;  %3817 = vmatpush1.msra.mxu1 %v3245_v41  ;;  %v3321_v50 = vld [vmem:[#allocation8 + $0x390] sm:$0xff]  ;;  %v3572_v41 = vld [vmem:[#allocation8 + $0xb68] sm:$0xff] }
 0x305   :  { %3747 = vmatprep.subr.mxu0 %v3496_v42  ;;  %3818 = vmatprep.subr.mxu1 %v3242_v44  ;;  %v3318_v42 = vld [vmem:[#allocation8 + $0x378] sm:$0xff]  ;;  %v3571_v44 = vld [vmem:[#allocation8 + $0xb60] sm:$0xff] }
 0x306   :  { %3748 = vmatpush1.msra.mxu0 %v3495_v57  ;;  %3819 = vmatpush1.msra.mxu1 %v3241_v12  ;;  %v3317_v57 = vld [vmem:[#allocation8 + $0x370] sm:$0xff]  ;;  %v3568_v12 = vld [vmem:[#allocation8 + $0xb48] sm:$0xff] }
 0x307   :  { %3749 = vmatprep.subr.mxu0 %v3492_v35  ;;  %3820 = vmatprep.subr.mxu1 %v3238_v36  ;;  %v3314_v35 = vld [vmem:[#allocation8 + $0x358] sm:$0xff]  ;;  %v3567_v36 = vld [vmem:[#allocation8 + $0xb40] sm:$0xff] }
 0x308   :  { %3750 = vmatpush1.msra.mxu0 %v3491_v46  ;;  %3821 = vmatpush1.msra.mxu1 %v3237_v47  ;;  %v3313_v46 = vld [vmem:[#allocation8 + $0x350] sm:$0xff]  ;;  %v3564_v47 = vld [vmem:[#allocation8 + $0xb28] sm:$0xff] }
 0x309   :  { %3751 = vmatprep.subr.mxu0 %v3488_v51  ;;  %3822 = vmatprep.subr.mxu1 %v3234_v52  ;;  %v3310_v51 = vld [vmem:[#allocation8 + $0x338] sm:$0xff]  ;;  %v3563_v52 = vld [vmem:[#allocation8 + $0xb20] sm:$0xff] }
 0x30a   :  { %3752 = vmatpush1.msra.mxu0 %v3487_v53  ;;  %3823 = vmatpush1.msra.mxu1 %v3233_v54  ;;  %v3309_v53 = vld [vmem:[#allocation8 + $0x330] sm:$0xff]  ;;  %v3560_v54 = vld [vmem:[#allocation8 + $0xb08] sm:$0xff] }
 0x30b   :  { %3753 = vmatprep.subr.mxu0 %v3484_v56  ;;  %3824 = vmatprep.subr.mxu1 %v3230_v60  ;;  %v3306_v56 = vld [vmem:[#allocation8 + $0x318] sm:$0xff]  ;;  %v3559_v60 = vld [vmem:[#allocation8 + $0xb00] sm:$0xff] }
 0x30c   :  { %3754 = vmatpush1.msra.mxu0 %v3483_v61  ;;  %3825 = vmatpush1.msra.mxu1 %v3229_v62  ;;  %v3305_v61 = vld [vmem:[#allocation8 + $0x310] sm:$0xff]  ;;  %v3556_v62 = vld [vmem:[#allocation8 + $0xae8] sm:$0xff] }
 0x30d   :  { %3755 = vmatprep.subr.mxu0 %v3480_v2  ;;  %3826 = vmatprep.subr.mxu1 %v3226_v58  ;;  %v3302_v2 = vld [vmem:[#allocation8 + $0x2f8] sm:$0xff]  ;;  %v3555_v58 = vld [vmem:[#allocation8 + $0xae0] sm:$0xff] }
 0x30e   :  { %3756 = vmatpush1.msra.mxu0 %v3479_v31  ;;  %3827 = vmatpush1.msra.mxu1 %v3225_v63  ;;  %v3301_v31 = vld [vmem:[#allocation8 + $0x2f0] sm:$0xff]  ;;  %v3552_v63 = vld [vmem:[#allocation8 + $0xac8] sm:$0xff] }
 0x30f   :  { %3757 = vmatprep.subr.mxu0 %v3476_v0  ;;  %3828 = vmatprep.subr.mxu1 %v3222_v33  ;;  %v3298_v0 = vld [vmem:[#allocation8 + $0x2d8] sm:$0xff]  ;;  %v3551_v33 = vld [vmem:[#allocation8 + $0xac0] sm:$0xff] }
 0x310   :  { %3758 = vmatpush1.msra.mxu0 %v3475_v3  ;;  %3829 = vmatpush1.msra.mxu1 %v3221_v4  ;;  %v3297_v3 = vld [vmem:[#allocation8 + $0x2d0] sm:$0xff]  ;;  %v3548_v4 = vld [vmem:[#allocation8 + $0xaa8] sm:$0xff] }
 0x311   :  { %3759 = vmatprep.subr.mxu0 %v3472_v5  ;;  %3830 = vmatprep.subr.mxu1 %v3218_v11  ;;  %v3294_v5 = vld [vmem:[#allocation8 + $0x2b8] sm:$0xff]  ;;  %v3547_v11 = vld [vmem:[#allocation8 + $0xaa0] sm:$0xff] }
 0x312   :  { %3760 = vmatpush1.msra.mxu0 %v3471_v13  ;;  %3831 = vmatpush1.msra.mxu1 %v3217_v30  ;;  %v3293_v13 = vld [vmem:[#allocation8 + $0x2b0] sm:$0xff]  ;;  %v3544_v30 = vld [vmem:[#allocation8 + $0xa88] sm:$0xff] }
 0x313   :  { %3761 = vmatprep.subr.mxu0 %v3468_v20  ;;  %3832 = vmatprep.subr.mxu1 %v3214_v21  ;;  %v3290_v20 = vld [vmem:[#allocation8 + $0x298] sm:$0xff]  ;;  %v3543_v21 = vld [vmem:[#allocation8 + $0xa80] sm:$0xff] }
 0x314   :  { %3762 = vmatpush1.msra.mxu0 %v3467_v23  ;;  %3833 = vmatpush1.msra.mxu1 %v3213_v24  ;;  %v3289_v23 = vld [vmem:[#allocation8 + $0x290] sm:$0xff]  ;;  %v3540_v24 = vld [vmem:[#allocation8 + $0xa68] sm:$0xff] }
 0x315   :  { %3763 = vmatprep.subr.mxu0 %v3464_v25  ;;  %3834 = vmatprep.subr.mxu1 %v3210_v26  ;;  %v3286_v25 = vld [vmem:[#allocation8 + $0x278] sm:$0xff]  ;;  %v3539_v26 = vld [vmem:[#allocation8 + $0xa60] sm:$0xff] }
 0x316   :  { %3764 = vmatpush1.msra.mxu0 %v3463_v29  ;;  %3835 = vmatpush1.msra.mxu1 %v3209_v48  ;;  %v3285_v29 = vld [vmem:[#allocation8 + $0x270] sm:$0xff]  ;;  %v3536_v48 = vld [vmem:[#allocation8 + $0xa48] sm:$0xff] }
 0x317   :  { %3765 = vmatprep.subr.mxu0 %v3588_v6  ;;  %3836 = vmatprep.subr.mxu1 %v3334_v37  ;;  %v3282_v6 = vld [vmem:[#allocation8 + $0x258] sm:$0xff]  ;;  %v3535_v37 = vld [vmem:[#allocation8 + $0xa40] sm:$0xff] }
 0x318   :  { %3766 = vmatpush2.msra.mxu0 %v3587_v1  ;;  %3837 = vmatpush2.msra.mxu1 %v3333_v38  ;;  %v3281_v1 = vld [vmem:[#allocation8 + $0x250] sm:$0xff]  ;;  %v3532_v38 = vld [vmem:[#allocation8 + $0xa28] sm:$0xff] }
 0x319   :  { %3767 = vmatprep.subr.mxu0 %v3584_v27  ;;  %3838 = vmatprep.subr.mxu1 %v3330_v10  ;;  %v3278_v27 = vld [vmem:[#allocation8 + $0x238] sm:$0xff] }
 0x31a   :  { %3768 = vmatpush2.msra.mxu0 %v3583_v34  ;;  %3839 = vmatpush2.msra.mxu1 %v3329_v28  ;;  %v7186_v10 = vld [vmem:[#allocation6] ss:$0 sm:$0xff]  ;;  %v10160_v34 = vld [vmem:[#allocation35_spill] sm:$0xff] }
 0x31b   :  { %3769 = vmatprep.subr.mxu0 %v3580_v16  ;;  %3840 = vmatprep.subr.mxu1 %v3326_v22  ;;  %v1424_v28 = vadd.f32 %v7186_v10, %v10160_v34  ;;  %v3531_v16 = vld [vmem:[#allocation8 + $0xa20] sm:$0xff]  ;;  %v3277_v22 = vld [vmem:[#allocation8 + $0x230] sm:$0xff] }
 0x31c   :  { %3770 = vmatpush2.msra.mxu0 %v3579_v18  ;;  %3841 = vmatpush2.msra.mxu1 %v3325_v7  ;;  %v3528_v18 = vld [vmem:[#allocation8 + $0xa08] sm:$0xff]  ;;  %v3274_v7 = vld [vmem:[#allocation8 + $0x218] sm:$0xff]  ;;  %v3489_v10 = vld [vmem:[#allocation8 + $0x8d0] sm:$0xff] }
 0x31d   :  { %3771 = vmatprep.subr.mxu0 %v3576_v49  ;;  %3842 = vmatprep.subr.mxu1 %v3322_v15  ;;  %v3527_v49 = vld [vmem:[#allocation8 + $0xa00] sm:$0xff]  ;;  %v3273_v15 = vld [vmem:[#allocation8 + $0x210] sm:$0xff] }
 0x31e   :  { %3772 = vmatpush2.msra.mxu0 %v3575_v40  ;;  %3843 = vmatpush2.msra.mxu1 %v3321_v50  ;;  %v9390_v40 = vmax.f32 %v1424_v28, 0.0  ;;  %v3398_v50 = vld [vmem:[#allocation8 + $0x5f8] sm:$0xff] }
 0x31f   :  { %3773 = vmatprep.subr.mxu0 %v3572_v41  ;;  %3844 = vmatprep.subr.mxu1 %v3318_v42  ;;  %v3526_v41 = vld [vmem:[#allocation8 + $0x9f8] sm:$0xff]  ;;  %v3397_v42 = vld [vmem:[#allocation8 + $0x5f0] sm:$0xff] }
 0x320   :  { %3774 = vmatpush2.msra.mxu0 %v3571_v44  ;;  %3845 = vmatpush2.msra.mxu1 %v3317_v57  ;;  %v3525_v44 = vld [vmem:[#allocation8 + $0x9f0] sm:$0xff]  ;;  %v3394_v57 = vld [vmem:[#allocation8 + $0x5d8] sm:$0xff] }
 0x321   :  { %3775 = vmatprep.subr.mxu0 %v3568_v12  ;;  %3846 = vmatprep.subr.mxu1 %v3314_v35  ;;  %v3522_v12 = vld [vmem:[#allocation8 + $0x9d8] sm:$0xff]  ;;  %v3393_v35 = vld [vmem:[#allocation8 + $0x5d0] sm:$0xff] }
 0x322   :  { %3776 = vmatpush2.msra.mxu0 %v3567_v36  ;;  %3847 = vmatpush2.msra.mxu1 %v3313_v46  ;;  %v3521_v36 = vld [vmem:[#allocation8 + $0x9d0] sm:$0xff]  ;;  %v3390_v46 = vld [vmem:[#allocation8 + $0x5b8] sm:$0xff] }
 0x323   :  { %3777 = vmatprep.subr.mxu0 %v3564_v47  ;;  %3848 = vmatprep.subr.mxu1 %v3310_v51  ;;  %v3518_v47 = vld [vmem:[#allocation8 + $0x9b8] sm:$0xff]  ;;  %v3389_v51 = vld [vmem:[#allocation8 + $0x5b0] sm:$0xff] }
 0x324   :  { %3778 = vmatpush2.msra.mxu0 %v3563_v52  ;;  %3849 = vmatpush2.msra.mxu1 %v3309_v53  ;;  %v3514_v52 = vld [vmem:[#allocation8 + $0x998] sm:$0xff]  ;;  %v3385_v53 = vld [vmem:[#allocation8 + $0x590] sm:$0xff] }
 0x325   :  { %3779 = vmatprep.subr.mxu0 %v3560_v54  ;;  %3850 = vmatprep.subr.mxu1 %v3306_v56  ;;  %v3513_v54 = vld [vmem:[#allocation8 + $0x990] sm:$0xff]  ;;  %v3382_v56 = vld [vmem:[#allocation8 + $0x578] sm:$0xff] }
 0x326   :  { %3780 = vmatpush2.msra.mxu0 %v3559_v60  ;;  %3851 = vmatpush2.msra.mxu1 %v3305_v61  ;;  %v3510_v60 = vld [vmem:[#allocation8 + $0x978] sm:$0xff]  ;;  %v3381_v61 = vld [vmem:[#allocation8 + $0x570] sm:$0xff] }
 0x327   :  { %3781 = vmatprep.subr.mxu0 %v3556_v62  ;;  %3852 = vmatprep.subr.mxu1 %v3302_v2  ;;  %v3509_v62 = vld [vmem:[#allocation8 + $0x970] sm:$0xff]  ;;  %v3378_v2 = vld [vmem:[#allocation8 + $0x558] sm:$0xff] }
 0x328   :  { %3782 = vmatpush2.msra.mxu0 %v3555_v58  ;;  %3853 = vmatpush2.msra.mxu1 %v3301_v31  ;;  %v3506_v58 = vld [vmem:[#allocation8 + $0x958] sm:$0xff]  ;;  %v9397_v31 = vpop.f32.mrf.mxu0 }
 0x329   :  { %3783 = vmatprep.subr.mxu0 %v3552_v63  ;;  %3854 = vmatprep.subr.mxu1 %v3298_v0  ;;  %v9399_v63 = vpop.f32.mrf.mxu1  ;;  %v3377_v0 = vld [vmem:[#allocation8 + $0x550] sm:$0xff] }
 0x32a   :  { %3784 = vmatpush2.msra.mxu0 %v3551_v33  ;;  %3855 = vmatpush2.msra.mxu1 %v3297_v3  ;;  %v3505_v33 = vld [vmem:[#allocation8 + $0x950] sm:$0xff]  ;;  %v3374_v3 = vld [vmem:[#allocation8 + $0x538] sm:$0xff] }
 0x32b   :  { %3785 = vmatprep.subr.mxu0 %v3548_v4  ;;  %3856 = vmatprep.subr.mxu1 %v3294_v5  ;;  %v3502_v4 = vld [vmem:[#allocation8 + $0x938] sm:$0xff]  ;;  %v3373_v5 = vld [vmem:[#allocation8 + $0x530] sm:$0xff] }
 0x32c   :  { %3786 = vmatpush2.msra.mxu0 %v3547_v11  ;;  %3857 = vmatpush2.msra.mxu1 %v3293_v13  ;;  %v3501_v11 = vld [vmem:[#allocation8 + $0x930] sm:$0xff]  ;;  %v3370_v13 = vld [vmem:[#allocation8 + $0x518] sm:$0xff] }
 0x32d   :  { %3787 = vmatprep.subr.mxu0 %v3544_v30  ;;  %3858 = vmatprep.subr.mxu1 %v3290_v20  ;;  %v3498_v30 = vld [vmem:[#allocation8 + $0x918] sm:$0xff]  ;;  %v9401_v20 = vpop.f32.mrf.mxu0 }
 0x32e   :  { %3788 = vmatpush2.msra.mxu0 %v3543_v21  ;;  %3859 = vmatpush2.msra.mxu1 %v3289_v23  ;;  %v9403_v21 = vpop.f32.mrf.mxu1  ;;  %v3369_v23 = vld [vmem:[#allocation8 + $0x510] sm:$0xff] }
 0x32f   :  { %3789 = vmatprep.subr.mxu0 %v3540_v24  ;;  %3860 = vmatprep.subr.mxu1 %v3286_v25  ;;  %v3497_v24 = vld [vmem:[#allocation8 + $0x910] sm:$0xff]  ;;  %v3366_v25 = vld [vmem:[#allocation8 + $0x4f8] sm:$0xff] }
 0x330   :  { %3790 = vmatpush2.msra.mxu0 %v3539_v26  ;;  %3861 = vmatpush2.msra.mxu1 %v3285_v29  ;;  %v3494_v26 = vld [vmem:[#allocation8 + $0x8f8] sm:$0xff]  ;;  %v3365_v29 = vld [vmem:[#allocation8 + $0x4f0] sm:$0xff] }
 0x331   :  { %3791 = vmatprep.subr.mxu0 %v3536_v48  ;;  %3862 = vmatprep.subr.mxu1 %v3282_v6  ;;  %v3493_v48 = vld [vmem:[#allocation8 + $0x8f0] sm:$0xff] }
 0x332   :  { %3792 = vmatpush2.msra.mxu0 %v3535_v37  ;;  %3863 = vmatpush2.msra.mxu1 %v3281_v1  ;;  %v3362_v1 = vld [vmem:[#allocation8 + $0x4d8] sm:$0xff] }
 0x333   :  { %3793 = vmatprep.subr.mxu0 %v3532_v38  ;;  %3864 = vmatprep.subr.mxu1 %v3278_v27  ;;  %v3490_v38 = vld [vmem:[#allocation8 + $0x8d8] sm:$0xff]  ;;  %v3361_v27 = vld [vmem:[#allocation8 + $0x4d0] sm:$0xff] }
 0x334   :  { %3794 = vmatpush2.msra.mxu0 %v3531_v16  ;;  %3865 = vmatpush2.msra.mxu1 %v3277_v22  ;;  %v3358_v16 = vld [vmem:[#allocation8 + $0x4b8] sm:$0xff] }
 0x335   :  { %3795 = vmatprep.subr.mxu0 %v3528_v18  ;;  %3866 = vmatprep.subr.mxu1 %v3274_v7  ;;  %v3486_v22 = vld [vmem:[#allocation8 + $0x8b8] sm:$0xff] }
 0x336   :  { %3796 = vmatpush2.msra.mxu0 %v3527_v49  ;;  %3867 = vmatpush2.msra.mxu1 %v3273_v15  ;;  %v3357_v49 = vld [vmem:[#allocation8 + $0x4b0] sm:$0xff] }
 0x337   :  { %3798 = vmatmul.mubr.f32.vlgmr.msra.gmra.mxu0 %v9390_v40  ;;  %3869 = vmatmul.mubr.f32.vlgmr.msra.gmra.mxu1 %v407_v8  ;;  %v3386_v8 = vld [vmem:[#allocation8 + $0x598] sm:$0xff]  ;;  %v3485_v15 = vld [vmem:[#allocation8 + $0x8b0] sm:$0xff] }
 0x338   :  { %3875 = vmatprep.subr.mxu0 %v3398_v50  ;;  %3946 = vmatprep.subr.mxu1 %v3526_v41  ;;  %v3354_v50 = vld [vmem:[#allocation8 + $0x498] sm:$0xff] }
 0x339   :  { %3876 = vmatpush1.msra.mxu0 %v3397_v42  ;;  %3939 = vmatprep.mubr.f32.mxu0 %v9354_v59  ;;  %v3482_v41 = vld [vmem:[#allocation8 + $0x898] sm:$0xff] }
 0x33a   :  { %3947 = vmatpush1.msra.mxu1 %v3525_v44  ;;  %4010 = vmatprep.mubr.f32.mxu1 %v9381_v19  ;;  %v6969_v44 = vld [vmem:[#allocation6] ss:$0 sm:$0xff] }
 0x33b   :  { %3877 = vmatprep.subr.mxu0 %v3394_v57  ;;  %3948 = vmatprep.subr.mxu1 %v3522_v12  ;;  %v3353_v57 = vld [vmem:[#allocation8 + $0x490] sm:$0xff] }
 0x33c   :  { %3878 = vmatpush1.msra.mxu0 %v3393_v35  ;;  %3949 = vmatpush1.msra.mxu1 %v3521_v36  ;;  %v3481_v12 = vld [vmem:[#allocation8 + $0x890] sm:$0xff]  ;;  %v3350_v36 = vld [vmem:[#allocation8 + $0x478] sm:$0xff] }
 0x33d   :  { %3879 = vmatprep.subr.mxu0 %v3390_v46  ;;  %3950 = vmatprep.subr.mxu1 %v3518_v47  ;;  %v3478_v46 = vld [vmem:[#allocation8 + $0x878] sm:$0xff]  ;;  %v3349_v47 = vld [vmem:[#allocation8 + $0x470] sm:$0xff] }
 0x33e   :  { %3880 = vmatpush1.msra.mxu0 %v3389_v51  ;;  %3951 = vmatpush1.msra.mxu1 %v3517_v55  ;;  %v3477_v51 = vld [vmem:[#allocation8 + $0x870] sm:$0xff]  ;;  %v3346_v55 = vld [vmem:[#allocation8 + $0x458] sm:$0xff] }
 0x33f   :  { %3881 = vmatprep.subr.mxu0 %v3386_v8  ;;  %3952 = vmatprep.subr.mxu1 %v3514_v52  ;;  %v3474_v8 = vld [vmem:[#allocation8 + $0x858] sm:$0xff]  ;;  %v3345_v52 = vld [vmem:[#allocation8 + $0x450] sm:$0xff] }
 0x340   :  { %3882 = vmatpush1.msra.mxu0 %v3385_v53  ;;  %3953 = vmatpush1.msra.mxu1 %v3513_v54  ;;  %v3473_v53 = vld [vmem:[#allocation8 + $0x850] sm:$0xff]  ;;  %v3342_v54 = vld [vmem:[#allocation8 + $0x438] sm:$0xff] }
 0x341   :  { %3883 = vmatprep.subr.mxu0 %v3382_v56  ;;  %3954 = vmatprep.subr.mxu1 %v3510_v60  ;;  %v3470_v56 = vld [vmem:[#allocation8 + $0x838] sm:$0xff]  ;;  %v3341_v60 = vld [vmem:[#allocation8 + $0x430] sm:$0xff] }
 0x342   :  { %3884 = vmatpush1.msra.mxu0 %v3381_v61  ;;  %3955 = vmatpush1.msra.mxu1 %v3509_v62  ;;  %v3469_v61 = vld [vmem:[#allocation8 + $0x830] sm:$0xff]  ;;  %v3338_v62 = vld [vmem:[#allocation8 + $0x418] sm:$0xff] }
 0x343   :  { %3885 = vmatprep.subr.mxu0 %v3378_v2  ;;  %3956 = vmatprep.subr.mxu1 %v3506_v58  ;;  %v3466_v2 = vld [vmem:[#allocation8 + $0x818] sm:$0xff]  ;;  %v3337_v58 = vld [vmem:[#allocation8 + $0x410] sm:$0xff] }
 0x344   :  { %3886 = vmatpush1.msra.mxu0 %v3377_v0  ;;  %3957 = vmatpush1.msra.mxu1 %v3505_v33  ;;  %v3465_v0 = vld [vmem:[#allocation8 + $0x810] sm:$0xff]  ;;  %v3462_v33 = vld [vmem:[#allocation8 + $0x7f8] sm:$0xff] }
 0x345   :  { %3887 = vmatprep.subr.mxu0 %v3374_v3  ;;  %3958 = vmatprep.subr.mxu1 %v3502_v4  ;;  %v3590_v3 = vld [vmem:[#allocation8 + $0xbf8] sm:$0xff]  ;;  %v3461_v4 = vld [vmem:[#allocation8 + $0x7f0] sm:$0xff] }
 0x346   :  { %3888 = vmatpush1.msra.mxu0 %v3373_v5  ;;  %3959 = vmatpush1.msra.mxu1 %v3501_v11  ;;  %v3589_v5 = vld [vmem:[#allocation8 + $0xbf0] sm:$0xff]  ;;  %v3458_v11 = vld [vmem:[#allocation8 + $0x7d8] sm:$0xff] }
 0x347   :  { %3889 = vmatprep.subr.mxu0 %v3370_v13  ;;  %3960 = vmatprep.subr.mxu1 %v3498_v30  ;;  %v2855_v6 = vpop.f32.mrf.mxu0  ;;  %v2926_v37 = vpop.f32.mrf.mxu1  ;;  %v3586_v13 = vld [vmem:[#allocation8 + $0xbd8] sm:$0xff]  ;;  %v3457_v30 = vld [vmem:[#allocation8 + $0x7d0] sm:$0xff] }
 0x348   :  { %3890 = vmatpush1.msra.mxu0 %v3369_v23  ;;  %3961 = vmatpush1.msra.mxu1 %v3497_v24  ;;  %v3585_v23 = vld [vmem:[#allocation8 + $0xbd0] sm:$0xff]  ;;  %v3454_v24 = vld [vmem:[#allocation8 + $0x7b8] sm:$0xff] }
 0x349   :  { %3891 = vmatprep.subr.mxu0 %v3366_v25  ;;  %3962 = vmatprep.subr.mxu1 %v3494_v26  ;;  %v2857_v34 = vpop.f32.mrf.mxu0  ;;  %v2928_v28 = vpop.f32.mrf.mxu1  ;;  %v3582_v25 = vld [vmem:[#allocation8 + $0xbb8] sm:$0xff]  ;;  %v3453_v26 = vld [vmem:[#allocation8 + $0x7b0] sm:$0xff] }
 0x34a   :  { %3892 = vmatpush1.msra.mxu0 %v3365_v29  ;;  %3963 = vmatpush1.msra.mxu1 %v3493_v48  ;;  %v2931_v18 = vmax.f32 %v2855_v6, %v2857_v34  ;;  %v2932_v7 = vmax.f32 %v2926_v37, %v2928_v28  ;;  %v3581_v29 = vld [vmem:[#allocation8 + $0xbb0] sm:$0xff]  ;;  %v3450_v48 = vld [vmem:[#allocation8 + $0x798] sm:$0xff] }
 0x34b   :  { %3893 = vmatprep.subr.mxu0 %v3362_v1  ;;  %3964 = vmatprep.subr.mxu1 %v3490_v38  ;;  %v3578_v6 = vld [vmem:[#allocation8 + $0xb98] sm:$0xff]  ;;  %v3449_v37 = vld [vmem:[#allocation8 + $0x790] sm:$0xff] }
 0x34c   :  { %3894 = vmatpush1.msra.mxu0 %v3361_v27  ;;  %3965 = vmatpush1.msra.mxu1 %v3489_v10  ;;  %v2933_v42 = vmax.f32 %v2931_v18, %v2932_v7  ;;  %v3577_v1 = vld [vmem:[#allocation8 + $0xb90] sm:$0xff]  ;;  %v3446_v38 = vld [vmem:[#allocation8 + $0x778] sm:$0xff] }
 0x34d   :  { %3895 = vmatprep.subr.mxu0 %v3358_v16  ;;  %3966 = vmatprep.subr.mxu1 %v3486_v22  ;;  %v3574_v27 = vld [vmem:[#allocation8 + $0xb78] sm:$0xff]  ;;  %v3445_v10 = vld [vmem:[#allocation8 + $0x770] sm:$0xff] }
 0x34e   :  { %3896 = vmatpush1.msra.mxu0 %v3357_v49  ;;  %3967 = vmatpush1.msra.mxu1 %v3485_v15  ;;  %v9405_v35 = vadd.f32 %v6969_v44, %v2933_v42  ;;  %v3573_v34 = vld [vmem:[#allocation8 + $0xb70] sm:$0xff]  ;;  %v3442_v28 = vld [vmem:[#allocation8 + $0x758] sm:$0xff] }
 0x34f   :  { %3897 = vmatprep.subr.mxu0 %v3354_v50  ;;  %3968 = vmatprep.subr.mxu1 %v3482_v41  ;;  %v3570_v16 = vld [vmem:[#allocation8 + $0xb58] sm:$0xff]  ;;  %v3441_v22 = vld [vmem:[#allocation8 + $0x750] sm:$0xff] }
 0x350   :  { %3898 = vmatpush1.msra.mxu0 %v3353_v57  ;;  %3969 = vmatpush1.msra.mxu1 %v3481_v12  ;;  %v3569_v18 = vld [vmem:[#allocation8 + $0xb50] sm:$0xff]  ;;  %v3438_v7 = vld [vmem:[#allocation8 + $0x738] sm:$0xff] }
 0x351   :  { %3899 = vmatprep.subr.mxu0 %v3350_v36  ;;  %3970 = vmatprep.subr.mxu1 %v3478_v46  ;;  %v3566_v49 = vld [vmem:[#allocation8 + $0xb38] sm:$0xff]  ;;  %v3437_v15 = vld [vmem:[#allocation8 + $0x730] sm:$0xff] }
 0x352   :  { %3900 = vmatpush1.msra.mxu0 %v3349_v47  ;;  %3971 = vmatpush1.msra.mxu1 %v3477_v51  ;;  %v3565_v50 = vld [vmem:[#allocation8 + $0xb30] sm:$0xff]  ;;  %v3434_v41 = vld [vmem:[#allocation8 + $0x718] sm:$0xff] }
 0x353   :  { %3901 = vmatprep.subr.mxu0 %v3346_v55  ;;  %3972 = vmatprep.subr.mxu1 %v3474_v8  ;;  %v3562_v42 = vld [vmem:[#allocation8 + $0xb18] sm:$0xff]  ;;  %v3433_v44 = vld [vmem:[#allocation8 + $0x710] sm:$0xff] }
 0x354   :  { %3902 = vmatpush1.msra.mxu0 %v3345_v52  ;;  %3973 = vmatpush1.msra.mxu1 %v3473_v53  ;;  %v3561_v57 = vld [vmem:[#allocation8 + $0xb10] sm:$0xff]  ;;  %v3430_v12 = vld [vmem:[#allocation8 + $0x6f8] sm:$0xff] }
 0x355   :  { %3903 = vmatprep.subr.mxu0 %v3342_v54  ;;  %3974 = vmatprep.subr.mxu1 %v3470_v56  ;;  %v3558_v36 = vld [vmem:[#allocation8 + $0xaf8] sm:$0xff]  ;;  %v3429_v46 = vld [vmem:[#allocation8 + $0x6f0] sm:$0xff] }
 0x356   :  { %3904 = vmatpush1.msra.mxu0 %v3341_v60  ;;  %3975 = vmatpush1.msra.mxu1 %v3469_v61  ;;  %v3557_v47 = vld [vmem:[#allocation8 + $0xaf0] sm:$0xff]  ;;  %v3426_v51 = vld [vmem:[#allocation8 + $0x6d8] sm:$0xff] }
 0x357   :  { %3905 = vmatprep.subr.mxu0 %v3338_v62  ;;  %3976 = vmatprep.subr.mxu1 %v3466_v2  ;;  %v3554_v55 = vld [vmem:[#allocation8 + $0xad8] sm:$0xff]  ;;  %v3425_v8 = vld [vmem:[#allocation8 + $0x6d0] sm:$0xff] }
 0x358   :  { %3906 = vmatpush1.msra.mxu0 %v3337_v58  ;;  %3977 = vmatpush1.msra.mxu1 %v3465_v0  ;;  %v3553_v52 = vld [vmem:[#allocation8 + $0xad0] sm:$0xff]  ;;  %v3422_v53 = vld [vmem:[#allocation8 + $0x6b8] sm:$0xff] }
 0x359   :  { %3907 = vmatprep.subr.mxu0 %v3462_v33  ;;  %3978 = vmatprep.subr.mxu1 %v3590_v3  ;;  %v3550_v54 = vld [vmem:[#allocation8 + $0xab8] sm:$0xff]  ;;  %v3421_v56 = vld [vmem:[#allocation8 + $0x6b0] sm:$0xff] }
 0x35a   :  { %3908 = vmatpush2.msra.mxu0 %v3461_v4  ;;  %3979 = vmatpush2.msra.mxu1 %v3589_v5  ;;  %v3549_v60 = vld [vmem:[#allocation8 + $0xab0] sm:$0xff]  ;;  %v3418_v61 = vld [vmem:[#allocation8 + $0x698] sm:$0xff] }
 0x35b   :  { %3909 = vmatprep.subr.mxu0 %v3458_v11  ;;  %3980 = vmatprep.subr.mxu1 %v3586_v13  ;;  %v3546_v62 = vld [vmem:[#allocation8 + $0xa98] sm:$0xff]  ;;  %v3417_v2 = vld [vmem:[#allocation8 + $0x690] sm:$0xff] }
 0x35c   :  { %3910 = vmatpush2.msra.mxu0 %v3457_v30  ;;  %3981 = vmatpush2.msra.mxu1 %v3585_v23  ;;  %v3545_v58 = vld [vmem:[#allocation8 + $0xa90] sm:$0xff]  ;;  %v3414_v0 = vld [vmem:[#allocation8 + $0x678] sm:$0xff] }
 0x35d   :  { %3911 = vmatprep.subr.mxu0 %v3454_v24  ;;  %3982 = vmatprep.subr.mxu1 %v3582_v25  ;;  %v3542_v33 = vld [vmem:[#allocation8 + $0xa78] sm:$0xff]  ;;  %v3413_v3 = vld [vmem:[#allocation8 + $0x670] sm:$0xff] }
 0x35e   :  { %3912 = vmatpush2.msra.mxu0 %v3453_v26  ;;  %3983 = vmatpush2.msra.mxu1 %v3581_v29  ;;  %v3541_v4 = vld [vmem:[#allocation8 + $0xa70] sm:$0xff]  ;;  %v3410_v5 = vld [vmem:[#allocation8 + $0x658] sm:$0xff] }
 0x35f   :  { %3913 = vmatprep.subr.mxu0 %v3450_v48  ;;  %3984 = vmatprep.subr.mxu1 %v3578_v6  ;;  %v3538_v11 = vld [vmem:[#allocation8 + $0xa58] sm:$0xff]  ;;  %v3409_v13 = vld [vmem:[#allocation8 + $0x650] sm:$0xff] }
 0x360   :  { %3914 = vmatpush2.msra.mxu0 %v3449_v37  ;;  %3985 = vmatpush2.msra.mxu1 %v3577_v1  ;;  %v3537_v30 = vld [vmem:[#allocation8 + $0xa50] sm:$0xff]  ;;  %v3406_v23 = vld [vmem:[#allocation8 + $0x638] sm:$0xff]  ;;  %v4097_v1 = vld [vmem:[#allocation8 + $0x1e8] sm:$0xff] }
 0x361   :  { %3915 = vmatprep.subr.mxu0 %v3446_v38  ;;  %3986 = vmatprep.subr.mxu1 %v3574_v27  ;;  %v3534_v24 = vld [vmem:[#allocation8 + $0xa38] sm:$0xff]  ;;  %v3405_v25 = vld [vmem:[#allocation8 + $0x630] sm:$0xff]  ;;  %v4225_v38 = vld [vmem:[#allocation8 + $0x5e8] sm:$0xff] }
 0x362   :  { %3916 = vmatpush2.msra.mxu0 %v3445_v10  ;;  %3987 = vmatpush2.msra.mxu1 %v3573_v34  ;;  %v3533_v26 = vld [vmem:[#allocation8 + $0xa30] sm:$0xff]  ;;  %v3402_v29 = vld [vmem:[#allocation8 + $0x618] sm:$0xff]  ;;  %v4096_v27 = vld [vmem:[#allocation8 + $0x1e0] sm:$0xff] }
 0x363   :  { %3917 = vmatprep.subr.mxu0 %v3442_v28  ;;  %3988 = vmatprep.subr.mxu1 %v3570_v16  ;;  %v3530_v48 = vld [vmem:[#allocation8 + $0xa18] sm:$0xff]  ;;  %v3401_v6 = vld [vmem:[#allocation8 + $0x610] sm:$0xff]  ;;  %v4224_v10 = vld [vmem:[#allocation8 + $0x5e0] sm:$0xff] }
 0x364   :  { %3918 = vmatpush2.msra.mxu0 %v3441_v22  ;;  %3989 = vmatpush2.msra.mxu1 %v3569_v18  ;;  %v3529_v37 = vld [vmem:[#allocation8 + $0xa10] sm:$0xff]  ;;  %v4093_v34 = vld [vmem:[#allocation8 + $0x1c8] sm:$0xff]  ;;  %v4092_v16 = vld [vmem:[#allocation8 + $0x1c0] sm:$0xff] }
 0x365   :  { %3919 = vmatprep.subr.mxu0 %v3438_v7  ;;  %3990 = vmatprep.subr.mxu1 %v3566_v49  ;;  %v4221_v28 = vld [vmem:[#allocation8 + $0x5c8] sm:$0xff]  ;;  %v4220_v22 = vld [vmem:[#allocation8 + $0x5c0] sm:$0xff] }
 0x366   :  { %3920 = vmatpush2.msra.mxu0 %v3437_v15  ;;  %3991 = vmatpush2.msra.mxu1 %v3565_v50  ;;  %v4089_v18 = vld [vmem:[#allocation8 + $0x1a8] sm:$0xff]  ;;  %v4088_v49 = vld [vmem:[#allocation8 + $0x1a0] sm:$0xff] }
 0x367   :  { %3921 = vmatprep.subr.mxu0 %v3434_v41  ;;  %3992 = vmatprep.subr.mxu1 %v3562_v42  ;;  %v4217_v7 = vld [vmem:[#allocation8 + $0x5a8] sm:$0xff]  ;;  %v4216_v15 = vld [vmem:[#allocation8 + $0x5a0] sm:$0xff] }
 0x368   :  { %3922 = vmatpush2.msra.mxu0 %v3433_v44  ;;  %3993 = vmatpush2.msra.mxu1 %v3561_v57  ;;  %v4085_v50 = vld [vmem:[#allocation8 + $0x188] sm:$0xff]  ;;  %v4084_v42 = vld [vmem:[#allocation8 + $0x180] sm:$0xff] }
 0x369   :  { %3923 = vmatprep.subr.mxu0 %v3430_v12  ;;  %3994 = vmatprep.subr.mxu1 %v3558_v36  ;;  %v4213_v41 = vld [vmem:[#allocation8 + $0x588] sm:$0xff]  ;;  %v4212_v44 = vld [vmem:[#allocation8 + $0x580] sm:$0xff] }
 0x36a   :  { %3924 = vmatpush2.msra.mxu0 %v3429_v46  ;;  %3995 = vmatpush2.msra.mxu1 %v3557_v47  ;;  %v4081_v57 = vld [vmem:[#allocation8 + $0x168] sm:$0xff]  ;;  %v4080_v36 = vld [vmem:[#allocation8 + $0x160] sm:$0xff] }
 0x36b   :  { %3925 = vmatprep.subr.mxu0 %v3426_v51  ;;  %3996 = vmatprep.subr.mxu1 %v3554_v55  ;;  %v4209_v12 = vld [vmem:[#allocation8 + $0x568] sm:$0xff]  ;;  %v4208_v46 = vld [vmem:[#allocation8 + $0x560] sm:$0xff] }
 0x36c   :  { %3926 = vmatpush2.msra.mxu0 %v3425_v8  ;;  %3997 = vmatpush2.msra.mxu1 %v3553_v52  ;;  %v4077_v47 = vld [vmem:[#allocation8 + $0x148] sm:$0xff]  ;;  %v4076_v55 = vld [vmem:[#allocation8 + $0x140] sm:$0xff] }
 0x36d   :  { %3927 = vmatprep.subr.mxu0 %v3422_v53  ;;  %3998 = vmatprep.subr.mxu1 %v3550_v54  ;;  %v4205_v51 = vld [vmem:[#allocation8 + $0x548] sm:$0xff]  ;;  %v4204_v8 = vld [vmem:[#allocation8 + $0x540] sm:$0xff] }
 0x36e   :  { %3928 = vmatpush2.msra.mxu0 %v3421_v56  ;;  %3999 = vmatpush2.msra.mxu1 %v3549_v60  ;;  %v4073_v52 = vld [vmem:[#allocation8 + $0x128] sm:$0xff]  ;;  %v4072_v54 = vld [vmem:[#allocation8 + $0x120] sm:$0xff] }
 0x36f   :  { %3929 = vmatprep.subr.mxu0 %v3418_v61  ;;  %4000 = vmatprep.subr.mxu1 %v3546_v62  ;;  %v4201_v53 = vld [vmem:[#allocation8 + $0x528] sm:$0xff]  ;;  %v4200_v56 = vld [vmem:[#allocation8 + $0x520] sm:$0xff] }
 0x370   :  { %3930 = vmatpush2.msra.mxu0 %v3417_v2  ;;  %4001 = vmatpush2.msra.mxu1 %v3545_v58  ;;  %v4069_v60 = vld [vmem:[#allocation8 + $0x108] sm:$0xff]  ;;  %v4068_v62 = vld [vmem:[#allocation8 + $0x100] sm:$0xff] }
 0x371   :  { %3931 = vmatprep.subr.mxu0 %v3414_v0  ;;  %4002 = vmatprep.subr.mxu1 %v3542_v33  ;;  %v4197_v61 = vld [vmem:[#allocation8 + $0x508] sm:$0xff]  ;;  %v4196_v2 = vld [vmem:[#allocation8 + $0x500] sm:$0xff] }
 0x372   :  { %3932 = vmatpush2.msra.mxu0 %v3413_v3  ;;  %4003 = vmatpush2.msra.mxu1 %v3541_v4  ;;  %v4065_v58 = vld [vmem:[#allocation8 + $0xe8] sm:$0xff]  ;;  %v4064_v33 = vld [vmem:[#allocation8 + $0xe0] sm:$0xff] }
 0x373   :  { %3933 = vmatprep.subr.mxu0 %v3410_v5  ;;  %4004 = vmatprep.subr.mxu1 %v3538_v11  ;;  %v4193_v0 = vld [vmem:[#allocation8 + $0x4e8] sm:$0xff]  ;;  %v4192_v3 = vld [vmem:[#allocation8 + $0x4e0] sm:$0xff] }
 0x374   :  { %3934 = vmatpush2.msra.mxu0 %v3409_v13  ;;  %4005 = vmatpush2.msra.mxu1 %v3537_v30  ;;  %v4061_v4 = vld [vmem:[#allocation8 + $0xc8] sm:$0xff]  ;;  %v4060_v11 = vld [vmem:[#allocation8 + $0xc0] sm:$0xff] }
 0x375   :  { %3935 = vmatprep.subr.mxu0 %v3406_v23  ;;  %4006 = vmatprep.subr.mxu1 %v3534_v24  ;;  %v4189_v5 = vld [vmem:[#allocation8 + $0x4c8] sm:$0xff]  ;;  %v4188_v13 = vld [vmem:[#allocation8 + $0x4c0] sm:$0xff] }
 0x376   :  { %3936 = vmatpush2.msra.mxu0 %v3405_v25  ;;  %4007 = vmatpush2.msra.mxu1 %v3533_v26  ;;  %v4057_v30 = vld [vmem:[#allocation8 + $0xa8] sm:$0xff]  ;;  %v4056_v24 = vld [vmem:[#allocation8 + $0xa0] sm:$0xff] }
 0x377   :  { %3937 = vmatprep.subr.mxu0 %v3402_v29  ;;  %4008 = vmatprep.subr.mxu1 %v3530_v48  ;;  %v4185_v23 = vld [vmem:[#allocation8 + $0x4a8] sm:$0xff]  ;;  %v4184_v25 = vld [vmem:[#allocation8 + $0x4a0] sm:$0xff] }
 0x378   :  { %3938 = vmatpush2.msra.mxu0 %v3401_v6  ;;  %4009 = vmatpush2.msra.mxu1 %v3529_v37  ;;  %v4053_v26 = vld [vmem:[#allocation8 + $0x88] sm:$0xff]  ;;  %v4052_v48 = vld [vmem:[#allocation8 + $0x80] sm:$0xff] }
 0x379   :  { %3940 = vmatmul.mubr.f32.vlgmr.msra.gmra.mxu0 %v9377_v9  ;;  %4011 = vmatmul.mubr.f32.vlgmr.msra.gmra.mxu1 %v9390_v40  ;;  %v4181_v29 = vld [vmem:[#allocation8 + $0x488] sm:$0xff]  ;;  %v4180_v6 = vld [vmem:[#allocation8 + $0x480] sm:$0xff] }
 0x37a   :  { %4420 = vmatprep.subr.mxu0 %v4097_v1  ;;  %4491 = vmatprep.subr.mxu1 %v4225_v38  ;;  %v4049_v37 = vld [vmem:[#allocation8 + $0x68] sm:$0xff]  ;;  %v4048_v38 = vld [vmem:[#allocation8 + $0x60] sm:$0xff] }
 0x37b   :  { %4421 = vmatpush1.msra.mxu0 %v4096_v27  ;;  %4484 = vmatprep.mubr.f32.mxu0 %v9354_v59  ;;  %v4177_v1 = vld [vmem:[#allocation8 + $0x468] sm:$0xff]  ;;  %v4176_v27 = vld [vmem:[#allocation8 + $0x460] sm:$0xff] }
 0x37c   :  { %4492 = vmatpush1.msra.mxu1 %v4224_v10  ;;  %4555 = vmatprep.mubr.f32.mxu1 %v9381_v19  ;;  %v4045_v10 = vld [vmem:[#allocation8 + $0x48] sm:$0xff] }
 0x37d   :  { %4422 = vmatprep.subr.mxu0 %v4093_v34  ;;  %4493 = vmatprep.subr.mxu1 %v4221_v28  ;;  %v4173_v34 = vld [vmem:[#allocation8 + $0x448] sm:$0xff]  ;;  %v4044_v28 = vld [vmem:[#allocation8 + $0x40] sm:$0xff] }
 0x37e   :  { %4423 = vmatpush1.msra.mxu0 %v4092_v16  ;;  %4494 = vmatpush1.msra.mxu1 %v4220_v22  ;;  %v4172_v16 = vld [vmem:[#allocation8 + $0x440] sm:$0xff]  ;;  %v4041_v22 = vld [vmem:[#allocation8 + $0x28] sm:$0xff] }
 0x37f   :  { %4424 = vmatprep.subr.mxu0 %v4089_v18  ;;  %4495 = vmatprep.subr.mxu1 %v4217_v7  ;;  %v4169_v18 = vld [vmem:[#allocation8 + $0x428] sm:$0xff]  ;;  %v4040_v7 = vld [vmem:[#allocation8 + $0x20] sm:$0xff] }
 0x380   :  { %4425 = vmatpush1.msra.mxu0 %v4088_v49  ;;  %4496 = vmatpush1.msra.mxu1 %v4216_v15  ;;  %v4168_v49 = vld [vmem:[#allocation8 + $0x420] sm:$0xff]  ;;  %v4037_v15 = vld [vmem:[#allocation8 + $0x8] sm:$0xff] }
 0x381   :  { %4426 = vmatprep.subr.mxu0 %v4085_v50  ;;  %4497 = vmatprep.subr.mxu1 %v4213_v41  ;;  %v4165_v50 = vld [vmem:[#allocation8 + $0x408] sm:$0xff]  ;;  %v4036_v41 = vld [vmem:[#allocation8] sm:$0xff] }
 0x382   :  { %4427 = vmatpush1.msra.mxu0 %v4084_v42  ;;  %4498 = vmatpush1.msra.mxu1 %v4212_v44  ;;  %v4164_v42 = vld [vmem:[#allocation8 + $0x400] sm:$0xff]  ;;  %v4161_v44 = vld [vmem:[#allocation8 + $0x3e8] sm:$0xff] }
 0x383   :  { %4428 = vmatprep.subr.mxu0 %v4081_v57  ;;  %4499 = vmatprep.subr.mxu1 %v4209_v12  ;;  %v4289_v57 = vld [vmem:[#allocation8 + $0x7e8] sm:$0xff]  ;;  %v4160_v12 = vld [vmem:[#allocation8 + $0x3e0] sm:$0xff] }
 0x384   :  { %4429 = vmatpush1.msra.mxu0 %v4080_v36  ;;  %4500 = vmatpush1.msra.mxu1 %v4208_v46  ;;  %v4288_v36 = vld [vmem:[#allocation8 + $0x7e0] sm:$0xff]  ;;  %v4157_v46 = vld [vmem:[#allocation8 + $0x3c8] sm:$0xff] }
 0x385   :  { %4430 = vmatprep.subr.mxu0 %v4077_v47  ;;  %4501 = vmatprep.subr.mxu1 %v4205_v51  ;;  %v4285_v47 = vld [vmem:[#allocation8 + $0x7c8] sm:$0xff]  ;;  %v4156_v51 = vld [vmem:[#allocation8 + $0x3c0] sm:$0xff] }
 0x386   :  { %4431 = vmatpush1.msra.mxu0 %v4076_v55  ;;  %4502 = vmatpush1.msra.mxu1 %v4204_v8  ;;  %v4284_v55 = vld [vmem:[#allocation8 + $0x7c0] sm:$0xff]  ;;  %v4153_v8 = vld [vmem:[#allocation8 + $0x3a8] sm:$0xff] }
 0x387   :  { %4432 = vmatprep.subr.mxu0 %v4073_v52  ;;  %4503 = vmatprep.subr.mxu1 %v4201_v53  ;;  %v4281_v52 = vld [vmem:[#allocation8 + $0x7a8] sm:$0xff]  ;;  %v4152_v53 = vld [vmem:[#allocation8 + $0x3a0] sm:$0xff] }
 0x388   :  { %4433 = vmatpush1.msra.mxu0 %v4072_v54  ;;  %4504 = vmatpush1.msra.mxu1 %v4200_v56  ;;  %v4280_v54 = vld [vmem:[#allocation8 + $0x7a0] sm:$0xff]  ;;  %v4149_v56 = vld [vmem:[#allocation8 + $0x388] sm:$0xff] }
 0x389   :  { %4434 = vmatprep.subr.mxu0 %v4069_v60  ;;  %4505 = vmatprep.subr.mxu1 %v4197_v61  ;;  %v4277_v60 = vld [vmem:[#allocation8 + $0x788] sm:$0xff]  ;;  %v4148_v61 = vld [vmem:[#allocation8 + $0x380] sm:$0xff] }
 0x38a   :  { %4435 = vmatpush1.msra.mxu0 %v4068_v62  ;;  %4506 = vmatpush1.msra.mxu1 %v4196_v2  ;;  %v4276_v62 = vld [vmem:[#allocation8 + $0x780] sm:$0xff]  ;;  %v4145_v2 = vld [vmem:[#allocation8 + $0x368] sm:$0xff] }
 0x38b   :  { %4436 = vmatprep.subr.mxu0 %v4065_v58  ;;  %4507 = vmatprep.subr.mxu1 %v4193_v0  ;;  %v4273_v58 = vld [vmem:[#allocation8 + $0x768] sm:$0xff]  ;;  %v4144_v0 = vld [vmem:[#allocation8 + $0x360] sm:$0xff] }
 0x38c   :  { %4437 = vmatpush1.msra.mxu0 %v4064_v33  ;;  %4508 = vmatpush1.msra.mxu1 %v4192_v3  ;;  %v4272_v33 = vld [vmem:[#allocation8 + $0x760] sm:$0xff]  ;;  %v4141_v3 = vld [vmem:[#allocation8 + $0x348] sm:$0xff] }
 0x38d   :  { %4438 = vmatprep.subr.mxu0 %v4061_v4  ;;  %4509 = vmatprep.subr.mxu1 %v4189_v5  ;;  %v4269_v4 = vld [vmem:[#allocation8 + $0x748] sm:$0xff]  ;;  %v4140_v5 = vld [vmem:[#allocation8 + $0x340] sm:$0xff] }
 0x38e   :  { %4439 = vmatpush1.msra.mxu0 %v4060_v11  ;;  %4510 = vmatpush1.msra.mxu1 %v4188_v13  ;;  %v4268_v11 = vld [vmem:[#allocation8 + $0x740] sm:$0xff]  ;;  %v4137_v13 = vld [vmem:[#allocation8 + $0x328] sm:$0xff] }
 0x38f   :  { %4440 = vmatprep.subr.mxu0 %v4057_v30  ;;  %4511 = vmatprep.subr.mxu1 %v4185_v23  ;;  %v4265_v30 = vld [vmem:[#allocation8 + $0x728] sm:$0xff]  ;;  %v4136_v23 = vld [vmem:[#allocation8 + $0x320] sm:$0xff] }
 0x390   :  { %4441 = vmatpush1.msra.mxu0 %v4056_v24  ;;  %4512 = vmatpush1.msra.mxu1 %v4184_v25  ;;  %v4264_v24 = vld [vmem:[#allocation8 + $0x720] sm:$0xff]  ;;  %v4133_v25 = vld [vmem:[#allocation8 + $0x308] sm:$0xff] }
 0x391   :  { %4442 = vmatprep.subr.mxu0 %v4053_v26  ;;  %4513 = vmatprep.subr.mxu1 %v4181_v29  ;;  %v4261_v26 = vld [vmem:[#allocation8 + $0x708] sm:$0xff]  ;;  %v4132_v29 = vld [vmem:[#allocation8 + $0x300] sm:$0xff] }
 0x392   :  { %4443 = vmatpush1.msra.mxu0 %v4052_v48  ;;  %4514 = vmatpush1.msra.mxu1 %v4180_v6  ;;  %v4260_v48 = vld [vmem:[#allocation8 + $0x700] sm:$0xff]  ;;  %v4129_v6 = vld [vmem:[#allocation8 + $0x2e8] sm:$0xff] }
 0x393   :  { %4444 = vmatprep.subr.mxu0 %v4049_v37  ;;  %4515 = vmatprep.subr.mxu1 %v4177_v1  ;;  %v4257_v37 = vld [vmem:[#allocation8 + $0x6e8] sm:$0xff]  ;;  %v4128_v1 = vld [vmem:[#allocation8 + $0x2e0] sm:$0xff] }
 0x394   :  { %4445 = vmatpush1.msra.mxu0 %v4048_v38  ;;  %4516 = vmatpush1.msra.mxu1 %v4176_v27  ;;  %v4256_v38 = vld [vmem:[#allocation8 + $0x6e0] sm:$0xff]  ;;  %v4125_v27 = vld [vmem:[#allocation8 + $0x2c8] sm:$0xff] }
 0x395   :  { %4446 = vmatprep.subr.mxu0 %v4045_v10  ;;  %4517 = vmatprep.subr.mxu1 %v4173_v34  ;;  %v4253_v10 = vld [vmem:[#allocation8 + $0x6c8] sm:$0xff]  ;;  %v4124_v34 = vld [vmem:[#allocation8 + $0x2c0] sm:$0xff] }
 0x396   :  { %4447 = vmatpush1.msra.mxu0 %v4044_v28  ;;  %4518 = vmatpush1.msra.mxu1 %v4172_v16  ;;  %v4252_v28 = vld [vmem:[#allocation8 + $0x6c0] sm:$0xff]  ;;  %v4121_v16 = vld [vmem:[#allocation8 + $0x2a8] sm:$0xff] }
 0x397   :  { %4448 = vmatprep.subr.mxu0 %v4041_v22  ;;  %4519 = vmatprep.subr.mxu1 %v4169_v18  ;;  %v4249_v22 = vld [vmem:[#allocation8 + $0x6a8] sm:$0xff]  ;;  %v4120_v18 = vld [vmem:[#allocation8 + $0x2a0] sm:$0xff] }
 0x398   :  { %4449 = vmatpush1.msra.mxu0 %v4040_v7  ;;  %4520 = vmatpush1.msra.mxu1 %v4168_v49  ;;  %v4248_v7 = vld [vmem:[#allocation8 + $0x6a0] sm:$0xff]  ;;  %v4117_v49 = vld [vmem:[#allocation8 + $0x288] sm:$0xff] }
 0x399   :  { %4450 = vmatprep.subr.mxu0 %v4037_v15  ;;  %4521 = vmatprep.subr.mxu1 %v4165_v50  ;;  %v4245_v15 = vld [vmem:[#allocation8 + $0x688] sm:$0xff]  ;;  %v2170_v50 = vmax.f32 %v9359_v39, %v9367_v32  ;;  %v4236_v32 = vld [vmem:[#allocation8 + $0x640] sm:$0xff] }
 0x39a   :  { %4451 = vmatpush1.msra.mxu0 %v4036_v41  ;;  %4522 = vmatpush1.msra.mxu1 %v4164_v42  ;;  %v2171_v41 = vmax.f32 %v9361_v14, %v9369_v45  ;;  %v4116_v42 = vld [vmem:[#allocation8 + $0x280] sm:$0xff]  ;;  %v4105_v45 = vld [vmem:[#allocation8 + $0x228] sm:$0xff] }
 0x39b   :  { %4452 = vmatprep.subr.mxu0 %v4161_v44  ;;  %4523 = vmatprep.subr.mxu1 %v4289_v57  ;;  %v4244_v44 = vld [vmem:[#allocation8 + $0x680] sm:$0xff]  ;;  %v4113_v57 = vld [vmem:[#allocation8 + $0x268] sm:$0xff] }
 0x39c   :  { %4453 = vmatpush2.msra.mxu0 %v4160_v12  ;;  %4524 = vmatpush2.msra.mxu1 %v4288_v36  ;;  %v4241_v12 = vld [vmem:[#allocation8 + $0x668] sm:$0xff]  ;;  %v4112_v36 = vld [vmem:[#allocation8 + $0x260] sm:$0xff]  ;;  %v2172_v39 = vmax.f32 %v2170_v50, %v2171_v41  ;;  %v4070_v41 = vld [vmem:[#allocation8 + $0x110] sm:$0xff] }
 0x39d   :  { %4454 = vmatprep.subr.mxu0 %v4157_v46  ;;  %4525 = vmatprep.subr.mxu1 %v4285_v47  ;;  %v4240_v46 = vld [vmem:[#allocation8 + $0x660] sm:$0xff]  ;;  %v4109_v47 = vld [vmem:[#allocation8 + $0x248] sm:$0xff] }
 0x39e   :  { %4455 = vmatpush2.msra.mxu0 %v4156_v51  ;;  %4526 = vmatpush2.msra.mxu1 %v4284_v55  ;;  %v4237_v51 = vld [vmem:[#allocation8 + $0x648] sm:$0xff]  ;;  %v4108_v14 = vld [vmem:[#allocation8 + $0x240] sm:$0xff] }
 0x39f   :  { %4456 = vmatprep.subr.mxu0 %v4153_v8  ;;  %4527 = vmatprep.subr.mxu1 %v4281_v52  ;;  %v4233_v55 = vld [vmem:[#allocation8 + $0x628] sm:$0xff]  ;;  %v4104_v8 = vld [vmem:[#allocation8 + $0x220] sm:$0xff] }
 0x3a0   :  { %4457 = vmatpush2.msra.mxu0 %v4152_v53  ;;  %4528 = vmatpush2.msra.mxu1 %v4280_v54  ;;  %v4232_v52 = vld [vmem:[#allocation8 + $0x620] sm:$0xff]  ;;  %v4101_v53 = vld [vmem:[#allocation8 + $0x208] sm:$0xff] }
 0x3a1   :  { %4458 = vmatprep.subr.mxu0 %v4149_v56  ;;  %4529 = vmatprep.subr.mxu1 %v4277_v60  ;;  %v4229_v54 = vld [vmem:[#allocation8 + $0x608] sm:$0xff]  ;;  %v9415_v56 = vld [vmem:[#allocation6] ss:$0 sm:$0xff]  ;;  %v4324_v50 = vld [vmem:[#allocation8 + $0x900] sm:$0xff] }
 0x3a2   :  { %4459 = vmatpush2.msra.mxu0 %v4148_v61  ;;  %4530 = vmatpush2.msra.mxu1 %v4276_v62  ;;  %v2180_v60 = vadd.f32 %v9415_v56, %v2172_v39  ;;  %v4100_v61 = vld [vmem:[#allocation8 + $0x200] sm:$0xff]  ;;  %v4313_v39 = vld [vmem:[#allocation8 + $0x8a8] sm:$0xff] }
 0x3a3   :  { %4460 = vmatprep.subr.mxu0 %v4145_v2  ;;  %4531 = vmatprep.subr.mxu1 %v4273_v58  ;;  %v4228_v62 = vld [vmem:[#allocation8 + $0x600] sm:$0xff]  ;;  %v4353_v2 = vld [vmem:[#allocation8 + $0x9e8] sm:$0xff]  ;;  %v4099_v58 = vld [vmem:[#allocation8 + $0x1f8] sm:$0xff] }
 0x3a4   :  { %4461 = vmatpush2.msra.mxu0 %v4144_v0  ;;  %4532 = vmatpush2.msra.mxu1 %v4272_v33  ;;  %v4352_v0 = vld [vmem:[#allocation8 + $0x9e0] sm:$0xff]  ;;  %v9418_v33 = vmax.f32 %v2180_v60, 0.0  ;;  %v4051_v60 = vld [vmem:[#allocation8 + $0x78] sm:$0xff] }
 0x3a5   :  { %4462 = vmatprep.subr.mxu0 %v4141_v3  ;;  %4533 = vmatprep.subr.mxu1 %v4269_v4  ;;  %v4098_v3 = vld [vmem:[#allocation8 + $0x1f0] sm:$0xff]  ;;  %v4349_v4 = vld [vmem:[#allocation8 + $0x9c8] sm:$0xff] }
 0x3a6   :  { %4463 = vmatpush2.msra.mxu0 %v4140_v5  ;;  %4534 = vmatpush2.msra.mxu1 %v4268_v11  ;;  %v4095_v5 = vld [vmem:[#allocation8 + $0x1d8] sm:$0xff]  ;;  %v4348_v11 = vld [vmem:[#allocation8 + $0x9c0] sm:$0xff] }
 0x3a7   :  { %4464 = vmatprep.subr.mxu0 %v4137_v13  ;;  %4535 = vmatprep.subr.mxu1 %v4265_v30  ;;  %v4094_v13 = vld [vmem:[#allocation8 + $0x1d0] sm:$0xff]  ;;  %v4345_v30 = vld [vmem:[#allocation8 + $0x9a8] sm:$0xff] }
 0x3a8   :  { %4465 = vmatpush2.msra.mxu0 %v4136_v23  ;;  %4536 = vmatpush2.msra.mxu1 %v4264_v24  ;;  %v4091_v23 = vld [vmem:[#allocation8 + $0x1b8] sm:$0xff]  ;;  %v4344_v24 = vld [vmem:[#allocation8 + $0x9a0] sm:$0xff] }
 0x3a9   :  { %4466 = vmatprep.subr.mxu0 %v4133_v25  ;;  %4537 = vmatprep.subr.mxu1 %v4261_v26  ;;  %v4090_v25 = vld [vmem:[#allocation8 + $0x1b0] sm:$0xff]  ;;  %v4341_v26 = vld [vmem:[#allocation8 + $0x988] sm:$0xff] }
 0x3aa   :  { %4467 = vmatpush2.msra.mxu0 %v4132_v29  ;;  %4538 = vmatpush2.msra.mxu1 %v4260_v48  ;;  %v4087_v29 = vld [vmem:[#allocation8 + $0x198] sm:$0xff]  ;;  %v4340_v48 = vld [vmem:[#allocation8 + $0x980] sm:$0xff] }
 0x3ab   :  { %4468 = vmatprep.subr.mxu0 %v4129_v6  ;;  %4539 = vmatprep.subr.mxu1 %v4257_v37  ;;  %v4086_v6 = vld [vmem:[#allocation8 + $0x190] sm:$0xff]  ;;  %v4337_v37 = vld [vmem:[#allocation8 + $0x968] sm:$0xff] }
 0x3ac   :  { %4469 = vmatpush2.msra.mxu0 %v4128_v1  ;;  %4540 = vmatpush2.msra.mxu1 %v4256_v38  ;;  %v4083_v1 = vld [vmem:[#allocation8 + $0x178] sm:$0xff]  ;;  %v4082_v38 = vld [vmem:[#allocation8 + $0x170] sm:$0xff] }
 0x3ad   :  { %4470 = vmatprep.subr.mxu0 %v4125_v27  ;;  %4541 = vmatprep.subr.mxu1 %v4253_v10  ;;  %v4333_v27 = vld [vmem:[#allocation8 + $0x948] sm:$0xff]  ;;  %v4079_v10 = vld [vmem:[#allocation8 + $0x158] sm:$0xff] }
 0x3ae   :  { %4471 = vmatpush2.msra.mxu0 %v4124_v34  ;;  %4542 = vmatpush2.msra.mxu1 %v4252_v28  ;;  %v4332_v34 = vld [vmem:[#allocation8 + $0x940] sm:$0xff]  ;;  %v4078_v28 = vld [vmem:[#allocation8 + $0x150] sm:$0xff] }
 0x3af   :  { %4472 = vmatprep.subr.mxu0 %v4121_v16  ;;  %4543 = vmatprep.subr.mxu1 %v4249_v22  ;;  %v4329_v16 = vld [vmem:[#allocation8 + $0x928] sm:$0xff]  ;;  %v4075_v22 = vld [vmem:[#allocation8 + $0x138] sm:$0xff] }
 0x3b0   :  { %4473 = vmatpush2.msra.mxu0 %v4120_v18  ;;  %4544 = vmatpush2.msra.mxu1 %v4248_v7  ;;  %v4328_v18 = vld [vmem:[#allocation8 + $0x920] sm:$0xff]  ;;  %v4074_v7 = vld [vmem:[#allocation8 + $0x130] sm:$0xff] }
 0x3b1   :  { %4474 = vmatprep.subr.mxu0 %v4117_v49  ;;  %4545 = vmatprep.subr.mxu1 %v4245_v15  ;;  %v4325_v49 = vld [vmem:[#allocation8 + $0x908] sm:$0xff]  ;;  %v4071_v15 = vld [vmem:[#allocation8 + $0x118] sm:$0xff] }
 0x3b2   :  { %4475 = vmatpush2.msra.mxu0 %v4116_v42  ;;  %4546 = vmatpush2.msra.mxu1 %v4244_v44  ;;  %v4321_v42 = vld [vmem:[#allocation8 + $0x8e8] sm:$0xff]  ;;  %v4067_v44 = vld [vmem:[#allocation8 + $0xf8] sm:$0xff] }
 0x3b3   :  { %4476 = vmatprep.subr.mxu0 %v4113_v57  ;;  %4547 = vmatprep.subr.mxu1 %v4241_v12  ;;  %v4320_v57 = vld [vmem:[#allocation8 + $0x8e0] sm:$0xff]  ;;  %v4066_v12 = vld [vmem:[#allocation8 + $0xf0] sm:$0xff] }
 0x3b4   :  { %4477 = vmatpush2.msra.mxu0 %v4112_v36  ;;  %4548 = vmatpush2.msra.mxu1 %v4240_v46  ;;  %v4317_v36 = vld [vmem:[#allocation8 + $0x8c8] sm:$0xff]  ;;  %v4063_v46 = vld [vmem:[#allocation8 + $0xd8] sm:$0xff] }
 0x3b5   :  { %4478 = vmatprep.subr.mxu0 %v4109_v47  ;;  %4549 = vmatprep.subr.mxu1 %v4237_v51  ;;  %v4316_v47 = vld [vmem:[#allocation8 + $0x8c0] sm:$0xff]  ;;  %v4062_v51 = vld [vmem:[#allocation8 + $0xd0] sm:$0xff] }
 0x3b6   :  { %4479 = vmatpush2.msra.mxu0 %v4108_v14  ;;  %4550 = vmatpush2.msra.mxu1 %v4236_v32  ;;  %v4059_v14 = vld [vmem:[#allocation8 + $0xb8] sm:$0xff]  ;;  %v4312_v32 = vld [vmem:[#allocation8 + $0x8a0] sm:$0xff] }
 0x3b7   :  { %4480 = vmatprep.subr.mxu0 %v4105_v45  ;;  %4551 = vmatprep.subr.mxu1 %v4233_v55  ;;  %v4058_v45 = vld [vmem:[#allocation8 + $0xb0] sm:$0xff]  ;;  %v4309_v55 = vld [vmem:[#allocation8 + $0x888] sm:$0xff] }
 0x3b8   :  { %4481 = vmatpush2.msra.mxu0 %v4104_v8  ;;  %4552 = vmatpush2.msra.mxu1 %v4232_v52  ;;  %v4055_v8 = vld [vmem:[#allocation8 + $0x98] sm:$0xff]  ;;  %v4308_v52 = vld [vmem:[#allocation8 + $0x880] sm:$0xff] }
 0x3b9   :  { %4482 = vmatprep.subr.mxu0 %v4101_v53  ;;  %4553 = vmatprep.subr.mxu1 %v4229_v54  ;;  %v4054_v53 = vld [vmem:[#allocation8 + $0x90] sm:$0xff]  ;;  %v4305_v54 = vld [vmem:[#allocation8 + $0x868] sm:$0xff] }
 0x3ba   :  { %4483 = vmatpush2.msra.mxu0 %v4100_v61  ;;  %4554 = vmatpush2.msra.mxu1 %v4228_v62  ;;  %v4304_v61 = vld [vmem:[#allocation8 + $0x860] sm:$0xff]  ;;  %v4050_v62 = vld [vmem:[#allocation8 + $0x70] sm:$0xff] }
 0x3bb   :  { %4485 = vmatmul.mubr.f32.vlgmr.msra.gmra.mxu0 %v9377_v9  ;;  %4556 = vmatmul.mubr.f32.vlgmr.msra.gmra.mxu1 %v9390_v40 }
 0x3bc   :  { %4562 = vmatprep.subr.mxu0 %v4353_v2  ;;  %4633 = vmatprep.subr.mxu1 %v4099_v58  ;;  %v4301_v2 = vld [vmem:[#allocation8 + $0x848] sm:$0xff]  ;;  %v4047_v58 = vld [vmem:[#allocation8 + $0x58] sm:$0xff] }
 0x3bd   :  { %4563 = vmatpush1.msra.mxu0 %v4352_v0  ;;  %4626 = vmatprep.mubr.f32.mxu0 %v9418_v33  ;;  %v4300_v0 = vld [vmem:[#allocation8 + $0x840] sm:$0xff] }
 0x3be   :  { %4634 = vmatpush1.msra.mxu1 %v4098_v3  ;;  %4697 = vmatprep.mubr.f32.mxu1 %v9354_v59  ;;  %v4336_v59 = vld [vmem:[#allocation8 + $0x960] sm:$0xff]  ;;  %v4046_v3 = vld [vmem:[#allocation8 + $0x50] sm:$0xff] }
 0x3bf   :  { %4564 = vmatprep.subr.mxu0 %v4349_v4  ;;  %4635 = vmatprep.subr.mxu1 %v4095_v5  ;;  %v4297_v4 = vld [vmem:[#allocation8 + $0x828] sm:$0xff]  ;;  %v4043_v5 = vld [vmem:[#allocation8 + $0x38] sm:$0xff] }
 0x3c0   :  { %4565 = vmatpush1.msra.mxu0 %v4348_v11  ;;  %4636 = vmatpush1.msra.mxu1 %v4094_v13  ;;  %v4296_v11 = vld [vmem:[#allocation8 + $0x820] sm:$0xff]  ;;  %v4042_v13 = vld [vmem:[#allocation8 + $0x30] sm:$0xff] }
 0x3c1   :  { %4566 = vmatprep.subr.mxu0 %v4345_v30  ;;  %4637 = vmatprep.subr.mxu1 %v4091_v23  ;;  %v4293_v30 = vld [vmem:[#allocation8 + $0x808] sm:$0xff]  ;;  %v4039_v23 = vld [vmem:[#allocation8 + $0x18] sm:$0xff] }
 0x3c2   :  { %4567 = vmatpush1.msra.mxu0 %v4344_v24  ;;  %4638 = vmatpush1.msra.mxu1 %v4090_v25  ;;  %v4292_v24 = vld [vmem:[#allocation8 + $0x800] sm:$0xff]  ;;  %v4038_v25 = vld [vmem:[#allocation8 + $0x10] sm:$0xff] }
 0x3c3   :  { %4568 = vmatprep.subr.mxu0 %v4341_v26  ;;  %4639 = vmatprep.subr.mxu1 %v4087_v29  ;;  %v4417_v26 = vld [vmem:[#allocation8 + $0xbe8] sm:$0xff]  ;;  %v4163_v29 = vld [vmem:[#allocation8 + $0x3f8] sm:$0xff] }
 0x3c4   :  { %4569 = vmatpush1.msra.mxu0 %v4340_v48  ;;  %4640 = vmatpush1.msra.mxu1 %v4086_v6  ;;  %v4416_v48 = vld [vmem:[#allocation8 + $0xbe0] sm:$0xff]  ;;  %v4162_v6 = vld [vmem:[#allocation8 + $0x3f0] sm:$0xff] }
 0x3c5   :  { %4570 = vmatprep.subr.mxu0 %v4337_v37  ;;  %4641 = vmatprep.subr.mxu1 %v4083_v1  ;;  %v4413_v37 = vld [vmem:[#allocation8 + $0xbc8] sm:$0xff]  ;;  %v4159_v1 = vld [vmem:[#allocation8 + $0x3d8] sm:$0xff] }
 0x3c6   :  { %4571 = vmatpush1.msra.mxu0 %v4336_v59  ;;  %4642 = vmatpush1.msra.mxu1 %v4082_v38  ;;  %v4412_v59 = vld [vmem:[#allocation8 + $0xbc0] sm:$0xff]  ;;  %v4158_v38 = vld [vmem:[#allocation8 + $0x3d0] sm:$0xff] }
 0x3c7   :  { %4572 = vmatprep.subr.mxu0 %v4333_v27  ;;  %4643 = vmatprep.subr.mxu1 %v4079_v10  ;;  %v4409_v27 = vld [vmem:[#allocation8 + $0xba8] sm:$0xff]  ;;  %v4155_v10 = vld [vmem:[#allocation8 + $0x3b8] sm:$0xff] }
 0x3c8   :  { %4573 = vmatpush1.msra.mxu0 %v4332_v34  ;;  %4644 = vmatpush1.msra.mxu1 %v4078_v28  ;;  %v4408_v34 = vld [vmem:[#allocation8 + $0xba0] sm:$0xff]  ;;  %v4154_v28 = vld [vmem:[#allocation8 + $0x3b0] sm:$0xff] }
 0x3c9   :  { %4574 = vmatprep.subr.mxu0 %v4329_v16  ;;  %4645 = vmatprep.subr.mxu1 %v4075_v22  ;;  %v4405_v16 = vld [vmem:[#allocation8 + $0xb88] sm:$0xff]  ;;  %v4151_v22 = vld [vmem:[#allocation8 + $0x398] sm:$0xff] }
 0x3ca   :  { %4575 = vmatpush1.msra.mxu0 %v4328_v18  ;;  %4646 = vmatpush1.msra.mxu1 %v4074_v7  ;;  %v4404_v18 = vld [vmem:[#allocation8 + $0xb80] sm:$0xff]  ;;  %v4150_v7 = vld [vmem:[#allocation8 + $0x390] sm:$0xff] }
 0x3cb   :  { %4576 = vmatprep.subr.mxu0 %v4325_v49  ;;  %4647 = vmatprep.subr.mxu1 %v4071_v15  ;;  %v4401_v49 = vld [vmem:[#allocation8 + $0xb68] sm:$0xff]  ;;  %v4147_v15 = vld [vmem:[#allocation8 + $0x378] sm:$0xff] }
 0x3cc   :  { %4577 = vmatpush1.msra.mxu0 %v4324_v50  ;;  %4648 = vmatpush1.msra.mxu1 %v4070_v41  ;;  %v4400_v50 = vld [vmem:[#allocation8 + $0xb60] sm:$0xff]  ;;  %v4146_v41 = vld [vmem:[#allocation8 + $0x370] sm:$0xff] }
 0x3cd   :  { %4578 = vmatprep.subr.mxu0 %v4321_v42  ;;  %4649 = vmatprep.subr.mxu1 %v4067_v44  ;;  %v4397_v42 = vld [vmem:[#allocation8 + $0xb48] sm:$0xff]  ;;  %v4143_v44 = vld [vmem:[#allocation8 + $0x358] sm:$0xff] }
 0x3ce   :  { %4579 = vmatpush1.msra.mxu0 %v4320_v57  ;;  %4650 = vmatpush1.msra.mxu1 %v4066_v12  ;;  %v4396_v57 = vld [vmem:[#allocation8 + $0xb40] sm:$0xff]  ;;  %v4142_v12 = vld [vmem:[#allocation8 + $0x350] sm:$0xff] }
 0x3cf   :  { %4580 = vmatprep.subr.mxu0 %v4317_v36  ;;  %4651 = vmatprep.subr.mxu1 %v4063_v46  ;;  %v4393_v36 = vld [vmem:[#allocation8 + $0xb28] sm:$0xff]  ;;  %v4139_v46 = vld [vmem:[#allocation8 + $0x338] sm:$0xff] }
 0x3d0   :  { %4581 = vmatpush1.msra.mxu0 %v4316_v47  ;;  %4652 = vmatpush1.msra.mxu1 %v4062_v51  ;;  %v4392_v47 = vld [vmem:[#allocation8 + $0xb20] sm:$0xff]  ;;  %v4138_v51 = vld [vmem:[#allocation8 + $0x330] sm:$0xff] }
 0x3d1   :  { %4582 = vmatprep.subr.mxu0 %v4313_v39  ;;  %4653 = vmatprep.subr.mxu1 %v4059_v14  ;;  %v4389_v39 = vld [vmem:[#allocation8 + $0xb08] sm:$0xff]  ;;  %v4135_v14 = vld [vmem:[#allocation8 + $0x318] sm:$0xff] }
 0x3d2   :  { %4583 = vmatpush1.msra.mxu0 %v4312_v32  ;;  %4654 = vmatpush1.msra.mxu1 %v4058_v45  ;;  %v4388_v32 = vld [vmem:[#allocation8 + $0xb00] sm:$0xff]  ;;  %v4134_v45 = vld [vmem:[#allocation8 + $0x310] sm:$0xff] }
 0x3d3   :  { %4584 = vmatprep.subr.mxu0 %v4309_v55  ;;  %4655 = vmatprep.subr.mxu1 %v4055_v8  ;;  %v4385_v55 = vld [vmem:[#allocation8 + $0xae8] sm:$0xff]  ;;  %v4131_v8 = vld [vmem:[#allocation8 + $0x2f8] sm:$0xff] }
 0x3d4   :  { %4585 = vmatpush1.msra.mxu0 %v4308_v52  ;;  %4656 = vmatpush1.msra.mxu1 %v4054_v53  ;;  %v4384_v52 = vld [vmem:[#allocation8 + $0xae0] sm:$0xff]  ;;  %v4130_v53 = vld [vmem:[#allocation8 + $0x2f0] sm:$0xff] }
 0x3d5   :  { %4586 = vmatprep.subr.mxu0 %v4305_v54  ;;  %4657 = vmatprep.subr.mxu1 %v4051_v60  ;;  %v4381_v54 = vld [vmem:[#allocation8 + $0xac8] sm:$0xff]  ;;  %v4127_v60 = vld [vmem:[#allocation8 + $0x2d8] sm:$0xff] }
 0x3d6   :  { %4587 = vmatpush1.msra.mxu0 %v4304_v61  ;;  %4658 = vmatpush1.msra.mxu1 %v4050_v62  ;;  %v4380_v61 = vld [vmem:[#allocation8 + $0xac0] sm:$0xff]  ;;  %v4126_v62 = vld [vmem:[#allocation8 + $0x2d0] sm:$0xff] }
 0x3d7   :  { %4588 = vmatprep.subr.mxu0 %v4301_v2  ;;  %4659 = vmatprep.subr.mxu1 %v4047_v58  ;;  %v4377_v2 = vld [vmem:[#allocation8 + $0xaa8] sm:$0xff]  ;;  %v4123_v58 = vld [vmem:[#allocation8 + $0x2b8] sm:$0xff] }
 0x3d8   :  { %4589 = vmatpush1.msra.mxu0 %v4300_v0  ;;  %4660 = vmatpush1.msra.mxu1 %v4046_v3  ;;  %v4376_v0 = vld [vmem:[#allocation8 + $0xaa0] sm:$0xff]  ;;  %v4122_v3 = vld [vmem:[#allocation8 + $0x2b0] sm:$0xff] }
 0x3d9   :  { %4590 = vmatprep.subr.mxu0 %v4297_v4  ;;  %4661 = vmatprep.subr.mxu1 %v4043_v5  ;;  %v4373_v4 = vld [vmem:[#allocation8 + $0xa88] sm:$0xff]  ;;  %v4119_v5 = vld [vmem:[#allocation8 + $0x298] sm:$0xff] }
 0x3da   :  { %4591 = vmatpush1.msra.mxu0 %v4296_v11  ;;  %4662 = vmatpush1.msra.mxu1 %v4042_v13  ;;  %v4372_v11 = vld [vmem:[#allocation8 + $0xa80] sm:$0xff]  ;;  %v4118_v13 = vld [vmem:[#allocation8 + $0x290] sm:$0xff] }
 0x3db   :  { %4592 = vmatprep.subr.mxu0 %v4293_v30  ;;  %4663 = vmatprep.subr.mxu1 %v4039_v23  ;;  %v4369_v30 = vld [vmem:[#allocation8 + $0xa68] sm:$0xff]  ;;  %v4115_v23 = vld [vmem:[#allocation8 + $0x278] sm:$0xff] }
 0x3dc   :  { %4593 = vmatpush1.msra.mxu0 %v4292_v24  ;;  %4664 = vmatpush1.msra.mxu1 %v4038_v25  ;;  %v4368_v24 = vld [vmem:[#allocation8 + $0xa60] sm:$0xff]  ;;  %v4114_v25 = vld [vmem:[#allocation8 + $0x270] sm:$0xff] }
 0x3dd   :  { %4594 = vmatprep.subr.mxu0 %v4417_v26  ;;  %4665 = vmatprep.subr.mxu1 %v4163_v29  ;;  %v4365_v26 = vld [vmem:[#allocation8 + $0xa48] sm:$0xff]  ;;  %v4111_v29 = vld [vmem:[#allocation8 + $0x258] sm:$0xff] }
 0x3de   :  { %4595 = vmatpush2.msra.mxu0 %v4416_v48  ;;  %4666 = vmatpush2.msra.mxu1 %v4162_v6  ;;  %v4364_v48 = vld [vmem:[#allocation8 + $0xa40] sm:$0xff]  ;;  %v4110_v6 = vld [vmem:[#allocation8 + $0x250] sm:$0xff] }
 0x3df   :  { %4596 = vmatprep.subr.mxu0 %v4413_v37  ;;  %4667 = vmatprep.subr.mxu1 %v4159_v1  ;;  %v4361_v37 = vld [vmem:[#allocation8 + $0xa28] sm:$0xff]  ;;  %v4107_v1 = vld [vmem:[#allocation8 + $0x238] sm:$0xff] }
 0x3e0   :  { %4597 = vmatpush2.msra.mxu0 %v4412_v59  ;;  %4668 = vmatpush2.msra.mxu1 %v4158_v38  ;;  %v1928_v59 = vadd.f32 %v9415_v56, %v9284_v43  ;;  %v4360_v38 = vld [vmem:[#allocation8 + $0xa20] sm:$0xff]  ;;  %v4355_v43 = vld [vmem:[#allocation8 + $0x9f8] sm:$0xff]  ;;  %v4226_v56 = vld [vmem:[#allocation8 + $0x5f0] sm:$0xff] }
 0x3e1   :  { %4598 = vmatprep.subr.mxu0 %v4409_v27  ;;  %4669 = vmatprep.subr.mxu1 %v4155_v10  ;;  %v4106_v27 = vld [vmem:[#allocation8 + $0x230] sm:$0xff]  ;;  %v4357_v10 = vld [vmem:[#allocation8 + $0xa08] sm:$0xff] }
 0x3e2   :  { %4599 = vmatpush2.msra.mxu0 %v4408_v34  ;;  %4670 = vmatpush2.msra.mxu1 %v4154_v28  ;;  %v4103_v34 = vld [vmem:[#allocation8 + $0x218] sm:$0xff]  ;;  %v4356_v28 = vld [vmem:[#allocation8 + $0xa00] sm:$0xff] }
 0x3e3   :  { %4600 = vmatprep.subr.mxu0 %v4405_v16  ;;  %4671 = vmatprep.subr.mxu1 %v4151_v22  ;;  %v4102_v16 = vld [vmem:[#allocation8 + $0x210] sm:$0xff]  ;;  %v9426_v22 = vmax.f32 %v1928_v59, 0.0 }
 0x3e4   :  { %4601 = vmatpush2.msra.mxu0 %v4404_v18  ;;  %4672 = vmatpush2.msra.mxu1 %v4150_v7  ;;  %v4227_v18 = vld [vmem:[#allocation8 + $0x5f8] sm:$0xff]  ;;  %v4354_v7 = vld [vmem:[#allocation8 + $0x9f0] sm:$0xff] }
 0x3e5   :  { %4602 = vmatprep.subr.mxu0 %v4401_v49  ;;  %4673 = vmatprep.subr.mxu1 %v4147_v15  ;;  %v4223_v49 = vld [vmem:[#allocation8 + $0x5d8] sm:$0xff]  ;;  %v4310_v59 = vld [vmem:[#allocation8 + $0x890] sm:$0xff] }
 0x3e6   :  { %4603 = vmatpush2.msra.mxu0 %v4400_v50  ;;  %4674 = vmatpush2.msra.mxu1 %v4146_v41  ;;  %v4351_v15 = vld [vmem:[#allocation8 + $0x9d8] sm:$0xff]  ;;  %v4222_v50 = vld [vmem:[#allocation8 + $0x5d0] sm:$0xff] }
 0x3e7   :  { %4604 = vmatprep.subr.mxu0 %v4397_v42  ;;  %4675 = vmatprep.subr.mxu1 %v4143_v44  ;;  %v4350_v41 = vld [vmem:[#allocation8 + $0x9d0] sm:$0xff]  ;;  %v4219_v42 = vld [vmem:[#allocation8 + $0x5b8] sm:$0xff] }
 0x3e8   :  { %4605 = vmatpush2.msra.mxu0 %v4396_v57  ;;  %4676 = vmatpush2.msra.mxu1 %v4142_v12  ;;  %v4347_v44 = vld [vmem:[#allocation8 + $0x9b8] sm:$0xff]  ;;  %v4218_v57 = vld [vmem:[#allocation8 + $0x5b0] sm:$0xff] }
 0x3e9   :  { %4606 = vmatprep.subr.mxu0 %v4393_v36  ;;  %4677 = vmatprep.subr.mxu1 %v4139_v46  ;;  %v4346_v12 = vld [vmem:[#allocation8 + $0x9b0] sm:$0xff]  ;;  %v4343_v36 = vld [vmem:[#allocation8 + $0x998] sm:$0xff] }
 0x3ea   :  { %4607 = vmatpush2.msra.mxu0 %v4392_v47  ;;  %4678 = vmatpush2.msra.mxu1 %v4138_v51  ;;  %v4214_v46 = vld [vmem:[#allocation8 + $0x590] sm:$0xff]  ;;  %v4211_v51 = vld [vmem:[#allocation8 + $0x578] sm:$0xff] }
 0x3eb   :  { %4608 = vmatprep.subr.mxu0 %v4389_v39  ;;  %4679 = vmatprep.subr.mxu1 %v4135_v14  ;;  %v4342_v47 = vld [vmem:[#allocation8 + $0x990] sm:$0xff]  ;;  %v4339_v39 = vld [vmem:[#allocation8 + $0x978] sm:$0xff] }
 0x3ec   :  { %4609 = vmatpush2.msra.mxu0 %v4388_v32  ;;  %4680 = vmatpush2.msra.mxu1 %v4134_v45  ;;  %v4210_v14 = vld [vmem:[#allocation8 + $0x570] sm:$0xff]  ;;  %v4207_v45 = vld [vmem:[#allocation8 + $0x558] sm:$0xff] }
 0x3ed   :  { %4610 = vmatprep.subr.mxu0 %v4385_v55  ;;  %4681 = vmatprep.subr.mxu1 %v4131_v8  ;;  %v4338_v32 = vld [vmem:[#allocation8 + $0x970] sm:$0xff]  ;;  %v4335_v55 = vld [vmem:[#allocation8 + $0x958] sm:$0xff] }
 0x3ee   :  { %4611 = vmatpush2.msra.mxu0 %v4384_v52  ;;  %4682 = vmatpush2.msra.mxu1 %v4130_v53  ;;  %v4206_v8 = vld [vmem:[#allocation8 + $0x550] sm:$0xff]  ;;  %v4203_v53 = vld [vmem:[#allocation8 + $0x538] sm:$0xff] }
 0x3ef   :  { %4612 = vmatprep.subr.mxu0 %v4381_v54  ;;  %4683 = vmatprep.subr.mxu1 %v4127_v60  ;;  %v4334_v52 = vld [vmem:[#allocation8 + $0x950] sm:$0xff]  ;;  %v4331_v54 = vld [vmem:[#allocation8 + $0x938] sm:$0xff] }
 0x3f0   :  { %4613 = vmatpush2.msra.mxu0 %v4380_v61  ;;  %4684 = vmatpush2.msra.mxu1 %v4126_v62  ;;  %v4202_v60 = vld [vmem:[#allocation8 + $0x530] sm:$0xff]  ;;  %v4199_v62 = vld [vmem:[#allocation8 + $0x518] sm:$0xff] }
 0x3f1   :  { %4614 = vmatprep.subr.mxu0 %v4377_v2  ;;  %4685 = vmatprep.subr.mxu1 %v4123_v58  ;;  %v4330_v61 = vld [vmem:[#allocation8 + $0x930] sm:$0xff]  ;;  %v4327_v2 = vld [vmem:[#allocation8 + $0x918] sm:$0xff] }
 0x3f2   :  { %4615 = vmatpush2.msra.mxu0 %v4376_v0  ;;  %4686 = vmatpush2.msra.mxu1 %v4122_v3  ;;  %v4198_v58 = vld [vmem:[#allocation8 + $0x510] sm:$0xff]  ;;  %v4195_v3 = vld [vmem:[#allocation8 + $0x4f8] sm:$0xff] }
 0x3f3   :  { %4616 = vmatprep.subr.mxu0 %v4373_v4  ;;  %4687 = vmatprep.subr.mxu1 %v4119_v5  ;;  %v4326_v0 = vld [vmem:[#allocation8 + $0x910] sm:$0xff]  ;;  %v4323_v4 = vld [vmem:[#allocation8 + $0x8f8] sm:$0xff] }
 0x3f4   :  { %4617 = vmatpush2.msra.mxu0 %v4372_v11  ;;  %4688 = vmatpush2.msra.mxu1 %v4118_v13  ;;  %v4194_v5 = vld [vmem:[#allocation8 + $0x4f0] sm:$0xff]  ;;  %v4191_v13 = vld [vmem:[#allocation8 + $0x4d8] sm:$0xff] }
 0x3f5   :  { %4618 = vmatprep.subr.mxu0 %v4369_v30  ;;  %4689 = vmatprep.subr.mxu1 %v4115_v23  ;;  %v4322_v11 = vld [vmem:[#allocation8 + $0x8f0] sm:$0xff]  ;;  %v4319_v30 = vld [vmem:[#allocation8 + $0x8d8] sm:$0xff] }
 0x3f6   :  { %4619 = vmatpush2.msra.mxu0 %v4368_v24  ;;  %4690 = vmatpush2.msra.mxu1 %v4114_v25  ;;  %v4190_v23 = vld [vmem:[#allocation8 + $0x4d0] sm:$0xff]  ;;  %v4187_v25 = vld [vmem:[#allocation8 + $0x4b8] sm:$0xff] }
 0x3f7   :  { %4620 = vmatprep.subr.mxu0 %v4365_v26  ;;  %4691 = vmatprep.subr.mxu1 %v4111_v29  ;;  %v4318_v24 = vld [vmem:[#allocation8 + $0x8d0] sm:$0xff]  ;;  %v4315_v26 = vld [vmem:[#allocation8 + $0x8b8] sm:$0xff] }
 0x3f8   :  { %4621 = vmatpush2.msra.mxu0 %v4364_v48  ;;  %4692 = vmatpush2.msra.mxu1 %v4110_v6  ;;  %v4186_v29 = vld [vmem:[#allocation8 + $0x4b0] sm:$0xff]  ;;  %v4183_v6 = vld [vmem:[#allocation8 + $0x498] sm:$0xff] }
 0x3f9   :  { %4622 = vmatprep.subr.mxu0 %v4361_v37  ;;  %4693 = vmatprep.subr.mxu1 %v4107_v1  ;;  %v4314_v48 = vld [vmem:[#allocation8 + $0x8b0] sm:$0xff]  ;;  %v4311_v37 = vld [vmem:[#allocation8 + $0x898] sm:$0xff] }
 0x3fa   :  { %4623 = vmatpush2.msra.mxu0 %v4360_v38  ;;  %4694 = vmatpush2.msra.mxu1 %v4106_v27  ;;  %v4182_v1 = vld [vmem:[#allocation8 + $0x490] sm:$0xff]  ;;  %v4179_v38 = vld [vmem:[#allocation8 + $0x478] sm:$0xff] }
 0x3fb   :  { %4624 = vmatprep.subr.mxu0 %v4357_v10  ;;  %4695 = vmatprep.subr.mxu1 %v4103_v34  ;;  %v4307_v27 = vld [vmem:[#allocation8 + $0x878] sm:$0xff]  ;;  %v4178_v10 = vld [vmem:[#allocation8 + $0x470] sm:$0xff] }
 0x3fc   :  { %4625 = vmatpush2.msra.mxu0 %v4356_v28  ;;  %4696 = vmatpush2.msra.mxu1 %v4102_v16  ;;  %v4306_v34 = vld [vmem:[#allocation8 + $0x870] sm:$0xff]  ;;  %v4175_v28 = vld [vmem:[#allocation8 + $0x458] sm:$0xff] }
 0x3fd   :  { %4627 = vmatmul.mubr.f32.vlgmr.msra.gmra.mxu0 %v9426_v22  ;;  %4698 = vmatmul.mubr.f32.vlgmr.msra.gmra.mxu1 %v9377_v9  ;;  %v4215_v9 = vld [vmem:[#allocation8 + $0x598] sm:$0xff] }
 0x3fe   :  { %4704 = vmatprep.subr.mxu0 %v4227_v18  ;;  %4775 = vmatprep.subr.mxu1 %v4355_v43  ;;  %v4303_v16 = vld [vmem:[#allocation8 + $0x858] sm:$0xff]  ;;  %v4174_v18 = vld [vmem:[#allocation8 + $0x450] sm:$0xff] }
 0x3ff   :  { %4705 = vmatpush1.msra.mxu0 %v4226_v56  ;;  %4768 = vmatprep.mubr.f32.mxu0 %v9381_v19  ;;  %v4302_v43 = vld [vmem:[#allocation8 + $0x850] sm:$0xff]  ;;  %v4171_v56 = vld [vmem:[#allocation8 + $0x438] sm:$0xff] }
 0x400   :  { %4776 = vmatpush1.msra.mxu1 %v4354_v7  ;;  %4839 = vmatprep.mubr.f32.mxu1 %v9418_v33  ;;  %v4299_v7 = vld [vmem:[#allocation8 + $0x838] sm:$0xff] }
 0x401   :  { %4706 = vmatprep.subr.mxu0 %v4223_v49  ;;  %4777 = vmatprep.subr.mxu1 %v4351_v15  ;;  %v4170_v49 = vld [vmem:[#allocation8 + $0x430] sm:$0xff] }
 0x402   :  { %4707 = vmatpush1.msra.mxu0 %v4222_v50  ;;  %4778 = vmatpush1.msra.mxu1 %v4350_v41  ;;  %v4298_v15 = vld [vmem:[#allocation8 + $0x830] sm:$0xff]  ;;  %v4167_v50 = vld [vmem:[#allocation8 + $0x418] sm:$0xff] }
 0x403   :  { %4708 = vmatprep.subr.mxu0 %v4219_v42  ;;  %4779 = vmatprep.subr.mxu1 %v4347_v44  ;;  %v4295_v41 = vld [vmem:[#allocation8 + $0x818] sm:$0xff]  ;;  %v4166_v42 = vld [vmem:[#allocation8 + $0x410] sm:$0xff] }
 0x404   :  { %4709 = vmatpush1.msra.mxu0 %v4218_v57  ;;  %4780 = vmatpush1.msra.mxu1 %v4346_v12  ;;  %v4294_v44 = vld [vmem:[#allocation8 + $0x810] sm:$0xff]  ;;  %v4291_v57 = vld [vmem:[#allocation8 + $0x7f8] sm:$0xff] }
 0x405   :  { %4710 = vmatprep.subr.mxu0 %v4215_v9  ;;  %4781 = vmatprep.subr.mxu1 %v4343_v36  ;;  %v4419_v12 = vld [vmem:[#allocation8 + $0xbf8] sm:$0xff]  ;;  %v4290_v9 = vld [vmem:[#allocation8 + $0x7f0] sm:$0xff] }
 0x406   :  { %4711 = vmatpush1.msra.mxu0 %v4214_v46  ;;  %4782 = vmatpush1.msra.mxu1 %v4342_v47  ;;  %v4418_v36 = vld [vmem:[#allocation8 + $0xbf0] sm:$0xff]  ;;  %v4287_v46 = vld [vmem:[#allocation8 + $0x7d8] sm:$0xff] }
 0x407   :  { %4712 = vmatprep.subr.mxu0 %v4211_v51  ;;  %4783 = vmatprep.subr.mxu1 %v4339_v39  ;;  %v4415_v47 = vld [vmem:[#allocation8 + $0xbd8] sm:$0xff]  ;;  %v4286_v51 = vld [vmem:[#allocation8 + $0x7d0] sm:$0xff] }
 0x408   :  { %4713 = vmatpush1.msra.mxu0 %v4210_v14  ;;  %4784 = vmatpush1.msra.mxu1 %v4338_v32  ;;  %v4414_v39 = vld [vmem:[#allocation8 + $0xbd0] sm:$0xff]  ;;  %v4283_v14 = vld [vmem:[#allocation8 + $0x7b8] sm:$0xff] }
 0x409   :  { %4714 = vmatprep.subr.mxu0 %v4207_v45  ;;  %4785 = vmatprep.subr.mxu1 %v4335_v55  ;;  %v4411_v32 = vld [vmem:[#allocation8 + $0xbb8] sm:$0xff]  ;;  %v4282_v45 = vld [vmem:[#allocation8 + $0x7b0] sm:$0xff] }
 0x40a   :  { %4715 = vmatpush1.msra.mxu0 %v4206_v8  ;;  %4786 = vmatpush1.msra.mxu1 %v4334_v52  ;;  %v4410_v55 = vld [vmem:[#allocation8 + $0xbb0] sm:$0xff]  ;;  %v4279_v8 = vld [vmem:[#allocation8 + $0x798] sm:$0xff] }
 0x40b   :  { %4716 = vmatprep.subr.mxu0 %v4203_v53  ;;  %4787 = vmatprep.subr.mxu1 %v4331_v54  ;;  %v4407_v52 = vld [vmem:[#allocation8 + $0xb98] sm:$0xff]  ;;  %v4278_v53 = vld [vmem:[#allocation8 + $0x790] sm:$0xff] }
 0x40c   :  { %4717 = vmatpush1.msra.mxu0 %v4202_v60  ;;  %4788 = vmatpush1.msra.mxu1 %v4330_v61  ;;  %v4406_v54 = vld [vmem:[#allocation8 + $0xb90] sm:$0xff]  ;;  %v4275_v60 = vld [vmem:[#allocation8 + $0x778] sm:$0xff] }
 0x40d   :  { %4718 = vmatprep.subr.mxu0 %v4199_v62  ;;  %4789 = vmatprep.subr.mxu1 %v4327_v2  ;;  %v4403_v61 = vld [vmem:[#allocation8 + $0xb78] sm:$0xff]  ;;  %v4274_v62 = vld [vmem:[#allocation8 + $0x770] sm:$0xff] }
 0x40e   :  { %4719 = vmatpush1.msra.mxu0 %v4198_v58  ;;  %4790 = vmatpush1.msra.mxu1 %v4326_v0  ;;  %v4402_v2 = vld [vmem:[#allocation8 + $0xb70] sm:$0xff]  ;;  %v4271_v58 = vld [vmem:[#allocation8 + $0x758] sm:$0xff] }
 0x40f   :  { %4720 = vmatprep.subr.mxu0 %v4195_v3  ;;  %4791 = vmatprep.subr.mxu1 %v4323_v4  ;;  %v4399_v0 = vld [vmem:[#allocation8 + $0xb58] sm:$0xff]  ;;  %v4270_v3 = vld [vmem:[#allocation8 + $0x750] sm:$0xff] }
 0x410   :  { %4721 = vmatpush1.msra.mxu0 %v4194_v5  ;;  %4792 = vmatpush1.msra.mxu1 %v4322_v11  ;;  %v4398_v4 = vld [vmem:[#allocation8 + $0xb50] sm:$0xff]  ;;  %v4267_v5 = vld [vmem:[#allocation8 + $0x738] sm:$0xff] }
 0x411   :  { %4722 = vmatprep.subr.mxu0 %v4191_v13  ;;  %4793 = vmatprep.subr.mxu1 %v4319_v30  ;;  %v4395_v11 = vld [vmem:[#allocation8 + $0xb38] sm:$0xff]  ;;  %v4266_v13 = vld [vmem:[#allocation8 + $0x730] sm:$0xff] }
 0x412   :  { %4723 = vmatpush1.msra.mxu0 %v4190_v23  ;;  %4794 = vmatpush1.msra.mxu1 %v4318_v24  ;;  %v4394_v30 = vld [vmem:[#allocation8 + $0xb30] sm:$0xff]  ;;  %v4263_v23 = vld [vmem:[#allocation8 + $0x718] sm:$0xff] }
 0x413   :  { %4724 = vmatprep.subr.mxu0 %v4187_v25  ;;  %4795 = vmatprep.subr.mxu1 %v4315_v26  ;;  %v4391_v24 = vld [vmem:[#allocation8 + $0xb18] sm:$0xff]  ;;  %v4262_v25 = vld [vmem:[#allocation8 + $0x710] sm:$0xff] }
 0x414   :  { %4725 = vmatpush1.msra.mxu0 %v4186_v29  ;;  %4796 = vmatpush1.msra.mxu1 %v4314_v48  ;;  %v4390_v26 = vld [vmem:[#allocation8 + $0xb10] sm:$0xff]  ;;  %v4259_v29 = vld [vmem:[#allocation8 + $0x6f8] sm:$0xff] }
 0x415   :  { %4726 = vmatprep.subr.mxu0 %v4183_v6  ;;  %4797 = vmatprep.subr.mxu1 %v4311_v37  ;;  %v4387_v48 = vld [vmem:[#allocation8 + $0xaf8] sm:$0xff]  ;;  %v4258_v6 = vld [vmem:[#allocation8 + $0x6f0] sm:$0xff] }
 0x416   :  { %4727 = vmatpush1.msra.mxu0 %v4182_v1  ;;  %4798 = vmatpush1.msra.mxu1 %v4310_v59  ;;  %v4386_v37 = vld [vmem:[#allocation8 + $0xaf0] sm:$0xff]  ;;  %v4255_v1 = vld [vmem:[#allocation8 + $0x6d8] sm:$0xff] }
 0x417   :  { %4728 = vmatprep.subr.mxu0 %v4179_v38  ;;  %4799 = vmatprep.subr.mxu1 %v4307_v27  ;;  %v4383_v59 = vld [vmem:[#allocation8 + $0xad8] sm:$0xff]  ;;  %v4254_v38 = vld [vmem:[#allocation8 + $0x6d0] sm:$0xff] }
 0x418   :  { %4729 = vmatpush1.msra.mxu0 %v4178_v10  ;;  %4800 = vmatpush1.msra.mxu1 %v4306_v34  ;;  %v4382_v27 = vld [vmem:[#allocation8 + $0xad0] sm:$0xff]  ;;  %v4251_v10 = vld [vmem:[#allocation8 + $0x6b8] sm:$0xff] }
 0x419   :  { %4730 = vmatprep.subr.mxu0 %v4175_v28  ;;  %4801 = vmatprep.subr.mxu1 %v4303_v16  ;;  %v4379_v34 = vld [vmem:[#allocation8 + $0xab8] sm:$0xff]  ;;  %v4250_v28 = vld [vmem:[#allocation8 + $0x6b0] sm:$0xff] }
 0x41a   :  { %4731 = vmatpush1.msra.mxu0 %v4174_v18  ;;  %4802 = vmatpush1.msra.mxu1 %v4302_v43  ;;  %v4378_v16 = vld [vmem:[#allocation8 + $0xab0] sm:$0xff]  ;;  %v4247_v18 = vld [vmem:[#allocation8 + $0x698] sm:$0xff] }
 0x41b   :  { %4732 = vmatprep.subr.mxu0 %v4171_v56  ;;  %4803 = vmatprep.subr.mxu1 %v4299_v7  ;;  %v4375_v43 = vld [vmem:[#allocation8 + $0xa98] sm:$0xff]  ;;  %v4246_v56 = vld [vmem:[#allocation8 + $0x690] sm:$0xff] }
 0x41c   :  { %4733 = vmatpush1.msra.mxu0 %v4170_v49  ;;  %4804 = vmatpush1.msra.mxu1 %v4298_v15  ;;  %v4374_v7 = vld [vmem:[#allocation8 + $0xa90] sm:$0xff]  ;;  %v4243_v49 = vld [vmem:[#allocation8 + $0x678] sm:$0xff] }
 0x41d   :  { %4734 = vmatprep.subr.mxu0 %v4167_v50  ;;  %4805 = vmatprep.subr.mxu1 %v4295_v41  ;;  %v4371_v15 = vld [vmem:[#allocation8 + $0xa78] sm:$0xff]  ;;  %v4242_v50 = vld [vmem:[#allocation8 + $0x670] sm:$0xff] }
 0x41e   :  { %4735 = vmatpush1.msra.mxu0 %v4166_v42  ;;  %4806 = vmatpush1.msra.mxu1 %v4294_v44  ;;  %v4370_v41 = vld [vmem:[#allocation8 + $0xa70] sm:$0xff]  ;;  %v4239_v42 = vld [vmem:[#allocation8 + $0x658] sm:$0xff] }
 0x41f   :  { %4736 = vmatprep.subr.mxu0 %v4291_v57  ;;  %4807 = vmatprep.subr.mxu1 %v4419_v12  ;;  %v4367_v44 = vld [vmem:[#allocation8 + $0xa58] sm:$0xff]  ;;  %v4238_v57 = vld [vmem:[#allocation8 + $0x650] sm:$0xff] }
 0x420   :  { %4737 = vmatpush2.msra.mxu0 %v4290_v9  ;;  %4808 = vmatpush2.msra.mxu1 %v4418_v36  ;;  %v4366_v12 = vld [vmem:[#allocation8 + $0xa50] sm:$0xff]  ;;  %v4235_v9 = vld [vmem:[#allocation8 + $0x638] sm:$0xff] }
 0x421   :  { %4738 = vmatprep.subr.mxu0 %v4287_v46  ;;  %4809 = vmatprep.subr.mxu1 %v4415_v47  ;;  %v4363_v36 = vld [vmem:[#allocation8 + $0xa38] sm:$0xff]  ;;  %v4234_v46 = vld [vmem:[#allocation8 + $0x630] sm:$0xff] }
 0x422   :  { %4739 = vmatpush2.msra.mxu0 %v4286_v51  ;;  %4810 = vmatpush2.msra.mxu1 %v4414_v39  ;;  %v4362_v47 = vld [vmem:[#allocation8 + $0xa30] sm:$0xff]  ;;  %v4231_v51 = vld [vmem:[#allocation8 + $0x618] sm:$0xff] }
 0x423   :  { %4740 = vmatprep.subr.mxu0 %v4283_v14  ;;  %4811 = vmatprep.subr.mxu1 %v4411_v32  ;;  %v4359_v39 = vld [vmem:[#allocation8 + $0xa18] sm:$0xff]  ;;  %v4230_v14 = vld [vmem:[#allocation8 + $0x610] sm:$0xff] }
 0x424   :  { %4741 = vmatpush2.msra.mxu0 %v4282_v45  ;;  %4812 = vmatpush2.msra.mxu1 %v4410_v55  ;;  %v4358_v32 = vld [vmem:[#allocation8 + $0xa10] sm:$0xff]  ;;  %v4926_v45 = vld [vmem:[#allocation8 + $0x1e8] sm:$0xff] }
 0x425   :  { %4742 = vmatprep.subr.mxu0 %v4279_v8  ;;  %4813 = vmatprep.subr.mxu1 %v4407_v52  ;;  %v5054_v55 = vld [vmem:[#allocation8 + $0x5e8] sm:$0xff]  ;;  %v4925_v8 = vld [vmem:[#allocation8 + $0x1e0] sm:$0xff] }
 0x426   :  { %4743 = vmatpush2.msra.mxu0 %v4278_v53  ;;  %4814 = vmatpush2.msra.mxu1 %v4406_v54  ;;  %v5053_v52 = vld [vmem:[#allocation8 + $0x5e0] sm:$0xff]  ;;  %v4922_v53 = vld [vmem:[#allocation8 + $0x1c8] sm:$0xff] }
 0x427   :  { %4744 = vmatprep.subr.mxu0 %v4275_v60  ;;  %4815 = vmatprep.subr.mxu1 %v4403_v61  ;;  %v5050_v54 = vld [vmem:[#allocation8 + $0x5c8] sm:$0xff]  ;;  %v4921_v60 = vld [vmem:[#allocation8 + $0x1c0] sm:$0xff] }
 0x428   :  { %4745 = vmatpush2.msra.mxu0 %v4274_v62  ;;  %4816 = vmatpush2.msra.mxu1 %v4402_v2  ;;  %v5049_v61 = vld [vmem:[#allocation8 + $0x5c0] sm:$0xff]  ;;  %v4918_v62 = vld [vmem:[#allocation8 + $0x1a8] sm:$0xff] }
 0x429   :  { %4746 = vmatprep.subr.mxu0 %v4271_v58  ;;  %4817 = vmatprep.subr.mxu1 %v4399_v0  ;;  %v5046_v2 = vld [vmem:[#allocation8 + $0x5a8] sm:$0xff]  ;;  %v4917_v58 = vld [vmem:[#allocation8 + $0x1a0] sm:$0xff] }
 0x42a   :  { %4747 = vmatpush2.msra.mxu0 %v4270_v3  ;;  %4818 = vmatpush2.msra.mxu1 %v4398_v4  ;;  %v5045_v0 = vld [vmem:[#allocation8 + $0x5a0] sm:$0xff]  ;;  %v4914_v3 = vld [vmem:[#allocation8 + $0x188] sm:$0xff] }
 0x42b   :  { %4748 = vmatprep.subr.mxu0 %v4267_v5  ;;  %4819 = vmatprep.subr.mxu1 %v4395_v11  ;;  %v5042_v4 = vld [vmem:[#allocation8 + $0x588] sm:$0xff]  ;;  %v4913_v5 = vld [vmem:[#allocation8 + $0x180] sm:$0xff] }
 0x42c   :  { %4749 = vmatpush2.msra.mxu0 %v4266_v13  ;;  %4820 = vmatpush2.msra.mxu1 %v4394_v30  ;;  %v5041_v11 = vld [vmem:[#allocation8 + $0x580] sm:$0xff]  ;;  %v4910_v13 = vld [vmem:[#allocation8 + $0x168] sm:$0xff] }
 0x42d   :  { %4750 = vmatprep.subr.mxu0 %v4263_v23  ;;  %4821 = vmatprep.subr.mxu1 %v4391_v24  ;;  %v5038_v30 = vld [vmem:[#allocation8 + $0x568] sm:$0xff]  ;;  %v4909_v23 = vld [vmem:[#allocation8 + $0x160] sm:$0xff] }
 0x42e   :  { %4751 = vmatpush2.msra.mxu0 %v4262_v25  ;;  %4822 = vmatpush2.msra.mxu1 %v4390_v26  ;;  %v5037_v24 = vld [vmem:[#allocation8 + $0x560] sm:$0xff]  ;;  %v4906_v25 = vld [vmem:[#allocation8 + $0x148] sm:$0xff] }
 0x42f   :  { %4752 = vmatprep.subr.mxu0 %v4259_v29  ;;  %4823 = vmatprep.subr.mxu1 %v4387_v48  ;;  %v5034_v26 = vld [vmem:[#allocation8 + $0x548] sm:$0xff]  ;;  %v4905_v29 = vld [vmem:[#allocation8 + $0x140] sm:$0xff] }
 0x430   :  { %4753 = vmatpush2.msra.mxu0 %v4258_v6  ;;  %4824 = vmatpush2.msra.mxu1 %v4386_v37  ;;  %v5033_v48 = vld [vmem:[#allocation8 + $0x540] sm:$0xff]  ;;  %v4902_v6 = vld [vmem:[#allocation8 + $0x128] sm:$0xff] }
 0x431   :  { %4754 = vmatprep.subr.mxu0 %v4255_v1  ;;  %4825 = vmatprep.subr.mxu1 %v4383_v59  ;;  %v5030_v37 = vld [vmem:[#allocation8 + $0x528] sm:$0xff]  ;;  %v4901_v1 = vld [vmem:[#allocation8 + $0x120] sm:$0xff] }
 0x432   :  { %4755 = vmatpush2.msra.mxu0 %v4254_v38  ;;  %4826 = vmatpush2.msra.mxu1 %v4382_v27  ;;  %v5029_v59 = vld [vmem:[#allocation8 + $0x520] sm:$0xff]  ;;  %v4898_v38 = vld [vmem:[#allocation8 + $0x108] sm:$0xff] }
 0x433   :  { %4756 = vmatprep.subr.mxu0 %v4251_v10  ;;  %4827 = vmatprep.subr.mxu1 %v4379_v34  ;;  %v5026_v27 = vld [vmem:[#allocation8 + $0x508] sm:$0xff]  ;;  %v4897_v10 = vld [vmem:[#allocation8 + $0x100] sm:$0xff] }
 0x434   :  { %4757 = vmatpush2.msra.mxu0 %v4250_v28  ;;  %4828 = vmatpush2.msra.mxu1 %v4378_v16  ;;  %v5025_v34 = vld [vmem:[#allocation8 + $0x500] sm:$0xff]  ;;  %v4894_v28 = vld [vmem:[#allocation8 + $0xe8] sm:$0xff] }
 0x435   :  { %4758 = vmatprep.subr.mxu0 %v4247_v18  ;;  %4829 = vmatprep.subr.mxu1 %v4375_v43  ;;  %v5022_v16 = vld [vmem:[#allocation8 + $0x4e8] sm:$0xff]  ;;  %v4893_v18 = vld [vmem:[#allocation8 + $0xe0] sm:$0xff] }
 0x436   :  { %4759 = vmatpush2.msra.mxu0 %v4246_v56  ;;  %4830 = vmatpush2.msra.mxu1 %v4374_v7  ;;  %v5021_v43 = vld [vmem:[#allocation8 + $0x4e0] sm:$0xff]  ;;  %v4890_v56 = vld [vmem:[#allocation8 + $0xc8] sm:$0xff] }
 0x437   :  { %4760 = vmatprep.subr.mxu0 %v4243_v49  ;;  %4831 = vmatprep.subr.mxu1 %v4371_v15  ;;  %v5018_v7 = vld [vmem:[#allocation8 + $0x4c8] sm:$0xff]  ;;  %v4889_v49 = vld [vmem:[#allocation8 + $0xc0] sm:$0xff] }
 0x438   :  { %4761 = vmatpush2.msra.mxu0 %v4242_v50  ;;  %4832 = vmatpush2.msra.mxu1 %v4370_v41  ;;  %v5017_v15 = vld [vmem:[#allocation8 + $0x4c0] sm:$0xff]  ;;  %v4886_v50 = vld [vmem:[#allocation8 + $0xa8] sm:$0xff] }
 0x439   :  { %4762 = vmatprep.subr.mxu0 %v4239_v42  ;;  %4833 = vmatprep.subr.mxu1 %v4367_v44  ;;  %v5014_v41 = vld [vmem:[#allocation8 + $0x4a8] sm:$0xff]  ;;  %v4885_v42 = vld [vmem:[#allocation8 + $0xa0] sm:$0xff] }
 0x43a   :  { %4763 = vmatpush2.msra.mxu0 %v4238_v57  ;;  %4834 = vmatpush2.msra.mxu1 %v4366_v12  ;;  %v5013_v44 = vld [vmem:[#allocation8 + $0x4a0] sm:$0xff]  ;;  %v4882_v57 = vld [vmem:[#allocation8 + $0x88] sm:$0xff] }
 0x43b   :  { %4764 = vmatprep.subr.mxu0 %v4235_v9  ;;  %4835 = vmatprep.subr.mxu1 %v4363_v36  ;;  %v5010_v12 = vld [vmem:[#allocation8 + $0x488] sm:$0xff]  ;;  %v4881_v9 = vld [vmem:[#allocation8 + $0x80] sm:$0xff] }
 0x43c   :  { %4765 = vmatpush2.msra.mxu0 %v4234_v46  ;;  %4836 = vmatpush2.msra.mxu1 %v4362_v47  ;;  %v5009_v36 = vld [vmem:[#allocation8 + $0x480] sm:$0xff]  ;;  %v4878_v46 = vld [vmem:[#allocation8 + $0x68] sm:$0xff] }
 0x43d   :  { %4766 = vmatprep.subr.mxu0 %v4231_v51  ;;  %4837 = vmatprep.subr.mxu1 %v4359_v39  ;;  %v5006_v47 = vld [vmem:[#allocation8 + $0x468] sm:$0xff]  ;;  %v4877_v51 = vld [vmem:[#allocation8 + $0x60] sm:$0xff] }
 0x43e   :  { %4767 = vmatpush2.msra.mxu0 %v4230_v14  ;;  %4838 = vmatpush2.msra.mxu1 %v4358_v32  ;;  %v5005_v39 = vld [vmem:[#allocation8 + $0x460] sm:$0xff]  ;;  %v4874_v14 = vld [vmem:[#allocation8 + $0x48] sm:$0xff] }
 0x43f   :  { %4769 = vmatmul.mubr.f32.vlgmr.msra.gmra.mxu0 %v9390_v40  ;;  %4840 = vmatmul.mubr.f32.vlgmr.msra.gmra.mxu1 %v9426_v22  ;;  %v5002_v32 = vld [vmem:[#allocation8 + $0x448] sm:$0xff] }
 0x440   :  { %5249 = vmatprep.subr.mxu0 %v4926_v45  ;;  %5320 = vmatprep.subr.mxu1 %v5054_v55  ;;  %v4873_v45 = vld [vmem:[#allocation8 + $0x40] sm:$0xff] }
 0x441   :  { %5250 = vmatpush1.msra.mxu0 %v4925_v8  ;;  %5313 = vmatprep.mubr.f32.mxu0 %v9381_v19  ;;  %v5001_v55 = vld [vmem:[#allocation8 + $0x440] sm:$0xff]  ;;  %v4870_v8 = vld [vmem:[#allocation8 + $0x28] sm:$0xff] }
 0x442   :  { %5321 = vmatpush1.msra.mxu1 %v5053_v52  ;;  %5384 = vmatprep.mubr.f32.mxu1 %v9418_v33  ;;  %v4998_v52 = vld [vmem:[#allocation8 + $0x428] sm:$0xff] }
 0x443   :  { %5251 = vmatprep.subr.mxu0 %v4922_v53  ;;  %5322 = vmatprep.subr.mxu1 %v5050_v54  ;;  %v4869_v53 = vld [vmem:[#allocation8 + $0x20] sm:$0xff] }
 0x444   :  { %5252 = vmatpush1.msra.mxu0 %v4921_v60  ;;  %5323 = vmatpush1.msra.mxu1 %v5049_v61  ;;  %v4997_v54 = vld [vmem:[#allocation8 + $0x420] sm:$0xff]  ;;  %v4866_v60 = vld [vmem:[#allocation8 + $0x8] sm:$0xff] }
 0x445   :  { %5253 = vmatprep.subr.mxu0 %v4918_v62  ;;  %5324 = vmatprep.subr.mxu1 %v5046_v2  ;;  %v4994_v61 = vld [vmem:[#allocation8 + $0x408] sm:$0xff]  ;;  %v4865_v62 = vld [vmem:[#allocation8] sm:$0xff] }
 0x446   :  { %5254 = vmatpush1.msra.mxu0 %v4917_v58  ;;  %5325 = vmatpush1.msra.mxu1 %v5045_v0  ;;  %v4993_v2 = vld [vmem:[#allocation8 + $0x400] sm:$0xff]  ;;  %v4990_v58 = vld [vmem:[#allocation8 + $0x3e8] sm:$0xff] }
 0x447   :  { %5255 = vmatprep.subr.mxu0 %v4914_v3  ;;  %5326 = vmatprep.subr.mxu1 %v5042_v4  ;;  %v5118_v0 = vld [vmem:[#allocation8 + $0x7e8] sm:$0xff]  ;;  %v4989_v3 = vld [vmem:[#allocation8 + $0x3e0] sm:$0xff] }
 0x448   :  { %5256 = vmatpush1.msra.mxu0 %v4913_v5  ;;  %5327 = vmatpush1.msra.mxu1 %v5041_v11  ;;  %v5117_v4 = vld [vmem:[#allocation8 + $0x7e0] sm:$0xff]  ;;  %v4986_v5 = vld [vmem:[#allocation8 + $0x3c8] sm:$0xff] }
 0x449   :  { %5257 = vmatprep.subr.mxu0 %v4910_v13  ;;  %5328 = vmatprep.subr.mxu1 %v5038_v30  ;;  %v5114_v11 = vld [vmem:[#allocation8 + $0x7c8] sm:$0xff]  ;;  %v4985_v13 = vld [vmem:[#allocation8 + $0x3c0] sm:$0xff] }
 0x44a   :  { %5258 = vmatpush1.msra.mxu0 %v4909_v23  ;;  %5329 = vmatpush1.msra.mxu1 %v5037_v24  ;;  %v5113_v30 = vld [vmem:[#allocation8 + $0x7c0] sm:$0xff]  ;;  %v4982_v23 = vld [vmem:[#allocation8 + $0x3a8] sm:$0xff] }
 0x44b   :  { %5259 = vmatprep.subr.mxu0 %v4906_v25  ;;  %5330 = vmatprep.subr.mxu1 %v5034_v26  ;;  %v5110_v24 = vld [vmem:[#allocation8 + $0x7a8] sm:$0xff]  ;;  %v4981_v25 = vld [vmem:[#allocation8 + $0x3a0] sm:$0xff] }
 0x44c   :  { %5260 = vmatpush1.msra.mxu0 %v4905_v29  ;;  %5331 = vmatpush1.msra.mxu1 %v5033_v48  ;;  %v5109_v26 = vld [vmem:[#allocation8 + $0x7a0] sm:$0xff]  ;;  %v4978_v29 = vld [vmem:[#allocation8 + $0x388] sm:$0xff] }
 0x44d   :  { %5261 = vmatprep.subr.mxu0 %v4902_v6  ;;  %5332 = vmatprep.subr.mxu1 %v5030_v37  ;;  %v5106_v48 = vld [vmem:[#allocation8 + $0x788] sm:$0xff]  ;;  %v4977_v6 = vld [vmem:[#allocation8 + $0x380] sm:$0xff] }
 0x44e   :  { %5262 = vmatpush1.msra.mxu0 %v4901_v1  ;;  %5333 = vmatpush1.msra.mxu1 %v5029_v59  ;;  %v5105_v37 = vld [vmem:[#allocation8 + $0x780] sm:$0xff]  ;;  %v4974_v1 = vld [vmem:[#allocation8 + $0x368] sm:$0xff] }
 0x44f   :  { %5263 = vmatprep.subr.mxu0 %v4898_v38  ;;  %5334 = vmatprep.subr.mxu1 %v5026_v27  ;;  %v5102_v59 = vld [vmem:[#allocation8 + $0x768] sm:$0xff]  ;;  %v4973_v38 = vld [vmem:[#allocation8 + $0x360] sm:$0xff] }
 0x450   :  { %5264 = vmatpush1.msra.mxu0 %v4897_v10  ;;  %5335 = vmatpush1.msra.mxu1 %v5025_v34  ;;  %v5101_v27 = vld [vmem:[#allocation8 + $0x760] sm:$0xff]  ;;  %v4970_v10 = vld [vmem:[#allocation8 + $0x348] sm:$0xff] }
 0x451   :  { %5265 = vmatprep.subr.mxu0 %v4894_v28  ;;  %5336 = vmatprep.subr.mxu1 %v5022_v16  ;;  %v5098_v34 = vld [vmem:[#allocation8 + $0x748] sm:$0xff]  ;;  %v4969_v28 = vld [vmem:[#allocation8 + $0x340] sm:$0xff] }
 0x452   :  { %5266 = vmatpush1.msra.mxu0 %v4893_v18  ;;  %5337 = vmatpush1.msra.mxu1 %v5021_v43  ;;  %v5097_v16 = vld [vmem:[#allocation8 + $0x740] sm:$0xff]  ;;  %v4966_v18 = vld [vmem:[#allocation8 + $0x328] sm:$0xff] }
 0x453   :  { %5267 = vmatprep.subr.mxu0 %v4890_v56  ;;  %5338 = vmatprep.subr.mxu1 %v5018_v7  ;;  %v5094_v43 = vld [vmem:[#allocation8 + $0x728] sm:$0xff]  ;;  %v4965_v56 = vld [vmem:[#allocation8 + $0x320] sm:$0xff] }
 0x454   :  { %5268 = vmatpush1.msra.mxu0 %v4889_v49  ;;  %5339 = vmatpush1.msra.mxu1 %v5017_v15  ;;  %v5093_v7 = vld [vmem:[#allocation8 + $0x720] sm:$0xff]  ;;  %v4962_v49 = vld [vmem:[#allocation8 + $0x308] sm:$0xff] }
 0x455   :  { %5269 = vmatprep.subr.mxu0 %v4886_v50  ;;  %5340 = vmatprep.subr.mxu1 %v5014_v41  ;;  %v5090_v15 = vld [vmem:[#allocation8 + $0x708] sm:$0xff]  ;;  %v4961_v50 = vld [vmem:[#allocation8 + $0x300] sm:$0xff] }
 0x456   :  { %5270 = vmatpush1.msra.mxu0 %v4885_v42  ;;  %5341 = vmatpush1.msra.mxu1 %v5013_v44  ;;  %v5089_v41 = vld [vmem:[#allocation8 + $0x700] sm:$0xff]  ;;  %v4958_v42 = vld [vmem:[#allocation8 + $0x2e8] sm:$0xff] }
 0x457   :  { %5271 = vmatprep.subr.mxu0 %v4882_v57  ;;  %5342 = vmatprep.subr.mxu1 %v5010_v12  ;;  %v5086_v44 = vld [vmem:[#allocation8 + $0x6e8] sm:$0xff]  ;;  %v4957_v57 = vld [vmem:[#allocation8 + $0x2e0] sm:$0xff] }
 0x458   :  { %5272 = vmatpush1.msra.mxu0 %v4881_v9  ;;  %5343 = vmatpush1.msra.mxu1 %v5009_v36  ;;  %v5085_v12 = vld [vmem:[#allocation8 + $0x6e0] sm:$0xff]  ;;  %v4954_v9 = vld [vmem:[#allocation8 + $0x2c8] sm:$0xff] }
 0x459   :  { %5273 = vmatprep.subr.mxu0 %v4878_v46  ;;  %5344 = vmatprep.subr.mxu1 %v5006_v47  ;;  %v5082_v36 = vld [vmem:[#allocation8 + $0x6c8] sm:$0xff]  ;;  %v4953_v46 = vld [vmem:[#allocation8 + $0x2c0] sm:$0xff] }
 0x45a   :  { %5274 = vmatpush1.msra.mxu0 %v4877_v51  ;;  %5345 = vmatpush1.msra.mxu1 %v5005_v39  ;;  %v5081_v47 = vld [vmem:[#allocation8 + $0x6c0] sm:$0xff]  ;;  %v4950_v51 = vld [vmem:[#allocation8 + $0x2a8] sm:$0xff] }
 0x45b   :  { %5275 = vmatprep.subr.mxu0 %v4874_v14  ;;  %5346 = vmatprep.subr.mxu1 %v5002_v32  ;;  %v5078_v39 = vld [vmem:[#allocation8 + $0x6a8] sm:$0xff]  ;;  %v4949_v14 = vld [vmem:[#allocation8 + $0x2a0] sm:$0xff] }
 0x45c   :  { %5276 = vmatpush1.msra.mxu0 %v4873_v45  ;;  %5347 = vmatpush1.msra.mxu1 %v5001_v55  ;;  %v5077_v32 = vld [vmem:[#allocation8 + $0x6a0] sm:$0xff]  ;;  %v4946_v45 = vld [vmem:[#allocation8 + $0x288] sm:$0xff] }
 0x45d   :  { %5277 = vmatprep.subr.mxu0 %v4870_v8  ;;  %5348 = vmatprep.subr.mxu1 %v4998_v52  ;;  %v5074_v55 = vld [vmem:[#allocation8 + $0x688] sm:$0xff]  ;;  %v2679_v8 = vmax.f32 %v9397_v31, %v9401_v20  ;;  %v2680_v52 = vmax.f32 %v9399_v63, %v9403_v21  ;;  %v4937_v63 = vld [vmem:[#allocation8 + $0x240] sm:$0xff] }
 0x45e   :  { %5278 = vmatpush1.msra.mxu0 %v4869_v53  ;;  %5349 = vmatpush1.msra.mxu1 %v4997_v54  ;;  %v4945_v53 = vld [vmem:[#allocation8 + $0x280] sm:$0xff]  ;;  %v4934_v21 = vld [vmem:[#allocation8 + $0x228] sm:$0xff] }
 0x45f   :  { %5279 = vmatprep.subr.mxu0 %v4866_v60  ;;  %5350 = vmatprep.subr.mxu1 %v4994_v61  ;;  %v5073_v54 = vld [vmem:[#allocation8 + $0x680] sm:$0xff]  ;;  %v4942_v60 = vld [vmem:[#allocation8 + $0x268] sm:$0xff]  ;;  %v2681_v31 = vmax.f32 %v2679_v8, %v2680_v52  ;;  %v4895_v8 = vld [vmem:[#allocation8 + $0xf0] sm:$0xff] }
 0x460   :  { %5280 = vmatpush1.msra.mxu0 %v4865_v62  ;;  %5351 = vmatpush1.msra.mxu1 %v4993_v2  ;;  %v5070_v61 = vld [vmem:[#allocation8 + $0x668] sm:$0xff]  ;;  %v4941_v62 = vld [vmem:[#allocation8 + $0x260] sm:$0xff] }
 0x461   :  { %5281 = vmatprep.subr.mxu0 %v4990_v58  ;;  %5352 = vmatprep.subr.mxu1 %v5118_v0  ;;  %v5069_v2 = vld [vmem:[#allocation8 + $0x660] sm:$0xff]  ;;  %v4938_v58 = vld [vmem:[#allocation8 + $0x248] sm:$0xff] }
 0x462   :  { %5282 = vmatpush2.msra.mxu0 %v4989_v3  ;;  %5353 = vmatpush2.msra.mxu1 %v5117_v4  ;;  %v5066_v0 = vld [vmem:[#allocation8 + $0x648] sm:$0xff]  ;;  %v5065_v20 = vld [vmem:[#allocation8 + $0x640] sm:$0xff] }
 0x463   :  { %5283 = vmatprep.subr.mxu0 %v4986_v5  ;;  %5354 = vmatprep.subr.mxu1 %v5114_v11  ;;  %v5062_v3 = vld [vmem:[#allocation8 + $0x628] sm:$0xff]  ;;  %v4933_v4 = vld [vmem:[#allocation8 + $0x220] sm:$0xff] }
 0x464   :  { %5284 = vmatpush2.msra.mxu0 %v4985_v13  ;;  %5355 = vmatpush2.msra.mxu1 %v5113_v30  ;;  %v5061_v5 = vld [vmem:[#allocation8 + $0x620] sm:$0xff]  ;;  %v4930_v11 = vld [vmem:[#allocation8 + $0x208] sm:$0xff]  ;;  %v7188_v30 = vld [vmem:[#allocation6] ss:$0 sm:$0xff] }
 0x465   :  { %5285 = vmatprep.subr.mxu0 %v4982_v23  ;;  %5356 = vmatprep.subr.mxu1 %v5110_v24  ;;  %v5058_v13 = vld [vmem:[#allocation8 + $0x608] sm:$0xff]  ;;  %v2689_v23 = vadd.f32 %v7188_v30, %v2681_v31  ;;  %v4929_v24 = vld [vmem:[#allocation8 + $0x200] sm:$0xff]  ;;  %v4884_v31 = vld [vmem:[#allocation8 + $0x98] sm:$0xff] }
 0x466   :  { %5286 = vmatpush2.msra.mxu0 %v4981_v25  ;;  %5357 = vmatpush2.msra.mxu1 %v5109_v26  ;;  %v5057_v25 = vld [vmem:[#allocation8 + $0x600] sm:$0xff]  ;;  %v5182_v26 = vld [vmem:[#allocation8 + $0x9e8] sm:$0xff] }
 0x467   :  { %5287 = vmatprep.subr.mxu0 %v4978_v29  ;;  %5358 = vmatprep.subr.mxu1 %v5106_v48  ;;  %v4928_v29 = vld [vmem:[#allocation8 + $0x1f8] sm:$0xff]  ;;  %v5181_v48 = vld [vmem:[#allocation8 + $0x9e0] sm:$0xff]  ;;  %v5146_v52 = vld [vmem:[#allocation8 + $0x8c8] sm:$0xff] }
 0x468   :  { %5288 = vmatpush2.msra.mxu0 %v4977_v6  ;;  %5359 = vmatpush2.msra.mxu1 %v5105_v37  ;;  %v9440_v6 = vmax.f32 %v2689_v23, 0.0  ;;  %v4927_v37 = vld [vmem:[#allocation8 + $0x1f0] sm:$0xff]  ;;  %v5129_v30 = vld [vmem:[#allocation8 + $0x840] sm:$0xff] }
 0x469   :  { %5289 = vmatprep.subr.mxu0 %v4974_v1  ;;  %5360 = vmatprep.subr.mxu1 %v5102_v59  ;;  %v5178_v1 = vld [vmem:[#allocation8 + $0x9c8] sm:$0xff]  ;;  %v4924_v59 = vld [vmem:[#allocation8 + $0x1d8] sm:$0xff]  ;;  %v4875_v23 = vld [vmem:[#allocation8 + $0x50] sm:$0xff] }
 0x46a   :  { %5290 = vmatpush2.msra.mxu0 %v4973_v38  ;;  %5361 = vmatpush2.msra.mxu1 %v5101_v27  ;;  %v5177_v38 = vld [vmem:[#allocation8 + $0x9c0] sm:$0xff]  ;;  %v4923_v27 = vld [vmem:[#allocation8 + $0x1d0] sm:$0xff] }
 0x46b   :  { %5291 = vmatprep.subr.mxu0 %v4970_v10  ;;  %5362 = vmatprep.subr.mxu1 %v5098_v34  ;;  %v5174_v10 = vld [vmem:[#allocation8 + $0x9a8] sm:$0xff]  ;;  %v4920_v34 = vld [vmem:[#allocation8 + $0x1b8] sm:$0xff] }
 0x46c   :  { %5292 = vmatpush2.msra.mxu0 %v4969_v28  ;;  %5363 = vmatpush2.msra.mxu1 %v5097_v16  ;;  %v5173_v28 = vld [vmem:[#allocation8 + $0x9a0] sm:$0xff]  ;;  %v4919_v16 = vld [vmem:[#allocation8 + $0x1b0] sm:$0xff] }
 0x46d   :  { %5293 = vmatprep.subr.mxu0 %v4966_v18  ;;  %5364 = vmatprep.subr.mxu1 %v5094_v43  ;;  %v5170_v18 = vld [vmem:[#allocation8 + $0x988] sm:$0xff]  ;;  %v4916_v43 = vld [vmem:[#allocation8 + $0x198] sm:$0xff] }
 0x46e   :  { %5294 = vmatpush2.msra.mxu0 %v4965_v56  ;;  %5365 = vmatpush2.msra.mxu1 %v5093_v7  ;;  %v5169_v56 = vld [vmem:[#allocation8 + $0x980] sm:$0xff]  ;;  %v4915_v7 = vld [vmem:[#allocation8 + $0x190] sm:$0xff] }
 0x46f   :  { %5295 = vmatprep.subr.mxu0 %v4962_v49  ;;  %5366 = vmatprep.subr.mxu1 %v5090_v15  ;;  %v5166_v49 = vld [vmem:[#allocation8 + $0x968] sm:$0xff]  ;;  %v4912_v15 = vld [vmem:[#allocation8 + $0x178] sm:$0xff] }
 0x470   :  { %5296 = vmatpush2.msra.mxu0 %v4961_v50  ;;  %5367 = vmatpush2.msra.mxu1 %v5089_v41  ;;  %v4911_v50 = vld [vmem:[#allocation8 + $0x170] sm:$0xff]  ;;  %v5162_v41 = vld [vmem:[#allocation8 + $0x948] sm:$0xff] }
 0x471   :  { %5297 = vmatprep.subr.mxu0 %v4958_v42  ;;  %5368 = vmatprep.subr.mxu1 %v5086_v44  ;;  %v4908_v42 = vld [vmem:[#allocation8 + $0x158] sm:$0xff]  ;;  %v5161_v44 = vld [vmem:[#allocation8 + $0x940] sm:$0xff] }
 0x472   :  { %5298 = vmatpush2.msra.mxu0 %v4957_v57  ;;  %5369 = vmatpush2.msra.mxu1 %v5085_v12  ;;  %v4907_v57 = vld [vmem:[#allocation8 + $0x150] sm:$0xff]  ;;  %v5158_v12 = vld [vmem:[#allocation8 + $0x928] sm:$0xff] }
 0x473   :  { %5299 = vmatprep.subr.mxu0 %v4954_v9  ;;  %5370 = vmatprep.subr.mxu1 %v5082_v36  ;;  %v4904_v9 = vld [vmem:[#allocation8 + $0x138] sm:$0xff]  ;;  %v5157_v36 = vld [vmem:[#allocation8 + $0x920] sm:$0xff] }
 0x474   :  { %5300 = vmatpush2.msra.mxu0 %v4953_v46  ;;  %5371 = vmatpush2.msra.mxu1 %v5081_v47  ;;  %v4903_v46 = vld [vmem:[#allocation8 + $0x130] sm:$0xff]  ;;  %v5154_v47 = vld [vmem:[#allocation8 + $0x908] sm:$0xff] }
 0x475   :  { %5301 = vmatprep.subr.mxu0 %v4950_v51  ;;  %5372 = vmatprep.subr.mxu1 %v5078_v39  ;;  %v4900_v51 = vld [vmem:[#allocation8 + $0x118] sm:$0xff]  ;;  %v5153_v39 = vld [vmem:[#allocation8 + $0x900] sm:$0xff] }
 0x476   :  { %5302 = vmatpush2.msra.mxu0 %v4949_v14  ;;  %5373 = vmatpush2.msra.mxu1 %v5077_v32  ;;  %v4899_v14 = vld [vmem:[#allocation8 + $0x110] sm:$0xff]  ;;  %v5150_v32 = vld [vmem:[#allocation8 + $0x8e8] sm:$0xff] }
 0x477   :  { %5303 = vmatprep.subr.mxu0 %v4946_v45  ;;  %5374 = vmatprep.subr.mxu1 %v5074_v55  ;;  %v4896_v45 = vld [vmem:[#allocation8 + $0xf8] sm:$0xff]  ;;  %v5149_v55 = vld [vmem:[#allocation8 + $0x8e0] sm:$0xff] }
 0x478   :  { %5304 = vmatpush2.msra.mxu0 %v4945_v53  ;;  %5375 = vmatpush2.msra.mxu1 %v5073_v54  ;;  %v4892_v53 = vld [vmem:[#allocation8 + $0xd8] sm:$0xff]  ;;  %v5145_v54 = vld [vmem:[#allocation8 + $0x8c0] sm:$0xff] }
 0x479   :  { %5305 = vmatprep.subr.mxu0 %v4942_v60  ;;  %5376 = vmatprep.subr.mxu1 %v5070_v61  ;;  %v4891_v60 = vld [vmem:[#allocation8 + $0xd0] sm:$0xff]  ;;  %v5142_v61 = vld [vmem:[#allocation8 + $0x8a8] sm:$0xff] }
 0x47a   :  { %5306 = vmatpush2.msra.mxu0 %v4941_v62  ;;  %5377 = vmatpush2.msra.mxu1 %v5069_v2  ;;  %v4888_v62 = vld [vmem:[#allocation8 + $0xb8] sm:$0xff]  ;;  %v5141_v2 = vld [vmem:[#allocation8 + $0x8a0] sm:$0xff] }
 0x47b   :  { %5307 = vmatprep.subr.mxu0 %v4938_v58  ;;  %5378 = vmatprep.subr.mxu1 %v5066_v0  ;;  %v4887_v58 = vld [vmem:[#allocation8 + $0xb0] sm:$0xff]  ;;  %v5138_v0 = vld [vmem:[#allocation8 + $0x888] sm:$0xff] }
 0x47c   :  { %5308 = vmatpush2.msra.mxu0 %v4937_v63  ;;  %5379 = vmatpush2.msra.mxu1 %v5065_v20  ;;  %v5137_v63 = vld [vmem:[#allocation8 + $0x880] sm:$0xff]  ;;  %v4883_v20 = vld [vmem:[#allocation8 + $0x90] sm:$0xff] }
 0x47d   :  { %5309 = vmatprep.subr.mxu0 %v4934_v21  ;;  %5380 = vmatprep.subr.mxu1 %v5062_v3  ;;  %v5134_v21 = vld [vmem:[#allocation8 + $0x868] sm:$0xff]  ;;  %v4880_v3 = vld [vmem:[#allocation8 + $0x78] sm:$0xff] }
 0x47e   :  { %5310 = vmatpush2.msra.mxu0 %v4933_v4  ;;  %5381 = vmatpush2.msra.mxu1 %v5061_v5  ;;  %v5133_v4 = vld [vmem:[#allocation8 + $0x860] sm:$0xff]  ;;  %v4879_v5 = vld [vmem:[#allocation8 + $0x70] sm:$0xff] }
 0x47f   :  { %5311 = vmatprep.subr.mxu0 %v4930_v11  ;;  %5382 = vmatprep.subr.mxu1 %v5058_v13  ;;  %v5130_v11 = vld [vmem:[#allocation8 + $0x848] sm:$0xff]  ;;  %v4876_v13 = vld [vmem:[#allocation8 + $0x58] sm:$0xff] }
 0x480   :  { %5312 = vmatpush2.msra.mxu0 %v4929_v24  ;;  %5383 = vmatpush2.msra.mxu1 %v5057_v25  ;;  %v5126_v24 = vld [vmem:[#allocation8 + $0x828] sm:$0xff]  ;;  %v4872_v25 = vld [vmem:[#allocation8 + $0x38] sm:$0xff] }
 0x481   :  { %5314 = vmatmul.mubr.f32.vlgmr.msra.gmra.mxu0 %v9390_v40  ;;  %5385 = vmatmul.mubr.f32.vlgmr.msra.gmra.mxu1 %v9426_v22 }
 0x482   :  { %5391 = vmatprep.subr.mxu0 %v5182_v26  ;;  %5462 = vmatprep.subr.mxu1 %v4928_v29  ;;  %v5125_v26 = vld [vmem:[#allocation8 + $0x820] sm:$0xff]  ;;  %v4871_v29 = vld [vmem:[#allocation8 + $0x30] sm:$0xff] }
 0x483   :  { %5392 = vmatpush1.msra.mxu0 %v5181_v48  ;;  %5455 = vmatprep.mubr.f32.mxu0 %v9440_v6  ;;  %v5122_v48 = vld [vmem:[#allocation8 + $0x808] sm:$0xff] }
 0x484   :  { %5463 = vmatpush1.msra.mxu1 %v4927_v37  ;;  %5526 = vmatprep.mubr.f32.mxu1 %v9381_v19  ;;  %v5165_v19 = vld [vmem:[#allocation8 + $0x960] sm:$0xff]  ;;  %v4868_v37 = vld [vmem:[#allocation8 + $0x18] sm:$0xff] }
 0x485   :  { %5393 = vmatprep.subr.mxu0 %v5178_v1  ;;  %5464 = vmatprep.subr.mxu1 %v4924_v59  ;;  %v5121_v1 = vld [vmem:[#allocation8 + $0x800] sm:$0xff]  ;;  %v4867_v59 = vld [vmem:[#allocation8 + $0x10] sm:$0xff] }
 0x486   :  { %5394 = vmatpush1.msra.mxu0 %v5177_v38  ;;  %5465 = vmatpush1.msra.mxu1 %v4923_v27  ;;  %v5246_v38 = vld [vmem:[#allocation8 + $0xbe8] sm:$0xff]  ;;  %v4992_v27 = vld [vmem:[#allocation8 + $0x3f8] sm:$0xff] }
 0x487   :  { %5395 = vmatprep.subr.mxu0 %v5174_v10  ;;  %5466 = vmatprep.subr.mxu1 %v4920_v34  ;;  %v5245_v10 = vld [vmem:[#allocation8 + $0xbe0] sm:$0xff]  ;;  %v4991_v34 = vld [vmem:[#allocation8 + $0x3f0] sm:$0xff] }
 0x488   :  { %5396 = vmatpush1.msra.mxu0 %v5173_v28  ;;  %5467 = vmatpush1.msra.mxu1 %v4919_v16  ;;  %v5242_v28 = vld [vmem:[#allocation8 + $0xbc8] sm:$0xff]  ;;  %v4988_v16 = vld [vmem:[#allocation8 + $0x3d8] sm:$0xff] }
 0x489   :  { %5397 = vmatprep.subr.mxu0 %v5170_v18  ;;  %5468 = vmatprep.subr.mxu1 %v4916_v43  ;;  %v5241_v18 = vld [vmem:[#allocation8 + $0xbc0] sm:$0xff]  ;;  %v4987_v43 = vld [vmem:[#allocation8 + $0x3d0] sm:$0xff] }
 0x48a   :  { %5398 = vmatpush1.msra.mxu0 %v5169_v56  ;;  %5469 = vmatpush1.msra.mxu1 %v4915_v7  ;;  %v5238_v56 = vld [vmem:[#allocation8 + $0xba8] sm:$0xff]  ;;  %v4984_v7 = vld [vmem:[#allocation8 + $0x3b8] sm:$0xff] }
 0x48b   :  { %5399 = vmatprep.subr.mxu0 %v5166_v49  ;;  %5470 = vmatprep.subr.mxu1 %v4912_v15  ;;  %v5237_v49 = vld [vmem:[#allocation8 + $0xba0] sm:$0xff]  ;;  %v4983_v15 = vld [vmem:[#allocation8 + $0x3b0] sm:$0xff] }
 0x48c   :  { %5400 = vmatpush1.msra.mxu0 %v5165_v19  ;;  %5471 = vmatpush1.msra.mxu1 %v4911_v50  ;;  %v5234_v19 = vld [vmem:[#allocation8 + $0xb88] sm:$0xff]  ;;  %v4980_v50 = vld [vmem:[#allocation8 + $0x398] sm:$0xff] }
 0x48d   :  { %5401 = vmatprep.subr.mxu0 %v5162_v41  ;;  %5472 = vmatprep.subr.mxu1 %v4908_v42  ;;  %v5233_v41 = vld [vmem:[#allocation8 + $0xb80] sm:$0xff]  ;;  %v4979_v42 = vld [vmem:[#allocation8 + $0x390] sm:$0xff] }
 0x48e   :  { %5402 = vmatpush1.msra.mxu0 %v5161_v44  ;;  %5473 = vmatpush1.msra.mxu1 %v4907_v57  ;;  %v5230_v44 = vld [vmem:[#allocation8 + $0xb68] sm:$0xff]  ;;  %v4976_v57 = vld [vmem:[#allocation8 + $0x378] sm:$0xff] }
 0x48f   :  { %5403 = vmatprep.subr.mxu0 %v5158_v12  ;;  %5474 = vmatprep.subr.mxu1 %v4904_v9  ;;  %v5229_v12 = vld [vmem:[#allocation8 + $0xb60] sm:$0xff]  ;;  %v4975_v9 = vld [vmem:[#allocation8 + $0x370] sm:$0xff] }
 0x490   :  { %5404 = vmatpush1.msra.mxu0 %v5157_v36  ;;  %5475 = vmatpush1.msra.mxu1 %v4903_v46  ;;  %v5226_v36 = vld [vmem:[#allocation8 + $0xb48] sm:$0xff]  ;;  %v4972_v46 = vld [vmem:[#allocation8 + $0x358] sm:$0xff] }
 0x491   :  { %5405 = vmatprep.subr.mxu0 %v5154_v47  ;;  %5476 = vmatprep.subr.mxu1 %v4900_v51  ;;  %v5225_v47 = vld [vmem:[#allocation8 + $0xb40] sm:$0xff]  ;;  %v4971_v51 = vld [vmem:[#allocation8 + $0x350] sm:$0xff] }
 0x492   :  { %5406 = vmatpush1.msra.mxu0 %v5153_v39  ;;  %5477 = vmatpush1.msra.mxu1 %v4899_v14  ;;  %v5222_v39 = vld [vmem:[#allocation8 + $0xb28] sm:$0xff]  ;;  %v4968_v14 = vld [vmem:[#allocation8 + $0x338] sm:$0xff] }
 0x493   :  { %5407 = vmatprep.subr.mxu0 %v5150_v32  ;;  %5478 = vmatprep.subr.mxu1 %v4896_v45  ;;  %v5221_v32 = vld [vmem:[#allocation8 + $0xb20] sm:$0xff]  ;;  %v4967_v45 = vld [vmem:[#allocation8 + $0x330] sm:$0xff] }
 0x494   :  { %5408 = vmatpush1.msra.mxu0 %v5149_v55  ;;  %5479 = vmatpush1.msra.mxu1 %v4895_v8  ;;  %v5218_v55 = vld [vmem:[#allocation8 + $0xb08] sm:$0xff]  ;;  %v4964_v8 = vld [vmem:[#allocation8 + $0x318] sm:$0xff] }
 0x495   :  { %5409 = vmatprep.subr.mxu0 %v5146_v52  ;;  %5480 = vmatprep.subr.mxu1 %v4892_v53  ;;  %v5217_v52 = vld [vmem:[#allocation8 + $0xb00] sm:$0xff]  ;;  %v4963_v53 = vld [vmem:[#allocation8 + $0x310] sm:$0xff] }
 0x496   :  { %5410 = vmatpush1.msra.mxu0 %v5145_v54  ;;  %5481 = vmatpush1.msra.mxu1 %v4891_v60  ;;  %v5214_v54 = vld [vmem:[#allocation8 + $0xae8] sm:$0xff]  ;;  %v4960_v60 = vld [vmem:[#allocation8 + $0x2f8] sm:$0xff] }
 0x497   :  { %5411 = vmatprep.subr.mxu0 %v5142_v61  ;;  %5482 = vmatprep.subr.mxu1 %v4888_v62  ;;  %v5213_v61 = vld [vmem:[#allocation8 + $0xae0] sm:$0xff]  ;;  %v4959_v62 = vld [vmem:[#allocation8 + $0x2f0] sm:$0xff] }
 0x498   :  { %5412 = vmatpush1.msra.mxu0 %v5141_v2  ;;  %5483 = vmatpush1.msra.mxu1 %v4887_v58  ;;  %v5210_v2 = vld [vmem:[#allocation8 + $0xac8] sm:$0xff]  ;;  %v4956_v58 = vld [vmem:[#allocation8 + $0x2d8] sm:$0xff] }
 0x499   :  { %5413 = vmatprep.subr.mxu0 %v5138_v0  ;;  %5484 = vmatprep.subr.mxu1 %v4884_v31  ;;  %v5209_v0 = vld [vmem:[#allocation8 + $0xac0] sm:$0xff]  ;;  %v4955_v31 = vld [vmem:[#allocation8 + $0x2d0] sm:$0xff] }
 0x49a   :  { %5414 = vmatpush1.msra.mxu0 %v5137_v63  ;;  %5485 = vmatpush1.msra.mxu1 %v4883_v20  ;;  %v5206_v63 = vld [vmem:[#allocation8 + $0xaa8] sm:$0xff]  ;;  %v4952_v20 = vld [vmem:[#allocation8 + $0x2b8] sm:$0xff] }
 0x49b   :  { %5415 = vmatprep.subr.mxu0 %v5134_v21  ;;  %5486 = vmatprep.subr.mxu1 %v4880_v3  ;;  %v5205_v21 = vld [vmem:[#allocation8 + $0xaa0] sm:$0xff]  ;;  %v4951_v3 = vld [vmem:[#allocation8 + $0x2b0] sm:$0xff] }
 0x49c   :  { %5416 = vmatpush1.msra.mxu0 %v5133_v4  ;;  %5487 = vmatpush1.msra.mxu1 %v4879_v5  ;;  %v5202_v4 = vld [vmem:[#allocation8 + $0xa88] sm:$0xff]  ;;  %v4948_v5 = vld [vmem:[#allocation8 + $0x298] sm:$0xff] }
 0x49d   :  { %5417 = vmatprep.subr.mxu0 %v5130_v11  ;;  %5488 = vmatprep.subr.mxu1 %v4876_v13  ;;  %v5201_v11 = vld [vmem:[#allocation8 + $0xa80] sm:$0xff]  ;;  %v4947_v13 = vld [vmem:[#allocation8 + $0x290] sm:$0xff] }
 0x49e   :  { %5418 = vmatpush1.msra.mxu0 %v5129_v30  ;;  %5489 = vmatpush1.msra.mxu1 %v4875_v23  ;;  %v5198_v30 = vld [vmem:[#allocation8 + $0xa68] sm:$0xff]  ;;  %v4944_v23 = vld [vmem:[#allocation8 + $0x278] sm:$0xff] }
 0x49f   :  { %5419 = vmatprep.subr.mxu0 %v5126_v24  ;;  %5490 = vmatprep.subr.mxu1 %v4872_v25  ;;  %v5197_v24 = vld [vmem:[#allocation8 + $0xa60] sm:$0xff]  ;;  %v4943_v25 = vld [vmem:[#allocation8 + $0x270] sm:$0xff] }
 0x4a0   :  { %5420 = vmatpush1.msra.mxu0 %v5125_v26  ;;  %5491 = vmatpush1.msra.mxu1 %v4871_v29  ;;  %v5194_v26 = vld [vmem:[#allocation8 + $0xa48] sm:$0xff]  ;;  %v4940_v29 = vld [vmem:[#allocation8 + $0x258] sm:$0xff] }
 0x4a1   :  { %5421 = vmatprep.subr.mxu0 %v5122_v48  ;;  %5492 = vmatprep.subr.mxu1 %v4868_v37  ;;  %v5193_v48 = vld [vmem:[#allocation8 + $0xa40] sm:$0xff]  ;;  %v4939_v37 = vld [vmem:[#allocation8 + $0x250] sm:$0xff] }
 0x4a2   :  { %5422 = vmatpush1.msra.mxu0 %v5121_v1  ;;  %5493 = vmatpush1.msra.mxu1 %v4867_v59  ;;  %v5190_v1 = vld [vmem:[#allocation8 + $0xa28] sm:$0xff]  ;;  %v4936_v59 = vld [vmem:[#allocation8 + $0x238] sm:$0xff] }
 0x4a3   :  { %5423 = vmatprep.subr.mxu0 %v5246_v38  ;;  %5494 = vmatprep.subr.mxu1 %v4992_v27  ;;  %v7189_v38 = vld [vmem:[#allocation6] ss:$0 sm:$0xff] }
 0x4a4   :  { %5424 = vmatpush2.msra.mxu0 %v5245_v10  ;;  %5495 = vmatpush2.msra.mxu1 %v4991_v34  ;;  %v2432_v27 = vadd.f32 %v7189_v38, %v9379_v17  ;;  %v5189_v10 = vld [vmem:[#allocation8 + $0xa20] sm:$0xff]  ;;  %v4935_v34 = vld [vmem:[#allocation8 + $0x230] sm:$0xff]  ;;  %v5184_v17 = vld [vmem:[#allocation8 + $0x9f8] sm:$0xff] }
 0x4a5   :  { %5425 = vmatprep.subr.mxu0 %v5242_v28  ;;  %5496 = vmatprep.subr.mxu1 %v4988_v16  ;;  %v5186_v28 = vld [vmem:[#allocation8 + $0xa08] sm:$0xff]  ;;  %v4932_v16 = vld [vmem:[#allocation8 + $0x218] sm:$0xff]  ;;  %v5135_v38 = vld [vmem:[#allocation8 + $0x870] sm:$0xff] }
 0x4a6   :  { %5426 = vmatpush2.msra.mxu0 %v5241_v18  ;;  %5497 = vmatpush2.msra.mxu1 %v4987_v43  ;;  %v5185_v18 = vld [vmem:[#allocation8 + $0xa00] sm:$0xff]  ;;  %v4931_v43 = vld [vmem:[#allocation8 + $0x210] sm:$0xff] }
 0x4a7   :  { %5427 = vmatprep.subr.mxu0 %v5238_v56  ;;  %5498 = vmatprep.subr.mxu1 %v4984_v7  ;;  %v9447_v56 = vmax.f32 %v2432_v27, 0.0  ;;  %v5056_v7 = vld [vmem:[#allocation8 + $0x5f8] sm:$0xff] }
 0x4a8   :  { %5428 = vmatpush2.msra.mxu0 %v5237_v49  ;;  %5499 = vmatpush2.msra.mxu1 %v4983_v15  ;;  %v5055_v49 = vld [vmem:[#allocation8 + $0x5f0] sm:$0xff]  ;;  %v5004_v27 = vld [vmem:[#allocation8 + $0x458] sm:$0xff] }
 0x4a9   :  { %5429 = vmatprep.subr.mxu0 %v5234_v19  ;;  %5500 = vmatprep.subr.mxu1 %v4980_v50  ;;  %v5183_v15 = vld [vmem:[#allocation8 + $0x9f0] sm:$0xff]  ;;  %v5052_v19 = vld [vmem:[#allocation8 + $0x5d8] sm:$0xff] }
 0x4aa   :  { %5430 = vmatpush2.msra.mxu0 %v5233_v41  ;;  %5501 = vmatpush2.msra.mxu1 %v4979_v42  ;;  %v5180_v50 = vld [vmem:[#allocation8 + $0x9d8] sm:$0xff]  ;;  %v5051_v41 = vld [vmem:[#allocation8 + $0x5d0] sm:$0xff] }
 0x4ab   :  { %5431 = vmatprep.subr.mxu0 %v5230_v44  ;;  %5502 = vmatprep.subr.mxu1 %v4976_v57  ;;  %v5179_v42 = vld [vmem:[#allocation8 + $0x9d0] sm:$0xff]  ;;  %v5048_v44 = vld [vmem:[#allocation8 + $0x5b8] sm:$0xff] }
 0x4ac   :  { %5432 = vmatpush2.msra.mxu0 %v5229_v12  ;;  %5503 = vmatpush2.msra.mxu1 %v4975_v9  ;;  %v5176_v57 = vld [vmem:[#allocation8 + $0x9b8] sm:$0xff]  ;;  %v5047_v12 = vld [vmem:[#allocation8 + $0x5b0] sm:$0xff] }
 0x4ad   :  { %5433 = vmatprep.subr.mxu0 %v5226_v36  ;;  %5504 = vmatprep.subr.mxu1 %v4972_v46  ;;  %v5175_v9 = vld [vmem:[#allocation8 + $0x9b0] sm:$0xff]  ;;  %v5172_v36 = vld [vmem:[#allocation8 + $0x998] sm:$0xff] }
 0x4ae   :  { %5434 = vmatpush2.msra.mxu0 %v5225_v47  ;;  %5505 = vmatpush2.msra.mxu1 %v4971_v51  ;;  %v5043_v46 = vld [vmem:[#allocation8 + $0x590] sm:$0xff]  ;;  %v5040_v51 = vld [vmem:[#allocation8 + $0x578] sm:$0xff] }
 0x4af   :  { %5435 = vmatprep.subr.mxu0 %v5222_v39  ;;  %5506 = vmatprep.subr.mxu1 %v4968_v14  ;;  %v5171_v47 = vld [vmem:[#allocation8 + $0x990] sm:$0xff]  ;;  %v5168_v39 = vld [vmem:[#allocation8 + $0x978] sm:$0xff] }
 0x4b0   :  { %5436 = vmatpush2.msra.mxu0 %v5221_v32  ;;  %5507 = vmatpush2.msra.mxu1 %v4967_v45  ;;  %v5039_v14 = vld [vmem:[#allocation8 + $0x570] sm:$0xff]  ;;  %v5036_v45 = vld [vmem:[#allocation8 + $0x558] sm:$0xff] }
 0x4b1   :  { %5437 = vmatprep.subr.mxu0 %v5218_v55  ;;  %5508 = vmatprep.subr.mxu1 %v4964_v8  ;;  %v5167_v32 = vld [vmem:[#allocation8 + $0x970] sm:$0xff]  ;;  %v5164_v55 = vld [vmem:[#allocation8 + $0x958] sm:$0xff] }
 0x4b2   :  { %5438 = vmatpush2.msra.mxu0 %v5217_v52  ;;  %5509 = vmatpush2.msra.mxu1 %v4963_v53  ;;  %v5035_v8 = vld [vmem:[#allocation8 + $0x550] sm:$0xff]  ;;  %v5032_v53 = vld [vmem:[#allocation8 + $0x538] sm:$0xff] }
 0x4b3   :  { %5439 = vmatprep.subr.mxu0 %v5214_v54  ;;  %5510 = vmatprep.subr.mxu1 %v4960_v60  ;;  %v5163_v52 = vld [vmem:[#allocation8 + $0x950] sm:$0xff]  ;;  %v5160_v54 = vld [vmem:[#allocation8 + $0x938] sm:$0xff] }
 0x4b4   :  { %5440 = vmatpush2.msra.mxu0 %v5213_v61  ;;  %5511 = vmatpush2.msra.mxu1 %v4959_v62  ;;  %v5031_v60 = vld [vmem:[#allocation8 + $0x530] sm:$0xff]  ;;  %v5028_v62 = vld [vmem:[#allocation8 + $0x518] sm:$0xff] }
 0x4b5   :  { %5441 = vmatprep.subr.mxu0 %v5210_v2  ;;  %5512 = vmatprep.subr.mxu1 %v4956_v58  ;;  %v5159_v61 = vld [vmem:[#allocation8 + $0x930] sm:$0xff]  ;;  %v5156_v2 = vld [vmem:[#allocation8 + $0x918] sm:$0xff] }
 0x4b6   :  { %5442 = vmatpush2.msra.mxu0 %v5209_v0  ;;  %5513 = vmatpush2.msra.mxu1 %v4955_v31  ;;  %v5027_v58 = vld [vmem:[#allocation8 + $0x510] sm:$0xff]  ;;  %v5024_v31 = vld [vmem:[#allocation8 + $0x4f8] sm:$0xff] }
 0x4b7   :  { %5443 = vmatprep.subr.mxu0 %v5206_v63  ;;  %5514 = vmatprep.subr.mxu1 %v4952_v20  ;;  %v5155_v0 = vld [vmem:[#allocation8 + $0x910] sm:$0xff]  ;;  %v5152_v63 = vld [vmem:[#allocation8 + $0x8f8] sm:$0xff] }
 0x4b8   :  { %5444 = vmatpush2.msra.mxu0 %v5205_v21  ;;  %5515 = vmatpush2.msra.mxu1 %v4951_v3  ;;  %v5023_v20 = vld [vmem:[#allocation8 + $0x4f0] sm:$0xff]  ;;  %v5020_v3 = vld [vmem:[#allocation8 + $0x4d8] sm:$0xff] }
 0x4b9   :  { %5445 = vmatprep.subr.mxu0 %v5202_v4  ;;  %5516 = vmatprep.subr.mxu1 %v4948_v5  ;;  %v5151_v21 = vld [vmem:[#allocation8 + $0x8f0] sm:$0xff]  ;;  %v5148_v4 = vld [vmem:[#allocation8 + $0x8d8] sm:$0xff] }
 0x4ba   :  { %5446 = vmatpush2.msra.mxu0 %v5201_v11  ;;  %5517 = vmatpush2.msra.mxu1 %v4947_v13  ;;  %v5019_v5 = vld [vmem:[#allocation8 + $0x4d0] sm:$0xff]  ;;  %v5016_v13 = vld [vmem:[#allocation8 + $0x4b8] sm:$0xff] }
 0x4bb   :  { %5447 = vmatprep.subr.mxu0 %v5198_v30  ;;  %5518 = vmatprep.subr.mxu1 %v4944_v23  ;;  %v5147_v11 = vld [vmem:[#allocation8 + $0x8d0] sm:$0xff]  ;;  %v5144_v30 = vld [vmem:[#allocation8 + $0x8b8] sm:$0xff] }
 0x4bc   :  { %5448 = vmatpush2.msra.mxu0 %v5197_v24  ;;  %5519 = vmatpush2.msra.mxu1 %v4943_v25  ;;  %v5015_v23 = vld [vmem:[#allocation8 + $0x4b0] sm:$0xff]  ;;  %v5012_v25 = vld [vmem:[#allocation8 + $0x498] sm:$0xff] }
 0x4bd   :  { %5449 = vmatprep.subr.mxu0 %v5194_v26  ;;  %5520 = vmatprep.subr.mxu1 %v4940_v29  ;;  %v5143_v24 = vld [vmem:[#allocation8 + $0x8b0] sm:$0xff]  ;;  %v5140_v26 = vld [vmem:[#allocation8 + $0x898] sm:$0xff] }
 0x4be   :  { %5450 = vmatpush2.msra.mxu0 %v5193_v48  ;;  %5521 = vmatpush2.msra.mxu1 %v4939_v37  ;;  %v5011_v29 = vld [vmem:[#allocation8 + $0x490] sm:$0xff]  ;;  %v5008_v37 = vld [vmem:[#allocation8 + $0x478] sm:$0xff] }
 0x4bf   :  { %5451 = vmatprep.subr.mxu0 %v5190_v1  ;;  %5522 = vmatprep.subr.mxu1 %v4936_v59  ;;  %v5139_v48 = vld [vmem:[#allocation8 + $0x890] sm:$0xff]  ;;  %v5136_v1 = vld [vmem:[#allocation8 + $0x878] sm:$0xff] }
 0x4c0   :  { %5452 = vmatpush2.msra.mxu0 %v5189_v10  ;;  %5523 = vmatpush2.msra.mxu1 %v4935_v34  ;;  %v5007_v59 = vld [vmem:[#allocation8 + $0x470] sm:$0xff]  ;;  %v5132_v10 = vld [vmem:[#allocation8 + $0x858] sm:$0xff] }
 0x4c1   :  { %5453 = vmatprep.subr.mxu0 %v5186_v28  ;;  %5524 = vmatprep.subr.mxu1 %v4932_v16  ;;  %v5003_v34 = vld [vmem:[#allocation8 + $0x450] sm:$0xff]  ;;  %v5000_v16 = vld [vmem:[#allocation8 + $0x438] sm:$0xff] }
 0x4c2   :  { %5454 = vmatpush2.msra.mxu0 %v5185_v18  ;;  %5525 = vmatpush2.msra.mxu1 %v4931_v43  ;;  %v5131_v28 = vld [vmem:[#allocation8 + $0x850] sm:$0xff]  ;;  %v5128_v18 = vld [vmem:[#allocation8 + $0x838] sm:$0xff] }
 0x4c3   :  { %5456 = vmatmul.mubr.f32.vlgmr.msra.gmra.mxu0 %v9447_v56  ;;  %5527 = vmatmul.mubr.f32.vlgmr.msra.gmra.mxu1 %v9390_v40  ;;  %v5044_v40 = vld [vmem:[#allocation8 + $0x598] sm:$0xff]  ;;  %v4999_v43 = vld [vmem:[#allocation8 + $0x430] sm:$0xff] }
 0x4c4   :  { %5533 = vmatprep.subr.mxu0 %v5056_v7  ;;  %5604 = vmatprep.subr.mxu1 %v5184_v17  ;;  %v5127_v7 = vld [vmem:[#allocation8 + $0x830] sm:$0xff]  ;;  %v4996_v17 = vld [vmem:[#allocation8 + $0x418] sm:$0xff] }
 0x4c5   :  { %5534 = vmatpush1.msra.mxu0 %v5055_v49  ;;  %5597 = vmatprep.mubr.f32.mxu0 %v9418_v33  ;;  %v5124_v49 = vld [vmem:[#allocation8 + $0x818] sm:$0xff] }
 0x4c6   :  { %5605 = vmatpush1.msra.mxu1 %v5183_v15  ;;  %5668 = vmatprep.mubr.f32.mxu1 %v9440_v6  ;;  %v4995_v15 = vld [vmem:[#allocation8 + $0x410] sm:$0xff] }
 0x4c7   :  { %5535 = vmatprep.subr.mxu0 %v5052_v19  ;;  %5606 = vmatprep.subr.mxu1 %v5180_v50  ;;  %v5123_v19 = vld [vmem:[#allocation8 + $0x810] sm:$0xff]  ;;  %v5120_v50 = vld [vmem:[#allocation8 + $0x7f8] sm:$0xff] }
 0x4c8   :  { %5536 = vmatpush1.msra.mxu0 %v5051_v41  ;;  %5607 = vmatpush1.msra.mxu1 %v5179_v42  ;;  %v5248_v41 = vld [vmem:[#allocation8 + $0xbf8] sm:$0xff]  ;;  %v5119_v42 = vld [vmem:[#allocation8 + $0x7f0] sm:$0xff] }
 0x4c9   :  { %5537 = vmatprep.subr.mxu0 %v5048_v44  ;;  %5608 = vmatprep.subr.mxu1 %v5176_v57  ;;  %v5247_v44 = vld [vmem:[#allocation8 + $0xbf0] sm:$0xff]  ;;  %v5116_v57 = vld [vmem:[#allocation8 + $0x7d8] sm:$0xff] }
 0x4ca   :  { %5538 = vmatpush1.msra.mxu0 %v5047_v12  ;;  %5609 = vmatpush1.msra.mxu1 %v5175_v9  ;;  %v5244_v12 = vld [vmem:[#allocation8 + $0xbd8] sm:$0xff]  ;;  %v5115_v9 = vld [vmem:[#allocation8 + $0x7d0] sm:$0xff] }
 0x4cb   :  { %5539 = vmatprep.subr.mxu0 %v5044_v40  ;;  %5610 = vmatprep.subr.mxu1 %v5172_v36  ;;  %v5243_v40 = vld [vmem:[#allocation8 + $0xbd0] sm:$0xff]  ;;  %v5112_v36 = vld [vmem:[#allocation8 + $0x7b8] sm:$0xff] }
 0x4cc   :  { %5540 = vmatpush1.msra.mxu0 %v5043_v46  ;;  %5611 = vmatpush1.msra.mxu1 %v5171_v47  ;;  %v5240_v46 = vld [vmem:[#allocation8 + $0xbb8] sm:$0xff]  ;;  %v5111_v47 = vld [vmem:[#allocation8 + $0x7b0] sm:$0xff] }
 0x4cd   :  { %5541 = vmatprep.subr.mxu0 %v5040_v51  ;;  %5612 = vmatprep.subr.mxu1 %v5168_v39  ;;  %v5239_v51 = vld [vmem:[#allocation8 + $0xbb0] sm:$0xff]  ;;  %v5108_v39 = vld [vmem:[#allocation8 + $0x798] sm:$0xff] }
 0x4ce   :  { %5542 = vmatpush1.msra.mxu0 %v5039_v14  ;;  %5613 = vmatpush1.msra.mxu1 %v5167_v32  ;;  %v5236_v14 = vld [vmem:[#allocation8 + $0xb98] sm:$0xff]  ;;  %v5107_v32 = vld [vmem:[#allocation8 + $0x790] sm:$0xff] }
 0x4cf   :  { %5543 = vmatprep.subr.mxu0 %v5036_v45  ;;  %5614 = vmatprep.subr.mxu1 %v5164_v55  ;;  %v5235_v45 = vld [vmem:[#allocation8 + $0xb90] sm:$0xff]  ;;  %v5104_v55 = vld [vmem:[#allocation8 + $0x778] sm:$0xff] }
 0x4d0   :  { %5544 = vmatpush1.msra.mxu0 %v5035_v8  ;;  %5615 = vmatpush1.msra.mxu1 %v5163_v52  ;;  %v5232_v8 = vld [vmem:[#allocation8 + $0xb78] sm:$0xff]  ;;  %v5103_v52 = vld [vmem:[#allocation8 + $0x770] sm:$0xff] }
 0x4d1   :  { %5545 = vmatprep.subr.mxu0 %v5032_v53  ;;  %5616 = vmatprep.subr.mxu1 %v5160_v54  ;;  %v5231_v53 = vld [vmem:[#allocation8 + $0xb70] sm:$0xff]  ;;  %v5100_v54 = vld [vmem:[#allocation8 + $0x758] sm:$0xff] }
 0x4d2   :  { %5546 = vmatpush1.msra.mxu0 %v5031_v60  ;;  %5617 = vmatpush1.msra.mxu1 %v5159_v61  ;;  %v5228_v60 = vld [vmem:[#allocation8 + $0xb58] sm:$0xff]  ;;  %v5099_v61 = vld [vmem:[#allocation8 + $0x750] sm:$0xff] }
 0x4d3   :  { %5547 = vmatprep.subr.mxu0 %v5028_v62  ;;  %5618 = vmatprep.subr.mxu1 %v5156_v2  ;;  %v5227_v62 = vld [vmem:[#allocation8 + $0xb50] sm:$0xff]  ;;  %v5096_v2 = vld [vmem:[#allocation8 + $0x738] sm:$0xff] }
 0x4d4   :  { %5548 = vmatpush1.msra.mxu0 %v5027_v58  ;;  %5619 = vmatpush1.msra.mxu1 %v5155_v0  ;;  %v5224_v58 = vld [vmem:[#allocation8 + $0xb38] sm:$0xff]  ;;  %v5095_v0 = vld [vmem:[#allocation8 + $0x730] sm:$0xff] }
 0x4d5   :  { %5549 = vmatprep.subr.mxu0 %v5024_v31  ;;  %5620 = vmatprep.subr.mxu1 %v5152_v63  ;;  %v5223_v31 = vld [vmem:[#allocation8 + $0xb30] sm:$0xff]  ;;  %v5092_v63 = vld [vmem:[#allocation8 + $0x718] sm:$0xff] }
 0x4d6   :  { %5550 = vmatpush1.msra.mxu0 %v5023_v20  ;;  %5621 = vmatpush1.msra.mxu1 %v5151_v21  ;;  %v5220_v20 = vld [vmem:[#allocation8 + $0xb18] sm:$0xff]  ;;  %v5091_v21 = vld [vmem:[#allocation8 + $0x710] sm:$0xff] }
 0x4d7   :  { %5551 = vmatprep.subr.mxu0 %v5020_v3  ;;  %5622 = vmatprep.subr.mxu1 %v5148_v4  ;;  %v5219_v3 = vld [vmem:[#allocation8 + $0xb10] sm:$0xff]  ;;  %v5088_v4 = vld [vmem:[#allocation8 + $0x6f8] sm:$0xff] }
 0x4d8   :  { %5552 = vmatpush1.msra.mxu0 %v5019_v5  ;;  %5623 = vmatpush1.msra.mxu1 %v5147_v11  ;;  %v5216_v5 = vld [vmem:[#allocation8 + $0xaf8] sm:$0xff]  ;;  %v5087_v11 = vld [vmem:[#allocation8 + $0x6f0] sm:$0xff] }
 0x4d9   :  { %5553 = vmatprep.subr.mxu0 %v5016_v13  ;;  %5624 = vmatprep.subr.mxu1 %v5144_v30  ;;  %v5215_v13 = vld [vmem:[#allocation8 + $0xaf0] sm:$0xff]  ;;  %v5084_v30 = vld [vmem:[#allocation8 + $0x6d8] sm:$0xff] }
 0x4da   :  { %5554 = vmatpush1.msra.mxu0 %v5015_v23  ;;  %5625 = vmatpush1.msra.mxu1 %v5143_v24  ;;  %v5212_v23 = vld [vmem:[#allocation8 + $0xad8] sm:$0xff]  ;;  %v5083_v24 = vld [vmem:[#allocation8 + $0x6d0] sm:$0xff] }
 0x4db   :  { %5555 = vmatprep.subr.mxu0 %v5012_v25  ;;  %5626 = vmatprep.subr.mxu1 %v5140_v26  ;;  %v5211_v25 = vld [vmem:[#allocation8 + $0xad0] sm:$0xff]  ;;  %v5080_v26 = vld [vmem:[#allocation8 + $0x6b8] sm:$0xff] }
 0x4dc   :  { %5556 = vmatpush1.msra.mxu0 %v5011_v29  ;;  %5627 = vmatpush1.msra.mxu1 %v5139_v48  ;;  %v5208_v29 = vld [vmem:[#allocation8 + $0xab8] sm:$0xff]  ;;  %v5079_v48 = vld [vmem:[#allocation8 + $0x6b0] sm:$0xff] }
 0x4dd   :  { %5557 = vmatprep.subr.mxu0 %v5008_v37  ;;  %5628 = vmatprep.subr.mxu1 %v5136_v1  ;;  %v5207_v37 = vld [vmem:[#allocation8 + $0xab0] sm:$0xff]  ;;  %v5076_v1 = vld [vmem:[#allocation8 + $0x698] sm:$0xff] }
 0x4de   :  { %5558 = vmatpush1.msra.mxu0 %v5007_v59  ;;  %5629 = vmatpush1.msra.mxu1 %v5135_v38  ;;  %v5204_v59 = vld [vmem:[#allocation8 + $0xa98] sm:$0xff]  ;;  %v5075_v38 = vld [vmem:[#allocation8 + $0x690] sm:$0xff] }
 0x4df   :  { %5559 = vmatprep.subr.mxu0 %v5004_v27  ;;  %5630 = vmatprep.subr.mxu1 %v5132_v10  ;;  %v5203_v27 = vld [vmem:[#allocation8 + $0xa90] sm:$0xff]  ;;  %v5072_v10 = vld [vmem:[#allocation8 + $0x678] sm:$0xff] }
 0x4e0   :  { %5560 = vmatpush1.msra.mxu0 %v5003_v34  ;;  %5631 = vmatpush1.msra.mxu1 %v5131_v28  ;;  %v5200_v34 = vld [vmem:[#allocation8 + $0xa78] sm:$0xff]  ;;  %v5071_v28 = vld [vmem:[#allocation8 + $0x670] sm:$0xff] }
 0x4e1   :  { %5561 = vmatprep.subr.mxu0 %v5000_v16  ;;  %5632 = vmatprep.subr.mxu1 %v5128_v18  ;;  %v5199_v16 = vld [vmem:[#allocation8 + $0xa70] sm:$0xff]  ;;  %v5068_v18 = vld [vmem:[#allocation8 + $0x658] sm:$0xff] }
 0x4e2   :  { %5562 = vmatpush1.msra.mxu0 %v4999_v43  ;;  %5633 = vmatpush1.msra.mxu1 %v5127_v7  ;;  %v5196_v43 = vld [vmem:[#allocation8 + $0xa58] sm:$0xff]  ;;  %v5067_v7 = vld [vmem:[#allocation8 + $0x650] sm:$0xff] }
 0x4e3   :  { %5563 = vmatprep.subr.mxu0 %v4996_v17  ;;  %5634 = vmatprep.subr.mxu1 %v5124_v49  ;;  %v5195_v17 = vld [vmem:[#allocation8 + $0xa50] sm:$0xff]  ;;  %v5064_v49 = vld [vmem:[#allocation8 + $0x638] sm:$0xff] }
 0x4e4   :  { %5564 = vmatpush1.msra.mxu0 %v4995_v15  ;;  %5635 = vmatpush1.msra.mxu1 %v5123_v19  ;;  %v5192_v15 = vld [vmem:[#allocation8 + $0xa38] sm:$0xff]  ;;  %v5063_v19 = vld [vmem:[#allocation8 + $0x630] sm:$0xff] }
 0x4e5   :  { %5565 = vmatprep.subr.mxu0 %v5120_v50  ;;  %5636 = vmatprep.subr.mxu1 %v5248_v41  ;;  %v5191_v50 = vld [vmem:[#allocation8 + $0xa30] sm:$0xff]  ;;  %v5060_v41 = vld [vmem:[#allocation8 + $0x618] sm:$0xff] }
 0x4e6   :  { %5566 = vmatpush2.msra.mxu0 %v5119_v42  ;;  %5637 = vmatpush2.msra.mxu1 %v5247_v44  ;;  %v5188_v42 = vld [vmem:[#allocation8 + $0xa18] sm:$0xff]  ;;  %v5059_v44 = vld [vmem:[#allocation8 + $0x610] sm:$0xff] }
 0x4e7   :  { %5567 = vmatprep.subr.mxu0 %v5116_v57  ;;  %5638 = vmatprep.subr.mxu1 %v5244_v12  ;;  %v5187_v57 = vld [vmem:[#allocation8 + $0xa10] sm:$0xff]  ;;  %v5755_v12 = vld [vmem:[#allocation8 + $0x1e8] sm:$0xff] }
 0x4e8   :  { %5568 = vmatpush2.msra.mxu0 %v5115_v9  ;;  %5639 = vmatpush2.msra.mxu1 %v5243_v40  ;;  %v5883_v9 = vld [vmem:[#allocation8 + $0x5e8] sm:$0xff]  ;;  %v5754_v40 = vld [vmem:[#allocation8 + $0x1e0] sm:$0xff] }
 0x4e9   :  { %5569 = vmatprep.subr.mxu0 %v5112_v36  ;;  %5640 = vmatprep.subr.mxu1 %v5240_v46  ;;  %v5882_v36 = vld [vmem:[#allocation8 + $0x5e0] sm:$0xff]  ;;  %v5751_v46 = vld [vmem:[#allocation8 + $0x1c8] sm:$0xff] }
 0x4ea   :  { %5570 = vmatpush2.msra.mxu0 %v5111_v47  ;;  %5641 = vmatpush2.msra.mxu1 %v5239_v51  ;;  %v5879_v47 = vld [vmem:[#allocation8 + $0x5c8] sm:$0xff]  ;;  %v5750_v51 = vld [vmem:[#allocation8 + $0x1c0] sm:$0xff] }
 0x4eb   :  { %5571 = vmatprep.subr.mxu0 %v5108_v39  ;;  %5642 = vmatprep.subr.mxu1 %v5236_v14  ;;  %v5878_v39 = vld [vmem:[#allocation8 + $0x5c0] sm:$0xff]  ;;  %v5747_v14 = vld [vmem:[#allocation8 + $0x1a8] sm:$0xff] }
 0x4ec   :  { %5572 = vmatpush2.msra.mxu0 %v5107_v32  ;;  %5643 = vmatpush2.msra.mxu1 %v5235_v45  ;;  %v5875_v32 = vld [vmem:[#allocation8 + $0x5a8] sm:$0xff]  ;;  %v5746_v45 = vld [vmem:[#allocation8 + $0x1a0] sm:$0xff] }
 0x4ed   :  { %5573 = vmatprep.subr.mxu0 %v5104_v55  ;;  %5644 = vmatprep.subr.mxu1 %v5232_v8  ;;  %v5874_v55 = vld [vmem:[#allocation8 + $0x5a0] sm:$0xff]  ;;  %v5743_v8 = vld [vmem:[#allocation8 + $0x188] sm:$0xff] }
 0x4ee   :  { %5574 = vmatpush2.msra.mxu0 %v5103_v52  ;;  %5645 = vmatpush2.msra.mxu1 %v5231_v53  ;;  %v5871_v52 = vld [vmem:[#allocation8 + $0x588] sm:$0xff]  ;;  %v5742_v53 = vld [vmem:[#allocation8 + $0x180] sm:$0xff] }
 0x4ef   :  { %5575 = vmatprep.subr.mxu0 %v5100_v54  ;;  %5646 = vmatprep.subr.mxu1 %v5228_v60  ;;  %v5870_v54 = vld [vmem:[#allocation8 + $0x580] sm:$0xff]  ;;  %v5739_v60 = vld [vmem:[#allocation8 + $0x168] sm:$0xff] }
 0x4f0   :  { %5576 = vmatpush2.msra.mxu0 %v5099_v61  ;;  %5647 = vmatpush2.msra.mxu1 %v5227_v62  ;;  %v5867_v61 = vld [vmem:[#allocation8 + $0x568] sm:$0xff]  ;;  %v5738_v62 = vld [vmem:[#allocation8 + $0x160] sm:$0xff] }
 0x4f1   :  { %5577 = vmatprep.subr.mxu0 %v5096_v2  ;;  %5648 = vmatprep.subr.mxu1 %v5224_v58  ;;  %v5866_v2 = vld [vmem:[#allocation8 + $0x560] sm:$0xff]  ;;  %v5735_v58 = vld [vmem:[#allocation8 + $0x148] sm:$0xff] }
 0x4f2   :  { %5578 = vmatpush2.msra.mxu0 %v5095_v0  ;;  %5649 = vmatpush2.msra.mxu1 %v5223_v31  ;;  %v5863_v0 = vld [vmem:[#allocation8 + $0x548] sm:$0xff]  ;;  %v5734_v31 = vld [vmem:[#allocation8 + $0x140] sm:$0xff] }
 0x4f3   :  { %5579 = vmatprep.subr.mxu0 %v5092_v63  ;;  %5650 = vmatprep.subr.mxu1 %v5220_v20  ;;  %v5862_v63 = vld [vmem:[#allocation8 + $0x540] sm:$0xff]  ;;  %v5731_v20 = vld [vmem:[#allocation8 + $0x128] sm:$0xff] }
 0x4f4   :  { %5580 = vmatpush2.msra.mxu0 %v5091_v21  ;;  %5651 = vmatpush2.msra.mxu1 %v5219_v3  ;;  %v5859_v21 = vld [vmem:[#allocation8 + $0x528] sm:$0xff]  ;;  %v5730_v3 = vld [vmem:[#allocation8 + $0x120] sm:$0xff] }
 0x4f5   :  { %5581 = vmatprep.subr.mxu0 %v5088_v4  ;;  %5652 = vmatprep.subr.mxu1 %v5216_v5  ;;  %v5858_v4 = vld [vmem:[#allocation8 + $0x520] sm:$0xff]  ;;  %v5727_v5 = vld [vmem:[#allocation8 + $0x108] sm:$0xff] }
 0x4f6   :  { %5582 = vmatpush2.msra.mxu0 %v5087_v11  ;;  %5653 = vmatpush2.msra.mxu1 %v5215_v13  ;;  %v5855_v11 = vld [vmem:[#allocation8 + $0x508] sm:$0xff]  ;;  %v5726_v13 = vld [vmem:[#allocation8 + $0x100] sm:$0xff] }
 0x4f7   :  { %5583 = vmatprep.subr.mxu0 %v5084_v30  ;;  %5654 = vmatprep.subr.mxu1 %v5212_v23  ;;  %v5854_v30 = vld [vmem:[#allocation8 + $0x500] sm:$0xff]  ;;  %v5723_v23 = vld [vmem:[#allocation8 + $0xe8] sm:$0xff] }
 0x4f8   :  { %5584 = vmatpush2.msra.mxu0 %v5083_v24  ;;  %5655 = vmatpush2.msra.mxu1 %v5211_v25  ;;  %v5851_v24 = vld [vmem:[#allocation8 + $0x4e8] sm:$0xff]  ;;  %v5722_v25 = vld [vmem:[#allocation8 + $0xe0] sm:$0xff] }
 0x4f9   :  { %5585 = vmatprep.subr.mxu0 %v5080_v26  ;;  %5656 = vmatprep.subr.mxu1 %v5208_v29  ;;  %v5850_v26 = vld [vmem:[#allocation8 + $0x4e0] sm:$0xff]  ;;  %v5719_v29 = vld [vmem:[#allocation8 + $0xc8] sm:$0xff] }
 0x4fa   :  { %5586 = vmatpush2.msra.mxu0 %v5079_v48  ;;  %5657 = vmatpush2.msra.mxu1 %v5207_v37  ;;  %v5847_v48 = vld [vmem:[#allocation8 + $0x4c8] sm:$0xff]  ;;  %v5718_v37 = vld [vmem:[#allocation8 + $0xc0] sm:$0xff] }
 0x4fb   :  { %5587 = vmatprep.subr.mxu0 %v5076_v1  ;;  %5658 = vmatprep.subr.mxu1 %v5204_v59  ;;  %v5846_v1 = vld [vmem:[#allocation8 + $0x4c0] sm:$0xff]  ;;  %v5715_v59 = vld [vmem:[#allocation8 + $0xa8] sm:$0xff] }
 0x4fc   :  { %5588 = vmatpush2.msra.mxu0 %v5075_v38  ;;  %5659 = vmatpush2.msra.mxu1 %v5203_v27  ;;  %v5843_v38 = vld [vmem:[#allocation8 + $0x4a8] sm:$0xff]  ;;  %v5714_v27 = vld [vmem:[#allocation8 + $0xa0] sm:$0xff] }
 0x4fd   :  { %5589 = vmatprep.subr.mxu0 %v5072_v10  ;;  %5660 = vmatprep.subr.mxu1 %v5200_v34  ;;  %v5842_v10 = vld [vmem:[#allocation8 + $0x4a0] sm:$0xff]  ;;  %v5711_v34 = vld [vmem:[#allocation8 + $0x88] sm:$0xff] }
 0x4fe   :  { %5590 = vmatpush2.msra.mxu0 %v5071_v28  ;;  %5661 = vmatpush2.msra.mxu1 %v5199_v16  ;;  %v5839_v28 = vld [vmem:[#allocation8 + $0x488] sm:$0xff]  ;;  %v5710_v16 = vld [vmem:[#allocation8 + $0x80] sm:$0xff] }
 0x4ff   :  { %5591 = vmatprep.subr.mxu0 %v5068_v18  ;;  %5662 = vmatprep.subr.mxu1 %v5196_v43  ;;  %v5838_v18 = vld [vmem:[#allocation8 + $0x480] sm:$0xff]  ;;  %v5707_v43 = vld [vmem:[#allocation8 + $0x68] sm:$0xff] }
 0x500   :  { %5592 = vmatpush2.msra.mxu0 %v5067_v7  ;;  %5663 = vmatpush2.msra.mxu1 %v5195_v17  ;;  %v5835_v7 = vld [vmem:[#allocation8 + $0x468] sm:$0xff]  ;;  %v5706_v17 = vld [vmem:[#allocation8 + $0x60] sm:$0xff] }
 0x501   :  { %5593 = vmatprep.subr.mxu0 %v5064_v49  ;;  %5664 = vmatprep.subr.mxu1 %v5192_v15  ;;  %v5834_v49 = vld [vmem:[#allocation8 + $0x460] sm:$0xff]  ;;  %v5703_v15 = vld [vmem:[#allocation8 + $0x48] sm:$0xff] }
 0x502   :  { %5594 = vmatpush2.msra.mxu0 %v5063_v19  ;;  %5665 = vmatpush2.msra.mxu1 %v5191_v50  ;;  %v5831_v19 = vld [vmem:[#allocation8 + $0x448] sm:$0xff]  ;;  %v5702_v50 = vld [vmem:[#allocation8 + $0x40] sm:$0xff] }
 0x503   :  { %5595 = vmatprep.subr.mxu0 %v5060_v41  ;;  %5666 = vmatprep.subr.mxu1 %v5188_v42  ;;  %v5830_v41 = vld [vmem:[#allocation8 + $0x440] sm:$0xff]  ;;  %v5699_v42 = vld [vmem:[#allocation8 + $0x28] sm:$0xff] }
 0x504   :  { %5596 = vmatpush2.msra.mxu0 %v5059_v44  ;;  %5667 = vmatpush2.msra.mxu1 %v5187_v57  ;;  %v5827_v44 = vld [vmem:[#allocation8 + $0x428] sm:$0xff]  ;;  %v5698_v57 = vld [vmem:[#allocation8 + $0x20] sm:$0xff] }
 0x505   :  { %5598 = vmatmul.mubr.f32.vlgmr.msra.gmra.mxu0 %v9426_v22  ;;  %5669 = vmatmul.mubr.f32.vlgmr.msra.gmra.mxu1 %v9447_v56 }
 0x506   :  { %6078 = vmatprep.subr.mxu0 %v5755_v12  ;;  %6149 = vmatprep.subr.mxu1 %v5883_v9  ;;  %v5826_v12 = vld [vmem:[#allocation8 + $0x420] sm:$0xff]  ;;  %v5695_v9 = vld [vmem:[#allocation8 + $0x8] sm:$0xff] }
 0x507   :  { %6079 = vmatpush1.msra.mxu0 %v5754_v40  ;;  %6142 = vmatprep.mubr.f32.mxu0 %v9418_v33  ;;  %v5823_v40 = vld [vmem:[#allocation8 + $0x408] sm:$0xff] }
 0x508   :  { %6150 = vmatpush1.msra.mxu1 %v5882_v36  ;;  %6213 = vmatprep.mubr.f32.mxu1 %v9440_v6  ;;  %v5694_v36 = vld [vmem:[#allocation8] sm:$0xff] }
 0x509   :  { %6080 = vmatprep.subr.mxu0 %v5751_v46  ;;  %6151 = vmatprep.subr.mxu1 %v5879_v47  ;;  %v5822_v46 = vld [vmem:[#allocation8 + $0x400] sm:$0xff]  ;;  %v5819_v47 = vld [vmem:[#allocation8 + $0x3e8] sm:$0xff] }
 0x50a   :  { %6081 = vmatpush1.msra.mxu0 %v5750_v51  ;;  %6152 = vmatpush1.msra.mxu1 %v5878_v39  ;;  %v5947_v51 = vld [vmem:[#allocation8 + $0x7e8] sm:$0xff]  ;;  %v5818_v39 = vld [vmem:[#allocation8 + $0x3e0] sm:$0xff] }
 0x50b   :  { %6082 = vmatprep.subr.mxu0 %v5747_v14  ;;  %6153 = vmatprep.subr.mxu1 %v5875_v32  ;;  %v5946_v14 = vld [vmem:[#allocation8 + $0x7e0] sm:$0xff]  ;;  %v5815_v32 = vld [vmem:[#allocation8 + $0x3c8] sm:$0xff] }
 0x50c   :  { %6083 = vmatpush1.msra.mxu0 %v5746_v45  ;;  %6154 = vmatpush1.msra.mxu1 %v5874_v55  ;;  %v5943_v45 = vld [vmem:[#allocation8 + $0x7c8] sm:$0xff]  ;;  %v5814_v55 = vld [vmem:[#allocation8 + $0x3c0] sm:$0xff] }
 0x50d   :  { %6084 = vmatprep.subr.mxu0 %v5743_v8  ;;  %6155 = vmatprep.subr.mxu1 %v5871_v52  ;;  %v5942_v8 = vld [vmem:[#allocation8 + $0x7c0] sm:$0xff]  ;;  %v5811_v52 = vld [vmem:[#allocation8 + $0x3a8] sm:$0xff] }
 0x50e   :  { %6085 = vmatpush1.msra.mxu0 %v5742_v53  ;;  %6156 = vmatpush1.msra.mxu1 %v5870_v54  ;;  %v5939_v53 = vld [vmem:[#allocation8 + $0x7a8] sm:$0xff]  ;;  %v5810_v54 = vld [vmem:[#allocation8 + $0x3a0] sm:$0xff] }
 0x50f   :  { %6086 = vmatprep.subr.mxu0 %v5739_v60  ;;  %6157 = vmatprep.subr.mxu1 %v5867_v61  ;;  %v5938_v60 = vld [vmem:[#allocation8 + $0x7a0] sm:$0xff]  ;;  %v5807_v61 = vld [vmem:[#allocation8 + $0x388] sm:$0xff] }
 0x510   :  { %6087 = vmatpush1.msra.mxu0 %v5738_v62  ;;  %6158 = vmatpush1.msra.mxu1 %v5866_v2  ;;  %v5935_v62 = vld [vmem:[#allocation8 + $0x788] sm:$0xff]  ;;  %v5806_v2 = vld [vmem:[#allocation8 + $0x380] sm:$0xff] }
 0x511   :  { %6088 = vmatprep.subr.mxu0 %v5735_v58  ;;  %6159 = vmatprep.subr.mxu1 %v5863_v0  ;;  %v5934_v58 = vld [vmem:[#allocation8 + $0x780] sm:$0xff]  ;;  %v5803_v0 = vld [vmem:[#allocation8 + $0x368] sm:$0xff] }
 0x512   :  { %6089 = vmatpush1.msra.mxu0 %v5734_v31  ;;  %6160 = vmatpush1.msra.mxu1 %v5862_v63  ;;  %v5931_v31 = vld [vmem:[#allocation8 + $0x768] sm:$0xff]  ;;  %v5802_v63 = vld [vmem:[#allocation8 + $0x360] sm:$0xff] }
 0x513   :  { %6090 = vmatprep.subr.mxu0 %v5731_v20  ;;  %6161 = vmatprep.subr.mxu1 %v5859_v21  ;;  %v5930_v20 = vld [vmem:[#allocation8 + $0x760] sm:$0xff]  ;;  %v5799_v21 = vld [vmem:[#allocation8 + $0x348] sm:$0xff] }
 0x514   :  { %6091 = vmatpush1.msra.mxu0 %v5730_v3  ;;  %6162 = vmatpush1.msra.mxu1 %v5858_v4  ;;  %v5927_v3 = vld [vmem:[#allocation8 + $0x748] sm:$0xff]  ;;  %v5798_v4 = vld [vmem:[#allocation8 + $0x340] sm:$0xff] }
 0x515   :  { %6092 = vmatprep.subr.mxu0 %v5727_v5  ;;  %6163 = vmatprep.subr.mxu1 %v5855_v11  ;;  %v5926_v5 = vld [vmem:[#allocation8 + $0x740] sm:$0xff]  ;;  %v5795_v11 = vld [vmem:[#allocation8 + $0x328] sm:$0xff] }
 0x516   :  { %6093 = vmatpush1.msra.mxu0 %v5726_v13  ;;  %6164 = vmatpush1.msra.mxu1 %v5854_v30  ;;  %v5923_v13 = vld [vmem:[#allocation8 + $0x728] sm:$0xff]  ;;  %v5794_v30 = vld [vmem:[#allocation8 + $0x320] sm:$0xff] }
 0x517   :  { %6094 = vmatprep.subr.mxu0 %v5723_v23  ;;  %6165 = vmatprep.subr.mxu1 %v5851_v24  ;;  %v5922_v23 = vld [vmem:[#allocation8 + $0x720] sm:$0xff]  ;;  %v5791_v24 = vld [vmem:[#allocation8 + $0x308] sm:$0xff] }
 0x518   :  { %6095 = vmatpush1.msra.mxu0 %v5722_v25  ;;  %6166 = vmatpush1.msra.mxu1 %v5850_v26  ;;  %v5919_v25 = vld [vmem:[#allocation8 + $0x708] sm:$0xff]  ;;  %v5790_v26 = vld [vmem:[#allocation8 + $0x300] sm:$0xff] }
 0x519   :  { %6096 = vmatprep.subr.mxu0 %v5719_v29  ;;  %6167 = vmatprep.subr.mxu1 %v5847_v48  ;;  %v5918_v29 = vld [vmem:[#allocation8 + $0x700] sm:$0xff]  ;;  %v3112_v48 = vpop.f32.mrf.mxu0 }
 0x51a   :  { %6097 = vmatpush1.msra.mxu0 %v5718_v37  ;;  %6168 = vmatpush1.msra.mxu1 %v5846_v1  ;;  %v3183_v37 = vpop.f32.mrf.mxu1  ;;  %v5787_v1 = vld [vmem:[#allocation8 + $0x2e8] sm:$0xff] }
 0x51b   :  { %6098 = vmatprep.subr.mxu0 %v5715_v59  ;;  %6169 = vmatprep.subr.mxu1 %v5843_v38  ;;  %v5915_v59 = vld [vmem:[#allocation8 + $0x6e8] sm:$0xff]  ;;  %v5786_v38 = vld [vmem:[#allocation8 + $0x2e0] sm:$0xff] }
 0x51c   :  { %6099 = vmatpush1.msra.mxu0 %v5714_v27  ;;  %6170 = vmatpush1.msra.mxu1 %v5842_v10  ;;  %v5914_v27 = vld [vmem:[#allocation8 + $0x6e0] sm:$0xff]  ;;  %v5783_v10 = vld [vmem:[#allocation8 + $0x2c8] sm:$0xff] }
 0x51d   :  { %6100 = vmatprep.subr.mxu0 %v5711_v34  ;;  %6171 = vmatprep.subr.mxu1 %v5839_v28  ;;  %v5911_v34 = vld [vmem:[#allocation8 + $0x6c8] sm:$0xff]  ;;  %v5782_v28 = vld [vmem:[#allocation8 + $0x2c0] sm:$0xff] }
 0x51e   :  { %6101 = vmatpush1.msra.mxu0 %v5710_v16  ;;  %6172 = vmatpush1.msra.mxu1 %v5838_v18  ;;  %v5910_v16 = vld [vmem:[#allocation8 + $0x6c0] sm:$0xff]  ;;  %v3114_v18 = vpop.f32.mrf.mxu0 }
 0x51f   :  { %6102 = vmatprep.subr.mxu0 %v5707_v43  ;;  %6173 = vmatprep.subr.mxu1 %v5835_v7  ;;  %v3185_v43 = vpop.f32.mrf.mxu1  ;;  %v5779_v7 = vld [vmem:[#allocation8 + $0x2a8] sm:$0xff] }
 0x520   :  { %6103 = vmatpush1.msra.mxu0 %v5706_v17  ;;  %6174 = vmatpush1.msra.mxu1 %v5834_v49  ;;  %v5907_v17 = vld [vmem:[#allocation8 + $0x6a8] sm:$0xff]  ;;  %v5778_v49 = vld [vmem:[#allocation8 + $0x2a0] sm:$0xff] }
 0x521   :  { %6104 = vmatprep.subr.mxu0 %v5703_v15  ;;  %6175 = vmatprep.subr.mxu1 %v5831_v19  ;;  %v5906_v15 = vld [vmem:[#allocation8 + $0x6a0] sm:$0xff]  ;;  %v5775_v19 = vld [vmem:[#allocation8 + $0x288] sm:$0xff] }
 0x522   :  { %6105 = vmatpush1.msra.mxu0 %v5702_v50  ;;  %6176 = vmatpush1.msra.mxu1 %v5830_v41  ;;  %v5903_v50 = vld [vmem:[#allocation8 + $0x688] sm:$0xff]  ;;  %v3188_v41 = vmax.f32 %v3112_v48, %v3114_v18  ;;  %v5741_v48 = vld [vmem:[#allocation8 + $0x178] sm:$0xff] }
 0x523   :  { %6106 = vmatprep.subr.mxu0 %v5699_v42  ;;  %6177 = vmatprep.subr.mxu1 %v5827_v44  ;;  %v3189_v42 = vmax.f32 %v3183_v37, %v3185_v43  ;;  %v5774_v44 = vld [vmem:[#allocation8 + $0x280] sm:$0xff]  ;;  %v5740_v37 = vld [vmem:[#allocation8 + $0x170] sm:$0xff]  ;;  %v5983_v18 = vld [vmem:[#allocation8 + $0x908] sm:$0xff] }
 0x524   :  { %6107 = vmatpush1.msra.mxu0 %v5698_v57  ;;  %6178 = vmatpush1.msra.mxu1 %v5826_v12  ;;  %v5902_v57 = vld [vmem:[#allocation8 + $0x680] sm:$0xff]  ;;  %v5771_v12 = vld [vmem:[#allocation8 + $0x268] sm:$0xff]  ;;  %v5729_v43 = vld [vmem:[#allocation8 + $0x118] sm:$0xff] }
 0x525   :  { %6108 = vmatprep.subr.mxu0 %v5695_v9  ;;  %6179 = vmatprep.subr.mxu1 %v5823_v40  ;;  %v5899_v9 = vld [vmem:[#allocation8 + $0x668] sm:$0xff]  ;;  %v5770_v40 = vld [vmem:[#allocation8 + $0x260] sm:$0xff] }
 0x526   :  { %6109 = vmatpush1.msra.mxu0 %v5694_v36  ;;  %6180 = vmatpush1.msra.mxu1 %v5822_v46  ;;  %v5898_v36 = vld [vmem:[#allocation8 + $0x660] sm:$0xff]  ;;  %v5767_v46 = vld [vmem:[#allocation8 + $0x248] sm:$0xff] }
 0x527   :  { %6110 = vmatprep.subr.mxu0 %v5819_v47  ;;  %6181 = vmatprep.subr.mxu1 %v5947_v51  ;;  %v5895_v47 = vld [vmem:[#allocation8 + $0x648] sm:$0xff]  ;;  %v3190_v51 = vmax.f32 %v3188_v41, %v3189_v42  ;;  %v5721_v42 = vld [vmem:[#allocation8 + $0xd8] sm:$0xff] }
 0x528   :  { %6111 = vmatpush2.msra.mxu0 %v5818_v39  ;;  %6182 = vmatpush2.msra.mxu1 %v5946_v14  ;;  %v5766_v39 = vld [vmem:[#allocation8 + $0x240] sm:$0xff]  ;;  %v5975_v41 = vld [vmem:[#allocation8 + $0x8c8] sm:$0xff] }
 0x529   :  { %6112 = vmatprep.subr.mxu0 %v5815_v32  ;;  %6183 = vmatprep.subr.mxu1 %v5943_v45  ;;  %v5894_v14 = vld [vmem:[#allocation8 + $0x640] sm:$0xff]  ;;  %v5763_v32 = vld [vmem:[#allocation8 + $0x228] sm:$0xff] }
 0x52a   :  { %6113 = vmatpush2.msra.mxu0 %v5814_v55  ;;  %6184 = vmatpush2.msra.mxu1 %v5942_v8  ;;  %v5891_v45 = vld [vmem:[#allocation8 + $0x628] sm:$0xff]  ;;  %v6975_v55 = vld [vmem:[#allocation6] ss:$0 sm:$0xff]  ;;  %v5762_v8 = vld [vmem:[#allocation8 + $0x220] sm:$0xff] }
 0x52b   :  { %6114 = vmatprep.subr.mxu0 %v5811_v52  ;;  %6185 = vmatprep.subr.mxu1 %v5939_v53  ;;  %v5890_v52 = vld [vmem:[#allocation8 + $0x620] sm:$0xff]  ;;  %v5759_v53 = vld [vmem:[#allocation8 + $0x208] sm:$0xff] }
 0x52c   :  { %6115 = vmatpush2.msra.mxu0 %v5810_v54  ;;  %6186 = vmatpush2.msra.mxu1 %v5938_v60  ;;  %v5887_v54 = vld [vmem:[#allocation8 + $0x608] sm:$0xff]  ;;  %v5758_v60 = vld [vmem:[#allocation8 + $0x200] sm:$0xff] }
 0x52d   :  { %6116 = vmatprep.subr.mxu0 %v5807_v61  ;;  %6187 = vmatprep.subr.mxu1 %v5935_v62  ;;  %v5886_v61 = vld [vmem:[#allocation8 + $0x600] sm:$0xff]  ;;  %v9457_v62 = vadd.f32 %v6975_v55, %v3190_v51  ;;  %v5708_v55 = vld [vmem:[#allocation8 + $0x70] sm:$0xff] }
 0x52e   :  { %6117 = vmatpush2.msra.mxu0 %v5806_v2  ;;  %6188 = vmatpush2.msra.mxu1 %v5934_v58  ;;  %v6011_v2 = vld [vmem:[#allocation8 + $0x9e8] sm:$0xff]  ;;  %v5757_v58 = vld [vmem:[#allocation8 + $0x1f8] sm:$0xff]  ;;  %v5966_v51 = vld [vmem:[#allocation8 + $0x880] sm:$0xff] }
 0x52f   :  { %6118 = vmatprep.subr.mxu0 %v5803_v0  ;;  %6189 = vmatprep.subr.mxu1 %v5931_v31  ;;  %v6010_v0 = vld [vmem:[#allocation8 + $0x9e0] sm:$0xff]  ;;  %v3199_v31 = vmax.f32 %v9457_v62, 0.0  ;;  %v9472_v62 = vpop.f32.mrf.mxu0 }
 0x530   :  { %6119 = vmatpush2.msra.mxu0 %v5802_v63  ;;  %6190 = vmatpush2.msra.mxu1 %v5930_v20  ;;  %v5756_v63 = vld [vmem:[#allocation8 + $0x1f0] sm:$0xff]  ;;  %v6007_v20 = vld [vmem:[#allocation8 + $0x9c8] sm:$0xff] }
 0x531   :  { %6120 = vmatprep.subr.mxu0 %v5799_v21  ;;  %6191 = vmatprep.subr.mxu1 %v5927_v3  ;;  %v5753_v21 = vld [vmem:[#allocation8 + $0x1d8] sm:$0xff]  ;;  %v6006_v3 = vld [vmem:[#allocation8 + $0x9c0] sm:$0xff] }
 0x532   :  { %6121 = vmatpush2.msra.mxu0 %v5798_v4  ;;  %6192 = vmatpush2.msra.mxu1 %v5926_v5  ;;  %v5752_v4 = vld [vmem:[#allocation8 + $0x1d0] sm:$0xff]  ;;  %v6003_v5 = vld [vmem:[#allocation8 + $0x9a8] sm:$0xff] }
 0x533   :  { %6122 = vmatprep.subr.mxu0 %v5795_v11  ;;  %6193 = vmatprep.subr.mxu1 %v5923_v13  ;;  %v5749_v11 = vld [vmem:[#allocation8 + $0x1b8] sm:$0xff]  ;;  %v6002_v13 = vld [vmem:[#allocation8 + $0x9a0] sm:$0xff] }
 0x534   :  { %6123 = vmatpush2.msra.mxu0 %v5794_v30  ;;  %6194 = vmatpush2.msra.mxu1 %v5922_v23  ;;  %v5748_v30 = vld [vmem:[#allocation8 + $0x1b0] sm:$0xff]  ;;  %v5999_v23 = vld [vmem:[#allocation8 + $0x988] sm:$0xff] }
 0x535   :  { %6124 = vmatprep.subr.mxu0 %v5791_v24  ;;  %6195 = vmatprep.subr.mxu1 %v5919_v25  ;;  %v5745_v24 = vld [vmem:[#allocation8 + $0x198] sm:$0xff]  ;;  %v5998_v25 = vld [vmem:[#allocation8 + $0x980] sm:$0xff] }
 0x536   :  { %6125 = vmatpush2.msra.mxu0 %v5790_v26  ;;  %6196 = vmatpush2.msra.mxu1 %v5918_v29  ;;  %v5744_v26 = vld [vmem:[#allocation8 + $0x190] sm:$0xff]  ;;  %v5995_v29 = vld [vmem:[#allocation8 + $0x968] sm:$0xff] }
 0x537   :  { %6126 = vmatprep.subr.mxu0 %v5787_v1  ;;  %6197 = vmatprep.subr.mxu1 %v5915_v59  ;;  %v5991_v1 = vld [vmem:[#allocation8 + $0x948] sm:$0xff]  ;;  %v5737_v59 = vld [vmem:[#allocation8 + $0x158] sm:$0xff] }
 0x538   :  { %6127 = vmatpush2.msra.mxu0 %v5786_v38  ;;  %6198 = vmatpush2.msra.mxu1 %v5914_v27  ;;  %v5990_v38 = vld [vmem:[#allocation8 + $0x940] sm:$0xff]  ;;  %v5736_v27 = vld [vmem:[#allocation8 + $0x150] sm:$0xff] }
 0x539   :  { %6128 = vmatprep.subr.mxu0 %v5783_v10  ;;  %6199 = vmatprep.subr.mxu1 %v5911_v34  ;;  %v5987_v10 = vld [vmem:[#allocation8 + $0x928] sm:$0xff]  ;;  %v5733_v34 = vld [vmem:[#allocation8 + $0x138] sm:$0xff] }
 0x53a   :  { %6129 = vmatpush2.msra.mxu0 %v5782_v28  ;;  %6200 = vmatpush2.msra.mxu1 %v5910_v16  ;;  %v5986_v28 = vld [vmem:[#allocation8 + $0x920] sm:$0xff]  ;;  %v5732_v16 = vld [vmem:[#allocation8 + $0x130] sm:$0xff] }
 0x53b   :  { %6130 = vmatprep.subr.mxu0 %v5779_v7  ;;  %6201 = vmatprep.subr.mxu1 %v5907_v17  ;;  %v5982_v7 = vld [vmem:[#allocation8 + $0x900] sm:$0xff]  ;;  %v5728_v17 = vld [vmem:[#allocation8 + $0x110] sm:$0xff] }
 0x53c   :  { %6131 = vmatpush2.msra.mxu0 %v5778_v49  ;;  %6202 = vmatpush2.msra.mxu1 %v5906_v15  ;;  %v5979_v49 = vld [vmem:[#allocation8 + $0x8e8] sm:$0xff]  ;;  %v5725_v15 = vld [vmem:[#allocation8 + $0xf8] sm:$0xff] }
 0x53d   :  { %6132 = vmatprep.subr.mxu0 %v5775_v19  ;;  %6203 = vmatprep.subr.mxu1 %v5903_v50  ;;  %v5978_v19 = vld [vmem:[#allocation8 + $0x8e0] sm:$0xff]  ;;  %v5724_v50 = vld [vmem:[#allocation8 + $0xf0] sm:$0xff] }
 0x53e   :  { %6133 = vmatpush2.msra.mxu0 %v5774_v44  ;;  %6204 = vmatpush2.msra.mxu1 %v5902_v57  ;;  %v5974_v44 = vld [vmem:[#allocation8 + $0x8c0] sm:$0xff]  ;;  %v5720_v57 = vld [vmem:[#allocation8 + $0xd0] sm:$0xff] }
 0x53f   :  { %6134 = vmatprep.subr.mxu0 %v5771_v12  ;;  %6205 = vmatprep.subr.mxu1 %v5899_v9  ;;  %v5971_v12 = vld [vmem:[#allocation8 + $0x8a8] sm:$0xff]  ;;  %v5717_v9 = vld [vmem:[#allocation8 + $0xb8] sm:$0xff] }
 0x540   :  { %6135 = vmatpush2.msra.mxu0 %v5770_v40  ;;  %6206 = vmatpush2.msra.mxu1 %v5898_v36  ;;  %v5970_v40 = vld [vmem:[#allocation8 + $0x8a0] sm:$0xff]  ;;  %v5716_v36 = vld [vmem:[#allocation8 + $0xb0] sm:$0xff] }
 0x541   :  { %6136 = vmatprep.subr.mxu0 %v5767_v46  ;;  %6207 = vmatprep.subr.mxu1 %v5895_v47  ;;  %v5967_v46 = vld [vmem:[#allocation8 + $0x888] sm:$0xff]  ;;  %v5713_v47 = vld [vmem:[#allocation8 + $0x98] sm:$0xff] }
 0x542   :  { %6137 = vmatpush2.msra.mxu0 %v5766_v39  ;;  %6208 = vmatpush2.msra.mxu1 %v5894_v14  ;;  %v5712_v39 = vld [vmem:[#allocation8 + $0x90] sm:$0xff]  ;;  %v5963_v14 = vld [vmem:[#allocation8 + $0x868] sm:$0xff] }
 0x543   :  { %6138 = vmatprep.subr.mxu0 %v5763_v32  ;;  %6209 = vmatprep.subr.mxu1 %v5891_v45  ;;  %v5709_v32 = vld [vmem:[#allocation8 + $0x78] sm:$0xff]  ;;  %v5962_v45 = vld [vmem:[#allocation8 + $0x860] sm:$0xff] }
 0x544   :  { %6139 = vmatpush2.msra.mxu0 %v5762_v8  ;;  %6210 = vmatpush2.msra.mxu1 %v5890_v52  ;;  %v5959_v8 = vld [vmem:[#allocation8 + $0x848] sm:$0xff]  ;;  %v5705_v52 = vld [vmem:[#allocation8 + $0x58] sm:$0xff] }
 0x545   :  { %6140 = vmatprep.subr.mxu0 %v5759_v53  ;;  %6211 = vmatprep.subr.mxu1 %v5887_v54  ;;  %v5958_v53 = vld [vmem:[#allocation8 + $0x840] sm:$0xff]  ;;  %v5704_v54 = vld [vmem:[#allocation8 + $0x50] sm:$0xff] }
 0x546   :  { %6141 = vmatpush2.msra.mxu0 %v5758_v60  ;;  %6212 = vmatpush2.msra.mxu1 %v5886_v61  ;;  %v5955_v60 = vld [vmem:[#allocation8 + $0x828] sm:$0xff]  ;;  %v5701_v61 = vld [vmem:[#allocation8 + $0x38] sm:$0xff] }
 0x547   :  { %6143 = vmatmul.mubr.f32.vlgmr.msra.gmra.mxu0 %v9426_v22  ;;  %6214 = vmatmul.mubr.f32.vlgmr.msra.gmra.mxu1 %v9447_v56 }
 0x548   :  { %6220 = vmatprep.subr.mxu0 %v6011_v2  ;;  %6291 = vmatprep.subr.mxu1 %v5757_v58  ;;  %v5954_v2 = vld [vmem:[#allocation8 + $0x820] sm:$0xff]  ;;  %v5700_v58 = vld [vmem:[#allocation8 + $0x30] sm:$0xff] }
 0x549   :  { %6221 = vmatpush1.msra.mxu0 %v6010_v0  ;;  %6284 = vmatprep.mubr.f32.mxu0 %v3199_v31  ;;  %v5951_v0 = vld [vmem:[#allocation8 + $0x808] sm:$0xff] }
 0x54a   :  { %6292 = vmatpush1.msra.mxu1 %v5756_v63  ;;  %6355 = vmatprep.mubr.f32.mxu1 %v9418_v33  ;;  %v5994_v33 = vld [vmem:[#allocation8 + $0x960] sm:$0xff]  ;;  %v5697_v63 = vld [vmem:[#allocation8 + $0x18] sm:$0xff] }
 0x54b   :  { %6222 = vmatprep.subr.mxu0 %v6007_v20  ;;  %6293 = vmatprep.subr.mxu1 %v5753_v21  ;;  %v5950_v20 = vld [vmem:[#allocation8 + $0x800] sm:$0xff]  ;;  %v5696_v21 = vld [vmem:[#allocation8 + $0x10] sm:$0xff] }
 0x54c   :  { %6223 = vmatpush1.msra.mxu0 %v6006_v3  ;;  %6294 = vmatpush1.msra.mxu1 %v5752_v4  ;;  %v6075_v3 = vld [vmem:[#allocation8 + $0xbe8] sm:$0xff]  ;;  %v5821_v4 = vld [vmem:[#allocation8 + $0x3f8] sm:$0xff] }
 0x54d   :  { %6224 = vmatprep.subr.mxu0 %v6003_v5  ;;  %6295 = vmatprep.subr.mxu1 %v5749_v11  ;;  %v6074_v5 = vld [vmem:[#allocation8 + $0xbe0] sm:$0xff]  ;;  %v5820_v11 = vld [vmem:[#allocation8 + $0x3f0] sm:$0xff] }
 0x54e   :  { %6225 = vmatpush1.msra.mxu0 %v6002_v13  ;;  %6296 = vmatpush1.msra.mxu1 %v5748_v30  ;;  %v6071_v13 = vld [vmem:[#allocation8 + $0xbc8] sm:$0xff]  ;;  %v5817_v30 = vld [vmem:[#allocation8 + $0x3d8] sm:$0xff] }
 0x54f   :  { %6226 = vmatprep.subr.mxu0 %v5999_v23  ;;  %6297 = vmatprep.subr.mxu1 %v5745_v24  ;;  %v6070_v23 = vld [vmem:[#allocation8 + $0xbc0] sm:$0xff]  ;;  %v5816_v24 = vld [vmem:[#allocation8 + $0x3d0] sm:$0xff] }
 0x550   :  { %6227 = vmatpush1.msra.mxu0 %v5998_v25  ;;  %6298 = vmatpush1.msra.mxu1 %v5744_v26  ;;  %v6067_v25 = vld [vmem:[#allocation8 + $0xba8] sm:$0xff]  ;;  %v5813_v26 = vld [vmem:[#allocation8 + $0x3b8] sm:$0xff] }
 0x551   :  { %6228 = vmatprep.subr.mxu0 %v5995_v29  ;;  %6299 = vmatprep.subr.mxu1 %v5741_v48  ;;  %v6066_v29 = vld [vmem:[#allocation8 + $0xba0] sm:$0xff]  ;;  %v5812_v48 = vld [vmem:[#allocation8 + $0x3b0] sm:$0xff] }
 0x552   :  { %6229 = vmatpush1.msra.mxu0 %v5994_v33  ;;  %6300 = vmatpush1.msra.mxu1 %v5740_v37  ;;  %v6063_v33 = vld [vmem:[#allocation8 + $0xb88] sm:$0xff]  ;;  %v5809_v37 = vld [vmem:[#allocation8 + $0x398] sm:$0xff] }
 0x553   :  { %6230 = vmatprep.subr.mxu0 %v5991_v1  ;;  %6301 = vmatprep.subr.mxu1 %v5737_v59  ;;  %v6062_v1 = vld [vmem:[#allocation8 + $0xb80] sm:$0xff]  ;;  %v5808_v59 = vld [vmem:[#allocation8 + $0x390] sm:$0xff] }
 0x554   :  { %6231 = vmatpush1.msra.mxu0 %v5990_v38  ;;  %6302 = vmatpush1.msra.mxu1 %v5736_v27  ;;  %v6059_v38 = vld [vmem:[#allocation8 + $0xb68] sm:$0xff]  ;;  %v5805_v27 = vld [vmem:[#allocation8 + $0x378] sm:$0xff] }
 0x555   :  { %6232 = vmatprep.subr.mxu0 %v5987_v10  ;;  %6303 = vmatprep.subr.mxu1 %v5733_v34  ;;  %v6058_v10 = vld [vmem:[#allocation8 + $0xb60] sm:$0xff]  ;;  %v5804_v34 = vld [vmem:[#allocation8 + $0x370] sm:$0xff] }
 0x556   :  { %6233 = vmatpush1.msra.mxu0 %v5986_v28  ;;  %6304 = vmatpush1.msra.mxu1 %v5732_v16  ;;  %v6055_v28 = vld [vmem:[#allocation8 + $0xb48] sm:$0xff]  ;;  %v5801_v16 = vld [vmem:[#allocation8 + $0x358] sm:$0xff] }
 0x557   :  { %6234 = vmatprep.subr.mxu0 %v5983_v18  ;;  %6305 = vmatprep.subr.mxu1 %v5729_v43  ;;  %v6054_v18 = vld [vmem:[#allocation8 + $0xb40] sm:$0xff]  ;;  %v5800_v43 = vld [vmem:[#allocation8 + $0x350] sm:$0xff] }
 0x558   :  { %6235 = vmatpush1.msra.mxu0 %v5982_v7  ;;  %6306 = vmatpush1.msra.mxu1 %v5728_v17  ;;  %v6051_v7 = vld [vmem:[#allocation8 + $0xb28] sm:$0xff]  ;;  %v5797_v17 = vld [vmem:[#allocation8 + $0x338] sm:$0xff] }
 0x559   :  { %6236 = vmatprep.subr.mxu0 %v5979_v49  ;;  %6307 = vmatprep.subr.mxu1 %v5725_v15  ;;  %v6050_v49 = vld [vmem:[#allocation8 + $0xb20] sm:$0xff]  ;;  %v5796_v15 = vld [vmem:[#allocation8 + $0x330] sm:$0xff] }
 0x55a   :  { %6237 = vmatpush1.msra.mxu0 %v5978_v19  ;;  %6308 = vmatpush1.msra.mxu1 %v5724_v50  ;;  %v6047_v19 = vld [vmem:[#allocation8 + $0xb08] sm:$0xff]  ;;  %v5793_v50 = vld [vmem:[#allocation8 + $0x318] sm:$0xff] }
 0x55b   :  { %6238 = vmatprep.subr.mxu0 %v5975_v41  ;;  %6309 = vmatprep.subr.mxu1 %v5721_v42  ;;  %v6046_v41 = vld [vmem:[#allocation8 + $0xb00] sm:$0xff]  ;;  %v5792_v42 = vld [vmem:[#allocation8 + $0x310] sm:$0xff] }
 0x55c   :  { %6239 = vmatpush1.msra.mxu0 %v5974_v44  ;;  %6310 = vmatpush1.msra.mxu1 %v5720_v57  ;;  %v6043_v44 = vld [vmem:[#allocation8 + $0xae8] sm:$0xff]  ;;  %v5789_v57 = vld [vmem:[#allocation8 + $0x2f8] sm:$0xff] }
 0x55d   :  { %6240 = vmatprep.subr.mxu0 %v5971_v12  ;;  %6311 = vmatprep.subr.mxu1 %v5717_v9  ;;  %v6042_v12 = vld [vmem:[#allocation8 + $0xae0] sm:$0xff]  ;;  %v5788_v9 = vld [vmem:[#allocation8 + $0x2f0] sm:$0xff] }
 0x55e   :  { %6241 = vmatpush1.msra.mxu0 %v5970_v40  ;;  %6312 = vmatpush1.msra.mxu1 %v5716_v36  ;;  %v6039_v40 = vld [vmem:[#allocation8 + $0xac8] sm:$0xff]  ;;  %v5785_v36 = vld [vmem:[#allocation8 + $0x2d8] sm:$0xff] }
 0x55f   :  { %6242 = vmatprep.subr.mxu0 %v5967_v46  ;;  %6313 = vmatprep.subr.mxu1 %v5713_v47  ;;  %v6038_v46 = vld [vmem:[#allocation8 + $0xac0] sm:$0xff]  ;;  %v5784_v47 = vld [vmem:[#allocation8 + $0x2d0] sm:$0xff] }
 0x560   :  { %6243 = vmatpush1.msra.mxu0 %v5966_v51  ;;  %6314 = vmatpush1.msra.mxu1 %v5712_v39  ;;  %v6035_v51 = vld [vmem:[#allocation8 + $0xaa8] sm:$0xff]  ;;  %v5781_v39 = vld [vmem:[#allocation8 + $0x2b8] sm:$0xff] }
 0x561   :  { %6244 = vmatprep.subr.mxu0 %v5963_v14  ;;  %6315 = vmatprep.subr.mxu1 %v5709_v32  ;;  %v6034_v14 = vld [vmem:[#allocation8 + $0xaa0] sm:$0xff]  ;;  %v5780_v32 = vld [vmem:[#allocation8 + $0x2b0] sm:$0xff] }
 0x562   :  { %6245 = vmatpush1.msra.mxu0 %v5962_v45  ;;  %6316 = vmatpush1.msra.mxu1 %v5708_v55  ;;  %v6031_v45 = vld [vmem:[#allocation8 + $0xa88] sm:$0xff]  ;;  %v5777_v55 = vld [vmem:[#allocation8 + $0x298] sm:$0xff] }
 0x563   :  { %6246 = vmatprep.subr.mxu0 %v5959_v8  ;;  %6317 = vmatprep.subr.mxu1 %v5705_v52  ;;  %v6030_v8 = vld [vmem:[#allocation8 + $0xa80] sm:$0xff]  ;;  %v5776_v52 = vld [vmem:[#allocation8 + $0x290] sm:$0xff] }
 0x564   :  { %6247 = vmatpush1.msra.mxu0 %v5958_v53  ;;  %6318 = vmatpush1.msra.mxu1 %v5704_v54  ;;  %v6027_v53 = vld [vmem:[#allocation8 + $0xa68] sm:$0xff]  ;;  %v5773_v54 = vld [vmem:[#allocation8 + $0x278] sm:$0xff] }
 0x565   :  { %6248 = vmatprep.subr.mxu0 %v5955_v60  ;;  %6319 = vmatprep.subr.mxu1 %v5701_v61  ;;  %v6026_v60 = vld [vmem:[#allocation8 + $0xa60] sm:$0xff]  ;;  %v5772_v61 = vld [vmem:[#allocation8 + $0x270] sm:$0xff] }
 0x566   :  { %6249 = vmatpush1.msra.mxu0 %v5954_v2  ;;  %6320 = vmatpush1.msra.mxu1 %v5700_v58  ;;  %v6023_v2 = vld [vmem:[#allocation8 + $0xa48] sm:$0xff]  ;;  %v5769_v58 = vld [vmem:[#allocation8 + $0x258] sm:$0xff] }
 0x567   :  { %6250 = vmatprep.subr.mxu0 %v5951_v0  ;;  %6321 = vmatprep.subr.mxu1 %v5697_v63  ;;  %v6022_v0 = vld [vmem:[#allocation8 + $0xa40] sm:$0xff]  ;;  %v5768_v63 = vld [vmem:[#allocation8 + $0x250] sm:$0xff] }
 0x568   :  { %6251 = vmatpush1.msra.mxu0 %v5950_v20  ;;  %6322 = vmatpush1.msra.mxu1 %v5696_v21  ;;  %v6019_v20 = vld [vmem:[#allocation8 + $0xa28] sm:$0xff]  ;;  %v5765_v21 = vld [vmem:[#allocation8 + $0x238] sm:$0xff] }
 0x569   :  { %6252 = vmatprep.subr.mxu0 %v6075_v3  ;;  %6323 = vmatprep.subr.mxu1 %v5821_v4  ;;  %v6018_v3 = vld [vmem:[#allocation8 + $0xa20] sm:$0xff]  ;;  %v5764_v4 = vld [vmem:[#allocation8 + $0x230] sm:$0xff] }
 0x56a   :  { %6253 = vmatpush2.msra.mxu0 %v6074_v5  ;;  %6324 = vmatpush2.msra.mxu1 %v5820_v11  ;;  %v6015_v5 = vld [vmem:[#allocation8 + $0xa08] sm:$0xff]  ;;  %v5761_v11 = vld [vmem:[#allocation8 + $0x218] sm:$0xff] }
 0x56b   :  { %6254 = vmatprep.subr.mxu0 %v6071_v13  ;;  %6325 = vmatprep.subr.mxu1 %v5817_v30  ;;  %v6014_v13 = vld [vmem:[#allocation8 + $0xa00] sm:$0xff]  ;;  %v5760_v30 = vld [vmem:[#allocation8 + $0x210] sm:$0xff] }
 0x56c   :  { %6255 = vmatpush2.msra.mxu0 %v6070_v23  ;;  %6326 = vmatpush2.msra.mxu1 %v5816_v24  ;;  %v2942_v23 = vmax.f32 %v9405_v35, 0.0  ;;  %v5885_v24 = vld [vmem:[#allocation8 + $0x5f8] sm:$0xff]  ;;  %v6582_v35 = vld [vmem:[#allocation11 + $0x1e8] sm:$0xff] }
 0x56d   :  { %6256 = vmatprep.subr.mxu0 %v6067_v25  ;;  %6327 = vmatprep.subr.mxu1 %v5813_v26  ;;  %v6013_v25 = vld [vmem:[#allocation8 + $0x9f8] sm:$0xff]  ;;  %v5884_v26 = vld [vmem:[#allocation8 + $0x5f0] sm:$0xff] }
 0x56e   :  { %6257 = vmatpush2.msra.mxu0 %v6066_v29  ;;  %6328 = vmatpush2.msra.mxu1 %v5812_v48  ;;  %v6012_v29 = vld [vmem:[#allocation8 + $0x9f0] sm:$0xff]  ;;  %v5881_v48 = vld [vmem:[#allocation8 + $0x5d8] sm:$0xff] }
 0x56f   :  { %6258 = vmatprep.subr.mxu0 %v6063_v33  ;;  %6329 = vmatprep.subr.mxu1 %v5809_v37  ;;  %v6009_v33 = vld [vmem:[#allocation8 + $0x9d8] sm:$0xff]  ;;  %v5880_v37 = vld [vmem:[#allocation8 + $0x5d0] sm:$0xff] }
 0x570   :  { %6259 = vmatpush2.msra.mxu0 %v6062_v1  ;;  %6330 = vmatpush2.msra.mxu1 %v5808_v59  ;;  %v6008_v1 = vld [vmem:[#allocation8 + $0x9d0] sm:$0xff]  ;;  %v5877_v59 = vld [vmem:[#allocation8 + $0x5b8] sm:$0xff] }
 0x571   :  { %6260 = vmatprep.subr.mxu0 %v6059_v38  ;;  %6331 = vmatprep.subr.mxu1 %v5805_v27  ;;  %v6005_v38 = vld [vmem:[#allocation8 + $0x9b8] sm:$0xff]  ;;  %v5876_v27 = vld [vmem:[#allocation8 + $0x5b0] sm:$0xff] }
 0x572   :  { %6261 = vmatpush2.msra.mxu0 %v6058_v10  ;;  %6332 = vmatpush2.msra.mxu1 %v5804_v34  ;;  %v5873_v10 = vld [vmem:[#allocation8 + $0x598] sm:$0xff] }
 0x573   :  { %6262 = vmatprep.subr.mxu0 %v6055_v28  ;;  %6333 = vmatprep.subr.mxu1 %v5801_v16  ;;  %v6001_v34 = vld [vmem:[#allocation8 + $0x998] sm:$0xff]  ;;  %v5872_v28 = vld [vmem:[#allocation8 + $0x590] sm:$0xff] }
 0x574   :  { %6263 = vmatpush2.msra.mxu0 %v6054_v18  ;;  %6334 = vmatpush2.msra.mxu1 %v5800_v43  ;;  %v5869_v16 = vld [vmem:[#allocation8 + $0x578] sm:$0xff]  ;;  %v5996_v43 = vld [vmem:[#allocation8 + $0x970] sm:$0xff] }
 0x575   :  { %6264 = vmatprep.subr.mxu0 %v6051_v7  ;;  %6335 = vmatprep.subr.mxu1 %v5797_v17  ;;  %v5997_v18 = vld [vmem:[#allocation8 + $0x978] sm:$0xff] }
 0x576   :  { %6265 = vmatpush2.msra.mxu0 %v6050_v49  ;;  %6336 = vmatpush2.msra.mxu1 %v5796_v15  ;;  %v5865_v7 = vld [vmem:[#allocation8 + $0x558] sm:$0xff]  ;;  %v5864_v49 = vld [vmem:[#allocation8 + $0x550] sm:$0xff] }
 0x577   :  { %6266 = vmatprep.subr.mxu0 %v6047_v19  ;;  %6337 = vmatprep.subr.mxu1 %v5793_v50  ;;  %v5993_v17 = vld [vmem:[#allocation8 + $0x958] sm:$0xff]  ;;  %v5992_v15 = vld [vmem:[#allocation8 + $0x950] sm:$0xff] }
 0x578   :  { %6267 = vmatpush2.msra.mxu0 %v6046_v41  ;;  %6338 = vmatpush2.msra.mxu1 %v5792_v42  ;;  %v5861_v19 = vld [vmem:[#allocation8 + $0x538] sm:$0xff]  ;;  %v9474_v41 = vpop.f32.mrf.mxu0  ;;  %v5860_v42 = vld [vmem:[#allocation8 + $0x530] sm:$0xff] }
 0x579   :  { %6268 = vmatprep.subr.mxu0 %v6043_v44  ;;  %6339 = vmatprep.subr.mxu1 %v5789_v57  ;;  %v5989_v50 = vld [vmem:[#allocation8 + $0x938] sm:$0xff]  ;;  %v5988_v44 = vld [vmem:[#allocation8 + $0x930] sm:$0xff] }
 0x57a   :  { %6269 = vmatpush2.msra.mxu0 %v6042_v12  ;;  %6340 = vmatpush2.msra.mxu1 %v5788_v9  ;;  %v5857_v57 = vld [vmem:[#allocation8 + $0x518] sm:$0xff]  ;;  %v9476_v9 = vpop.f32.mrf.mxu1 }
 0x57b   :  { %6270 = vmatprep.subr.mxu0 %v6039_v40  ;;  %6341 = vmatprep.subr.mxu1 %v5785_v36  ;;  %v5985_v12 = vld [vmem:[#allocation8 + $0x918] sm:$0xff]  ;;  %v9478_v40 = vpop.f32.mrf.mxu0  ;;  %v5856_v36 = vld [vmem:[#allocation8 + $0x510] sm:$0xff] }
 0x57c   :  { %6271 = vmatpush2.msra.mxu0 %v6038_v46  ;;  %6342 = vmatpush2.msra.mxu1 %v5784_v47  ;;  %v5984_v46 = vld [vmem:[#allocation8 + $0x910] sm:$0xff]  ;;  %v5853_v47 = vld [vmem:[#allocation8 + $0x4f8] sm:$0xff] }
 0x57d   :  { %6272 = vmatprep.subr.mxu0 %v6035_v51  ;;  %6343 = vmatprep.subr.mxu1 %v5781_v39  ;;  %v5981_v51 = vld [vmem:[#allocation8 + $0x8f8] sm:$0xff]  ;;  %v5852_v39 = vld [vmem:[#allocation8 + $0x4f0] sm:$0xff] }
 0x57e   :  { %6273 = vmatpush2.msra.mxu0 %v6034_v14  ;;  %6344 = vmatpush2.msra.mxu1 %v5780_v32  ;;  %v5980_v14 = vld [vmem:[#allocation8 + $0x8f0] sm:$0xff]  ;;  %v5849_v32 = vld [vmem:[#allocation8 + $0x4d8] sm:$0xff] }
 0x57f   :  { %6274 = vmatprep.subr.mxu0 %v6031_v45  ;;  %6345 = vmatprep.subr.mxu1 %v5777_v55  ;;  %v5977_v45 = vld [vmem:[#allocation8 + $0x8d8] sm:$0xff]  ;;  %v9480_v55 = vpop.f32.mrf.mxu1 }
 0x580   :  { %6275 = vmatpush2.msra.mxu0 %v6030_v8  ;;  %6346 = vmatpush2.msra.mxu1 %v5776_v52  ;;  %v9482_v8 = vpop.f32.mrf.mxu0  ;;  %v5848_v52 = vld [vmem:[#allocation8 + $0x4d0] sm:$0xff] }
 0x581   :  { %6276 = vmatprep.subr.mxu0 %v6027_v53  ;;  %6347 = vmatprep.subr.mxu1 %v5773_v54  ;;  %v5976_v53 = vld [vmem:[#allocation8 + $0x8d0] sm:$0xff]  ;;  %v5845_v54 = vld [vmem:[#allocation8 + $0x4b8] sm:$0xff] }
 0x582   :  { %6277 = vmatpush2.msra.mxu0 %v6026_v60  ;;  %6348 = vmatpush2.msra.mxu1 %v5772_v61  ;;  %v5973_v60 = vld [vmem:[#allocation8 + $0x8b8] sm:$0xff]  ;;  %v9484_v61 = vpop.f32.mrf.mxu1 }
 0x583   :  { %6278 = vmatprep.subr.mxu0 %v6023_v2  ;;  %6349 = vmatprep.subr.mxu1 %v5769_v58  ;;  %v9486_v2 = vpop.f32.mrf.mxu0  ;;  %v5844_v58 = vld [vmem:[#allocation8 + $0x4b0] sm:$0xff] }
 0x584   :  { %6279 = vmatpush2.msra.mxu0 %v6022_v0  ;;  %6350 = vmatpush2.msra.mxu1 %v5768_v63  ;;  %v5972_v0 = vld [vmem:[#allocation8 + $0x8b0] sm:$0xff]  ;;  %v5841_v63 = vld [vmem:[#allocation8 + $0x498] sm:$0xff] }
 0x585   :  { %6280 = vmatprep.subr.mxu0 %v6019_v20  ;;  %6351 = vmatprep.subr.mxu1 %v5765_v21  ;;  %v5969_v20 = vld [vmem:[#allocation8 + $0x898] sm:$0xff]  ;;  %v5840_v21 = vld [vmem:[#allocation8 + $0x490] sm:$0xff] }
 0x586   :  { %6281 = vmatpush2.msra.mxu0 %v6018_v3  ;;  %6352 = vmatpush2.msra.mxu1 %v5764_v4  ;;  %v5968_v3 = vld [vmem:[#allocation8 + $0x890] sm:$0xff]  ;;  %v5837_v4 = vld [vmem:[#allocation8 + $0x478] sm:$0xff] }
 0x587   :  { %6282 = vmatprep.subr.mxu0 %v6015_v5  ;;  %6353 = vmatprep.subr.mxu1 %v5761_v11  ;;  %v5965_v5 = vld [vmem:[#allocation8 + $0x878] sm:$0xff]  ;;  %v9488_v11 = vpop.f32.mrf.mxu1 }
 0x588   :  { %6283 = vmatpush2.msra.mxu0 %v6014_v13  ;;  %6354 = vmatpush2.msra.mxu1 %v5760_v30  ;;  %v9490_v13 = vpop.f32.mrf.mxu0  ;;  %v5836_v30 = vld [vmem:[#allocation8 + $0x470] sm:$0xff] }
 0x589   :  { %6285 = vmatmul.mubr.f32.vlgmr.msra.gmra.mxu0 %v2942_v23  ;;  %6356 = vmatmul.mubr.f32.vlgmr.msra.gmra.mxu1 %v9426_v22  ;;  %v6004_v22 = vld [vmem:[#allocation8 + $0x9b0] sm:$0xff] }
 0x58a   :  { %6362 = vmatprep.subr.mxu0 %v5885_v24  ;;  %6433 = vmatprep.subr.mxu1 %v6013_v25  ;;  %v5964_v24 = vld [vmem:[#allocation8 + $0x870] sm:$0xff]  ;;  %v5833_v25 = vld [vmem:[#allocation8 + $0x458] sm:$0xff] }
 0x58b   :  { %6363 = vmatpush1.msra.mxu0 %v5884_v26  ;;  %6426 = vmatprep.mubr.f32.mxu0 %v9440_v6  ;;  %v6000_v6 = vld [vmem:[#allocation8 + $0x990] sm:$0xff]  ;;  %v5961_v26 = vld [vmem:[#allocation8 + $0x858] sm:$0xff] }
 0x58c   :  { %6434 = vmatpush1.msra.mxu1 %v6012_v29  ;;  %6497 = vmatprep.mubr.f32.mxu1 %v3199_v31  ;;  %v5868_v31 = vld [vmem:[#allocation8 + $0x570] sm:$0xff]  ;;  %v9492_v29 = vpop.f32.mrf.mxu1 }
 0x58d   :  { %6364 = vmatprep.subr.mxu0 %v5881_v48  ;;  %6435 = vmatprep.subr.mxu1 %v6009_v33  ;;  %v9494_v48 = vpop.f32.mrf.mxu0  ;;  %v5832_v33 = vld [vmem:[#allocation8 + $0x450] sm:$0xff] }
 0x58e   :  { %6365 = vmatpush1.msra.mxu0 %v5880_v37  ;;  %6436 = vmatpush1.msra.mxu1 %v6008_v1  ;;  %v5960_v37 = vld [vmem:[#allocation8 + $0x850] sm:$0xff]  ;;  %v5829_v1 = vld [vmem:[#allocation8 + $0x438] sm:$0xff] }
 0x58f   :  { %6366 = vmatprep.subr.mxu0 %v5877_v59  ;;  %6437 = vmatprep.subr.mxu1 %v6005_v38  ;;  %v5957_v59 = vld [vmem:[#allocation8 + $0x838] sm:$0xff]  ;;  %v5828_v38 = vld [vmem:[#allocation8 + $0x430] sm:$0xff] }
 0x590   :  { %6367 = vmatpush1.msra.mxu0 %v5876_v27  ;;  %6438 = vmatpush1.msra.mxu1 %v6004_v22  ;;  %v5956_v27 = vld [vmem:[#allocation8 + $0x830] sm:$0xff]  ;;  %v5825_v22 = vld [vmem:[#allocation8 + $0x418] sm:$0xff] }
 0x591   :  { %6368 = vmatprep.subr.mxu0 %v5873_v10  ;;  %6439 = vmatprep.subr.mxu1 %v6001_v34  ;;  %v5953_v10 = vld [vmem:[#allocation8 + $0x818] sm:$0xff]  ;;  %v9496_v34 = vpop.f32.mrf.mxu1 }
 0x592   :  { %6369 = vmatpush1.msra.mxu0 %v5872_v28  ;;  %6440 = vmatpush1.msra.mxu1 %v6000_v6  ;;  %v9498_v28 = vpop.f32.mrf.mxu0  ;;  %v5824_v6 = vld [vmem:[#allocation8 + $0x410] sm:$0xff] }
 0x593   :  { %6370 = vmatprep.subr.mxu0 %v5869_v16  ;;  %6441 = vmatprep.subr.mxu1 %v5997_v18  ;;  %v5952_v16 = vld [vmem:[#allocation8 + $0x810] sm:$0xff]  ;;  %v5949_v18 = vld [vmem:[#allocation8 + $0x7f8] sm:$0xff] }
 0x594   :  { %6371 = vmatpush1.msra.mxu0 %v5868_v31  ;;  %6442 = vmatpush1.msra.mxu1 %v5996_v43  ;;  %v6077_v31 = vld [vmem:[#allocation8 + $0xbf8] sm:$0xff]  ;;  %v9500_v43 = vpop.f32.mrf.mxu1 }
 0x595   :  { %6372 = vmatprep.subr.mxu0 %v5865_v7  ;;  %6443 = vmatprep.subr.mxu1 %v5993_v17  ;;  %v9502_v7 = vpop.f32.mrf.mxu0  ;;  %v5948_v17 = vld [vmem:[#allocation8 + $0x7f0] sm:$0xff] }
 0x596   :  { %6373 = vmatpush1.msra.mxu0 %v5864_v49  ;;  %6444 = vmatpush1.msra.mxu1 %v5992_v15  ;;  %v6076_v49 = vld [vmem:[#allocation8 + $0xbf0] sm:$0xff]  ;;  %v5945_v15 = vld [vmem:[#allocation8 + $0x7d8] sm:$0xff] }
 0x597   :  { %6374 = vmatprep.subr.mxu0 %v5861_v19  ;;  %6445 = vmatprep.subr.mxu1 %v5989_v50  ;;  %v6073_v19 = vld [vmem:[#allocation8 + $0xbd8] sm:$0xff]  ;;  %v5944_v50 = vld [vmem:[#allocation8 + $0x7d0] sm:$0xff] }
 0x598   :  { %6375 = vmatpush1.msra.mxu0 %v5860_v42  ;;  %6446 = vmatpush1.msra.mxu1 %v5988_v44  ;;  %v6072_v42 = vld [vmem:[#allocation8 + $0xbd0] sm:$0xff]  ;;  %v5941_v44 = vld [vmem:[#allocation8 + $0x7b8] sm:$0xff] }
 0x599   :  { %6376 = vmatprep.subr.mxu0 %v5857_v57  ;;  %6447 = vmatprep.subr.mxu1 %v5985_v12  ;;  %v6069_v57 = vld [vmem:[#allocation8 + $0xbb8] sm:$0xff]  ;;  %v4559_v12 = vpop.f32.mrf.mxu1 }
 0x59a   :  { %6377 = vmatpush1.msra.mxu0 %v5856_v36  ;;  %6448 = vmatpush1.msra.mxu1 %v5984_v46  ;;  %v9504_v36 = vpop.f32.mrf.mxu0  ;;  %v5940_v46 = vld [vmem:[#allocation8 + $0x7b0] sm:$0xff] }
 0x59b   :  { %6378 = vmatprep.subr.mxu0 %v5853_v47  ;;  %6449 = vmatprep.subr.mxu1 %v5981_v51  ;;  %v6068_v47 = vld [vmem:[#allocation8 + $0xbb0] sm:$0xff]  ;;  %v5937_v51 = vld [vmem:[#allocation8 + $0x798] sm:$0xff] }
 0x59c   :  { %6379 = vmatpush1.msra.mxu0 %v5852_v39  ;;  %6450 = vmatpush1.msra.mxu1 %v5980_v14  ;;  %v6065_v39 = vld [vmem:[#allocation8 + $0xb98] sm:$0xff]  ;;  %v4699_v14 = vpop.f32.mrf.mxu1 }
 0x59d   :  { %6380 = vmatprep.subr.mxu0 %v5849_v32  ;;  %6451 = vmatprep.subr.mxu1 %v5977_v45  ;;  %v4770_v32 = vpop.f32.mrf.mxu0  ;;  %v5936_v45 = vld [vmem:[#allocation8 + $0x790] sm:$0xff] }
 0x59e   :  { %6381 = vmatpush1.msra.mxu0 %v5848_v52  ;;  %6452 = vmatpush1.msra.mxu1 %v5976_v53  ;;  %v6064_v52 = vld [vmem:[#allocation8 + $0xb90] sm:$0xff]  ;;  %v5933_v53 = vld [vmem:[#allocation8 + $0x778] sm:$0xff] }
 0x59f   :  { %6382 = vmatprep.subr.mxu0 %v5845_v54  ;;  %6453 = vmatprep.subr.mxu1 %v5973_v60  ;;  %v6061_v54 = vld [vmem:[#allocation8 + $0xb78] sm:$0xff]  ;;  %v5932_v60 = vld [vmem:[#allocation8 + $0x770] sm:$0xff] }
 0x5a0   :  { %6383 = vmatpush1.msra.mxu0 %v5844_v58  ;;  %6454 = vmatpush1.msra.mxu1 %v5972_v0  ;;  %v6060_v58 = vld [vmem:[#allocation8 + $0xb70] sm:$0xff]  ;;  %v5929_v0 = vld [vmem:[#allocation8 + $0x758] sm:$0xff] }
 0x5a1   :  { %6384 = vmatprep.subr.mxu0 %v5841_v63  ;;  %6455 = vmatprep.subr.mxu1 %v5969_v20  ;;  %v6057_v63 = vld [vmem:[#allocation8 + $0xb58] sm:$0xff]  ;;  %v4701_v20 = vpop.f32.mrf.mxu1 }
 0x5a2   :  { %6385 = vmatpush1.msra.mxu0 %v5840_v21  ;;  %6456 = vmatpush1.msra.mxu1 %v5968_v3  ;;  %v4772_v21 = vpop.f32.mrf.mxu0  ;;  %v5928_v3 = vld [vmem:[#allocation8 + $0x750] sm:$0xff] }
 0x5a3   :  { %6386 = vmatprep.subr.mxu0 %v5837_v4  ;;  %6457 = vmatprep.subr.mxu1 %v5965_v5  ;;  %v6056_v4 = vld [vmem:[#allocation8 + $0xb50] sm:$0xff]  ;;  %v5925_v5 = vld [vmem:[#allocation8 + $0x738] sm:$0xff] }
 0x5a4   :  { %6387 = vmatpush1.msra.mxu0 %v5836_v30  ;;  %6458 = vmatpush1.msra.mxu1 %v5964_v24  ;;  %v6053_v30 = vld [vmem:[#allocation8 + $0xb38] sm:$0xff]  ;;  %v4841_v24 = vpop.f32.mrf.mxu1 }
 0x5a5   :  { %6388 = vmatprep.subr.mxu0 %v5833_v25  ;;  %6459 = vmatprep.subr.mxu1 %v5961_v26  ;;  %v5924_v25 = vld [vmem:[#allocation8 + $0x730] sm:$0xff] }
 0x5a6   :  { %6389 = vmatpush1.msra.mxu0 %v5832_v33  ;;  %6460 = vmatpush1.msra.mxu1 %v5960_v37  ;;  %v6052_v26 = vld [vmem:[#allocation8 + $0xb30] sm:$0xff]  ;;  %v4773_v33 = vadd.f32 %v4772_v21, %v4701_v20  ;;  %v5921_v37 = vld [vmem:[#allocation8 + $0x718] sm:$0xff]  ;;  %v9511_v20 = vld [vmem:[#allocation9] ss:$0 sm:$0xff] }
 0x5a7   :  { %6390 = vmatprep.subr.mxu0 %v5829_v1  ;;  %6461 = vmatprep.subr.mxu1 %v5957_v59  ;;  %v6049_v1 = vld [vmem:[#allocation8 + $0xb18] sm:$0xff]  ;;  %v5920_v59 = vld [vmem:[#allocation8 + $0x710] sm:$0xff] }
 0x5a8   :  { %6391 = vmatpush1.msra.mxu0 %v5828_v38  ;;  %6462 = vmatpush1.msra.mxu1 %v5956_v27  ;;  %v6048_v38 = vld [vmem:[#allocation8 + $0xb10] sm:$0xff]  ;;  %v4771_v27 = vadd.f32 %v4770_v32, %v4699_v14  ;;  %v5905_v14 = vld [vmem:[#allocation8 + $0x698] sm:$0xff] }
 0x5a9   :  { %6392 = vmatprep.subr.mxu0 %v5825_v22  ;;  %6463 = vmatprep.subr.mxu1 %v5953_v10  ;;  %v5917_v22 = vld [vmem:[#allocation8 + $0x6f8] sm:$0xff] }
 0x5aa   :  { %6393 = vmatpush1.msra.mxu0 %v5824_v6  ;;  %6464 = vmatpush1.msra.mxu1 %v5952_v16  ;;  %v6045_v10 = vld [vmem:[#allocation8 + $0xaf8] sm:$0xff]  ;;  %v4843_v6 = vpop.f32.mrf.mxu1  ;;  %v5916_v16 = vld [vmem:[#allocation8 + $0x6f0] sm:$0xff] }
 0x5ab   :  { %6394 = vmatprep.subr.mxu0 %v5949_v18  ;;  %6465 = vmatprep.subr.mxu1 %v6077_v31  ;;  %v6044_v18 = vld [vmem:[#allocation8 + $0xaf0] sm:$0xff]  ;;  %v4560_v31 = vadd.f32 %v4559_v12, %v9498_v28  ;;  %v6033_v32 = vld [vmem:[#allocation8 + $0xa98] sm:$0xff] }
 0x5ac   :  { %6395 = vmatpush2.msra.mxu0 %v5948_v17  ;;  %6466 = vmatpush2.msra.mxu1 %v6076_v49  ;;  %v4844_v17 = vadd.f32 %v4843_v6, %v4773_v33  ;;  %v5913_v49 = vld [vmem:[#allocation8 + $0x6d8] sm:$0xff]  ;;  %v5908_v28 = vld [vmem:[#allocation8 + $0x6b0] sm:$0xff] }
 0x5ad   :  { %6396 = vmatprep.subr.mxu0 %v5945_v15  ;;  %6467 = vmatprep.subr.mxu1 %v6073_v19  ;;  %v6041_v15 = vld [vmem:[#allocation8 + $0xad8] sm:$0xff]  ;;  %v5912_v19 = vld [vmem:[#allocation8 + $0x6d0] sm:$0xff] }
 0x5ae   :  { %6397 = vmatpush2.msra.mxu0 %v5944_v50  ;;  %6468 = vmatpush2.msra.mxu1 %v6072_v42  ;;  %v6040_v50 = vld [vmem:[#allocation8 + $0xad0] sm:$0xff]  ;;  %v4558_v42 = vadd.f32 %v9500_v43, %v9494_v48  ;;  %v5893_v21 = vld [vmem:[#allocation8 + $0x638] sm:$0xff] }
 0x5af   :  { %6398 = vmatprep.subr.mxu0 %v5941_v44  ;;  %6469 = vmatprep.subr.mxu1 %v6069_v57  ;;  %v4631_v44 = vadd.f32 %v9504_v36, %v4560_v31  ;;  %v4842_v57 = vadd.f32 %v4841_v24, %v4771_v27  ;;  %v6036_v12 = vld [vmem:[#allocation8 + $0xab0] sm:$0xff]  ;;  %v6017_v24 = vld [vmem:[#allocation8 + $0xa18] sm:$0xff]  ;;  %v6549_v31 = vld [vmem:[#allocation11 + $0xe0] sm:$0xff] }
 0x5b0   :  { %6399 = vmatpush2.msra.mxu0 %v5940_v46  ;;  %6470 = vmatpush2.msra.mxu1 %v6068_v47  ;;  %v5909_v46 = vld [vmem:[#allocation8 + $0x6b8] sm:$0xff]  ;;  %v5904_v48 = vld [vmem:[#allocation8 + $0x690] sm:$0xff] }
 0x5b1   :  { %6400 = vmatprep.subr.mxu0 %v5937_v51  ;;  %6471 = vmatprep.subr.mxu1 %v6065_v39  ;;  %v6037_v47 = vld [vmem:[#allocation8 + $0xab8] sm:$0xff]  ;;  %v4629_v51 = vadd.f32 %v9502_v7, %v4558_v42  ;;  %v4847_v39 = vmax.f32 %v4842_v57, %v4844_v17  ;;  %v6032_v43 = vld [vmem:[#allocation8 + $0xa90] sm:$0xff]  ;;  %v6565_v42 = vld [vmem:[#allocation11 + $0x160] sm:$0xff] }
 0x5b2   :  { %6401 = vmatpush2.msra.mxu0 %v5936_v45  ;;  %6472 = vmatpush2.msra.mxu1 %v6064_v52  ;;  %v5901_v45 = vld [vmem:[#allocation8 + $0x678] sm:$0xff]  ;;  %v6016_v33 = vld [vmem:[#allocation8 + $0xa10] sm:$0xff] }
 0x5b3   :  { %6402 = vmatprep.subr.mxu0 %v5933_v53  ;;  %6473 = vmatprep.subr.mxu1 %v6061_v54  ;;  %v4846_v36 = vmax.f32 %v4629_v51, %v4631_v44  ;;  %v6029_v52 = vld [vmem:[#allocation8 + $0xa78] sm:$0xff]  ;;  %v5900_v53 = vld [vmem:[#allocation8 + $0x670] sm:$0xff] }
 0x5b4   :  { %6403 = vmatpush2.msra.mxu0 %v5932_v60  ;;  %6474 = vmatpush2.msra.mxu1 %v6060_v58  ;;  %v6028_v54 = vld [vmem:[#allocation8 + $0xa70] sm:$0xff]  ;;  %v5897_v7 = vld [vmem:[#allocation8 + $0x658] sm:$0xff] }
 0x5b5   :  { %6404 = vmatprep.subr.mxu0 %v5929_v0  ;;  %6475 = vmatprep.subr.mxu1 %v6057_v63  ;;  %v4848_v60 = vmax.f32 %v4846_v36, %v4847_v39  ;;  %v6025_v58 = vld [vmem:[#allocation8 + $0xa58] sm:$0xff]  ;;  %v5896_v0 = vld [vmem:[#allocation8 + $0x650] sm:$0xff]  ;;  %v6545_v39 = vld [vmem:[#allocation11 + $0xc0] sm:$0xff] }
 0x5b6   :  { %6405 = vmatpush2.msra.mxu0 %v5928_v3  ;;  %6476 = vmatpush2.msra.mxu1 %v6056_v4  ;;  %v6024_v63 = vld [vmem:[#allocation8 + $0xa50] sm:$0xff]  ;;  %v6021_v3 = vld [vmem:[#allocation8 + $0xa38] sm:$0xff] }
 0x5b7   :  { %6406 = vmatprep.subr.mxu0 %v5925_v5  ;;  %6477 = vmatprep.subr.mxu1 %v6053_v30  ;;  %v5892_v4 = vld [vmem:[#allocation8 + $0x630] sm:$0xff]  ;;  %v5889_v30 = vld [vmem:[#allocation8 + $0x618] sm:$0xff] }
 0x5b8   :  { %6407 = vmatpush2.msra.mxu0 %v5924_v25  ;;  %6478 = vmatpush2.msra.mxu1 %v6052_v26  ;;  %v6020_v5 = vld [vmem:[#allocation8 + $0xa30] sm:$0xff]  ;;  %v4856_v25 = vadd.f32 %v9511_v20, %v4848_v60  ;;  %v6584_v6 = vld [vmem:[#allocation11 + $0x1f8] sm:$0xff] }
 0x5b9   :  { %6408 = vmatprep.subr.mxu0 %v5921_v37  ;;  %6479 = vmatprep.subr.mxu1 %v6049_v1  ;;  %v5888_v26 = vld [vmem:[#allocation8 + $0x610] sm:$0xff]  ;;  %v6552_v37 = vld [vmem:[#allocation11 + $0xf8] sm:$0xff] }
 0x5ba   :  { %6409 = vmatpush2.msra.mxu0 %v5920_v59  ;;  %6480 = vmatpush2.msra.mxu1 %v6048_v38  ;;  %v6536_v1 = vld [vmem:[#allocation11 + $0x78] sm:$0xff]  ;;  %v4857_v59 = vmax.f32 %v4856_v25, 0.0  ;;  %v6551_v38 = vld [vmem:[#allocation11 + $0xf0] sm:$0xff]  ;;  %v6537_v25 = vld [vmem:[#allocation11 + $0x80] sm:$0xff] }
 0x5bb   :  { %6410 = vmatprep.subr.mxu0 %v5917_v22  ;;  %6481 = vmatprep.subr.mxu1 %v6045_v10  ;;  %v6535_v27 = vld [vmem:[#allocation11 + $0x70] sm:$0xff]  ;;  %v6550_v22 = vld [vmem:[#allocation11 + $0xe8] sm:$0xff]  ;;  %v6580_v57 = vld [vmem:[#allocation11 + $0x1d8] sm:$0xff] }
 0x5bc   :  { %6411 = vmatpush2.msra.mxu0 %v5916_v16  ;;  %6482 = vmatpush2.msra.mxu1 %v6044_v18  ;;  %v6534_v10 = vld [vmem:[#allocation11 + $0x68] sm:$0xff]  ;;  %v6568_v16 = vld [vmem:[#allocation11 + $0x178] sm:$0xff]  ;;  %v6583_v18 = vld [vmem:[#allocation11 + $0x1f0] sm:$0xff] }
 0x5bd   :  { %6412 = vmatprep.subr.mxu0 %v5913_v49  ;;  %6483 = vmatprep.subr.mxu1 %v6041_v15  ;;  %v6567_v17 = vld [vmem:[#allocation11 + $0x170] sm:$0xff]  ;;  %v6566_v49 = vld [vmem:[#allocation11 + $0x168] sm:$0xff]  ;;  %v6532_v15 = vld [vmem:[#allocation11 + $0x58] sm:$0xff] }
 0x5be   :  { %6413 = vmatpush2.msra.mxu0 %v5912_v19  ;;  %6484 = vmatpush2.msra.mxu1 %v6040_v50  ;;  %v6581_v19 = vld [vmem:[#allocation11 + $0x1e0] sm:$0xff]  ;;  %v6547_v50 = vld [vmem:[#allocation11 + $0xd0] sm:$0xff]  ;;  %v6544_v36 = vld [vmem:[#allocation11 + $0xb8] sm:$0xff] }
 0x5bf   :  { %6414 = vmatprep.subr.mxu0 %v5909_v46  ;;  %6485 = vmatprep.subr.mxu1 %v6037_v47  ;;  %v6531_v44 = vld [vmem:[#allocation11 + $0x50] sm:$0xff]  ;;  %v6546_v46 = vld [vmem:[#allocation11 + $0xc8] sm:$0xff]  ;;  %v6564_v47 = vld [vmem:[#allocation11 + $0x158] sm:$0xff] }
 0x5c0   :  { %6415 = vmatpush2.msra.mxu0 %v5908_v28  ;;  %6486 = vmatpush2.msra.mxu1 %v6036_v12  ;;  %v3944_v28 = vadd.f32 %v9490_v13, %v9488_v11  ;;  %v6530_v12 = vld [vmem:[#allocation11 + $0x48] sm:$0xff]  ;;  %v6579_v51 = vld [vmem:[#allocation11 + $0x1d0] sm:$0xff]  ;;  %v3731_v11 = vadd.f32 %v9480_v55, %v9474_v41 }
 0x5c1   :  { %6416 = vmatprep.subr.mxu0 %v5905_v14  ;;  %6487 = vmatprep.subr.mxu1 %v6033_v32  ;;  %v6563_v14 = vld [vmem:[#allocation11 + $0x150] sm:$0xff]  ;;  %v3942_v32 = vadd.f32 %v9486_v2, %v9484_v61  ;;  %v6561_v61 = vld [vmem:[#allocation11 + $0x140] sm:$0xff]  ;;  %v3729_v2 = vadd.f32 %v9476_v9, %v9472_v62  ;;  %v6542_v41 = vld [vmem:[#allocation11 + $0xa8] sm:$0xff] }
 0x5c2   :  { %6417 = vmatpush2.msra.mxu0 %v5904_v48  ;;  %6488 = vmatpush2.msra.mxu1 %v6032_v43  ;;  %v6529_v48 = vld [vmem:[#allocation11 + $0x40] sm:$0xff]  ;;  %v6578_v43 = vld [vmem:[#allocation11 + $0x1c8] sm:$0xff]  ;;  %v4015_v13 = vadd.f32 %v9496_v34, %v3944_v28  ;;  %v3802_v60 = vadd.f32 %v9482_v8, %v3731_v11  ;;  %v6540_v9 = vld [vmem:[#allocation11 + $0x98] sm:$0xff] }
 0x5c3   :  { %6418 = vmatprep.subr.mxu0 %v5901_v45  ;;  %6489 = vmatprep.subr.mxu1 %v6029_v52  ;;  %v6562_v45 = vld [vmem:[#allocation11 + $0x148] sm:$0xff]  ;;  %v6528_v52 = vld [vmem:[#allocation11 + $0x38] sm:$0xff]  ;;  %v3800_v55 = vadd.f32 %v9478_v40, %v3729_v2  ;;  %v6525_v62 = vld [vmem:[#allocation11 + $0x20] sm:$0xff] }
 0x5c4   :  { %6419 = vmatpush2.msra.mxu0 %v5900_v53  ;;  %6490 = vmatpush2.msra.mxu1 %v6028_v54  ;;  %v6577_v53 = vld [vmem:[#allocation11 + $0x1c0] sm:$0xff]  ;;  %v6543_v54 = vld [vmem:[#allocation11 + $0xb0] sm:$0xff]  ;;  %v6538_v40 = vld [vmem:[#allocation11 + $0x88] sm:$0xff] }
 0x5c5   :  { %6420 = vmatprep.subr.mxu0 %v5897_v7  ;;  %6491 = vmatprep.subr.mxu1 %v6025_v58  ;;  %v4013_v7 = vadd.f32 %v9492_v29, %v3942_v32  ;;  %v6527_v58 = vld [vmem:[#allocation11 + $0x30] sm:$0xff]  ;;  %v6524_v29 = vld [vmem:[#allocation11 + $0x18] sm:$0xff]  ;;  %v6741_v28 = vld [vmem:[#allocation14 + $0x40] sm:$0xff]  ;;  %v5386_v32 = vpop.f32.mrf.mxu1 }
 0x5c6   :  { %6421 = vmatpush2.msra.mxu0 %v5896_v0  ;;  %6492 = vmatpush2.msra.mxu1 %v6024_v63  ;;  %v6526_v0 = vld [vmem:[#allocation11 + $0x28] sm:$0xff]  ;;  %v6541_v63 = vld [vmem:[#allocation11 + $0xa0] sm:$0xff] }
 0x5c7   :  { %6422 = vmatprep.subr.mxu0 %v5893_v21  ;;  %6493 = vmatprep.subr.mxu1 %v6021_v3  ;;  %v4018_v34 = vmax.f32 %v4013_v7, %v4015_v13  ;;  %v4017_v21 = vmax.f32 %v3800_v55, %v3802_v60  ;;  %v6976_v3 = vld [vmem:[#allocation9] ss:$0 sm:$0xff] }
 0x5c8   :  { %6423 = vmatpush2.msra.mxu0 %v5892_v4  ;;  %6494 = vmatpush2.msra.mxu1 %v6020_v5  ;;  %v6539_v4 = vld [vmem:[#allocation11 + $0x90] sm:$0xff] }
 0x5c9   :  { %6424 = vmatprep.subr.mxu0 %v5889_v30  ;;  %6495 = vmatprep.subr.mxu1 %v6017_v24  ;;  %v4019_v8 = vmax.f32 %v4017_v21, %v4018_v34  ;;  %v6523_v5 = vld [vmem:[#allocation11 + $0x10] sm:$0xff]  ;;  %v6522_v24 = vld [vmem:[#allocation11 + $0x8] sm:$0xff] }
 0x5ca   :  { %6425 = vmatpush2.msra.mxu0 %v5888_v26  ;;  %6496 = vmatpush2.msra.mxu1 %v6016_v33  ;;  %v6521_v26 = vld [vmem:[#allocation11] sm:$0xff] }
 0x5cb   :  { %6427 = vmatmul.mubr.f32.vlgmr.msra.gmra.mxu0 %v9447_v56  ;;  %6498 = vmatmul.mubr.f32.vlgmr.msra.gmra.mxu1 %v2942_v23  ;;  %v6533_v56 = vld [vmem:[#allocation11 + $0x60] sm:$0xff]  ;;  %v6548_v23 = vld [vmem:[#allocation11 + $0xd8] sm:$0xff]  ;;  %v4027_v30 = vadd.f32 %v6976_v3, %v4019_v8 }
 0x5cc   :  { %6983 = vmatprep.subr.mxu0 %v6552_v37  ;;  %6656 = vmatprep.mubr.f32.mxu0 %v4857_v59  ;;  %v6576_v37 = vld [vmem:[#allocation11 + $0x1b8] sm:$0xff]  ;;  %v6575_v59 = vld [vmem:[#allocation11 + $0x1b0] sm:$0xff] }
 0x5cd   :  { %6984 = vmatpush3.msra.mxu0 %v6536_v1  ;;  %7018 = vmatprep.subr.mxu1 %v6584_v6  ;;  %v4028_v33 = vmax.f32 %v4027_v30, 0.0  ;;  %v6560_v1 = vld [vmem:[#allocation11 + $0x138] sm:$0xff]  ;;  %v6557_v6 = vld [vmem:[#allocation11 + $0x120] sm:$0xff] }
 0x5ce   :  { %6985 = vmatprep.subr.mxu0 %v6551_v38  ;;  %7019 = vmatpush3.msra.mxu1 %v6568_v16  ;;  %v6559_v38 = vld [vmem:[#allocation11 + $0x130] sm:$0xff]  ;;  %v6572_v16 = vld [vmem:[#allocation11 + $0x198] sm:$0xff] }
 0x5cf   :  { %6986 = vmatpush3.msra.mxu0 %v6535_v27  ;;  %7020 = vmatprep.subr.mxu1 %v6583_v18  ;;  %v6574_v27 = vld [vmem:[#allocation11 + $0x1a8] sm:$0xff]  ;;  %v6556_v18 = vld [vmem:[#allocation11 + $0x118] sm:$0xff] }
 0x5d0   :  { %6987 = vmatprep.subr.mxu0 %v6550_v22  ;;  %7021 = vmatpush3.msra.mxu1 %v6567_v17  ;;  %v6558_v22 = vld [vmem:[#allocation11 + $0x128] sm:$0xff]  ;;  %v6555_v17 = vld [vmem:[#allocation11 + $0x110] sm:$0xff] }
 0x5d1   :  { %6988 = vmatpush3.msra.mxu0 %v6534_v10  ;;  %7022 = vmatprep.subr.mxu1 %v6582_v35  ;;  %v6573_v10 = vld [vmem:[#allocation11 + $0x1a0] sm:$0xff]  ;;  %v6554_v35 = vld [vmem:[#allocation11 + $0x108] sm:$0xff] }
 0x5d2   :  { %6989 = vmatprep.subr.mxu0 %v6549_v31  ;;  %7023 = vmatpush3.msra.mxu1 %v6566_v49  ;;  %v6571_v31 = vld [vmem:[#allocation11 + $0x190] sm:$0xff]  ;;  %v6553_v49 = vld [vmem:[#allocation11 + $0x100] sm:$0xff] }
 0x5d3   :  { %6990 = vmatpush3.msra.mxu0 %v6533_v56  ;;  %7024 = vmatprep.subr.mxu1 %v6581_v19  ;;  %v6570_v56 = vld [vmem:[#allocation11 + $0x188] sm:$0xff]  ;;  %v7425_v19 = vmov 0.0  }
 0x5d4   :  { %6991 = vmatprep.subr.mxu0 %v6548_v23  ;;  %7025 = vmatpush3.msra.mxu1 %v6565_v42  ;;  %v6569_v23 = vld [vmem:[#allocation11 + $0x180] sm:$0xff]  ;;  %v6746_v42 = vld [vmem:[#allocation14 + $0x68] sm:$0xff] }
 0x5d5   :  { %6992 = vmatpush3.msra.mxu0 %v6532_v15  ;;  %7026 = vmatprep.subr.mxu1 %v6580_v57  ;;  %v6748_v15 = vld [vmem:[#allocation14 + $0x78] sm:$0xff] }
 0x5d6   :  { %6993 = vmatprep.subr.mxu0 %v6547_v50  ;;  %7027 = vmatpush3.msra.mxu1 %v6564_v47  ;;  %v6747_v50 = vld [vmem:[#allocation14 + $0x70] sm:$0xff]  ;;  %v6744_v57 = vld [vmem:[#allocation14 + $0x58] sm:$0xff]  ;;  %v6742_v47 = vld [vmem:[#allocation14 + $0x48] sm:$0xff] }
 0x5d7   :  { %6994 = vmatpush3.msra.mxu0 %v6531_v44  ;;  %7028 = vmatprep.subr.mxu1 %v6579_v51  ;;  %v6745_v44 = vld [vmem:[#allocation14 + $0x60] sm:$0xff]  ;;  %v6739_v51 = vld [vmem:[#allocation14 + $0x30] sm:$0xff] }
 0x5d8   :  { %6995 = vmatprep.subr.mxu0 %v6546_v46  ;;  %7029 = vmatpush3.msra.mxu1 %v6563_v14  ;;  %v6743_v46 = vld [vmem:[#allocation14 + $0x50] sm:$0xff]  ;;  %v5315_v14 = vpop.f32.mrf.mxu0 }
 0x5d9   :  { %6996 = vmatpush3.msra.mxu0 %v6530_v12  ;;  %7030 = vmatprep.subr.mxu1 %v6578_v43  ;;  %v6740_v12 = vld [vmem:[#allocation14 + $0x38] sm:$0xff]  ;;  %v5388_v43 = vpop.f32.mrf.mxu1  ;;  %v5387_v8 = vadd.f32 %v5386_v32, %v5315_v14 }
 0x5da   :  { %6997 = vmatprep.subr.mxu0 %v6545_v39  ;;  %7031 = vmatpush3.msra.mxu1 %v6562_v45  ;;  %v6738_v39 = vld [vmem:[#allocation14 + $0x28] sm:$0xff]  ;;  %v6834_v14 = vld [vmem:[#allocation17 + $0x38] sm:$0xff]  ;;  %v6833_v32 = vld [vmem:[#allocation17 + $0x30] sm:$0xff] }
 0x5db   :  { %6998 = vmatpush3.msra.mxu0 %v6529_v48  ;;  %7032 = vmatprep.subr.mxu1 %v6577_v53  ;;  %v5317_v48 = vpop.f32.mrf.mxu0  ;;  %v5528_v45 = vpop.f32.mrf.mxu1 }
 0x5dc   :  { %6999 = vmatprep.subr.mxu0 %v6544_v36  ;;  %7033 = vmatpush3.msra.mxu1 %v6561_v61 }
 0x5dd   :  { %7000 = vmatpush3.msra.mxu0 %v6528_v52  ;;  %7034 = vmatprep.subr.mxu1 %v6576_v37  ;;  %v5457_v36 = vpop.f32.mrf.mxu0  ;;  %v5530_v13 = vpop.f32.mrf.mxu1 }
 0x5de   :  { %7001 = vmatprep.subr.mxu0 %v6543_v54  ;;  %7035 = vmatpush3.msra.mxu1 %v6560_v1 }
 0x5df   :  { %7002 = vmatpush3.msra.mxu0 %v6527_v58  ;;  %7036 = vmatprep.subr.mxu1 %v6575_v59  ;;  %v5459_v11 = vpop.f32.mrf.mxu0  ;;  %v5670_v53 = vpop.f32.mrf.mxu1 }
 0x5e0   :  { %7003 = vmatprep.subr.mxu0 %v6542_v41  ;;  %7037 = vmatpush3.msra.mxu1 %v6559_v38 }
 0x5e1   :  { %7004 = vmatpush3.msra.mxu0 %v6526_v0  ;;  %7038 = vmatprep.subr.mxu1 %v6574_v27  ;;  %v5599_v52 = vpop.f32.mrf.mxu0  ;;  %v5672_v61 = vpop.f32.mrf.mxu1 }
 0x5e2   :  { %7005 = vmatprep.subr.mxu0 %v6541_v63  ;;  %7039 = vmatpush3.msra.mxu1 %v6558_v22  ;;  %v5600_v0 = vadd.f32 %v5599_v52, %v5528_v45  ;;  %v5389_v63 = vadd.f32 %v5388_v43, %v5317_v48  ;;  %v6832_v48 = vld [vmem:[#allocation17 + $0x28] sm:$0xff]  ;;  %v6831_v43 = vld [vmem:[#allocation17 + $0x20] sm:$0xff]  ;;  %v6980_v52 = vld [vmem:[#allocation12] ss:$0 sm:$0xff] }
 0x5e3   :  { %7006 = vmatpush3.msra.mxu0 %v6525_v62  ;;  %7040 = vmatprep.subr.mxu1 %v6573_v10  ;;  %v5601_v54 = vpop.f32.mrf.mxu0 }
 0x5e4   :  { %7007 = vmatprep.subr.mxu0 %v6540_v9  ;;  %7041 = vmatpush3.msra.mxu1 %v6557_v6  ;;  %v5602_v41 = vadd.f32 %v5601_v54, %v5530_v13  ;;  %v5671_v3 = vadd.f32 %v5670_v53, %v5600_v0 }
 0x5e5   :  { %7008 = vmatpush3.msra.mxu0 %v6524_v29  ;;  %7042 = vmatprep.subr.mxu1 %v6572_v16  ;;  %v5460_v29 = vadd.f32 %v5459_v11, %v5389_v63 }
 0x5e6   :  { %7009 = vmatprep.subr.mxu0 %v6539_v4  ;;  %7043 = vmatpush3.msra.mxu1 %v6556_v18  ;;  %v5673_v21 = vadd.f32 %v5672_v61, %v5602_v41  ;;  %v6828_v41 = vld [vmem:[#allocation17 + $0x8] sm:$0xff] }
 0x5e7   :  { %7010 = vmatpush3.msra.mxu0 %v6523_v5  ;;  %7044 = vmatprep.subr.mxu1 %v6571_v31 }
 0x5e8   :  { %7011 = vmatprep.subr.mxu0 %v6538_v40  ;;  %7045 = vmatpush3.msra.mxu1 %v6555_v17 }
 0x5e9   :  { %7012 = vmatpush3.msra.mxu0 %v6522_v24  ;;  %7046 = vmatprep.subr.mxu1 %v6570_v56  ;;  %v5458_v24 = vadd.f32 %v5457_v36, %v5387_v8  ;;  %v6830_v36 = vld [vmem:[#allocation17 + $0x18] sm:$0xff] }
 0x5ea   :  { %7013 = vmatprep.subr.mxu0 %v6537_v25  ;;  %7047 = vmatpush3.msra.mxu1 %v6554_v35  ;;  %v5676_v25 = vmax.f32 %v5671_v3, %v5673_v21 }
 0x5eb   :  { %7014 = vmatpush3.msra.mxu0 %v6521_v26  ;;  %7048 = vmatprep.subr.mxu1 %v6569_v23  ;;  %v5675_v59 = vmax.f32 %v5458_v24, %v5460_v29 }
 0x5ec   :  { %6657 = vmatmul.mubr.f32.vlgmr.msra.gmra.mxu0 %v4028_v33  ;;  %7049 = vmatpush3.msra.mxu1 %v6553_v49  ;;  %v6737_v49 = vld [vmem:[#allocation14 + $0x20] sm:$0xff] }
 0x5ed   :  { %7087 = vmatprep.subr.mxu0 %v7425_v19  ;;  %7122 = vmatprep.subr.mxu1 %v7425_v19  ;;  %v5677_v6 = vmax.f32 %v5675_v59, %v5676_v25 }
 0x5ee   :  { %7088 = vmatpush3.msra.mxu0 %v6748_v15  ;;  %v6736_v15 = vld [vmem:[#allocation14 + $0x18] sm:$0xff]  ;;  %7119 = vmatprep.mubr.msk.f32.mxu0 %vm7426_vm12, %v7425_v19 }
 0x5ef   :  { %7089 = vmatprep.subr.mxu0 %v7425_v19  ;;  %v5685_v17 = vadd.f32 %v9511_v20, %v5677_v6 }
 0x5f0   :  { %7090 = vmatpush3.msra.mxu0 %v6747_v50  ;;  %v6735_v50 = vld [vmem:[#allocation14 + $0x10] sm:$0xff] }
 0x5f1   :  { %7091 = vmatprep.subr.mxu0 %v7425_v19  ;;  %v5686_v23 = vmax.f32 %v5685_v17, 0.0 }
 0x5f2   :  { %7092 = vmatpush3.msra.mxu0 %v6746_v42  ;;  %v6734_v42 = vld [vmem:[#allocation14 + $0x8] sm:$0xff] }
 0x5f3   :  { %7093 = vmatprep.subr.mxu0 %v7425_v19 }
 0x5f4   :  { %7094 = vmatpush3.msra.mxu0 %v6745_v44  ;;  %v6733_v44 = vld [vmem:[#allocation14] sm:$0xff] }
 0x5f5   :  { %7095 = vmatprep.subr.mxu0 %v7425_v19 }
 0x5f6   :  { %7096 = vmatpush3.msra.mxu0 %v6744_v57  ;;  %v6841_v57 = vld [vmem:[#allocation17 + $0x70] sm:$0xff] }
 0x5f7   :  { %7097 = vmatprep.subr.mxu0 %v7425_v19 }
 0x5f8   :  { %7098 = vmatpush3.msra.mxu0 %v6743_v46  ;;  %v6840_v46 = vld [vmem:[#allocation17 + $0x68] sm:$0xff] }
 0x5f9   :  { %7099 = vmatprep.subr.mxu0 %v7425_v19 }
 0x5fa   :  { %7100 = vmatpush3.msra.mxu0 %v6742_v47  ;;  %v6839_v47 = vld [vmem:[#allocation17 + $0x60] sm:$0xff] }
 0x5fb   :  { %7101 = vmatprep.subr.mxu0 %v7425_v19 }
 0x5fc   :  { %7102 = vmatpush3.msra.mxu0 %v6741_v28  ;;  %v6838_v28 = vld [vmem:[#allocation17 + $0x58] sm:$0xff] }
 0x5fd   :  { %7103 = vmatprep.subr.mxu0 %v7425_v19 }
 0x5fe   :  { %7104 = vmatpush3.msra.mxu0 %v6740_v12  ;;  %v6837_v12 = vld [vmem:[#allocation17 + $0x50] sm:$0xff] }
 0x5ff   :  { %7105 = vmatprep.subr.mxu0 %v7425_v19 }
 0x600   :  { %7106 = vmatpush3.msra.mxu0 %v6739_v51  ;;  %v6836_v51 = vld [vmem:[#allocation17 + $0x48] sm:$0xff] }
 0x601   :  { %7107 = vmatprep.subr.mxu0 %v7425_v19 }
 0x602   :  { %7108 = vmatpush3.msra.mxu0 %v6738_v39  ;;  %v6835_v39 = vld [vmem:[#allocation17 + $0x40] sm:$0xff] }
 0x603   :  { %7109 = vmatprep.subr.mxu0 %v7425_v19 }
 0x604   :  { %7110 = vmatpush3.msra.mxu0 %v6737_v49 }
 0x605   :  { %7111 = vmatprep.subr.mxu0 %v7425_v19 }
 0x606   :  { %7112 = vmatpush3.msra.mxu0 %v6736_v15 }
 0x607   :  { %v6144_v2 = vpop.f32.mrf.mxu0  ;;  %v6215_v60 = vpop.f32.mrf.mxu1  ;;  %7113 = vmatprep.subr.mxu0 %v7425_v19 }
 0x608   :  { %v6216_v33 = vadd.f32 %v6215_v60, %v6144_v2  ;;  %7114 = vmatpush3.msra.mxu0 %v6735_v50 }
 0x609   :  { %v6146_v7 = vpop.f32.mrf.mxu0  ;;  %v6217_v58 = vpop.f32.mrf.mxu1  ;;  %7115 = vmatprep.subr.mxu0 %v7425_v19 }
 0x60a   :  { %v6218_v40 = vadd.f32 %v6217_v58, %v6146_v7  ;;  %7116 = vmatpush3.msra.mxu0 %v6734_v42  ;;  %v6829_v58 = vld [vmem:[#allocation17 + $0x10] sm:$0xff] }
 0x60b   :  { %7117 = vmatprep.subr.mxu0 %v7425_v19 }
 0x60c   :  { %7118 = vmatpush3.msra.mxu0 %v6733_v44 }
 0x649   :  { %v6286_v55 = vpop.f32.mrf.mxu0  ;;  %v6357_v34 = vpop.f32.mrf.mxu1 }
 0x64a   :  { %v6287_v27 = vadd.f32 %v6286_v55, %v6216_v33  ;;  %v6827_v55 = vld [vmem:[#allocation17] sm:$0xff] }
 0x64b   :  { %v6288_v62 = vpop.f32.mrf.mxu0  ;;  %v6359_v9 = vpop.f32.mrf.mxu1 }
 0x64c   :  { %v6289_v37 = vadd.f32 %v6288_v62, %v6218_v40 }
 0x64e   :  { %v6504_v16 = vmax.f32 %v6287_v27, %v6289_v37 }
 0x68b   :  { %v6428_v4 = vpop.f32.mrf.mxu0  ;;  %v6499_v5 = vpop.f32.mrf.mxu1 }
 0x68c   :  { %v6429_v30 = vadd.f32 %v6428_v4, %v6357_v34  ;;  %v6981_v34 = vld [vmem:[#allocation15] ss:$0 sm:$0xff] }
 0x68d   :  { %v6430_v26 = vpop.f32.mrf.mxu0  ;;  %v6501_v38 = vpop.f32.mrf.mxu1 }
 0x68e   :  { %v6431_v1 = vadd.f32 %v6430_v26, %v6359_v9  ;;  %v6500_v22 = vadd.f32 %v6499_v5, %v6429_v30  ;;  %v6982_v9 = vld [vmem:[#allocation18] ss:$0 sm:$0xff] }
 0x690   :  { %v6502_v10 = vadd.f32 %v6501_v38, %v6431_v1 }
 0x692   :  { %v6505_v18 = vmax.f32 %v6500_v22, %v6502_v10 }
 0x694   :  { %v6506_v31 = vmax.f32 %v6504_v16, %v6505_v18 }
 0x696   :  { %v6514_v56 = vadd.f32 %v9511_v20, %v6506_v31  ;;  %v6842_v20 = vld [vmem:[#allocation17 + $0x78] sm:$0xff] }
 0x698   :  { %v6515_v35 = vmax.f32 %v6514_v56, 0.0 }
 0x69a   :  { %6726 = vmatprep.mubr.f32.mxu1 %v6515_v35 }
 0x69b   :  { %6727 = vmatmul.mubr.f32.vlgmr.msra.gmra.mxu1 %v5686_v23 }
 0x69c   :  { %7154 = vmatprep.mubr.msk.f32.mxu1 %vm7426_vm12, %v7425_v19  ;;  %7123 = vmatpush3.msra.mxu1 %v6842_v20 }
 0x69d   :  { %7124 = vmatprep.subr.mxu1 %v7425_v19 }
 0x69e   :  { %7125 = vmatpush3.msra.mxu1 %v6841_v57 }
 0x69f   :  { %7126 = vmatprep.subr.mxu1 %v7425_v19 }
 0x6a0   :  { %7127 = vmatpush3.msra.mxu1 %v6840_v46 }
 0x6a1   :  { %7128 = vmatprep.subr.mxu1 %v7425_v19 }
 0x6a2   :  { %7129 = vmatpush3.msra.mxu1 %v6839_v47 }
 0x6a3   :  { %7130 = vmatprep.subr.mxu1 %v7425_v19 }
 0x6a4   :  { %7131 = vmatpush3.msra.mxu1 %v6838_v28 }
 0x6a5   :  { %7132 = vmatprep.subr.mxu1 %v7425_v19 }
 0x6a6   :  { %7133 = vmatpush3.msra.mxu1 %v6837_v12 }
 0x6a7   :  { %7134 = vmatprep.subr.mxu1 %v7425_v19 }
 0x6a8   :  { %7135 = vmatpush3.msra.mxu1 %v6836_v51 }
 0x6a9   :  { %7136 = vmatprep.subr.mxu1 %v7425_v19 }
 0x6aa   :  { %7137 = vmatpush3.msra.mxu1 %v6835_v39 }
 0x6ab   :  { %7138 = vmatprep.subr.mxu1 %v7425_v19 }
 0x6ac   :  { %7139 = vmatpush3.msra.mxu1 %v6834_v14  ;;  %v7015_v45 = vpop.f32.mrf.mxu0 }
 0x6ad   :  { %7140 = vmatprep.subr.mxu1 %v7425_v19 }
 0x6ae   :  { %7141 = vmatpush3.msra.mxu1 %v6833_v32  ;;  %v7016_v11 = vpop.f32.mrf.mxu0 }
 0x6af   :  { %7142 = vmatprep.subr.mxu1 %v7425_v19  ;;  %v7017_v13 = vadd.f32 %v7016_v11, %v7015_v45 }
 0x6b0   :  { %7143 = vmatpush3.msra.mxu1 %v6832_v48 }
 0x6b1   :  { %7144 = vmatprep.subr.mxu1 %v7425_v19  ;;  %v6659_v61 = vadd.f32 %v7017_v13, %v6980_v52 }
 0x6b2   :  { %7145 = vmatpush3.msra.mxu1 %v6831_v43 }
 0x6b3   :  { %7146 = vmatprep.subr.mxu1 %v7425_v19 }
 0x6b4   :  { %7147 = vmatpush3.msra.mxu1 %v6830_v36 }
 0x6b5   :  { %7148 = vmatprep.subr.mxu1 %v7425_v19 }
 0x6b6   :  { %7149 = vmatpush3.msra.mxu1 %v6829_v58 }
 0x6b7   :  { %7150 = vmatprep.subr.mxu1 %v7425_v19 }
 0x6b8   :  { %7151 = vmatpush3.msra.mxu1 %v6828_v41 }
 0x6b9   :  { %7152 = vmatprep.subr.mxu1 %v7425_v19 }
 0x6ba   :  { %7153 = vmatpush3.msra.mxu1 %v6827_v55 }
 0x75b   :  { %v7050_v53 = vpop.f32.mrf.mxu1 }
 0x75d   :  { %v7051_v54 = vpop.f32.mrf.mxu1 }
 0x75e   :  { %v7052_v2 = vadd.f32 %v7051_v54, %v7050_v53 }
 0x760   :  { %v6729_v60 = vadd.f32 %v7052_v2, %v6659_v61 }
 0x762   :  { %v6732_v7 = vmax.f32 %v6729_v60, 0.0 }
 0x764   :  { %7120 = vmatmul.mubr.f32.vlgmr.msra.gmra.mxu0 %v6732_v7 }
 0x824   :  { %v6822_v0 = vpop.f32.mrf.mxu0 }
 0x825   :  { %v6823_v63 = vadd.f32 %v6981_v34, %v6822_v0 }
 0x826   :  { %v7121_v21 = vpop.f32.mrf.mxu0 }
 0x827   :  { %v6826_v62 = vmax.f32 %v6823_v63, 0.0 }
 0x829   :  { %7155 = vmatmul.mubr.f32.vlgmr.msra.gmra.mxu1 %v6826_v62 }
 0x8e9   :  { %v6916_v8 = vpop.f32.mrf.mxu1 }
 0x8ea   :  { %v6917_v29 = vadd.f32 %v6982_v9, %v6916_v8 }
 0x8eb   :  { %v7156_v3 = vpop.f32.mrf.mxu1 }
 0x8ec   :  { %6920 = vmax.xlane.f32.xlu0 %v6917_v29 }
 0x975   :  { %v6921_v4 = vpop.xlane.xlu0 %6920 }
 0x976   :  { %v6922_v5 = vsub.f32 %v6917_v29, %v6921_v4 }
 0x978   :  { %v6923_v40 = vmul.f32 1.442695, %v6922_v5 }
 0x97a   :  { %7182 = vpow2.f32 %v6923_v40 }
 0x987   :  { %v7183_v30 = vpop.eup %7182 }
 0x988   :  { %6925 = vadd.xlane.f32.xlu1 %v7183_v30 }
 0xa11   :  { %v6926_v24 = vpop.xlane.xlu1 %6925 }
 0xa12   :  { %7184 = vrcp.f32 %v6926_v24 }
 0xa1f   :  { %v7185_v19 = vpop.eup %7184 }
 0xa20   :  { %v6928_v25 = vmul.f32 %v7185_v19, %v7183_v30 }
 0xa22   :  { %6929 = vst [vmem:[%s9579_s11] sm:$0xff] %v6928_v25 }
 0xa23   :  { %6934 = vsyncpa [#allocation5], 1 }
 0xa24   :  { %6935 = vsyncpa [#allocation7], 1 }
 0xa25   :  { %6936 = vsyncpa [#allocation10], 1 }
 0xa26   :  { %6937 = vsyncpa [#allocation13], 1 }
 0xa27   :  { %6938 = vsyncpa [#allocation16], 1 }
 0xa28   :  { %6939 = vsyncpa [#allocation19], 1 }

</bundles_post_ra>
